<compile_context>
chip_gen: v5e
topology: v5e:2x2
jax: 0.10.0
libtpu: 0.0.40
codegen_flags: <defaults>
</compile_context>

<pallas_src>
import functools

import jax
import jax.numpy as jnp
from jax import lax
from jax.experimental import pallas as pl
from jax.experimental.pallas import tpu as pltpu

# ---------------- configuration (small synthetic sizes) ----------------
BATCH = 2
IN_CH = 3
IMG = 16
PATCH = 4            # Backbone6 stand-in: Conv2d(IN_CH, HIDDEN, k=4, s=4)
HIDDEN = 32          # reference uses 2048; scaled down for the synthetic test
NUM_LABELS = 8
HEADS = 4
LAYERS = 3
TOKENS = (IMG // PATCH) ** 2           # 16 image tokens
SEQ = TOKENS + NUM_LABELS              # 24 tokens total
EPS = 1e-5


def _ln(x, g, b):
    mu = jnp.mean(x, axis=-1, keepdims=True)
    var = jnp.mean((x - mu) ** 2, axis=-1, keepdims=True)
    return (x - mu) * lax.rsqrt(var + EPS) * g + b


# ---------------- fused forward kernel ----------------
def ctran_fused_kernel(patches_ref, idx_ref, conv_wt_ref, conv_b_ref,
                       label_emb_ref, known_emb_ref, ln_g_ref, ln_b_ref,
                       wqkv_ref, bqkv_ref, wo_ref, bo_ref,
                       w1_ref, b1_ref, w2_ref, b2_ref,
                       g1_ref, be1_ref, g2_ref, be2_ref,
                       out_w_ref, out_b_ref,
                       out_ref, attn_ref,
                       *, batch, tokens, num_labels, heads, layers):
    S = tokens + num_labels
    H = conv_wt_ref.shape[-1]
    hd = H // heads
    scale = 1.0 / float(hd) ** 0.5
    inv_heads = 1.0 / float(heads)

    # --- backbone patch projection: (B*T, C*ph*pw) @ (C*ph*pw, H) ---
    feats = jnp.dot(patches_ref[...], conv_wt_ref[...],
                    preferred_element_type=jnp.float32) + conv_b_ref[...]

    # --- known-label-state embedding: one-hot matmul replaces the gather ---
    onehot = (idx_ref[...] ==
              lax.broadcasted_iota(jnp.int32, (batch * num_labels, 3), 1)
              ).astype(jnp.float32)                                    # (B*L, 3)
    state = jnp.dot(onehot, known_emb_ref[...],
                    preferred_element_type=jnp.float32)                # (B*L, H)

    label_base = label_emb_ref[...]                                    # (L, H)

    # --- build (B*S, H) token slab: [image tokens ; label tokens] per batch ---
    rows = []
    for b in range(batch):
        rows.append(feats[b * tokens:(b + 1) * tokens, :])
        rows.append(label_base + state[b * num_labels:(b + 1) * num_labels, :])
    x = jnp.concatenate(rows, axis=0)                                  # (B*S, H)

    x = _ln(x, ln_g_ref[...], ln_b_ref[...])

    # --- transformer encoder layers (static layer loop over stacked weights) ---
    for l in range(layers):
        qkv = jnp.dot(x, wqkv_ref[l],
                      preferred_element_type=jnp.float32) + bqkv_ref[l]   # (B*S, 3H)
        q = qkv[:, :H] * scale
        k = qkv[:, H:2 * H]
        v = qkv[:, 2 * H:]

        def split_bh(t):
            # (B*S, H) -> (B*heads, S, hd), batch-major then head-major
            return jnp.stack(
                [t[b * S:(b + 1) * S, h * hd:(h + 1) * hd]
                 for b in range(batch) for h in range(heads)], axis=0)

        qh, kh, vh = split_bh(q), split_bh(k), split_bh(v)

        # batched attention over the fused (batch*heads) axis
        s = jnp.einsum('bqd,bkd->bqk', qh, kh,
                       preferred_element_type=jnp.float32)             # (B*h, S, S)
        s = s - jnp.max(s, axis=-1, keepdims=True)
        e = jnp.exp(s)
        p = e * pl.reciprocal(jnp.sum(e, axis=-1, keepdims=True), approx=True)

        # heads-averaged attention map per batch
        attn_ref[l] = jnp.stack(
            [sum(p[b * heads + h] for h in range(heads)) * inv_heads
             for b in range(batch)], axis=0)                           # (B, S, S)

        ctx = jnp.einsum('bqk,bkd->bqd', p, vh,
                         preferred_element_type=jnp.float32)           # (B*h, S, hd)
        ctx = jnp.concatenate(
            [jnp.concatenate([ctx[b * heads + h] for h in range(heads)], axis=-1)
             for b in range(batch)], axis=0)                           # (B*S, H)

        attn_out = jnp.dot(ctx, wo_ref[l],
                           preferred_element_type=jnp.float32) + bo_ref[l]
        src = _ln(x + attn_out, g1_ref[l], be1_ref[l])                 # norm1

        ff = jnp.maximum(
            jnp.dot(src, w1_ref[l], preferred_element_type=jnp.float32) + b1_ref[l],
            0.0)
        ff = jnp.dot(ff, w2_ref[l], preferred_element_type=jnp.float32) + b2_ref[l]
        x = _ln(src + ff, g2_ref[l], be2_ref[l])                       # norm2

    # --- output head: diag(output_linear(label_tokens)) as mul + lane reduce ---
    lab = jnp.stack([x[b * S + tokens:(b + 1) * S, :] for b in range(batch)],
                    axis=0)                                            # (B, L, H)
    out_ref[...] = (jnp.sum(lab * out_w_ref[...][None], axis=-1)
                    + out_b_ref[...])                                  # (B, L)


# ---------------- pallas_call wrapper ----------------
def _full_spec(shape):
    n = len(shape)
    return pl.BlockSpec(shape, lambda i, _n=n: (0,) * _n)


def ctran_forward(images, mask, params):
    B = images.shape[0]

    # Backbone6 stand-in: patchify conv, lowered to a matmul inside the kernel.
    # TODO(synk): Backbone6's exact architecture is not in the provided source;
    # it is replaced by Conv2d(IN_CH, HIDDEN, k=PATCH, s=PATCH).
    hp = wp = IMG // PATCH
    patches = images.reshape(B, IN_CH, hp, PATCH, wp, PATCH)
    patches = patches.transpose(0, 2, 4, 1, 3, 5).reshape(
        B * hp * wp, IN_CH * PATCH * PATCH)                  # row-major (h, w)

    # custom_replace(mask, 0, 1, 2): -1,0,1 -> 0,1,2 (mask assumed in {-1,0,1})
    idx = (mask.astype(jnp.int32) + 1).reshape(B * NUM_LABELS, 1)

    st = params['layers_stacked']
    inputs = [patches, idx,
              params['conv_wt'], params['conv_b'],
              params['label_emb'], params['known_emb'],
              params['ln_g'], params['ln_b'],
              st['wqkv_t'], st['bqkv'], st['wo_t'], st['bo'],
              st['w1_t'], st['b1'], st['w2_t'], st['b2'],
              st['g1'], st['be1'], st['g2'], st['be2'],
              params['out_w'], params['out_b']]

    kern = functools.partial(ctran_fused_kernel, batch=B, tokens=TOKENS,
                             num_labels=NUM_LABELS, heads=HEADS, layers=LAYERS)

    out, attn_stack = pl.pallas_call(
        kern,
        out_shape=(jax.ShapeDtypeStruct((B, NUM_LABELS), jnp.float32),
                   jax.ShapeDtypeStruct((LAYERS, B, SEQ, SEQ), jnp.float32)),
        grid=(1,),
        in_specs=[_full_spec(tuple(a.shape)) for a in inputs],
        out_specs=(_full_spec((B, NUM_LABELS)),
                   _full_spec((LAYERS, B, SEQ, SEQ))),
        compiler_params=pltpu.CompilerParams(
            dimension_semantics=("arbitrary",)),
    )(*inputs)

    attns = [attn_stack[l] for l in range(LAYERS)]
    return out, None, attns


# ---------------- parameters (deterministic synthetic init) ----------------
def init_params(key):
    keys = iter(jax.random.split(key, 64))

    def nrm(shape, scale=0.02):
        return (scale * jax.random.normal(next(keys), shape)).astype(jnp.float32)

    conv_w = nrm((HIDDEN, IN_CH, PATCH, PATCH))        # PyTorch Conv2d weight
    params = {
        'conv_wt': conv_w.reshape(HIDDEN, -1).T,       # (C*ph*pw, HIDDEN)
        'conv_b': nrm((1, HIDDEN)),
        'label_emb': nrm((NUM_LABELS, HIDDEN)),        # label_lt.weight
        'known_emb': nrm((3, HIDDEN)).at[0].set(0.0),  # known_label_lt, padding_idx=0
        'ln_g': jnp.ones((1, HIDDEN), jnp.float32),
        'ln_b': jnp.zeros((1, HIDDEN), jnp.float32),
        'out_w': nrm((NUM_LABELS, HIDDEN)),            # output_linear.weight (out, in)
        'out_b': nrm((1, NUM_LABELS)),
    }
    layer_list = []
    for _ in range(LAYERS):
        in_proj_w = nrm((3 * HIDDEN, HIDDEN))
        out_proj_w = nrm((HIDDEN, HIDDEN))
        w1 = nrm((HIDDEN, HIDDEN))                     # dim_feedforward = d_model * 1
        w2 = nrm((HIDDEN, HIDDEN))
        layer_list.append({
            'wqkv_t': in_proj_w.T, 'bqkv': nrm((1, 3 * HIDDEN)),
            'wo_t': out_proj_w.T, 'bo': nrm((1, HIDDEN)),
            'w1_t': w1.T, 'b1': nrm((1, HIDDEN)),
            'w2_t': w2.T, 'b2': nrm((1, HIDDEN)),
            'g1': jnp.ones((1, HIDDEN), jnp.float32),
            'be1': jnp.zeros((1, HIDDEN), jnp.float32),
            'g2': jnp.ones((1, HIDDEN), jnp.float32),
            'be2': jnp.zeros((1, HIDDEN), jnp.float32),
        })
    # stack per-layer weights on a leading LAYERS axis for in-kernel indexing
    params['layers_stacked'] = {
        k: jnp.stack([lp[k] for lp in layer_list], axis=0) for k in layer_list[0]
    }
    return params


if __name__ == "__main__":
    key = jax.random.PRNGKey(0)
    kp, ki, km = jax.random.split(key, 3)
    params = init_params(kp)
    images = jax.random.normal(ki, (BATCH, IN_CH, IMG, IMG), jnp.float32)   # NCHW
    mask = jax.random.randint(km, (BATCH, NUM_LABELS), -1, 2)               # {-1,0,1}

    output, _, attns = ctran_forward(images, mask, params)
    jax.block_until_ready(output)
    for a in attns:
        jax.block_until_ready(a)

    assert output.shape == (BATCH, NUM_LABELS)
    assert all(a.shape == (BATCH, SEQ, SEQ) for a in attns) and len(attns) == LAYERS
    assert bool(jnp.all(jnp.isfinite(output)))
    print("KERNEL_OK")
</pallas_src>

<mosaic_0001>
module attributes {stable_mosaic.version = 11 : i64} {
  func.func @ctran_fused_kernel(%arg0: i32, %arg1: memref<32x48xf32, #tpu.memory_space<vmem>>, %arg2: memref<16x1xi32, #tpu.memory_space<vmem>>, %arg3: memref<48x32xf32, #tpu.memory_space<vmem>>, %arg4: memref<1x32xf32, #tpu.memory_space<vmem>>, %arg5: memref<8x32xf32, #tpu.memory_space<vmem>>, %arg6: memref<3x32xf32, #tpu.memory_space<vmem>>, %arg7: memref<1x32xf32, #tpu.memory_space<vmem>>, %arg8: memref<1x32xf32, #tpu.memory_space<vmem>>, %arg9: memref<3x32x96xf32, #tpu.memory_space<vmem>>, %arg10: memref<3x1x96xf32, #tpu.memory_space<vmem>>, %arg11: memref<3x32x32xf32, #tpu.memory_space<vmem>>, %arg12: memref<3x1x32xf32, #tpu.memory_space<vmem>>, %arg13: memref<3x32x32xf32, #tpu.memory_space<vmem>>, %arg14: memref<3x1x32xf32, #tpu.memory_space<vmem>>, %arg15: memref<3x32x32xf32, #tpu.memory_space<vmem>>, %arg16: memref<3x1x32xf32, #tpu.memory_space<vmem>>, %arg17: memref<3x1x32xf32, #tpu.memory_space<vmem>>, %arg18: memref<3x1x32xf32, #tpu.memory_space<vmem>>, %arg19: memref<3x1x32xf32, #tpu.memory_space<vmem>>, %arg20: memref<3x1x32xf32, #tpu.memory_space<vmem>>, %arg21: memref<8x32xf32, #tpu.memory_space<vmem>>, %arg22: memref<1x8xf32, #tpu.memory_space<vmem>>, %arg23: memref<2x8xf32, #tpu.memory_space<vmem>>, %arg24: memref<3x2x24x24xf32, #tpu.memory_space<vmem>>) attributes {dimension_semantics = [#tpu.dimension_semantics<arbitrary>], iteration_bounds = array<i64: 1>, scalar_prefetch = 0 : i64, scratch_operands = 0 : i64, tpu.core_type = #tpu.core_type<tc>, window_params = [{pipeline_mode = #tpu.pipeline_mode<synchronous>, transform_indices = @transform_0, window_bounds = array<i64: 32, 48>}, {pipeline_mode = #tpu.pipeline_mode<synchronous>, transform_indices = @transform_1, window_bounds = array<i64: 16, 1>}, {pipeline_mode = #tpu.pipeline_mode<synchronous>, transform_indices = @transform_2, window_bounds = array<i64: 48, 32>}, {pipeline_mode = #tpu.pipeline_mode<synchronous>, transform_indices = @transform_3, window_bounds = array<i64: 1, 32>}, {pipeline_mode = #tpu.pipeline_mode<synchronous>, transform_indices = @transform_4, window_bounds = array<i64: 8, 32>}, {pipeline_mode = #tpu.pipeline_mode<synchronous>, transform_indices = @transform_5, window_bounds = array<i64: 3, 32>}, {pipeline_mode = #tpu.pipeline_mode<synchronous>, transform_indices = @transform_6, window_bounds = array<i64: 1, 32>}, {pipeline_mode = #tpu.pipeline_mode<synchronous>, transform_indices = @transform_7, window_bounds = array<i64: 1, 32>}, {pipeline_mode = #tpu.pipeline_mode<synchronous>, transform_indices = @transform_8, window_bounds = array<i64: 3, 32, 96>}, {pipeline_mode = #tpu.pipeline_mode<synchronous>, transform_indices = @transform_9, window_bounds = array<i64: 3, 1, 96>}, {pipeline_mode = #tpu.pipeline_mode<synchronous>, transform_indices = @transform_10, window_bounds = array<i64: 3, 32, 32>}, {pipeline_mode = #tpu.pipeline_mode<synchronous>, transform_indices = @transform_11, window_bounds = array<i64: 3, 1, 32>}, {pipeline_mode = #tpu.pipeline_mode<synchronous>, transform_indices = @transform_12, window_bounds = array<i64: 3, 32, 32>}, {pipeline_mode = #tpu.pipeline_mode<synchronous>, transform_indices = @transform_13, window_bounds = array<i64: 3, 1, 32>}, {pipeline_mode = #tpu.pipeline_mode<synchronous>, transform_indices = @transform_14, window_bounds = array<i64: 3, 32, 32>}, {pipeline_mode = #tpu.pipeline_mode<synchronous>, transform_indices = @transform_15, window_bounds = array<i64: 3, 1, 32>}, {pipeline_mode = #tpu.pipeline_mode<synchronous>, transform_indices = @transform_16, window_bounds = array<i64: 3, 1, 32>}, {pipeline_mode = #tpu.pipeline_mode<synchronous>, transform_indices = @transform_17, window_bounds = array<i64: 3, 1, 32>}, {pipeline_mode = #tpu.pipeline_mode<synchronous>, transform_indices = @transform_18, window_bounds = array<i64: 3, 1, 32>}, {pipeline_mode = #tpu.pipeline_mode<synchronous>, transform_indices = @transform_19, window_bounds = array<i64: 3, 1, 32>}, {pipeline_mode = #tpu.pipeline_mode<synchronous>, transform_indices = @transform_20, window_bounds = array<i64: 8, 32>}, {pipeline_mode = #tpu.pipeline_mode<synchronous>, transform_indices = @transform_21, window_bounds = array<i64: 1, 8>}, {pipeline_mode = #tpu.pipeline_mode<synchronous>, transform_indices = @transform_22, window_bounds = array<i64: 2, 8>}, {pipeline_mode = #tpu.pipeline_mode<synchronous>, transform_indices = @transform_23, window_bounds = array<i64: 3, 2, 24, 24>}]} {
    %c0 = arith.constant 0 : index
    %c0_0 = arith.constant 0 : index
    %0 = vector.load %arg1[%c0, %c0_0] : memref<32x48xf32, #tpu.memory_space<vmem>>, vector<32x48xf32>
    %c0_1 = arith.constant 0 : index
    %c0_2 = arith.constant 0 : index
    %1 = vector.load %arg3[%c0_1, %c0_2] : memref<48x32xf32, #tpu.memory_space<vmem>>, vector<48x32xf32>
    %cst = arith.constant dense<0.000000e+00> : vector<32x32xf32>
    %2 = tpu.matmul %0, %1, %cst {dimension_numbers = #tpu.dot_dimension_numbers<[1], [0], [0], [1], [0, 0, 1, 1], [], []>} : vector<32x48xf32>, vector<48x32xf32>, vector<32x32xf32> -> vector<32x32xf32>
    %c0_3 = arith.constant 0 : index
    %c0_4 = arith.constant 0 : index
    %3 = vector.load %arg4[%c0_3, %c0_4] : memref<1x32xf32, #tpu.memory_space<vmem>>, vector<1x32xf32>
    %4 = vector.broadcast %3 : vector<1x32xf32> to vector<32x32xf32>
    %5 = arith.addf %2, %4 : vector<32x32xf32>
    %c0_5 = arith.constant 0 : index
    %c0_6 = arith.constant 0 : index
    %6 = vector.load %arg2[%c0_5, %c0_6] : memref<16x1xi32, #tpu.memory_space<vmem>>, vector<16x1xi32>
    %7 = tpu.iota {dimensions = array<i32: 1>} : vector<16x3xi32>
    %8 = vector.broadcast %6 : vector<16x1xi32> to vector<16x3xi32>
    %9 = arith.cmpi eq, %8, %7 : vector<16x3xi32>
    %10 = arith.extui %9 : vector<16x3xi1> to vector<16x3xi32>
    %11 = arith.sitofp %10 : vector<16x3xi32> to vector<16x3xf32>
    %c0_7 = arith.constant 0 : index
    %c0_8 = arith.constant 0 : index
    %12 = vector.load %arg6[%c0_7, %c0_8] : memref<3x32xf32, #tpu.memory_space<vmem>>, vector<3x32xf32>
    %cst_9 = arith.constant dense<0.000000e+00> : vector<16x32xf32>
    %13 = tpu.matmul %11, %12, %cst_9 {dimension_numbers = #tpu.dot_dimension_numbers<[1], [0], [0], [1], [0, 0, 1, 1], [], []>} : vector<16x3xf32>, vector<3x32xf32>, vector<16x32xf32> -> vector<16x32xf32>
    %c0_10 = arith.constant 0 : index
    %c0_11 = arith.constant 0 : index
    %14 = vector.load %arg5[%c0_10, %c0_11] : memref<8x32xf32, #tpu.memory_space<vmem>>, vector<8x32xf32>
    %15 = vector.extract_strided_slice %5 {offsets = [0, 0], sizes = [16, 32], strides = [1, 1]} : vector<32x32xf32> to vector<16x32xf32>
    %16 = vector.extract_strided_slice %13 {offsets = [0, 0], sizes = [8, 32], strides = [1, 1]} : vector<16x32xf32> to vector<8x32xf32>
    %17 = arith.addf %14, %16 : vector<8x32xf32>
    %18 = vector.extract_strided_slice %5 {offsets = [16, 0], sizes = [16, 32], strides = [1, 1]} : vector<32x32xf32> to vector<16x32xf32>
    %19 = vector.extract_strided_slice %13 {offsets = [8, 0], sizes = [8, 32], strides = [1, 1]} : vector<16x32xf32> to vector<8x32xf32>
    %20 = arith.addf %14, %19 : vector<8x32xf32>
    %21 = tpu.concatenate %15, %17, %18, %20 in 0 : vector<16x32xf32>, vector<8x32xf32>, vector<16x32xf32>, vector<8x32xf32> -> vector<48x32xf32>
    %c0_12 = arith.constant 0 : index
    %c0_13 = arith.constant 0 : index
    %22 = vector.load %arg7[%c0_12, %c0_13] : memref<1x32xf32, #tpu.memory_space<vmem>>, vector<1x32xf32>
    %c0_14 = arith.constant 0 : index
    %c0_15 = arith.constant 0 : index
    %23 = vector.load %arg8[%c0_14, %c0_15] : memref<1x32xf32, #tpu.memory_space<vmem>>, vector<1x32xf32>
    %cst_16 = arith.constant dense<0.000000e+00> : vector<48xf32>
    %24 = vector.multi_reduction <add>, %21, %cst_16 [1] : vector<48x32xf32> to vector<48xf32>
    %25 = vector.shape_cast %24 : vector<48xf32> to vector<48x1xf32>
    %cst_17 = arith.constant 3.200000e+01 : f32
    %26 = vector.broadcast %cst_17 : f32 to vector<48x1xf32>
    %27 = arith.divf %25, %26 : vector<48x1xf32>
    %28 = vector.broadcast %27 : vector<48x1xf32> to vector<48x32xf32>
    %29 = arith.subf %21, %28 : vector<48x32xf32>
    %30 = arith.mulf %29, %29 : vector<48x32xf32>
    %cst_18 = arith.constant dense<0.000000e+00> : vector<48xf32>
    %31 = vector.multi_reduction <add>, %30, %cst_18 [1] : vector<48x32xf32> to vector<48xf32>
    %32 = vector.shape_cast %31 : vector<48xf32> to vector<48x1xf32>
    %cst_19 = arith.constant 3.200000e+01 : f32
    %33 = vector.broadcast %cst_19 : f32 to vector<48x1xf32>
    %34 = arith.divf %32, %33 : vector<48x1xf32>
    %35 = vector.broadcast %27 : vector<48x1xf32> to vector<48x32xf32>
    %36 = arith.subf %21, %35 : vector<48x32xf32>
    %cst_20 = arith.constant 9.99999974E-6 : f32
    %37 = vector.broadcast %cst_20 : f32 to vector<48x1xf32>
    %38 = arith.addf %34, %37 : vector<48x1xf32>
    %39 = math.rsqrt %38 : vector<48x1xf32>
    %40 = vector.broadcast %39 : vector<48x1xf32> to vector<48x32xf32>
    %41 = arith.mulf %36, %40 : vector<48x32xf32>
    %42 = vector.broadcast %22 : vector<1x32xf32> to vector<48x32xf32>
    %43 = arith.mulf %41, %42 : vector<48x32xf32>
    %44 = vector.broadcast %23 : vector<1x32xf32> to vector<48x32xf32>
    %45 = arith.addf %43, %44 : vector<48x32xf32>
    %c0_21 = arith.constant 0 : index
    %c0_22 = arith.constant 0 : index
    %c0_23 = arith.constant 0 : index
    %46 = vector.load %arg9[%c0_21, %c0_22, %c0_23] : memref<3x32x96xf32, #tpu.memory_space<vmem>>, vector<1x32x96xf32>
    %47 = vector.shape_cast %46 : vector<1x32x96xf32> to vector<32x96xf32>
    %cst_24 = arith.constant dense<0.000000e+00> : vector<48x96xf32>
    %48 = tpu.matmul %45, %47, %cst_24 {dimension_numbers = #tpu.dot_dimension_numbers<[1], [0], [0], [1], [0, 0, 1, 1], [], []>} : vector<48x32xf32>, vector<32x96xf32>, vector<48x96xf32> -> vector<48x96xf32>
    %c0_25 = arith.constant 0 : index
    %c0_26 = arith.constant 0 : index
    %c0_27 = arith.constant 0 : index
    %49 = vector.load %arg10[%c0_25, %c0_26, %c0_27] : memref<3x1x96xf32, #tpu.memory_space<vmem>>, vector<1x1x96xf32>
    %50 = vector.shape_cast %49 : vector<1x1x96xf32> to vector<1x96xf32>
    %51 = vector.broadcast %50 : vector<1x96xf32> to vector<48x96xf32>
    %52 = arith.addf %48, %51 : vector<48x96xf32>
    %53 = vector.extract_strided_slice %52 {offsets = [0, 0], sizes = [48, 32], strides = [1, 1]} : vector<48x96xf32> to vector<48x32xf32>
    %cst_28 = arith.constant 0.353553385 : f32
    %54 = vector.broadcast %cst_28 : f32 to vector<48x32xf32>
    %55 = arith.mulf %53, %54 : vector<48x32xf32>
    %56 = vector.extract_strided_slice %52 {offsets = [0, 32], sizes = [48, 32], strides = [1, 1]} : vector<48x96xf32> to vector<48x32xf32>
    %57 = vector.extract_strided_slice %52 {offsets = [0, 64], sizes = [48, 32], strides = [1, 1]} : vector<48x96xf32> to vector<48x32xf32>
    %58 = vector.extract_strided_slice %55 {offsets = [0, 0], sizes = [24, 8], strides = [1, 1]} : vector<48x32xf32> to vector<24x8xf32>
    %59 = vector.extract_strided_slice %55 {offsets = [0, 8], sizes = [24, 8], strides = [1, 1]} : vector<48x32xf32> to vector<24x8xf32>
    %60 = vector.extract_strided_slice %55 {offsets = [0, 16], sizes = [24, 8], strides = [1, 1]} : vector<48x32xf32> to vector<24x8xf32>
    %61 = vector.extract_strided_slice %55 {offsets = [0, 24], sizes = [24, 8], strides = [1, 1]} : vector<48x32xf32> to vector<24x8xf32>
    %62 = vector.extract_strided_slice %55 {offsets = [24, 0], sizes = [24, 8], strides = [1, 1]} : vector<48x32xf32> to vector<24x8xf32>
    %63 = vector.extract_strided_slice %55 {offsets = [24, 8], sizes = [24, 8], strides = [1, 1]} : vector<48x32xf32> to vector<24x8xf32>
    %64 = vector.extract_strided_slice %55 {offsets = [24, 16], sizes = [24, 8], strides = [1, 1]} : vector<48x32xf32> to vector<24x8xf32>
    %65 = vector.extract_strided_slice %55 {offsets = [24, 24], sizes = [24, 8], strides = [1, 1]} : vector<48x32xf32> to vector<24x8xf32>
    %66 = vector.shape_cast %58 : vector<24x8xf32> to vector<1x24x8xf32>
    %67 = vector.shape_cast %59 : vector<24x8xf32> to vector<1x24x8xf32>
    %68 = vector.shape_cast %60 : vector<24x8xf32> to vector<1x24x8xf32>
    %69 = vector.shape_cast %61 : vector<24x8xf32> to vector<1x24x8xf32>
    %70 = vector.shape_cast %62 : vector<24x8xf32> to vector<1x24x8xf32>
    %71 = vector.shape_cast %63 : vector<24x8xf32> to vector<1x24x8xf32>
    %72 = vector.shape_cast %64 : vector<24x8xf32> to vector<1x24x8xf32>
    %73 = vector.shape_cast %65 : vector<24x8xf32> to vector<1x24x8xf32>
    %74 = tpu.concatenate %66, %67, %68, %69, %70, %71, %72, %73 in 0 : vector<1x24x8xf32>, vector<1x24x8xf32>, vector<1x24x8xf32>, vector<1x24x8xf32>, vector<1x24x8xf32>, vector<1x24x8xf32>, vector<1x24x8xf32>, vector<1x24x8xf32> -> vector<8x24x8xf32>
    %75 = vector.extract_strided_slice %56 {offsets = [0, 0], sizes = [24, 8], strides = [1, 1]} : vector<48x32xf32> to vector<24x8xf32>
    %76 = vector.extract_strided_slice %56 {offsets = [0, 8], sizes = [24, 8], strides = [1, 1]} : vector<48x32xf32> to vector<24x8xf32>
    %77 = vector.extract_strided_slice %56 {offsets = [0, 16], sizes = [24, 8], strides = [1, 1]} : vector<48x32xf32> to vector<24x8xf32>
    %78 = vector.extract_strided_slice %56 {offsets = [0, 24], sizes = [24, 8], strides = [1, 1]} : vector<48x32xf32> to vector<24x8xf32>
    %79 = vector.extract_strided_slice %56 {offsets = [24, 0], sizes = [24, 8], strides = [1, 1]} : vector<48x32xf32> to vector<24x8xf32>
    %80 = vector.extract_strided_slice %56 {offsets = [24, 8], sizes = [24, 8], strides = [1, 1]} : vector<48x32xf32> to vector<24x8xf32>
    %81 = vector.extract_strided_slice %56 {offsets = [24, 16], sizes = [24, 8], strides = [1, 1]} : vector<48x32xf32> to vector<24x8xf32>
    %82 = vector.extract_strided_slice %56 {offsets = [24, 24], sizes = [24, 8], strides = [1, 1]} : vector<48x32xf32> to vector<24x8xf32>
    %83 = vector.shape_cast %75 : vector<24x8xf32> to vector<1x24x8xf32>
    %84 = vector.shape_cast %76 : vector<24x8xf32> to vector<1x24x8xf32>
    %85 = vector.shape_cast %77 : vector<24x8xf32> to vector<1x24x8xf32>
    %86 = vector.shape_cast %78 : vector<24x8xf32> to vector<1x24x8xf32>
    %87 = vector.shape_cast %79 : vector<24x8xf32> to vector<1x24x8xf32>
    %88 = vector.shape_cast %80 : vector<24x8xf32> to vector<1x24x8xf32>
    %89 = vector.shape_cast %81 : vector<24x8xf32> to vector<1x24x8xf32>
    %90 = vector.shape_cast %82 : vector<24x8xf32> to vector<1x24x8xf32>
    %91 = tpu.concatenate %83, %84, %85, %86, %87, %88, %89, %90 in 0 : vector<1x24x8xf32>, vector<1x24x8xf32>, vector<1x24x8xf32>, vector<1x24x8xf32>, vector<1x24x8xf32>, vector<1x24x8xf32>, vector<1x24x8xf32>, vector<1x24x8xf32> -> vector<8x24x8xf32>
    %92 = vector.extract_strided_slice %57 {offsets = [0, 0], sizes = [24, 8], strides = [1, 1]} : vector<48x32xf32> to vector<24x8xf32>
    %93 = vector.extract_strided_slice %57 {offsets = [0, 8], sizes = [24, 8], strides = [1, 1]} : vector<48x32xf32> to vector<24x8xf32>
    %94 = vector.extract_strided_slice %57 {offsets = [0, 16], sizes = [24, 8], strides = [1, 1]} : vector<48x32xf32> to vector<24x8xf32>
    %95 = vector.extract_strided_slice %57 {offsets = [0, 24], sizes = [24, 8], strides = [1, 1]} : vector<48x32xf32> to vector<24x8xf32>
    %96 = vector.extract_strided_slice %57 {offsets = [24, 0], sizes = [24, 8], strides = [1, 1]} : vector<48x32xf32> to vector<24x8xf32>
    %97 = vector.extract_strided_slice %57 {offsets = [24, 8], sizes = [24, 8], strides = [1, 1]} : vector<48x32xf32> to vector<24x8xf32>
    %98 = vector.extract_strided_slice %57 {offsets = [24, 16], sizes = [24, 8], strides = [1, 1]} : vector<48x32xf32> to vector<24x8xf32>
    %99 = vector.extract_strided_slice %57 {offsets = [24, 24], sizes = [24, 8], strides = [1, 1]} : vector<48x32xf32> to vector<24x8xf32>
    %100 = vector.shape_cast %92 : vector<24x8xf32> to vector<1x24x8xf32>
    %101 = vector.shape_cast %93 : vector<24x8xf32> to vector<1x24x8xf32>
    %102 = vector.shape_cast %94 : vector<24x8xf32> to vector<1x24x8xf32>
    %103 = vector.shape_cast %95 : vector<24x8xf32> to vector<1x24x8xf32>
    %104 = vector.shape_cast %96 : vector<24x8xf32> to vector<1x24x8xf32>
    %105 = vector.shape_cast %97 : vector<24x8xf32> to vector<1x24x8xf32>
    %106 = vector.shape_cast %98 : vector<24x8xf32> to vector<1x24x8xf32>
    %107 = vector.shape_cast %99 : vector<24x8xf32> to vector<1x24x8xf32>
    %108 = tpu.concatenate %100, %101, %102, %103, %104, %105, %106, %107 in 0 : vector<1x24x8xf32>, vector<1x24x8xf32>, vector<1x24x8xf32>, vector<1x24x8xf32>, vector<1x24x8xf32>, vector<1x24x8xf32>, vector<1x24x8xf32>, vector<1x24x8xf32> -> vector<8x24x8xf32>
    "tpu.trace_start"() <{level = 10 : i32, message = "bqd,bkd->bqk"}> : () -> ()
    %cst_29 = arith.constant dense<0.000000e+00> : vector<8x24x24xf32>
    %109 = tpu.matmul %74, %91, %cst_29 {dimension_numbers = #tpu.dot_dimension_numbers<[2], [2], [1], [1], [0, 0, 0, 1, 1, 1], [0], [0]>} : vector<8x24x8xf32>, vector<8x24x8xf32>, vector<8x24x24xf32> -> vector<8x24x24xf32>
    "tpu.trace_stop"() : () -> ()
    %cst_30 = arith.constant dense<0xFF800000> : vector<8x24xf32>
    %110 = vector.multi_reduction <maximumf>, %109, %cst_30 [2] : vector<8x24x24xf32> to vector<8x24xf32>
    %111 = vector.shape_cast %110 : vector<8x24xf32> to vector<8x24x1xf32>
    %112 = vector.broadcast %111 : vector<8x24x1xf32> to vector<8x24x24xf32>
    %113 = arith.subf %109, %112 : vector<8x24x24xf32>
    %114 = math.exp %113 : vector<8x24x24xf32>
    %cst_31 = arith.constant dense<0.000000e+00> : vector<8x24xf32>
    %115 = vector.multi_reduction <add>, %114, %cst_31 [2] : vector<8x24x24xf32> to vector<8x24xf32>
    %116 = vector.shape_cast %115 : vector<8x24xf32> to vector<8x24x1xf32>
    %117 = tpu.reciprocal %116 {approx = true} : vector<8x24x1xf32> -> vector<8x24x1xf32>
    %118 = vector.broadcast %117 : vector<8x24x1xf32> to vector<8x24x24xf32>
    %119 = arith.mulf %114, %118 : vector<8x24x24xf32>
    %120 = vector.extract_strided_slice %119 {offsets = [0, 0, 0], sizes = [1, 24, 24], strides = [1, 1, 1]} : vector<8x24x24xf32> to vector<1x24x24xf32>
    %121 = vector.shape_cast %120 : vector<1x24x24xf32> to vector<24x24xf32>
    %cst_32 = arith.constant 0.000000e+00 : f32
    %122 = vector.broadcast %cst_32 : f32 to vector<24x24xf32>
    %123 = arith.addf %122, %121 : vector<24x24xf32>
    %124 = vector.extract_strided_slice %119 {offsets = [1, 0, 0], sizes = [1, 24, 24], strides = [1, 1, 1]} : vector<8x24x24xf32> to vector<1x24x24xf32>
    %125 = vector.shape_cast %124 : vector<1x24x24xf32> to vector<24x24xf32>
    %126 = arith.addf %123, %125 : vector<24x24xf32>
    %127 = vector.extract_strided_slice %119 {offsets = [2, 0, 0], sizes = [1, 24, 24], strides = [1, 1, 1]} : vector<8x24x24xf32> to vector<1x24x24xf32>
    %128 = vector.shape_cast %127 : vector<1x24x24xf32> to vector<24x24xf32>
    %129 = arith.addf %126, %128 : vector<24x24xf32>
    %130 = vector.extract_strided_slice %119 {offsets = [3, 0, 0], sizes = [1, 24, 24], strides = [1, 1, 1]} : vector<8x24x24xf32> to vector<1x24x24xf32>
    %131 = vector.shape_cast %130 : vector<1x24x24xf32> to vector<24x24xf32>
    %132 = arith.addf %129, %131 : vector<24x24xf32>
    %cst_33 = arith.constant 2.500000e-01 : f32
    %133 = vector.broadcast %cst_33 : f32 to vector<24x24xf32>
    %134 = arith.mulf %132, %133 : vector<24x24xf32>
    %135 = vector.extract_strided_slice %119 {offsets = [4, 0, 0], sizes = [1, 24, 24], strides = [1, 1, 1]} : vector<8x24x24xf32> to vector<1x24x24xf32>
    %136 = vector.shape_cast %135 : vector<1x24x24xf32> to vector<24x24xf32>
    %cst_34 = arith.constant 0.000000e+00 : f32
    %137 = vector.broadcast %cst_34 : f32 to vector<24x24xf32>
    %138 = arith.addf %137, %136 : vector<24x24xf32>
    %139 = vector.extract_strided_slice %119 {offsets = [5, 0, 0], sizes = [1, 24, 24], strides = [1, 1, 1]} : vector<8x24x24xf32> to vector<1x24x24xf32>
    %140 = vector.shape_cast %139 : vector<1x24x24xf32> to vector<24x24xf32>
    %141 = arith.addf %138, %140 : vector<24x24xf32>
    %142 = vector.extract_strided_slice %119 {offsets = [6, 0, 0], sizes = [1, 24, 24], strides = [1, 1, 1]} : vector<8x24x24xf32> to vector<1x24x24xf32>
    %143 = vector.shape_cast %142 : vector<1x24x24xf32> to vector<24x24xf32>
    %144 = arith.addf %141, %143 : vector<24x24xf32>
    %145 = vector.extract_strided_slice %119 {offsets = [7, 0, 0], sizes = [1, 24, 24], strides = [1, 1, 1]} : vector<8x24x24xf32> to vector<1x24x24xf32>
    %146 = vector.shape_cast %145 : vector<1x24x24xf32> to vector<24x24xf32>
    %147 = arith.addf %144, %146 : vector<24x24xf32>
    %cst_35 = arith.constant 2.500000e-01 : f32
    %148 = vector.broadcast %cst_35 : f32 to vector<24x24xf32>
    %149 = arith.mulf %147, %148 : vector<24x24xf32>
    %150 = vector.shape_cast %134 : vector<24x24xf32> to vector<1x24x24xf32>
    %151 = vector.shape_cast %149 : vector<24x24xf32> to vector<1x24x24xf32>
    %152 = tpu.concatenate %150, %151 in 0 : vector<1x24x24xf32>, vector<1x24x24xf32> -> vector<2x24x24xf32>
    %c0_36 = arith.constant 0 : index
    %c0_37 = arith.constant 0 : index
    %c0_38 = arith.constant 0 : index
    %c0_39 = arith.constant 0 : index
    %153 = vector.load %arg24[%c0_36, %c0_37, %c0_38, %c0_39] : memref<3x2x24x24xf32, #tpu.memory_space<vmem>>, vector<1x2x24x24xf32>
    %154 = vector.shape_cast %153 : vector<1x2x24x24xf32> to vector<2x24x24xf32>
    %155 = vector.shape_cast %152 : vector<2x24x24xf32> to vector<1x2x24x24xf32>
    tpu.vector_store %arg24[%c0_36, %c0_37, %c0_38, %c0_39], %155 {strides = array<i32>} : memref<3x2x24x24xf32, #tpu.memory_space<vmem>>, vector<1x2x24x24xf32>,
    "tpu.trace_start"() <{level = 10 : i32, message = "bqk,bkd->bqd"}> : () -> ()
    %cst_40 = arith.constant dense<0.000000e+00> : vector<8x24x8xf32>
    %156 = tpu.matmul %119, %108, %cst_40 {dimension_numbers = #tpu.dot_dimension_numbers<[2], [1], [1], [2], [0, 0, 0, 1, 1, 2], [0], [0]>} : vector<8x24x24xf32>, vector<8x24x8xf32>, vector<8x24x8xf32> -> vector<8x24x8xf32>
    "tpu.trace_stop"() : () -> ()
    %157 = vector.extract_strided_slice %156 {offsets = [0, 0, 0], sizes = [1, 24, 8], strides = [1, 1, 1]} : vector<8x24x8xf32> to vector<1x24x8xf32>
    %158 = vector.shape_cast %157 : vector<1x24x8xf32> to vector<24x8xf32>
    %159 = vector.extract_strided_slice %156 {offsets = [1, 0, 0], sizes = [1, 24, 8], strides = [1, 1, 1]} : vector<8x24x8xf32> to vector<1x24x8xf32>
    %160 = vector.shape_cast %159 : vector<1x24x8xf32> to vector<24x8xf32>
    %161 = vector.extract_strided_slice %156 {offsets = [2, 0, 0], sizes = [1, 24, 8], strides = [1, 1, 1]} : vector<8x24x8xf32> to vector<1x24x8xf32>
    %162 = vector.shape_cast %161 : vector<1x24x8xf32> to vector<24x8xf32>
    %163 = vector.extract_strided_slice %156 {offsets = [3, 0, 0], sizes = [1, 24, 8], strides = [1, 1, 1]} : vector<8x24x8xf32> to vector<1x24x8xf32>
    %164 = vector.shape_cast %163 : vector<1x24x8xf32> to vector<24x8xf32>
    %165 = tpu.concatenate %158, %160, %162, %164 in 1 : vector<24x8xf32>, vector<24x8xf32>, vector<24x8xf32>, vector<24x8xf32> -> vector<24x32xf32>
    %166 = vector.extract_strided_slice %156 {offsets = [4, 0, 0], sizes = [1, 24, 8], strides = [1, 1, 1]} : vector<8x24x8xf32> to vector<1x24x8xf32>
    %167 = vector.shape_cast %166 : vector<1x24x8xf32> to vector<24x8xf32>
    %168 = vector.extract_strided_slice %156 {offsets = [5, 0, 0], sizes = [1, 24, 8], strides = [1, 1, 1]} : vector<8x24x8xf32> to vector<1x24x8xf32>
    %169 = vector.shape_cast %168 : vector<1x24x8xf32> to vector<24x8xf32>
    %170 = vector.extract_strided_slice %156 {offsets = [6, 0, 0], sizes = [1, 24, 8], strides = [1, 1, 1]} : vector<8x24x8xf32> to vector<1x24x8xf32>
    %171 = vector.shape_cast %170 : vector<1x24x8xf32> to vector<24x8xf32>
    %172 = vector.extract_strided_slice %156 {offsets = [7, 0, 0], sizes = [1, 24, 8], strides = [1, 1, 1]} : vector<8x24x8xf32> to vector<1x24x8xf32>
    %173 = vector.shape_cast %172 : vector<1x24x8xf32> to vector<24x8xf32>
    %174 = tpu.concatenate %167, %169, %171, %173 in 1 : vector<24x8xf32>, vector<24x8xf32>, vector<24x8xf32>, vector<24x8xf32> -> vector<24x32xf32>
    %175 = tpu.concatenate %165, %174 in 0 : vector<24x32xf32>, vector<24x32xf32> -> vector<48x32xf32>
    %c0_41 = arith.constant 0 : index
    %c0_42 = arith.constant 0 : index
    %c0_43 = arith.constant 0 : index
    %176 = vector.load %arg11[%c0_41, %c0_42, %c0_43] : memref<3x32x32xf32, #tpu.memory_space<vmem>>, vector<1x32x32xf32>
    %177 = vector.shape_cast %176 : vector<1x32x32xf32> to vector<32x32xf32>
    %cst_44 = arith.constant dense<0.000000e+00> : vector<48x32xf32>
    %178 = tpu.matmul %175, %177, %cst_44 {dimension_numbers = #tpu.dot_dimension_numbers<[1], [0], [0], [1], [0, 0, 1, 1], [], []>} : vector<48x32xf32>, vector<32x32xf32>, vector<48x32xf32> -> vector<48x32xf32>
    %c0_45 = arith.constant 0 : index
    %c0_46 = arith.constant 0 : index
    %c0_47 = arith.constant 0 : index
    %179 = vector.load %arg12[%c0_45, %c0_46, %c0_47] : memref<3x1x32xf32, #tpu.memory_space<vmem>>, vector<1x1x32xf32>
    %180 = vector.shape_cast %179 : vector<1x1x32xf32> to vector<1x32xf32>
    %181 = vector.broadcast %180 : vector<1x32xf32> to vector<48x32xf32>
    %182 = arith.addf %178, %181 : vector<48x32xf32>
    %183 = arith.addf %45, %182 : vector<48x32xf32>
    %c0_48 = arith.constant 0 : index
    %c0_49 = arith.constant 0 : index
    %c0_50 = arith.constant 0 : index
    %184 = vector.load %arg17[%c0_48, %c0_49, %c0_50] : memref<3x1x32xf32, #tpu.memory_space<vmem>>, vector<1x1x32xf32>
    %185 = vector.shape_cast %184 : vector<1x1x32xf32> to vector<1x32xf32>
    %c0_51 = arith.constant 0 : index
    %c0_52 = arith.constant 0 : index
    %c0_53 = arith.constant 0 : index
    %186 = vector.load %arg18[%c0_51, %c0_52, %c0_53] : memref<3x1x32xf32, #tpu.memory_space<vmem>>, vector<1x1x32xf32>
    %187 = vector.shape_cast %186 : vector<1x1x32xf32> to vector<1x32xf32>
    %cst_54 = arith.constant dense<0.000000e+00> : vector<48xf32>
    %188 = vector.multi_reduction <add>, %183, %cst_54 [1] : vector<48x32xf32> to vector<48xf32>
    %189 = vector.shape_cast %188 : vector<48xf32> to vector<48x1xf32>
    %cst_55 = arith.constant 3.200000e+01 : f32
    %190 = vector.broadcast %cst_55 : f32 to vector<48x1xf32>
    %191 = arith.divf %189, %190 : vector<48x1xf32>
    %192 = vector.broadcast %191 : vector<48x1xf32> to vector<48x32xf32>
    %193 = arith.subf %183, %192 : vector<48x32xf32>
    %194 = arith.mulf %193, %193 : vector<48x32xf32>
    %cst_56 = arith.constant dense<0.000000e+00> : vector<48xf32>
    %195 = vector.multi_reduction <add>, %194, %cst_56 [1] : vector<48x32xf32> to vector<48xf32>
    %196 = vector.shape_cast %195 : vector<48xf32> to vector<48x1xf32>
    %cst_57 = arith.constant 3.200000e+01 : f32
    %197 = vector.broadcast %cst_57 : f32 to vector<48x1xf32>
    %198 = arith.divf %196, %197 : vector<48x1xf32>
    %199 = vector.broadcast %191 : vector<48x1xf32> to vector<48x32xf32>
    %200 = arith.subf %183, %199 : vector<48x32xf32>
    %cst_58 = arith.constant 9.99999974E-6 : f32
    %201 = vector.broadcast %cst_58 : f32 to vector<48x1xf32>
    %202 = arith.addf %198, %201 : vector<48x1xf32>
    %203 = math.rsqrt %202 : vector<48x1xf32>
    %204 = vector.broadcast %203 : vector<48x1xf32> to vector<48x32xf32>
    %205 = arith.mulf %200, %204 : vector<48x32xf32>
    %206 = vector.broadcast %185 : vector<1x32xf32> to vector<48x32xf32>
    %207 = arith.mulf %205, %206 : vector<48x32xf32>
    %208 = vector.broadcast %187 : vector<1x32xf32> to vector<48x32xf32>
    %209 = arith.addf %207, %208 : vector<48x32xf32>
    %c0_59 = arith.constant 0 : index
    %c0_60 = arith.constant 0 : index
    %c0_61 = arith.constant 0 : index
    %210 = vector.load %arg13[%c0_59, %c0_60, %c0_61] : memref<3x32x32xf32, #tpu.memory_space<vmem>>, vector<1x32x32xf32>
    %211 = vector.shape_cast %210 : vector<1x32x32xf32> to vector<32x32xf32>
    %cst_62 = arith.constant dense<0.000000e+00> : vector<48x32xf32>
    %212 = tpu.matmul %209, %211, %cst_62 {dimension_numbers = #tpu.dot_dimension_numbers<[1], [0], [0], [1], [0, 0, 1, 1], [], []>} : vector<48x32xf32>, vector<32x32xf32>, vector<48x32xf32> -> vector<48x32xf32>
    %c0_63 = arith.constant 0 : index
    %c0_64 = arith.constant 0 : index
    %c0_65 = arith.constant 0 : index
    %213 = vector.load %arg14[%c0_63, %c0_64, %c0_65] : memref<3x1x32xf32, #tpu.memory_space<vmem>>, vector<1x1x32xf32>
    %214 = vector.shape_cast %213 : vector<1x1x32xf32> to vector<1x32xf32>
    %215 = vector.broadcast %214 : vector<1x32xf32> to vector<48x32xf32>
    %216 = arith.addf %212, %215 : vector<48x32xf32>
    %cst_66 = arith.constant 0.000000e+00 : f32
    %217 = vector.broadcast %cst_66 : f32 to vector<48x32xf32>
    %218 = arith.maximumf %216, %217 : vector<48x32xf32>
    %c0_67 = arith.constant 0 : index
    %c0_68 = arith.constant 0 : index
    %c0_69 = arith.constant 0 : index
    %219 = vector.load %arg15[%c0_67, %c0_68, %c0_69] : memref<3x32x32xf32, #tpu.memory_space<vmem>>, vector<1x32x32xf32>
    %220 = vector.shape_cast %219 : vector<1x32x32xf32> to vector<32x32xf32>
    %cst_70 = arith.constant dense<0.000000e+00> : vector<48x32xf32>
    %221 = tpu.matmul %218, %220, %cst_70 {dimension_numbers = #tpu.dot_dimension_numbers<[1], [0], [0], [1], [0, 0, 1, 1], [], []>} : vector<48x32xf32>, vector<32x32xf32>, vector<48x32xf32> -> vector<48x32xf32>
    %c0_71 = arith.constant 0 : index
    %c0_72 = arith.constant 0 : index
    %c0_73 = arith.constant 0 : index
    %222 = vector.load %arg16[%c0_71, %c0_72, %c0_73] : memref<3x1x32xf32, #tpu.memory_space<vmem>>, vector<1x1x32xf32>
    %223 = vector.shape_cast %222 : vector<1x1x32xf32> to vector<1x32xf32>
    %224 = vector.broadcast %223 : vector<1x32xf32> to vector<48x32xf32>
    %225 = arith.addf %221, %224 : vector<48x32xf32>
    %226 = arith.addf %209, %225 : vector<48x32xf32>
    %c0_74 = arith.constant 0 : index
    %c0_75 = arith.constant 0 : index
    %c0_76 = arith.constant 0 : index
    %227 = vector.load %arg19[%c0_74, %c0_75, %c0_76] : memref<3x1x32xf32, #tpu.memory_space<vmem>>, vector<1x1x32xf32>
    %228 = vector.shape_cast %227 : vector<1x1x32xf32> to vector<1x32xf32>
    %c0_77 = arith.constant 0 : index
    %c0_78 = arith.constant 0 : index
    %c0_79 = arith.constant 0 : index
    %229 = vector.load %arg20[%c0_77, %c0_78, %c0_79] : memref<3x1x32xf32, #tpu.memory_space<vmem>>, vector<1x1x32xf32>
    %230 = vector.shape_cast %229 : vector<1x1x32xf32> to vector<1x32xf32>
    %cst_80 = arith.constant dense<0.000000e+00> : vector<48xf32>
    %231 = vector.multi_reduction <add>, %226, %cst_80 [1] : vector<48x32xf32> to vector<48xf32>
    %232 = vector.shape_cast %231 : vector<48xf32> to vector<48x1xf32>
    %cst_81 = arith.constant 3.200000e+01 : f32
    %233 = vector.broadcast %cst_81 : f32 to vector<48x1xf32>
    %234 = arith.divf %232, %233 : vector<48x1xf32>
    %235 = vector.broadcast %234 : vector<48x1xf32> to vector<48x32xf32>
    %236 = arith.subf %226, %235 : vector<48x32xf32>
    %237 = arith.mulf %236, %236 : vector<48x32xf32>
    %cst_82 = arith.constant dense<0.000000e+00> : vector<48xf32>
    %238 = vector.multi_reduction <add>, %237, %cst_82 [1] : vector<48x32xf32> to vector<48xf32>
    %239 = vector.shape_cast %238 : vector<48xf32> to vector<48x1xf32>
    %cst_83 = arith.constant 3.200000e+01 : f32
    %240 = vector.broadcast %cst_83 : f32 to vector<48x1xf32>
    %241 = arith.divf %239, %240 : vector<48x1xf32>
    %242 = vector.broadcast %234 : vector<48x1xf32> to vector<48x32xf32>
    %243 = arith.subf %226, %242 : vector<48x32xf32>
    %cst_84 = arith.constant 9.99999974E-6 : f32
    %244 = vector.broadcast %cst_84 : f32 to vector<48x1xf32>
    %245 = arith.addf %241, %244 : vector<48x1xf32>
    %246 = math.rsqrt %245 : vector<48x1xf32>
    %247 = vector.broadcast %246 : vector<48x1xf32> to vector<48x32xf32>
    %248 = arith.mulf %243, %247 : vector<48x32xf32>
    %249 = vector.broadcast %228 : vector<1x32xf32> to vector<48x32xf32>
    %250 = arith.mulf %248, %249 : vector<48x32xf32>
    %251 = vector.broadcast %230 : vector<1x32xf32> to vector<48x32xf32>
    %252 = arith.addf %250, %251 : vector<48x32xf32>
    %c1 = arith.constant 1 : index
    %c0_85 = arith.constant 0 : index
    %c0_86 = arith.constant 0 : index
    %253 = vector.load %arg9[%c1, %c0_85, %c0_86] : memref<3x32x96xf32, #tpu.memory_space<vmem>>, vector<1x32x96xf32>
    %254 = vector.shape_cast %253 : vector<1x32x96xf32> to vector<32x96xf32>
    %cst_87 = arith.constant dense<0.000000e+00> : vector<48x96xf32>
    %255 = tpu.matmul %252, %254, %cst_87 {dimension_numbers = #tpu.dot_dimension_numbers<[1], [0], [0], [1], [0, 0, 1, 1], [], []>} : vector<48x32xf32>, vector<32x96xf32>, vector<48x96xf32> -> vector<48x96xf32>
    %c1_88 = arith.constant 1 : index
    %c0_89 = arith.constant 0 : index
    %c0_90 = arith.constant 0 : index
    %256 = vector.load %arg10[%c1_88, %c0_89, %c0_90] : memref<3x1x96xf32, #tpu.memory_space<vmem>>, vector<1x1x96xf32>
    %257 = vector.shape_cast %256 : vector<1x1x96xf32> to vector<1x96xf32>
    %258 = vector.broadcast %257 : vector<1x96xf32> to vector<48x96xf32>
    %259 = arith.addf %255, %258 : vector<48x96xf32>
    %260 = vector.extract_strided_slice %259 {offsets = [0, 0], sizes = [48, 32], strides = [1, 1]} : vector<48x96xf32> to vector<48x32xf32>
    %cst_91 = arith.constant 0.353553385 : f32
    %261 = vector.broadcast %cst_91 : f32 to vector<48x32xf32>
    %262 = arith.mulf %260, %261 : vector<48x32xf32>
    %263 = vector.extract_strided_slice %259 {offsets = [0, 32], sizes = [48, 32], strides = [1, 1]} : vector<48x96xf32> to vector<48x32xf32>
    %264 = vector.extract_strided_slice %259 {offsets = [0, 64], sizes = [48, 32], strides = [1, 1]} : vector<48x96xf32> to vector<48x32xf32>
    %265 = vector.extract_strided_slice %262 {offsets = [0, 0], sizes = [24, 8], strides = [1, 1]} : vector<48x32xf32> to vector<24x8xf32>
    %266 = vector.extract_strided_slice %262 {offsets = [0, 8], sizes = [24, 8], strides = [1, 1]} : vector<48x32xf32> to vector<24x8xf32>
    %267 = vector.extract_strided_slice %262 {offsets = [0, 16], sizes = [24, 8], strides = [1, 1]} : vector<48x32xf32> to vector<24x8xf32>
    %268 = vector.extract_strided_slice %262 {offsets = [0, 24], sizes = [24, 8], strides = [1, 1]} : vector<48x32xf32> to vector<24x8xf32>
    %269 = vector.extract_strided_slice %262 {offsets = [24, 0], sizes = [24, 8], strides = [1, 1]} : vector<48x32xf32> to vector<24x8xf32>
    %270 = vector.extract_strided_slice %262 {offsets = [24, 8], sizes = [24, 8], strides = [1, 1]} : vector<48x32xf32> to vector<24x8xf32>
    %271 = vector.extract_strided_slice %262 {offsets = [24, 16], sizes = [24, 8], strides = [1, 1]} : vector<48x32xf32> to vector<24x8xf32>
    %272 = vector.extract_strided_slice %262 {offsets = [24, 24], sizes = [24, 8], strides = [1, 1]} : vector<48x32xf32> to vector<24x8xf32>
    %273 = vector.shape_cast %265 : vector<24x8xf32> to vector<1x24x8xf32>
    %274 = vector.shape_cast %266 : vector<24x8xf32> to vector<1x24x8xf32>
    %275 = vector.shape_cast %267 : vector<24x8xf32> to vector<1x24x8xf32>
    %276 = vector.shape_cast %268 : vector<24x8xf32> to vector<1x24x8xf32>
    %277 = vector.shape_cast %269 : vector<24x8xf32> to vector<1x24x8xf32>
    %278 = vector.shape_cast %270 : vector<24x8xf32> to vector<1x24x8xf32>
    %279 = vector.shape_cast %271 : vector<24x8xf32> to vector<1x24x8xf32>
    %280 = vector.shape_cast %272 : vector<24x8xf32> to vector<1x24x8xf32>
    %281 = tpu.concatenate %273, %274, %275, %276, %277, %278, %279, %280 in 0 : vector<1x24x8xf32>, vector<1x24x8xf32>, vector<1x24x8xf32>, vector<1x24x8xf32>, vector<1x24x8xf32>, vector<1x24x8xf32>, vector<1x24x8xf32>, vector<1x24x8xf32> -> vector<8x24x8xf32>
    %282 = vector.extract_strided_slice %263 {offsets = [0, 0], sizes = [24, 8], strides = [1, 1]} : vector<48x32xf32> to vector<24x8xf32>
    %283 = vector.extract_strided_slice %263 {offsets = [0, 8], sizes = [24, 8], strides = [1, 1]} : vector<48x32xf32> to vector<24x8xf32>
    %284 = vector.extract_strided_slice %263 {offsets = [0, 16], sizes = [24, 8], strides = [1, 1]} : vector<48x32xf32> to vector<24x8xf32>
    %285 = vector.extract_strided_slice %263 {offsets = [0, 24], sizes = [24, 8], strides = [1, 1]} : vector<48x32xf32> to vector<24x8xf32>
    %286 = vector.extract_strided_slice %263 {offsets = [24, 0], sizes = [24, 8], strides = [1, 1]} : vector<48x32xf32> to vector<24x8xf32>
    %287 = vector.extract_strided_slice %263 {offsets = [24, 8], sizes = [24, 8], strides = [1, 1]} : vector<48x32xf32> to vector<24x8xf32>
    %288 = vector.extract_strided_slice %263 {offsets = [24, 16], sizes = [24, 8], strides = [1, 1]} : vector<48x32xf32> to vector<24x8xf32>
    %289 = vector.extract_strided_slice %263 {offsets = [24, 24], sizes = [24, 8], strides = [1, 1]} : vector<48x32xf32> to vector<24x8xf32>
    %290 = vector.shape_cast %282 : vector<24x8xf32> to vector<1x24x8xf32>
    %291 = vector.shape_cast %283 : vector<24x8xf32> to vector<1x24x8xf32>
    %292 = vector.shape_cast %284 : vector<24x8xf32> to vector<1x24x8xf32>
    %293 = vector.shape_cast %285 : vector<24x8xf32> to vector<1x24x8xf32>
    %294 = vector.shape_cast %286 : vector<24x8xf32> to vector<1x24x8xf32>
    %295 = vector.shape_cast %287 : vector<24x8xf32> to vector<1x24x8xf32>
    %296 = vector.shape_cast %288 : vector<24x8xf32> to vector<1x24x8xf32>
    %297 = vector.shape_cast %289 : vector<24x8xf32> to vector<1x24x8xf32>
    %298 = tpu.concatenate %290, %291, %292, %293, %294, %295, %296, %297 in 0 : vector<1x24x8xf32>, vector<1x24x8xf32>, vector<1x24x8xf32>, vector<1x24x8xf32>, vector<1x24x8xf32>, vector<1x24x8xf32>, vector<1x24x8xf32>, vector<1x24x8xf32> -> vector<8x24x8xf32>
    %299 = vector.extract_strided_slice %264 {offsets = [0, 0], sizes = [24, 8], strides = [1, 1]} : vector<48x32xf32> to vector<24x8xf32>
    %300 = vector.extract_strided_slice %264 {offsets = [0, 8], sizes = [24, 8], strides = [1, 1]} : vector<48x32xf32> to vector<24x8xf32>
    %301 = vector.extract_strided_slice %264 {offsets = [0, 16], sizes = [24, 8], strides = [1, 1]} : vector<48x32xf32> to vector<24x8xf32>
    %302 = vector.extract_strided_slice %264 {offsets = [0, 24], sizes = [24, 8], strides = [1, 1]} : vector<48x32xf32> to vector<24x8xf32>
    %303 = vector.extract_strided_slice %264 {offsets = [24, 0], sizes = [24, 8], strides = [1, 1]} : vector<48x32xf32> to vector<24x8xf32>
    %304 = vector.extract_strided_slice %264 {offsets = [24, 8], sizes = [24, 8], strides = [1, 1]} : vector<48x32xf32> to vector<24x8xf32>
    %305 = vector.extract_strided_slice %264 {offsets = [24, 16], sizes = [24, 8], strides = [1, 1]} : vector<48x32xf32> to vector<24x8xf32>
    %306 = vector.extract_strided_slice %264 {offsets = [24, 24], sizes = [24, 8], strides = [1, 1]} : vector<48x32xf32> to vector<24x8xf32>
    %307 = vector.shape_cast %299 : vector<24x8xf32> to vector<1x24x8xf32>
    %308 = vector.shape_cast %300 : vector<24x8xf32> to vector<1x24x8xf32>
    %309 = vector.shape_cast %301 : vector<24x8xf32> to vector<1x24x8xf32>
    %310 = vector.shape_cast %302 : vector<24x8xf32> to vector<1x24x8xf32>
    %311 = vector.shape_cast %303 : vector<24x8xf32> to vector<1x24x8xf32>
    %312 = vector.shape_cast %304 : vector<24x8xf32> to vector<1x24x8xf32>
    %313 = vector.shape_cast %305 : vector<24x8xf32> to vector<1x24x8xf32>
    %314 = vector.shape_cast %306 : vector<24x8xf32> to vector<1x24x8xf32>
    %315 = tpu.concatenate %307, %308, %309, %310, %311, %312, %313, %314 in 0 : vector<1x24x8xf32>, vector<1x24x8xf32>, vector<1x24x8xf32>, vector<1x24x8xf32>, vector<1x24x8xf32>, vector<1x24x8xf32>, vector<1x24x8xf32>, vector<1x24x8xf32> -> vector<8x24x8xf32>
    "tpu.trace_start"() <{level = 10 : i32, message = "bqd,bkd->bqk"}> : () -> ()
    %cst_92 = arith.constant dense<0.000000e+00> : vector<8x24x24xf32>
    %316 = tpu.matmul %281, %298, %cst_92 {dimension_numbers = #tpu.dot_dimension_numbers<[2], [2], [1], [1], [0, 0, 0, 1, 1, 1], [0], [0]>} : vector<8x24x8xf32>, vector<8x24x8xf32>, vector<8x24x24xf32> -> vector<8x24x24xf32>
    "tpu.trace_stop"() : () -> ()
    %cst_93 = arith.constant dense<0xFF800000> : vector<8x24xf32>
    %317 = vector.multi_reduction <maximumf>, %316, %cst_93 [2] : vector<8x24x24xf32> to vector<8x24xf32>
    %318 = vector.shape_cast %317 : vector<8x24xf32> to vector<8x24x1xf32>
    %319 = vector.broadcast %318 : vector<8x24x1xf32> to vector<8x24x24xf32>
    %320 = arith.subf %316, %319 : vector<8x24x24xf32>
    %321 = math.exp %320 : vector<8x24x24xf32>
    %cst_94 = arith.constant dense<0.000000e+00> : vector<8x24xf32>
    %322 = vector.multi_reduction <add>, %321, %cst_94 [2] : vector<8x24x24xf32> to vector<8x24xf32>
    %323 = vector.shape_cast %322 : vector<8x24xf32> to vector<8x24x1xf32>
    %324 = tpu.reciprocal %323 {approx = true} : vector<8x24x1xf32> -> vector<8x24x1xf32>
    %325 = vector.broadcast %324 : vector<8x24x1xf32> to vector<8x24x24xf32>
    %326 = arith.mulf %321, %325 : vector<8x24x24xf32>
    %327 = vector.extract_strided_slice %326 {offsets = [0, 0, 0], sizes = [1, 24, 24], strides = [1, 1, 1]} : vector<8x24x24xf32> to vector<1x24x24xf32>
    %328 = vector.shape_cast %327 : vector<1x24x24xf32> to vector<24x24xf32>
    %cst_95 = arith.constant 0.000000e+00 : f32
    %329 = vector.broadcast %cst_95 : f32 to vector<24x24xf32>
    %330 = arith.addf %329, %328 : vector<24x24xf32>
    %331 = vector.extract_strided_slice %326 {offsets = [1, 0, 0], sizes = [1, 24, 24], strides = [1, 1, 1]} : vector<8x24x24xf32> to vector<1x24x24xf32>
    %332 = vector.shape_cast %331 : vector<1x24x24xf32> to vector<24x24xf32>
    %333 = arith.addf %330, %332 : vector<24x24xf32>
    %334 = vector.extract_strided_slice %326 {offsets = [2, 0, 0], sizes = [1, 24, 24], strides = [1, 1, 1]} : vector<8x24x24xf32> to vector<1x24x24xf32>
    %335 = vector.shape_cast %334 : vector<1x24x24xf32> to vector<24x24xf32>
    %336 = arith.addf %333, %335 : vector<24x24xf32>
    %337 = vector.extract_strided_slice %326 {offsets = [3, 0, 0], sizes = [1, 24, 24], strides = [1, 1, 1]} : vector<8x24x24xf32> to vector<1x24x24xf32>
    %338 = vector.shape_cast %337 : vector<1x24x24xf32> to vector<24x24xf32>
    %339 = arith.addf %336, %338 : vector<24x24xf32>
    %cst_96 = arith.constant 2.500000e-01 : f32
    %340 = vector.broadcast %cst_96 : f32 to vector<24x24xf32>
    %341 = arith.mulf %339, %340 : vector<24x24xf32>
    %342 = vector.extract_strided_slice %326 {offsets = [4, 0, 0], sizes = [1, 24, 24], strides = [1, 1, 1]} : vector<8x24x24xf32> to vector<1x24x24xf32>
    %343 = vector.shape_cast %342 : vector<1x24x24xf32> to vector<24x24xf32>
    %cst_97 = arith.constant 0.000000e+00 : f32
    %344 = vector.broadcast %cst_97 : f32 to vector<24x24xf32>
    %345 = arith.addf %344, %343 : vector<24x24xf32>
    %346 = vector.extract_strided_slice %326 {offsets = [5, 0, 0], sizes = [1, 24, 24], strides = [1, 1, 1]} : vector<8x24x24xf32> to vector<1x24x24xf32>
    %347 = vector.shape_cast %346 : vector<1x24x24xf32> to vector<24x24xf32>
    %348 = arith.addf %345, %347 : vector<24x24xf32>
    %349 = vector.extract_strided_slice %326 {offsets = [6, 0, 0], sizes = [1, 24, 24], strides = [1, 1, 1]} : vector<8x24x24xf32> to vector<1x24x24xf32>
    %350 = vector.shape_cast %349 : vector<1x24x24xf32> to vector<24x24xf32>
    %351 = arith.addf %348, %350 : vector<24x24xf32>
    %352 = vector.extract_strided_slice %326 {offsets = [7, 0, 0], sizes = [1, 24, 24], strides = [1, 1, 1]} : vector<8x24x24xf32> to vector<1x24x24xf32>
    %353 = vector.shape_cast %352 : vector<1x24x24xf32> to vector<24x24xf32>
    %354 = arith.addf %351, %353 : vector<24x24xf32>
    %cst_98 = arith.constant 2.500000e-01 : f32
    %355 = vector.broadcast %cst_98 : f32 to vector<24x24xf32>
    %356 = arith.mulf %354, %355 : vector<24x24xf32>
    %357 = vector.shape_cast %341 : vector<24x24xf32> to vector<1x24x24xf32>
    %358 = vector.shape_cast %356 : vector<24x24xf32> to vector<1x24x24xf32>
    %359 = tpu.concatenate %357, %358 in 0 : vector<1x24x24xf32>, vector<1x24x24xf32> -> vector<2x24x24xf32>
    %c1_99 = arith.constant 1 : index
    %c0_100 = arith.constant 0 : index
    %c0_101 = arith.constant 0 : index
    %c0_102 = arith.constant 0 : index
    %360 = vector.load %arg24[%c1_99, %c0_100, %c0_101, %c0_102] : memref<3x2x24x24xf32, #tpu.memory_space<vmem>>, vector<1x2x24x24xf32>
    %361 = vector.shape_cast %360 : vector<1x2x24x24xf32> to vector<2x24x24xf32>
    %362 = vector.shape_cast %359 : vector<2x24x24xf32> to vector<1x2x24x24xf32>
    tpu.vector_store %arg24[%c1_99, %c0_100, %c0_101, %c0_102], %362 {strides = array<i32>} : memref<3x2x24x24xf32, #tpu.memory_space<vmem>>, vector<1x2x24x24xf32>,
    "tpu.trace_start"() <{level = 10 : i32, message = "bqk,bkd->bqd"}> : () -> ()
    %cst_103 = arith.constant dense<0.000000e+00> : vector<8x24x8xf32>
    %363 = tpu.matmul %326, %315, %cst_103 {dimension_numbers = #tpu.dot_dimension_numbers<[2], [1], [1], [2], [0, 0, 0, 1, 1, 2], [0], [0]>} : vector<8x24x24xf32>, vector<8x24x8xf32>, vector<8x24x8xf32> -> vector<8x24x8xf32>
    "tpu.trace_stop"() : () -> ()
    %364 = vector.extract_strided_slice %363 {offsets = [0, 0, 0], sizes = [1, 24, 8], strides = [1, 1, 1]} : vector<8x24x8xf32> to vector<1x24x8xf32>
    %365 = vector.shape_cast %364 : vector<1x24x8xf32> to vector<24x8xf32>
    %366 = vector.extract_strided_slice %363 {offsets = [1, 0, 0], sizes = [1, 24, 8], strides = [1, 1, 1]} : vector<8x24x8xf32> to vector<1x24x8xf32>
    %367 = vector.shape_cast %366 : vector<1x24x8xf32> to vector<24x8xf32>
    %368 = vector.extract_strided_slice %363 {offsets = [2, 0, 0], sizes = [1, 24, 8], strides = [1, 1, 1]} : vector<8x24x8xf32> to vector<1x24x8xf32>
    %369 = vector.shape_cast %368 : vector<1x24x8xf32> to vector<24x8xf32>
    %370 = vector.extract_strided_slice %363 {offsets = [3, 0, 0], sizes = [1, 24, 8], strides = [1, 1, 1]} : vector<8x24x8xf32> to vector<1x24x8xf32>
    %371 = vector.shape_cast %370 : vector<1x24x8xf32> to vector<24x8xf32>
    %372 = tpu.concatenate %365, %367, %369, %371 in 1 : vector<24x8xf32>, vector<24x8xf32>, vector<24x8xf32>, vector<24x8xf32> -> vector<24x32xf32>
    %373 = vector.extract_strided_slice %363 {offsets = [4, 0, 0], sizes = [1, 24, 8], strides = [1, 1, 1]} : vector<8x24x8xf32> to vector<1x24x8xf32>
    %374 = vector.shape_cast %373 : vector<1x24x8xf32> to vector<24x8xf32>
    %375 = vector.extract_strided_slice %363 {offsets = [5, 0, 0], sizes = [1, 24, 8], strides = [1, 1, 1]} : vector<8x24x8xf32> to vector<1x24x8xf32>
    %376 = vector.shape_cast %375 : vector<1x24x8xf32> to vector<24x8xf32>
    %377 = vector.extract_strided_slice %363 {offsets = [6, 0, 0], sizes = [1, 24, 8], strides = [1, 1, 1]} : vector<8x24x8xf32> to vector<1x24x8xf32>
    %378 = vector.shape_cast %377 : vector<1x24x8xf32> to vector<24x8xf32>
    %379 = vector.extract_strided_slice %363 {offsets = [7, 0, 0], sizes = [1, 24, 8], strides = [1, 1, 1]} : vector<8x24x8xf32> to vector<1x24x8xf32>
    %380 = vector.shape_cast %379 : vector<1x24x8xf32> to vector<24x8xf32>
    %381 = tpu.concatenate %374, %376, %378, %380 in 1 : vector<24x8xf32>, vector<24x8xf32>, vector<24x8xf32>, vector<24x8xf32> -> vector<24x32xf32>
    %382 = tpu.concatenate %372, %381 in 0 : vector<24x32xf32>, vector<24x32xf32> -> vector<48x32xf32>
    %c1_104 = arith.constant 1 : index
    %c0_105 = arith.constant 0 : index
    %c0_106 = arith.constant 0 : index
    %383 = vector.load %arg11[%c1_104, %c0_105, %c0_106] : memref<3x32x32xf32, #tpu.memory_space<vmem>>, vector<1x32x32xf32>
    %384 = vector.shape_cast %383 : vector<1x32x32xf32> to vector<32x32xf32>
    %cst_107 = arith.constant dense<0.000000e+00> : vector<48x32xf32>
    %385 = tpu.matmul %382, %384, %cst_107 {dimension_numbers = #tpu.dot_dimension_numbers<[1], [0], [0], [1], [0, 0, 1, 1], [], []>} : vector<48x32xf32>, vector<32x32xf32>, vector<48x32xf32> -> vector<48x32xf32>
    %c1_108 = arith.constant 1 : index
    %c0_109 = arith.constant 0 : index
    %c0_110 = arith.constant 0 : index
    %386 = vector.load %arg12[%c1_108, %c0_109, %c0_110] : memref<3x1x32xf32, #tpu.memory_space<vmem>>, vector<1x1x32xf32>
    %387 = vector.shape_cast %386 : vector<1x1x32xf32> to vector<1x32xf32>
    %388 = vector.broadcast %387 : vector<1x32xf32> to vector<48x32xf32>
    %389 = arith.addf %385, %388 : vector<48x32xf32>
    %390 = arith.addf %252, %389 : vector<48x32xf32>
    %c1_111 = arith.constant 1 : index
    %c0_112 = arith.constant 0 : index
    %c0_113 = arith.constant 0 : index
    %391 = vector.load %arg17[%c1_111, %c0_112, %c0_113] : memref<3x1x32xf32, #tpu.memory_space<vmem>>, vector<1x1x32xf32>
    %392 = vector.shape_cast %391 : vector<1x1x32xf32> to vector<1x32xf32>
    %c1_114 = arith.constant 1 : index
    %c0_115 = arith.constant 0 : index
    %c0_116 = arith.constant 0 : index
    %393 = vector.load %arg18[%c1_114, %c0_115, %c0_116] : memref<3x1x32xf32, #tpu.memory_space<vmem>>, vector<1x1x32xf32>
    %394 = vector.shape_cast %393 : vector<1x1x32xf32> to vector<1x32xf32>
    %cst_117 = arith.constant dense<0.000000e+00> : vector<48xf32>
    %395 = vector.multi_reduction <add>, %390, %cst_117 [1] : vector<48x32xf32> to vector<48xf32>
    %396 = vector.shape_cast %395 : vector<48xf32> to vector<48x1xf32>
    %cst_118 = arith.constant 3.200000e+01 : f32
    %397 = vector.broadcast %cst_118 : f32 to vector<48x1xf32>
    %398 = arith.divf %396, %397 : vector<48x1xf32>
    %399 = vector.broadcast %398 : vector<48x1xf32> to vector<48x32xf32>
    %400 = arith.subf %390, %399 : vector<48x32xf32>
    %401 = arith.mulf %400, %400 : vector<48x32xf32>
    %cst_119 = arith.constant dense<0.000000e+00> : vector<48xf32>
    %402 = vector.multi_reduction <add>, %401, %cst_119 [1] : vector<48x32xf32> to vector<48xf32>
    %403 = vector.shape_cast %402 : vector<48xf32> to vector<48x1xf32>
    %cst_120 = arith.constant 3.200000e+01 : f32
    %404 = vector.broadcast %cst_120 : f32 to vector<48x1xf32>
    %405 = arith.divf %403, %404 : vector<48x1xf32>
    %406 = vector.broadcast %398 : vector<48x1xf32> to vector<48x32xf32>
    %407 = arith.subf %390, %406 : vector<48x32xf32>
    %cst_121 = arith.constant 9.99999974E-6 : f32
    %408 = vector.broadcast %cst_121 : f32 to vector<48x1xf32>
    %409 = arith.addf %405, %408 : vector<48x1xf32>
    %410 = math.rsqrt %409 : vector<48x1xf32>
    %411 = vector.broadcast %410 : vector<48x1xf32> to vector<48x32xf32>
    %412 = arith.mulf %407, %411 : vector<48x32xf32>
    %413 = vector.broadcast %392 : vector<1x32xf32> to vector<48x32xf32>
    %414 = arith.mulf %412, %413 : vector<48x32xf32>
    %415 = vector.broadcast %394 : vector<1x32xf32> to vector<48x32xf32>
    %416 = arith.addf %414, %415 : vector<48x32xf32>
    %c1_122 = arith.constant 1 : index
    %c0_123 = arith.constant 0 : index
    %c0_124 = arith.constant 0 : index
    %417 = vector.load %arg13[%c1_122, %c0_123, %c0_124] : memref<3x32x32xf32, #tpu.memory_space<vmem>>, vector<1x32x32xf32>
    %418 = vector.shape_cast %417 : vector<1x32x32xf32> to vector<32x32xf32>
    %cst_125 = arith.constant dense<0.000000e+00> : vector<48x32xf32>
    %419 = tpu.matmul %416, %418, %cst_125 {dimension_numbers = #tpu.dot_dimension_numbers<[1], [0], [0], [1], [0, 0, 1, 1], [], []>} : vector<48x32xf32>, vector<32x32xf32>, vector<48x32xf32> -> vector<48x32xf32>
    %c1_126 = arith.constant 1 : index
    %c0_127 = arith.constant 0 : index
    %c0_128 = arith.constant 0 : index
    %420 = vector.load %arg14[%c1_126, %c0_127, %c0_128] : memref<3x1x32xf32, #tpu.memory_space<vmem>>, vector<1x1x32xf32>
    %421 = vector.shape_cast %420 : vector<1x1x32xf32> to vector<1x32xf32>
    %422 = vector.broadcast %421 : vector<1x32xf32> to vector<48x32xf32>
    %423 = arith.addf %419, %422 : vector<48x32xf32>
    %cst_129 = arith.constant 0.000000e+00 : f32
    %424 = vector.broadcast %cst_129 : f32 to vector<48x32xf32>
    %425 = arith.maximumf %423, %424 : vector<48x32xf32>
    %c1_130 = arith.constant 1 : index
    %c0_131 = arith.constant 0 : index
    %c0_132 = arith.constant 0 : index
    %426 = vector.load %arg15[%c1_130, %c0_131, %c0_132] : memref<3x32x32xf32, #tpu.memory_space<vmem>>, vector<1x32x32xf32>
    %427 = vector.shape_cast %426 : vector<1x32x32xf32> to vector<32x32xf32>
    %cst_133 = arith.constant dense<0.000000e+00> : vector<48x32xf32>
    %428 = tpu.matmul %425, %427, %cst_133 {dimension_numbers = #tpu.dot_dimension_numbers<[1], [0], [0], [1], [0, 0, 1, 1], [], []>} : vector<48x32xf32>, vector<32x32xf32>, vector<48x32xf32> -> vector<48x32xf32>
    %c1_134 = arith.constant 1 : index
    %c0_135 = arith.constant 0 : index
    %c0_136 = arith.constant 0 : index
    %429 = vector.load %arg16[%c1_134, %c0_135, %c0_136] : memref<3x1x32xf32, #tpu.memory_space<vmem>>, vector<1x1x32xf32>
    %430 = vector.shape_cast %429 : vector<1x1x32xf32> to vector<1x32xf32>
    %431 = vector.broadcast %430 : vector<1x32xf32> to vector<48x32xf32>
    %432 = arith.addf %428, %431 : vector<48x32xf32>
    %433 = arith.addf %416, %432 : vector<48x32xf32>
    %c1_137 = arith.constant 1 : index
    %c0_138 = arith.constant 0 : index
    %c0_139 = arith.constant 0 : index
    %434 = vector.load %arg19[%c1_137, %c0_138, %c0_139] : memref<3x1x32xf32, #tpu.memory_space<vmem>>, vector<1x1x32xf32>
    %435 = vector.shape_cast %434 : vector<1x1x32xf32> to vector<1x32xf32>
    %c1_140 = arith.constant 1 : index
    %c0_141 = arith.constant 0 : index
    %c0_142 = arith.constant 0 : index
    %436 = vector.load %arg20[%c1_140, %c0_141, %c0_142] : memref<3x1x32xf32, #tpu.memory_space<vmem>>, vector<1x1x32xf32>
    %437 = vector.shape_cast %436 : vector<1x1x32xf32> to vector<1x32xf32>
    %cst_143 = arith.constant dense<0.000000e+00> : vector<48xf32>
    %438 = vector.multi_reduction <add>, %433, %cst_143 [1] : vector<48x32xf32> to vector<48xf32>
    %439 = vector.shape_cast %438 : vector<48xf32> to vector<48x1xf32>
    %cst_144 = arith.constant 3.200000e+01 : f32
    %440 = vector.broadcast %cst_144 : f32 to vector<48x1xf32>
    %441 = arith.divf %439, %440 : vector<48x1xf32>
    %442 = vector.broadcast %441 : vector<48x1xf32> to vector<48x32xf32>
    %443 = arith.subf %433, %442 : vector<48x32xf32>
    %444 = arith.mulf %443, %443 : vector<48x32xf32>
    %cst_145 = arith.constant dense<0.000000e+00> : vector<48xf32>
    %445 = vector.multi_reduction <add>, %444, %cst_145 [1] : vector<48x32xf32> to vector<48xf32>
    %446 = vector.shape_cast %445 : vector<48xf32> to vector<48x1xf32>
    %cst_146 = arith.constant 3.200000e+01 : f32
    %447 = vector.broadcast %cst_146 : f32 to vector<48x1xf32>
    %448 = arith.divf %446, %447 : vector<48x1xf32>
    %449 = vector.broadcast %441 : vector<48x1xf32> to vector<48x32xf32>
    %450 = arith.subf %433, %449 : vector<48x32xf32>
    %cst_147 = arith.constant 9.99999974E-6 : f32
    %451 = vector.broadcast %cst_147 : f32 to vector<48x1xf32>
    %452 = arith.addf %448, %451 : vector<48x1xf32>
    %453 = math.rsqrt %452 : vector<48x1xf32>
    %454 = vector.broadcast %453 : vector<48x1xf32> to vector<48x32xf32>
    %455 = arith.mulf %450, %454 : vector<48x32xf32>
    %456 = vector.broadcast %435 : vector<1x32xf32> to vector<48x32xf32>
    %457 = arith.mulf %455, %456 : vector<48x32xf32>
    %458 = vector.broadcast %437 : vector<1x32xf32> to vector<48x32xf32>
    %459 = arith.addf %457, %458 : vector<48x32xf32>
    %c2 = arith.constant 2 : index
    %c0_148 = arith.constant 0 : index
    %c0_149 = arith.constant 0 : index
    %460 = vector.load %arg9[%c2, %c0_148, %c0_149] : memref<3x32x96xf32, #tpu.memory_space<vmem>>, vector<1x32x96xf32>
    %461 = vector.shape_cast %460 : vector<1x32x96xf32> to vector<32x96xf32>
    %cst_150 = arith.constant dense<0.000000e+00> : vector<48x96xf32>
    %462 = tpu.matmul %459, %461, %cst_150 {dimension_numbers = #tpu.dot_dimension_numbers<[1], [0], [0], [1], [0, 0, 1, 1], [], []>} : vector<48x32xf32>, vector<32x96xf32>, vector<48x96xf32> -> vector<48x96xf32>
    %c2_151 = arith.constant 2 : index
    %c0_152 = arith.constant 0 : index
    %c0_153 = arith.constant 0 : index
    %463 = vector.load %arg10[%c2_151, %c0_152, %c0_153] : memref<3x1x96xf32, #tpu.memory_space<vmem>>, vector<1x1x96xf32>
    %464 = vector.shape_cast %463 : vector<1x1x96xf32> to vector<1x96xf32>
    %465 = vector.broadcast %464 : vector<1x96xf32> to vector<48x96xf32>
    %466 = arith.addf %462, %465 : vector<48x96xf32>
    %467 = vector.extract_strided_slice %466 {offsets = [0, 0], sizes = [48, 32], strides = [1, 1]} : vector<48x96xf32> to vector<48x32xf32>
    %cst_154 = arith.constant 0.353553385 : f32
    %468 = vector.broadcast %cst_154 : f32 to vector<48x32xf32>
    %469 = arith.mulf %467, %468 : vector<48x32xf32>
    %470 = vector.extract_strided_slice %466 {offsets = [0, 32], sizes = [48, 32], strides = [1, 1]} : vector<48x96xf32> to vector<48x32xf32>
    %471 = vector.extract_strided_slice %466 {offsets = [0, 64], sizes = [48, 32], strides = [1, 1]} : vector<48x96xf32> to vector<48x32xf32>
    %472 = vector.extract_strided_slice %469 {offsets = [0, 0], sizes = [24, 8], strides = [1, 1]} : vector<48x32xf32> to vector<24x8xf32>
    %473 = vector.extract_strided_slice %469 {offsets = [0, 8], sizes = [24, 8], strides = [1, 1]} : vector<48x32xf32> to vector<24x8xf32>
    %474 = vector.extract_strided_slice %469 {offsets = [0, 16], sizes = [24, 8], strides = [1, 1]} : vector<48x32xf32> to vector<24x8xf32>
    %475 = vector.extract_strided_slice %469 {offsets = [0, 24], sizes = [24, 8], strides = [1, 1]} : vector<48x32xf32> to vector<24x8xf32>
    %476 = vector.extract_strided_slice %469 {offsets = [24, 0], sizes = [24, 8], strides = [1, 1]} : vector<48x32xf32> to vector<24x8xf32>
    %477 = vector.extract_strided_slice %469 {offsets = [24, 8], sizes = [24, 8], strides = [1, 1]} : vector<48x32xf32> to vector<24x8xf32>
    %478 = vector.extract_strided_slice %469 {offsets = [24, 16], sizes = [24, 8], strides = [1, 1]} : vector<48x32xf32> to vector<24x8xf32>
    %479 = vector.extract_strided_slice %469 {offsets = [24, 24], sizes = [24, 8], strides = [1, 1]} : vector<48x32xf32> to vector<24x8xf32>
    %480 = vector.shape_cast %472 : vector<24x8xf32> to vector<1x24x8xf32>
    %481 = vector.shape_cast %473 : vector<24x8xf32> to vector<1x24x8xf32>
    %482 = vector.shape_cast %474 : vector<24x8xf32> to vector<1x24x8xf32>
    %483 = vector.shape_cast %475 : vector<24x8xf32> to vector<1x24x8xf32>
    %484 = vector.shape_cast %476 : vector<24x8xf32> to vector<1x24x8xf32>
    %485 = vector.shape_cast %477 : vector<24x8xf32> to vector<1x24x8xf32>
    %486 = vector.shape_cast %478 : vector<24x8xf32> to vector<1x24x8xf32>
    %487 = vector.shape_cast %479 : vector<24x8xf32> to vector<1x24x8xf32>
    %488 = tpu.concatenate %480, %481, %482, %483, %484, %485, %486, %487 in 0 : vector<1x24x8xf32>, vector<1x24x8xf32>, vector<1x24x8xf32>, vector<1x24x8xf32>, vector<1x24x8xf32>, vector<1x24x8xf32>, vector<1x24x8xf32>, vector<1x24x8xf32> -> vector<8x24x8xf32>
    %489 = vector.extract_strided_slice %470 {offsets = [0, 0], sizes = [24, 8], strides = [1, 1]} : vector<48x32xf32> to vector<24x8xf32>
    %490 = vector.extract_strided_slice %470 {offsets = [0, 8], sizes = [24, 8], strides = [1, 1]} : vector<48x32xf32> to vector<24x8xf32>
    %491 = vector.extract_strided_slice %470 {offsets = [0, 16], sizes = [24, 8], strides = [1, 1]} : vector<48x32xf32> to vector<24x8xf32>
    %492 = vector.extract_strided_slice %470 {offsets = [0, 24], sizes = [24, 8], strides = [1, 1]} : vector<48x32xf32> to vector<24x8xf32>
    %493 = vector.extract_strided_slice %470 {offsets = [24, 0], sizes = [24, 8], strides = [1, 1]} : vector<48x32xf32> to vector<24x8xf32>
    %494 = vector.extract_strided_slice %470 {offsets = [24, 8], sizes = [24, 8], strides = [1, 1]} : vector<48x32xf32> to vector<24x8xf32>
    %495 = vector.extract_strided_slice %470 {offsets = [24, 16], sizes = [24, 8], strides = [1, 1]} : vector<48x32xf32> to vector<24x8xf32>
    %496 = vector.extract_strided_slice %470 {offsets = [24, 24], sizes = [24, 8], strides = [1, 1]} : vector<48x32xf32> to vector<24x8xf32>
    %497 = vector.shape_cast %489 : vector<24x8xf32> to vector<1x24x8xf32>
    %498 = vector.shape_cast %490 : vector<24x8xf32> to vector<1x24x8xf32>
    %499 = vector.shape_cast %491 : vector<24x8xf32> to vector<1x24x8xf32>
    %500 = vector.shape_cast %492 : vector<24x8xf32> to vector<1x24x8xf32>
    %501 = vector.shape_cast %493 : vector<24x8xf32> to vector<1x24x8xf32>
    %502 = vector.shape_cast %494 : vector<24x8xf32> to vector<1x24x8xf32>
    %503 = vector.shape_cast %495 : vector<24x8xf32> to vector<1x24x8xf32>
    %504 = vector.shape_cast %496 : vector<24x8xf32> to vector<1x24x8xf32>
    %505 = tpu.concatenate %497, %498, %499, %500, %501, %502, %503, %504 in 0 : vector<1x24x8xf32>, vector<1x24x8xf32>, vector<1x24x8xf32>, vector<1x24x8xf32>, vector<1x24x8xf32>, vector<1x24x8xf32>, vector<1x24x8xf32>, vector<1x24x8xf32> -> vector<8x24x8xf32>
    %506 = vector.extract_strided_slice %471 {offsets = [0, 0], sizes = [24, 8], strides = [1, 1]} : vector<48x32xf32> to vector<24x8xf32>
    %507 = vector.extract_strided_slice %471 {offsets = [0, 8], sizes = [24, 8], strides = [1, 1]} : vector<48x32xf32> to vector<24x8xf32>
    %508 = vector.extract_strided_slice %471 {offsets = [0, 16], sizes = [24, 8], strides = [1, 1]} : vector<48x32xf32> to vector<24x8xf32>
    %509 = vector.extract_strided_slice %471 {offsets = [0, 24], sizes = [24, 8], strides = [1, 1]} : vector<48x32xf32> to vector<24x8xf32>
    %510 = vector.extract_strided_slice %471 {offsets = [24, 0], sizes = [24, 8], strides = [1, 1]} : vector<48x32xf32> to vector<24x8xf32>
    %511 = vector.extract_strided_slice %471 {offsets = [24, 8], sizes = [24, 8], strides = [1, 1]} : vector<48x32xf32> to vector<24x8xf32>
    %512 = vector.extract_strided_slice %471 {offsets = [24, 16], sizes = [24, 8], strides = [1, 1]} : vector<48x32xf32> to vector<24x8xf32>
    %513 = vector.extract_strided_slice %471 {offsets = [24, 24], sizes = [24, 8], strides = [1, 1]} : vector<48x32xf32> to vector<24x8xf32>
    %514 = vector.shape_cast %506 : vector<24x8xf32> to vector<1x24x8xf32>
    %515 = vector.shape_cast %507 : vector<24x8xf32> to vector<1x24x8xf32>
    %516 = vector.shape_cast %508 : vector<24x8xf32> to vector<1x24x8xf32>
    %517 = vector.shape_cast %509 : vector<24x8xf32> to vector<1x24x8xf32>
    %518 = vector.shape_cast %510 : vector<24x8xf32> to vector<1x24x8xf32>
    %519 = vector.shape_cast %511 : vector<24x8xf32> to vector<1x24x8xf32>
    %520 = vector.shape_cast %512 : vector<24x8xf32> to vector<1x24x8xf32>
    %521 = vector.shape_cast %513 : vector<24x8xf32> to vector<1x24x8xf32>
    %522 = tpu.concatenate %514, %515, %516, %517, %518, %519, %520, %521 in 0 : vector<1x24x8xf32>, vector<1x24x8xf32>, vector<1x24x8xf32>, vector<1x24x8xf32>, vector<1x24x8xf32>, vector<1x24x8xf32>, vector<1x24x8xf32>, vector<1x24x8xf32> -> vector<8x24x8xf32>
    "tpu.trace_start"() <{level = 10 : i32, message = "bqd,bkd->bqk"}> : () -> ()
    %cst_155 = arith.constant dense<0.000000e+00> : vector<8x24x24xf32>
    %523 = tpu.matmul %488, %505, %cst_155 {dimension_numbers = #tpu.dot_dimension_numbers<[2], [2], [1], [1], [0, 0, 0, 1, 1, 1], [0], [0]>} : vector<8x24x8xf32>, vector<8x24x8xf32>, vector<8x24x24xf32> -> vector<8x24x24xf32>
    "tpu.trace_stop"() : () -> ()
    %cst_156 = arith.constant dense<0xFF800000> : vector<8x24xf32>
    %524 = vector.multi_reduction <maximumf>, %523, %cst_156 [2] : vector<8x24x24xf32> to vector<8x24xf32>
    %525 = vector.shape_cast %524 : vector<8x24xf32> to vector<8x24x1xf32>
    %526 = vector.broadcast %525 : vector<8x24x1xf32> to vector<8x24x24xf32>
    %527 = arith.subf %523, %526 : vector<8x24x24xf32>
    %528 = math.exp %527 : vector<8x24x24xf32>
    %cst_157 = arith.constant dense<0.000000e+00> : vector<8x24xf32>
    %529 = vector.multi_reduction <add>, %528, %cst_157 [2] : vector<8x24x24xf32> to vector<8x24xf32>
    %530 = vector.shape_cast %529 : vector<8x24xf32> to vector<8x24x1xf32>
    %531 = tpu.reciprocal %530 {approx = true} : vector<8x24x1xf32> -> vector<8x24x1xf32>
    %532 = vector.broadcast %531 : vector<8x24x1xf32> to vector<8x24x24xf32>
    %533 = arith.mulf %528, %532 : vector<8x24x24xf32>
    %534 = vector.extract_strided_slice %533 {offsets = [0, 0, 0], sizes = [1, 24, 24], strides = [1, 1, 1]} : vector<8x24x24xf32> to vector<1x24x24xf32>
    %535 = vector.shape_cast %534 : vector<1x24x24xf32> to vector<24x24xf32>
    %cst_158 = arith.constant 0.000000e+00 : f32
    %536 = vector.broadcast %cst_158 : f32 to vector<24x24xf32>
    %537 = arith.addf %536, %535 : vector<24x24xf32>
    %538 = vector.extract_strided_slice %533 {offsets = [1, 0, 0], sizes = [1, 24, 24], strides = [1, 1, 1]} : vector<8x24x24xf32> to vector<1x24x24xf32>
    %539 = vector.shape_cast %538 : vector<1x24x24xf32> to vector<24x24xf32>
    %540 = arith.addf %537, %539 : vector<24x24xf32>
    %541 = vector.extract_strided_slice %533 {offsets = [2, 0, 0], sizes = [1, 24, 24], strides = [1, 1, 1]} : vector<8x24x24xf32> to vector<1x24x24xf32>
    %542 = vector.shape_cast %541 : vector<1x24x24xf32> to vector<24x24xf32>
    %543 = arith.addf %540, %542 : vector<24x24xf32>
    %544 = vector.extract_strided_slice %533 {offsets = [3, 0, 0], sizes = [1, 24, 24], strides = [1, 1, 1]} : vector<8x24x24xf32> to vector<1x24x24xf32>
    %545 = vector.shape_cast %544 : vector<1x24x24xf32> to vector<24x24xf32>
    %546 = arith.addf %543, %545 : vector<24x24xf32>
    %cst_159 = arith.constant 2.500000e-01 : f32
    %547 = vector.broadcast %cst_159 : f32 to vector<24x24xf32>
    %548 = arith.mulf %546, %547 : vector<24x24xf32>
    %549 = vector.extract_strided_slice %533 {offsets = [4, 0, 0], sizes = [1, 24, 24], strides = [1, 1, 1]} : vector<8x24x24xf32> to vector<1x24x24xf32>
    %550 = vector.shape_cast %549 : vector<1x24x24xf32> to vector<24x24xf32>
    %cst_160 = arith.constant 0.000000e+00 : f32
    %551 = vector.broadcast %cst_160 : f32 to vector<24x24xf32>
    %552 = arith.addf %551, %550 : vector<24x24xf32>
    %553 = vector.extract_strided_slice %533 {offsets = [5, 0, 0], sizes = [1, 24, 24], strides = [1, 1, 1]} : vector<8x24x24xf32> to vector<1x24x24xf32>
    %554 = vector.shape_cast %553 : vector<1x24x24xf32> to vector<24x24xf32>
    %555 = arith.addf %552, %554 : vector<24x24xf32>
    %556 = vector.extract_strided_slice %533 {offsets = [6, 0, 0], sizes = [1, 24, 24], strides = [1, 1, 1]} : vector<8x24x24xf32> to vector<1x24x24xf32>
    %557 = vector.shape_cast %556 : vector<1x24x24xf32> to vector<24x24xf32>
    %558 = arith.addf %555, %557 : vector<24x24xf32>
    %559 = vector.extract_strided_slice %533 {offsets = [7, 0, 0], sizes = [1, 24, 24], strides = [1, 1, 1]} : vector<8x24x24xf32> to vector<1x24x24xf32>
    %560 = vector.shape_cast %559 : vector<1x24x24xf32> to vector<24x24xf32>
    %561 = arith.addf %558, %560 : vector<24x24xf32>
    %cst_161 = arith.constant 2.500000e-01 : f32
    %562 = vector.broadcast %cst_161 : f32 to vector<24x24xf32>
    %563 = arith.mulf %561, %562 : vector<24x24xf32>
    %564 = vector.shape_cast %548 : vector<24x24xf32> to vector<1x24x24xf32>
    %565 = vector.shape_cast %563 : vector<24x24xf32> to vector<1x24x24xf32>
    %566 = tpu.concatenate %564, %565 in 0 : vector<1x24x24xf32>, vector<1x24x24xf32> -> vector<2x24x24xf32>
    %c2_162 = arith.constant 2 : index
    %c0_163 = arith.constant 0 : index
    %c0_164 = arith.constant 0 : index
    %c0_165 = arith.constant 0 : index
    %567 = vector.load %arg24[%c2_162, %c0_163, %c0_164, %c0_165] : memref<3x2x24x24xf32, #tpu.memory_space<vmem>>, vector<1x2x24x24xf32>
    %568 = vector.shape_cast %567 : vector<1x2x24x24xf32> to vector<2x24x24xf32>
    %569 = vector.shape_cast %566 : vector<2x24x24xf32> to vector<1x2x24x24xf32>
    tpu.vector_store %arg24[%c2_162, %c0_163, %c0_164, %c0_165], %569 {strides = array<i32>} : memref<3x2x24x24xf32, #tpu.memory_space<vmem>>, vector<1x2x24x24xf32>,
    "tpu.trace_start"() <{level = 10 : i32, message = "bqk,bkd->bqd"}> : () -> ()
    %cst_166 = arith.constant dense<0.000000e+00> : vector<8x24x8xf32>
    %570 = tpu.matmul %533, %522, %cst_166 {dimension_numbers = #tpu.dot_dimension_numbers<[2], [1], [1], [2], [0, 0, 0, 1, 1, 2], [0], [0]>} : vector<8x24x24xf32>, vector<8x24x8xf32>, vector<8x24x8xf32> -> vector<8x24x8xf32>
    "tpu.trace_stop"() : () -> ()
    %571 = vector.extract_strided_slice %570 {offsets = [0, 0, 0], sizes = [1, 24, 8], strides = [1, 1, 1]} : vector<8x24x8xf32> to vector<1x24x8xf32>
    %572 = vector.shape_cast %571 : vector<1x24x8xf32> to vector<24x8xf32>
    %573 = vector.extract_strided_slice %570 {offsets = [1, 0, 0], sizes = [1, 24, 8], strides = [1, 1, 1]} : vector<8x24x8xf32> to vector<1x24x8xf32>
    %574 = vector.shape_cast %573 : vector<1x24x8xf32> to vector<24x8xf32>
    %575 = vector.extract_strided_slice %570 {offsets = [2, 0, 0], sizes = [1, 24, 8], strides = [1, 1, 1]} : vector<8x24x8xf32> to vector<1x24x8xf32>
    %576 = vector.shape_cast %575 : vector<1x24x8xf32> to vector<24x8xf32>
    %577 = vector.extract_strided_slice %570 {offsets = [3, 0, 0], sizes = [1, 24, 8], strides = [1, 1, 1]} : vector<8x24x8xf32> to vector<1x24x8xf32>
    %578 = vector.shape_cast %577 : vector<1x24x8xf32> to vector<24x8xf32>
    %579 = tpu.concatenate %572, %574, %576, %578 in 1 : vector<24x8xf32>, vector<24x8xf32>, vector<24x8xf32>, vector<24x8xf32> -> vector<24x32xf32>
    %580 = vector.extract_strided_slice %570 {offsets = [4, 0, 0], sizes = [1, 24, 8], strides = [1, 1, 1]} : vector<8x24x8xf32> to vector<1x24x8xf32>
    %581 = vector.shape_cast %580 : vector<1x24x8xf32> to vector<24x8xf32>
    %582 = vector.extract_strided_slice %570 {offsets = [5, 0, 0], sizes = [1, 24, 8], strides = [1, 1, 1]} : vector<8x24x8xf32> to vector<1x24x8xf32>
    %583 = vector.shape_cast %582 : vector<1x24x8xf32> to vector<24x8xf32>
    %584 = vector.extract_strided_slice %570 {offsets = [6, 0, 0], sizes = [1, 24, 8], strides = [1, 1, 1]} : vector<8x24x8xf32> to vector<1x24x8xf32>
    %585 = vector.shape_cast %584 : vector<1x24x8xf32> to vector<24x8xf32>
    %586 = vector.extract_strided_slice %570 {offsets = [7, 0, 0], sizes = [1, 24, 8], strides = [1, 1, 1]} : vector<8x24x8xf32> to vector<1x24x8xf32>
    %587 = vector.shape_cast %586 : vector<1x24x8xf32> to vector<24x8xf32>
    %588 = tpu.concatenate %581, %583, %585, %587 in 1 : vector<24x8xf32>, vector<24x8xf32>, vector<24x8xf32>, vector<24x8xf32> -> vector<24x32xf32>
    %589 = tpu.concatenate %579, %588 in 0 : vector<24x32xf32>, vector<24x32xf32> -> vector<48x32xf32>
    %c2_167 = arith.constant 2 : index
    %c0_168 = arith.constant 0 : index
    %c0_169 = arith.constant 0 : index
    %590 = vector.load %arg11[%c2_167, %c0_168, %c0_169] : memref<3x32x32xf32, #tpu.memory_space<vmem>>, vector<1x32x32xf32>
    %591 = vector.shape_cast %590 : vector<1x32x32xf32> to vector<32x32xf32>
    %cst_170 = arith.constant dense<0.000000e+00> : vector<48x32xf32>
    %592 = tpu.matmul %589, %591, %cst_170 {dimension_numbers = #tpu.dot_dimension_numbers<[1], [0], [0], [1], [0, 0, 1, 1], [], []>} : vector<48x32xf32>, vector<32x32xf32>, vector<48x32xf32> -> vector<48x32xf32>
    %c2_171 = arith.constant 2 : index
    %c0_172 = arith.constant 0 : index
    %c0_173 = arith.constant 0 : index
    %593 = vector.load %arg12[%c2_171, %c0_172, %c0_173] : memref<3x1x32xf32, #tpu.memory_space<vmem>>, vector<1x1x32xf32>
    %594 = vector.shape_cast %593 : vector<1x1x32xf32> to vector<1x32xf32>
    %595 = vector.broadcast %594 : vector<1x32xf32> to vector<48x32xf32>
    %596 = arith.addf %592, %595 : vector<48x32xf32>
    %597 = arith.addf %459, %596 : vector<48x32xf32>
    %c2_174 = arith.constant 2 : index
    %c0_175 = arith.constant 0 : index
    %c0_176 = arith.constant 0 : index
    %598 = vector.load %arg17[%c2_174, %c0_175, %c0_176] : memref<3x1x32xf32, #tpu.memory_space<vmem>>, vector<1x1x32xf32>
    %599 = vector.shape_cast %598 : vector<1x1x32xf32> to vector<1x32xf32>
    %c2_177 = arith.constant 2 : index
    %c0_178 = arith.constant 0 : index
    %c0_179 = arith.constant 0 : index
    %600 = vector.load %arg18[%c2_177, %c0_178, %c0_179] : memref<3x1x32xf32, #tpu.memory_space<vmem>>, vector<1x1x32xf32>
    %601 = vector.shape_cast %600 : vector<1x1x32xf32> to vector<1x32xf32>
    %cst_180 = arith.constant dense<0.000000e+00> : vector<48xf32>
    %602 = vector.multi_reduction <add>, %597, %cst_180 [1] : vector<48x32xf32> to vector<48xf32>
    %603 = vector.shape_cast %602 : vector<48xf32> to vector<48x1xf32>
    %cst_181 = arith.constant 3.200000e+01 : f32
    %604 = vector.broadcast %cst_181 : f32 to vector<48x1xf32>
    %605 = arith.divf %603, %604 : vector<48x1xf32>
    %606 = vector.broadcast %605 : vector<48x1xf32> to vector<48x32xf32>
    %607 = arith.subf %597, %606 : vector<48x32xf32>
    %608 = arith.mulf %607, %607 : vector<48x32xf32>
    %cst_182 = arith.constant dense<0.000000e+00> : vector<48xf32>
    %609 = vector.multi_reduction <add>, %608, %cst_182 [1] : vector<48x32xf32> to vector<48xf32>
    %610 = vector.shape_cast %609 : vector<48xf32> to vector<48x1xf32>
    %cst_183 = arith.constant 3.200000e+01 : f32
    %611 = vector.broadcast %cst_183 : f32 to vector<48x1xf32>
    %612 = arith.divf %610, %611 : vector<48x1xf32>
    %613 = vector.broadcast %605 : vector<48x1xf32> to vector<48x32xf32>
    %614 = arith.subf %597, %613 : vector<48x32xf32>
    %cst_184 = arith.constant 9.99999974E-6 : f32
    %615 = vector.broadcast %cst_184 : f32 to vector<48x1xf32>
    %616 = arith.addf %612, %615 : vector<48x1xf32>
    %617 = math.rsqrt %616 : vector<48x1xf32>
    %618 = vector.broadcast %617 : vector<48x1xf32> to vector<48x32xf32>
    %619 = arith.mulf %614, %618 : vector<48x32xf32>
    %620 = vector.broadcast %599 : vector<1x32xf32> to vector<48x32xf32>
    %621 = arith.mulf %619, %620 : vector<48x32xf32>
    %622 = vector.broadcast %601 : vector<1x32xf32> to vector<48x32xf32>
    %623 = arith.addf %621, %622 : vector<48x32xf32>
    %c2_185 = arith.constant 2 : index
    %c0_186 = arith.constant 0 : index
    %c0_187 = arith.constant 0 : index
    %624 = vector.load %arg13[%c2_185, %c0_186, %c0_187] : memref<3x32x32xf32, #tpu.memory_space<vmem>>, vector<1x32x32xf32>
    %625 = vector.shape_cast %624 : vector<1x32x32xf32> to vector<32x32xf32>
    %cst_188 = arith.constant dense<0.000000e+00> : vector<48x32xf32>
    %626 = tpu.matmul %623, %625, %cst_188 {dimension_numbers = #tpu.dot_dimension_numbers<[1], [0], [0], [1], [0, 0, 1, 1], [], []>} : vector<48x32xf32>, vector<32x32xf32>, vector<48x32xf32> -> vector<48x32xf32>
    %c2_189 = arith.constant 2 : index
    %c0_190 = arith.constant 0 : index
    %c0_191 = arith.constant 0 : index
    %627 = vector.load %arg14[%c2_189, %c0_190, %c0_191] : memref<3x1x32xf32, #tpu.memory_space<vmem>>, vector<1x1x32xf32>
    %628 = vector.shape_cast %627 : vector<1x1x32xf32> to vector<1x32xf32>
    %629 = vector.broadcast %628 : vector<1x32xf32> to vector<48x32xf32>
    %630 = arith.addf %626, %629 : vector<48x32xf32>
    %cst_192 = arith.constant 0.000000e+00 : f32
    %631 = vector.broadcast %cst_192 : f32 to vector<48x32xf32>
    %632 = arith.maximumf %630, %631 : vector<48x32xf32>
    %c2_193 = arith.constant 2 : index
    %c0_194 = arith.constant 0 : index
    %c0_195 = arith.constant 0 : index
    %633 = vector.load %arg15[%c2_193, %c0_194, %c0_195] : memref<3x32x32xf32, #tpu.memory_space<vmem>>, vector<1x32x32xf32>
    %634 = vector.shape_cast %633 : vector<1x32x32xf32> to vector<32x32xf32>
    %cst_196 = arith.constant dense<0.000000e+00> : vector<48x32xf32>
    %635 = tpu.matmul %632, %634, %cst_196 {dimension_numbers = #tpu.dot_dimension_numbers<[1], [0], [0], [1], [0, 0, 1, 1], [], []>} : vector<48x32xf32>, vector<32x32xf32>, vector<48x32xf32> -> vector<48x32xf32>
    %c2_197 = arith.constant 2 : index
    %c0_198 = arith.constant 0 : index
    %c0_199 = arith.constant 0 : index
    %636 = vector.load %arg16[%c2_197, %c0_198, %c0_199] : memref<3x1x32xf32, #tpu.memory_space<vmem>>, vector<1x1x32xf32>
    %637 = vector.shape_cast %636 : vector<1x1x32xf32> to vector<1x32xf32>
    %638 = vector.broadcast %637 : vector<1x32xf32> to vector<48x32xf32>
    %639 = arith.addf %635, %638 : vector<48x32xf32>
    %640 = arith.addf %623, %639 : vector<48x32xf32>
    %c2_200 = arith.constant 2 : index
    %c0_201 = arith.constant 0 : index
    %c0_202 = arith.constant 0 : index
    %641 = vector.load %arg19[%c2_200, %c0_201, %c0_202] : memref<3x1x32xf32, #tpu.memory_space<vmem>>, vector<1x1x32xf32>
    %642 = vector.shape_cast %641 : vector<1x1x32xf32> to vector<1x32xf32>
    %c2_203 = arith.constant 2 : index
    %c0_204 = arith.constant 0 : index
    %c0_205 = arith.constant 0 : index
    %643 = vector.load %arg20[%c2_203, %c0_204, %c0_205] : memref<3x1x32xf32, #tpu.memory_space<vmem>>, vector<1x1x32xf32>
    %644 = vector.shape_cast %643 : vector<1x1x32xf32> to vector<1x32xf32>
    %cst_206 = arith.constant dense<0.000000e+00> : vector<48xf32>
    %645 = vector.multi_reduction <add>, %640, %cst_206 [1] : vector<48x32xf32> to vector<48xf32>
    %646 = vector.shape_cast %645 : vector<48xf32> to vector<48x1xf32>
    %cst_207 = arith.constant 3.200000e+01 : f32
    %647 = vector.broadcast %cst_207 : f32 to vector<48x1xf32>
    %648 = arith.divf %646, %647 : vector<48x1xf32>
    %649 = vector.broadcast %648 : vector<48x1xf32> to vector<48x32xf32>
    %650 = arith.subf %640, %649 : vector<48x32xf32>
    %651 = arith.mulf %650, %650 : vector<48x32xf32>
    %cst_208 = arith.constant dense<0.000000e+00> : vector<48xf32>
    %652 = vector.multi_reduction <add>, %651, %cst_208 [1] : vector<48x32xf32> to vector<48xf32>
    %653 = vector.shape_cast %652 : vector<48xf32> to vector<48x1xf32>
    %cst_209 = arith.constant 3.200000e+01 : f32
    %654 = vector.broadcast %cst_209 : f32 to vector<48x1xf32>
    %655 = arith.divf %653, %654 : vector<48x1xf32>
    %656 = vector.broadcast %648 : vector<48x1xf32> to vector<48x32xf32>
    %657 = arith.subf %640, %656 : vector<48x32xf32>
    %cst_210 = arith.constant 9.99999974E-6 : f32
    %658 = vector.broadcast %cst_210 : f32 to vector<48x1xf32>
    %659 = arith.addf %655, %658 : vector<48x1xf32>
    %660 = math.rsqrt %659 : vector<48x1xf32>
    %661 = vector.broadcast %660 : vector<48x1xf32> to vector<48x32xf32>
    %662 = arith.mulf %657, %661 : vector<48x32xf32>
    %663 = vector.broadcast %642 : vector<1x32xf32> to vector<48x32xf32>
    %664 = arith.mulf %662, %663 : vector<48x32xf32>
    %665 = vector.broadcast %644 : vector<1x32xf32> to vector<48x32xf32>
    %666 = arith.addf %664, %665 : vector<48x32xf32>
    %667 = vector.extract_strided_slice %666 {offsets = [16, 0], sizes = [8, 32], strides = [1, 1]} : vector<48x32xf32> to vector<8x32xf32>
    %668 = vector.extract_strided_slice %666 {offsets = [40, 0], sizes = [8, 32], strides = [1, 1]} : vector<48x32xf32> to vector<8x32xf32>
    %669 = vector.shape_cast %667 : vector<8x32xf32> to vector<1x8x32xf32>
    %670 = vector.shape_cast %668 : vector<8x32xf32> to vector<1x8x32xf32>
    %671 = tpu.concatenate %669, %670 in 0 : vector<1x8x32xf32>, vector<1x8x32xf32> -> vector<2x8x32xf32>
    %c0_211 = arith.constant 0 : index
    %c0_212 = arith.constant 0 : index
    %672 = vector.load %arg21[%c0_211, %c0_212] : memref<8x32xf32, #tpu.memory_space<vmem>>, vector<8x32xf32>
    %673 = vector.shape_cast %672 : vector<8x32xf32> to vector<1x8x32xf32>
    %674 = vector.broadcast %673 : vector<1x8x32xf32> to vector<2x8x32xf32>
    %675 = arith.mulf %671, %674 : vector<2x8x32xf32>
    %cst_213 = arith.constant dense<0.000000e+00> : vector<2x8xf32>
    %676 = vector.multi_reduction <add>, %675, %cst_213 [2] : vector<2x8x32xf32> to vector<2x8xf32>
    %c0_214 = arith.constant 0 : index
    %c0_215 = arith.constant 0 : index
    %677 = vector.load %arg22[%c0_214, %c0_215] : memref<1x8xf32, #tpu.memory_space<vmem>>, vector<1x8xf32>
    %678 = vector.broadcast %677 : vector<1x8xf32> to vector<2x8xf32>
    %679 = arith.addf %676, %678 : vector<2x8xf32>
    %c0_216 = arith.constant 0 : index
    %c0_217 = arith.constant 0 : index
    %680 = vector.load %arg23[%c0_216, %c0_217] : memref<2x8xf32, #tpu.memory_space<vmem>>, vector<2x8xf32>
    tpu.vector_store %arg23[%c0_216, %c0_217], %679 {strides = array<i32>} : memref<2x8xf32, #tpu.memory_space<vmem>>, vector<2x8xf32>,
    return
  }
  func.func @transform_0(%arg0: i32) -> (i32, i32) {
    %c0_i32 = arith.constant 0 : i32
    %c0_i32_0 = arith.constant 0 : i32
    %c0_i32_1 = arith.constant 0 : i32
    return %c0_i32, %c0_i32_0 : i32, i32
  }
  func.func @transform_1(%arg0: i32) -> (i32, i32) {
    %c0_i32 = arith.constant 0 : i32
    %c0_i32_0 = arith.constant 0 : i32
    %c0_i32_1 = arith.constant 0 : i32
    return %c0_i32, %c0_i32_0 : i32, i32
  }
  func.func @transform_2(%arg0: i32) -> (i32, i32) {
    %c0_i32 = arith.constant 0 : i32
    %c0_i32_0 = arith.constant 0 : i32
    %c0_i32_1 = arith.constant 0 : i32
    return %c0_i32, %c0_i32_0 : i32, i32
  }
  func.func @transform_3(%arg0: i32) -> (i32, i32) {
    %c0_i32 = arith.constant 0 : i32
    %c0_i32_0 = arith.constant 0 : i32
    %c0_i32_1 = arith.constant 0 : i32
    return %c0_i32, %c0_i32_0 : i32, i32
  }
  func.func @transform_4(%arg0: i32) -> (i32, i32) {
    %c0_i32 = arith.constant 0 : i32
    %c0_i32_0 = arith.constant 0 : i32
    %c0_i32_1 = arith.constant 0 : i32
    return %c0_i32, %c0_i32_0 : i32, i32
  }
  func.func @transform_5(%arg0: i32) -> (i32, i32) {
    %c0_i32 = arith.constant 0 : i32
    %c0_i32_0 = arith.constant 0 : i32
    %c0_i32_1 = arith.constant 0 : i32
    return %c0_i32, %c0_i32_0 : i32, i32
  }
  func.func @transform_6(%arg0: i32) -> (i32, i32) {
    %c0_i32 = arith.constant 0 : i32
    %c0_i32_0 = arith.constant 0 : i32
    %c0_i32_1 = arith.constant 0 : i32
    return %c0_i32, %c0_i32_0 : i32, i32
  }
  func.func @transform_7(%arg0: i32) -> (i32, i32) {
    %c0_i32 = arith.constant 0 : i32
    %c0_i32_0 = arith.constant 0 : i32
    %c0_i32_1 = arith.constant 0 : i32
    return %c0_i32, %c0_i32_0 : i32, i32
  }
  func.func @transform_8(%arg0: i32) -> (i32, i32, i32) {
    %c0_i32 = arith.constant 0 : i32
    %c0_i32_0 = arith.constant 0 : i32
    %c0_i32_1 = arith.constant 0 : i32
    %c0_i32_2 = arith.constant 0 : i32
    return %c0_i32, %c0_i32_0, %c0_i32_1 : i32, i32, i32
  }
  func.func @transform_9(%arg0: i32) -> (i32, i32, i32) {
    %c0_i32 = arith.constant 0 : i32
    %c0_i32_0 = arith.constant 0 : i32
    %c0_i32_1 = arith.constant 0 : i32
    %c0_i32_2 = arith.constant 0 : i32
    return %c0_i32, %c0_i32_0, %c0_i32_1 : i32, i32, i32
  }
  func.func @transform_10(%arg0: i32) -> (i32, i32, i32) {
    %c0_i32 = arith.constant 0 : i32
    %c0_i32_0 = arith.constant 0 : i32
    %c0_i32_1 = arith.constant 0 : i32
    %c0_i32_2 = arith.constant 0 : i32
    return %c0_i32, %c0_i32_0, %c0_i32_1 : i32, i32, i32
  }
  func.func @transform_11(%arg0: i32) -> (i32, i32, i32) {
    %c0_i32 = arith.constant 0 : i32
    %c0_i32_0 = arith.constant 0 : i32
    %c0_i32_1 = arith.constant 0 : i32
    %c0_i32_2 = arith.constant 0 : i32
    return %c0_i32, %c0_i32_0, %c0_i32_1 : i32, i32, i32
  }
  func.func @transform_12(%arg0: i32) -> (i32, i32, i32) {
    %c0_i32 = arith.constant 0 : i32
    %c0_i32_0 = arith.constant 0 : i32
    %c0_i32_1 = arith.constant 0 : i32
    %c0_i32_2 = arith.constant 0 : i32
    return %c0_i32, %c0_i32_0, %c0_i32_1 : i32, i32, i32
  }
  func.func @transform_13(%arg0: i32) -> (i32, i32, i32) {
    %c0_i32 = arith.constant 0 : i32
    %c0_i32_0 = arith.constant 0 : i32
    %c0_i32_1 = arith.constant 0 : i32
    %c0_i32_2 = arith.constant 0 : i32
    return %c0_i32, %c0_i32_0, %c0_i32_1 : i32, i32, i32
  }
  func.func @transform_14(%arg0: i32) -> (i32, i32, i32) {
    %c0_i32 = arith.constant 0 : i32
    %c0_i32_0 = arith.constant 0 : i32
    %c0_i32_1 = arith.constant 0 : i32
    %c0_i32_2 = arith.constant 0 : i32
    return %c0_i32, %c0_i32_0, %c0_i32_1 : i32, i32, i32
  }
  func.func @transform_15(%arg0: i32) -> (i32, i32, i32) {
    %c0_i32 = arith.constant 0 : i32
    %c0_i32_0 = arith.constant 0 : i32
    %c0_i32_1 = arith.constant 0 : i32
    %c0_i32_2 = arith.constant 0 : i32
    return %c0_i32, %c0_i32_0, %c0_i32_1 : i32, i32, i32
  }
  func.func @transform_16(%arg0: i32) -> (i32, i32, i32) {
    %c0_i32 = arith.constant 0 : i32
    %c0_i32_0 = arith.constant 0 : i32
    %c0_i32_1 = arith.constant 0 : i32
    %c0_i32_2 = arith.constant 0 : i32
    return %c0_i32, %c0_i32_0, %c0_i32_1 : i32, i32, i32
  }
  func.func @transform_17(%arg0: i32) -> (i32, i32, i32) {
    %c0_i32 = arith.constant 0 : i32
    %c0_i32_0 = arith.constant 0 : i32
    %c0_i32_1 = arith.constant 0 : i32
    %c0_i32_2 = arith.constant 0 : i32
    return %c0_i32, %c0_i32_0, %c0_i32_1 : i32, i32, i32
  }
  func.func @transform_18(%arg0: i32) -> (i32, i32, i32) {
    %c0_i32 = arith.constant 0 : i32
    %c0_i32_0 = arith.constant 0 : i32
    %c0_i32_1 = arith.constant 0 : i32
    %c0_i32_2 = arith.constant 0 : i32
    return %c0_i32, %c0_i32_0, %c0_i32_1 : i32, i32, i32
  }
  func.func @transform_19(%arg0: i32) -> (i32, i32, i32) {
    %c0_i32 = arith.constant 0 : i32
    %c0_i32_0 = arith.constant 0 : i32
    %c0_i32_1 = arith.constant 0 : i32
    %c0_i32_2 = arith.constant 0 : i32
    return %c0_i32, %c0_i32_0, %c0_i32_1 : i32, i32, i32
  }
  func.func @transform_20(%arg0: i32) -> (i32, i32) {
    %c0_i32 = arith.constant 0 : i32
    %c0_i32_0 = arith.constant 0 : i32
    %c0_i32_1 = arith.constant 0 : i32
    return %c0_i32, %c0_i32_0 : i32, i32
  }
  func.func @transform_21(%arg0: i32) -> (i32, i32) {
    %c0_i32 = arith.constant 0 : i32
    %c0_i32_0 = arith.constant 0 : i32
    %c0_i32_1 = arith.constant 0 : i32
    return %c0_i32, %c0_i32_0 : i32, i32
  }
  func.func @transform_22(%arg0: i32) -> (i32, i32) {
    %c0_i32 = arith.constant 0 : i32
    %c0_i32_0 = arith.constant 0 : i32
    %c0_i32_1 = arith.constant 0 : i32
    return %c0_i32, %c0_i32_0 : i32, i32
  }
  func.func @transform_23(%arg0: i32) -> (i32, i32, i32, i32) {
    %c0_i32 = arith.constant 0 : i32
    %c0_i32_0 = arith.constant 0 : i32
    %c0_i32_1 = arith.constant 0 : i32
    %c0_i32_2 = arith.constant 0 : i32
    %c0_i32_3 = arith.constant 0 : i32
    return %c0_i32, %c0_i32_0, %c0_i32_1, %c0_i32_2 : i32, i32, i32, i32
  }
}

</mosaic_0001>

<bundles_post_ra>
// kernel: tpu_custom_call.1
= control target key start
LH: loop header
LB: loop body
LE: loop exit
PB: predicated region body
PF: predicated region fallthrough
CT: control target
= control target key end

     0   :  { %s10032_s0 = inlined_call_operand.hbm [shape: f32[32,48], index: 0, kind: input, shape index: {}]   ;;  %s10033_s1 = inlined_call_operand.vmem [shape: s32[16,1], index: 1, kind: input, shape index: {}]   ;;  %s10034_s2 = inlined_call_operand.vmem [shape: f32[48,32], index: 2, kind: input, shape index: {}]   ;;  %s10035_s3 = inlined_call_operand.hbm [shape: f32[1,32], index: 3, kind: input, shape index: {}]   ;;  %s10036_s4 = inlined_call_operand.vmem [shape: f32[8,32], index: 4, kind: input, shape index: {}]   ;;  %s10037_s5 = inlined_call_operand.hbm [shape: f32[3,32], index: 5, kind: input, shape index: {}]   ;;  %s10038_s6 = inlined_call_operand.hbm [shape: f32[1,32], index: 6, kind: input, shape index: {}]   ;;  %s10039_s7 = inlined_call_operand.hbm [shape: f32[1,32], index: 7, kind: input, shape index: {}]   ;;  %s10040_s8 = inlined_call_operand.vmem [shape: f32[3,32,96], index: 8, kind: input, shape index: {}]   ;;  %s10041_s9 = inlined_call_operand.hbm [shape: f32[3,1,96], index: 9, kind: input, shape index: {}]   ;;  %s10042_s10 = inlined_call_operand.hbm [shape: f32[3,32,32], index: 10, kind: input, shape index: {}]   ;;  %s10043_s11 = inlined_call_operand.hbm [shape: f32[3,1,32], index: 11, kind: input, shape index: {}]   ;;  %s10044_s12 = inlined_call_operand.hbm [shape: f32[3,32,32], index: 12, kind: input, shape index: {}]   ;;  %s10045_s13 = inlined_call_operand.hbm [shape: f32[3,1,32], index: 13, kind: input, shape index: {}]   ;;  %s10046_s14 = inlined_call_operand.hbm [shape: f32[3,32,32], index: 14, kind: input, shape index: {}]   ;;  %s10047_s15 = inlined_call_operand.hbm [shape: f32[3,1,32], index: 15, kind: input, shape index: {}]   ;;  %s10048_s16 = inlined_call_operand.hbm [shape: f32[3,1,32], index: 16, kind: input, shape index: {}]   ;;  %s10049_s17 = inlined_call_operand.hbm [shape: f32[3,1,32], index: 17, kind: input, shape index: {}]   ;;  %s10050_s18 = inlined_call_operand.hbm [shape: f32[3,1,32], index: 18, kind: input, shape index: {}]   ;;  %s10051_s19 = inlined_call_operand.hbm [shape: f32[3,1,32], index: 19, kind: input, shape index: {}]   ;;  %s10052_s20 = inlined_call_operand.vmem [shape: f32[8,32], index: 20, kind: input, shape index: {}]   ;;  %s10053_s21 = inlined_call_operand.vmem [shape: f32[1,8], index: 21, kind: input, shape index: {}]   ;;  %s10054_s22 = inlined_call_operand.hbm [shape: f32[2,8], index: 22, kind: output, shape index: {0}]   ;;  %s10055_s23 = inlined_call_operand.hbm [shape: f32[3,2,24,24], index: 23, kind: output, shape index: {1}]  }
   0x1   :  { %10061 = sst [smem:[#allocation43_spill]] %s10032_s0 }
   0x2   :  { %10062 = sst [smem:[#allocation44_spill]] %s10033_s1 }
   0x3   :  { %10063 = sst [smem:[#allocation45_spill]] %s10034_s2 }
   0x4   :  { %10064 = sst [smem:[#allocation46_spill]] %s10035_s3 }
   0x5   :  { %10065 = sst [smem:[#allocation47_spill]] %s10036_s4 }
   0x6   :  { %10066 = sst [smem:[#allocation48_spill]] %s10037_s5 }
   0x7   :  { %10067 = sst [smem:[#allocation49_spill]] %s10038_s6 }
   0x8   :  { %10068 = sst [smem:[#allocation50_spill]] %s10039_s7 }
   0x9   :  { %10069 = sst [smem:[#allocation51_spill]] %s10054_s22 }
   0xa   :  { %29 = vsyncpa [#allocation3], 0 }
   0xb   :  { %30 = vsyncpa [#allocation6], 0 }
   0xc   :  { %31 = vsyncpa [#allocation9], 0 }
   0xd   :  { %32 = vsyncpa [#allocation12], 0 }
   0xe   :  { %33 = vsyncpa [#allocation15], 0 }
   0xf   :  { %34 = vsyncpa [#allocation18], 0 }
  0x10   :  { %35 = vsyncpa [#allocation21], 0 }
  0x11   :  { %36 = vsyncpa [#allocation24], 0 }
  0x12   :  { %37 = vsyncpa [#allocation27], 0 }
  0x13   :  { %38 = vsyncpa [#allocation4], 0  ;;  %s10070_s24 = sld [smem:[#allocation46_spill]] }
  0x19   :  { %s62_s25 = sshll.u32 %s10070_s24, 4  ;;  %s63_s25 = int_to_ptr.hbm [resolvable:$true] %s62_s25 }
  0x1a   :  { %39 = vsyncpa [#allocation30], 0  ;;  %s7211_s5 = smov [#allocation5]   ;;  %s10071_s6 = sld [smem:[#allocation49_spill]] }
  0x1b   :  { %s64_s1 = sshll.u32 %s7211_s5, 4  ;;  %s7212_s7 = smov [#allocation8]   ;;  %s65_s1 = int_to_ptr.vmem [resolvable:$true] %s64_s1 }
  0x1c   :  { %67 = dma.hbm_to_vmem [thread:$0]  %s63_s25, 16, %s65_s1, [#allocation6]  }
  0x1d   :  { %s88_s28 = sshll.u32 %s7212_s7, 4  ;;  %s109_s0 = sshll.u32 %s10041_s9, 4  ;;  %s89_s28 = int_to_ptr.vmem [resolvable:$true] %s88_s28  ;;  %s110_s0 = int_to_ptr.hbm [resolvable:$true] %s109_s0 }
  0x1e   :  { %s7213_s4 = smov [#allocation11]   ;;  %s135_s22 = sshll.u32 %s10043_s11, 4  ;;  %s136_s22 = int_to_ptr.hbm [resolvable:$true] %s135_s22 }
  0x1f   :  { %s111_s30 = sshll.u32 %s7213_s4, 4  ;;  %s7214_s26 = smov 16   ;;  %s112_s30 = int_to_ptr.vmem [resolvable:$true] %s111_s30 }
  0x20   :  { %s86_s27 = sshll.u32 %s10071_s6, 4  ;;  %s7215_s2 = smov 1   ;;  %s87_s27 = int_to_ptr.hbm [resolvable:$true] %s86_s27 }
  0x21   :  { %91 = dma.hbm_to_vmem [thread:$0]  %s87_s27, 16, %s89_s28, [#allocation9]  }
  0x22   :  { %117 = dma.hbm_to_vmem [thread:$0]  %s110_s0, 48, %s112_s30, [#allocation12], %s7214_s26, %s7214_s26, %s7215_s2  }
  0x23   :  { %s7216_s25 = smov [#allocation14]   ;;  %s161_s27 = sshll.u32 %s10045_s13, 4  ;;  %s162_s27 = int_to_ptr.hbm [resolvable:$true] %s161_s27 }
  0x24   :  { %s137_s1 = sshll.u32 %s7216_s25, 4  ;;  %s187_s28 = sshll.u32 %s10047_s15, 4  ;;  %s138_s1 = int_to_ptr.vmem [resolvable:$true] %s137_s1  ;;  %s188_s28 = int_to_ptr.hbm [resolvable:$true] %s187_s28 }
  0x25   :  { %143 = dma.hbm_to_vmem [thread:$0]  %s136_s22, 48, %s138_s1, [#allocation15], %s7214_s26, %s7214_s26, %s7215_s2  }
  0x26   :  { %s7217_s29 = smov [#allocation17]   ;;  %s7218_s0 = smov [#allocation20]  }
  0x27   :  { %s163_s3 = sshll.u32 %s7217_s29, 4  ;;  %s189_s13 = sshll.u32 %s7218_s0, 4  ;;  %s164_s3 = int_to_ptr.vmem [resolvable:$true] %s163_s3  ;;  %s190_s13 = int_to_ptr.vmem [resolvable:$true] %s189_s13 }
  0x28   :  { %169 = dma.hbm_to_vmem [thread:$0]  %s162_s27, 48, %s164_s3, [#allocation18], %s7214_s26, %s7214_s26, %s7215_s2  }
  0x29   :  { %s213_s24 = sshll.u32 %s10049_s17, 4  ;;  %s10072_s5 = sld [smem:[#allocation43_spill]]  ;;  %s214_s24 = int_to_ptr.hbm [resolvable:$true] %s213_s24 }
  0x2a   :  { %195 = dma.hbm_to_vmem [thread:$0]  %s188_s28, 48, %s190_s13, [#allocation21], %s7214_s26, %s7214_s26, %s7215_s2  }
  0x2b   :  { %s7219_s1 = smov [#allocation23]   ;;  %s7220_s6 = smov [#allocation2]  }
  0x2c   :  { %s215_s9 = sshll.u32 %s7219_s1, 4  ;;  %s46_s17 = sshll.u32 %s7220_s6, 4  ;;  %s216_s9 = int_to_ptr.vmem [resolvable:$true] %s215_s9  ;;  %s47_s17 = int_to_ptr.vmem [resolvable:$true] %s46_s17 }
  0x2d   :  { %221 = dma.hbm_to_vmem [thread:$0]  %s214_s24, 48, %s216_s9, [#allocation24], %s7214_s26, %s7214_s26, %s7215_s2  }
  0x2e   :  { %s7221_s27 = smov 128   ;;  %s7222_s11 = smov 8  }
  0x2f   :  { %s44_s25 = sshll.u32 %s10072_s5, 4  ;;  %s10073_s29 = sld [smem:[#allocation48_spill]]  ;;  %s45_s25 = int_to_ptr.hbm [resolvable:$true] %s44_s25 }
  0x30   :  { %52 = dma.hbm_to_vmem [thread:$0]  %s45_s25, 512, %s47_s17, [#allocation3], %s7221_s27, %s7221_s27, %s7222_s11  }
  0x31   :  { %s7223_s0 = smov [#allocation7]   ;;  %s10074_s24 = sld [smem:[#allocation50_spill]] }
  0x32   :  { %s77_s13 = sshll.u32 %s7223_s0, 4  ;;  %s7224_s22 = smov [#allocation10]   ;;  %s78_s13 = int_to_ptr.vmem [resolvable:$true] %s77_s13 }
  0x33   :  { %s99_s5 = sshll.u32 %s7224_s22, 4  ;;  %s122_s25 = sshll.u32 %s10042_s10, 4  ;;  %s100_s5 = int_to_ptr.vmem [resolvable:$true] %s99_s5  ;;  %s123_s25 = int_to_ptr.hbm [resolvable:$true] %s122_s25 }
  0x34   :  { %s148_s7 = sshll.u32 %s10044_s12, 4  ;;  %s7225_s28 = smov [#allocation13]   ;;  %s149_s7 = int_to_ptr.hbm [resolvable:$true] %s148_s7 }
  0x35   :  { %s75_s3 = sshll.u32 %s10073_s29, 4  ;;  %s124_s29 = sshll.u32 %s7225_s28, 4  ;;  %s76_s3 = int_to_ptr.hbm [resolvable:$true] %s75_s3  ;;  %s125_s29 = int_to_ptr.vmem [resolvable:$true] %s124_s29 }
  0x36   :  { %80 = dma.hbm_to_vmem [thread:$0]  %s76_s3, 64, %s78_s13, [#allocation6]  }
  0x37   :  { %s97_s15 = sshll.u32 %s10074_s24, 4  ;;  %s7226_s3 = smov [#allocation16]   ;;  %s98_s15 = int_to_ptr.hbm [resolvable:$true] %s97_s15 }
  0x38   :  { %102 = dma.hbm_to_vmem [thread:$0]  %s98_s15, 16, %s100_s5, [#allocation9]  }
  0x39   :  { %130 = dma.hbm_to_vmem [thread:$0]  %s123_s25, 1536, %s125_s29, [#allocation12], %s7221_s27, %s7221_s27, %s7222_s11  }
  0x3a   :  { %s150_s0 = sshll.u32 %s7226_s3, 4  ;;  %s174_s10 = sshll.u32 %s10046_s14, 4  ;;  %s151_s0 = int_to_ptr.vmem [resolvable:$true] %s150_s0  ;;  %s175_s10 = int_to_ptr.hbm [resolvable:$true] %s174_s10 }
  0x3b   :  { %156 = dma.hbm_to_vmem [thread:$0]  %s149_s7, 1536, %s151_s0, [#allocation15], %s7221_s27, %s7221_s27, %s7222_s11  }
  0x3c   :  { %s200_s24 = sshll.u32 %s10048_s16, 4  ;;  %s7227_s15 = smov [#allocation19]   ;;  %s201_s24 = int_to_ptr.hbm [resolvable:$true] %s200_s24 }
  0x3d   :  { %s176_s22 = sshll.u32 %s7227_s15, 4  ;;  %s7228_s5 = smov [#allocation22]   ;;  %s177_s22 = int_to_ptr.vmem [resolvable:$true] %s176_s22 }
  0x3e   :  { %182 = dma.hbm_to_vmem [thread:$0]  %s175_s10, 1536, %s177_s22, [#allocation18], %s7221_s27, %s7221_s27, %s7222_s11  }
  0x3f   :  { %s202_s14 = sshll.u32 %s7228_s5, 4  ;;  %s226_s25 = sshll.u32 %s10050_s18, 4  ;;  %s203_s14 = int_to_ptr.vmem [resolvable:$true] %s202_s14  ;;  %s227_s25 = int_to_ptr.hbm [resolvable:$true] %s226_s25 }
  0x40   :  { %208 = dma.hbm_to_vmem [thread:$0]  %s201_s24, 48, %s203_s14, [#allocation21], %s7214_s26, %s7214_s26, %s7215_s2  }
  0x41   :  { %s239_s17 = sshll.u32 %s10051_s19, 4  ;;  %s7229_s7 = smov [#allocation25]   ;;  %s240_s17 = int_to_ptr.hbm [resolvable:$true] %s239_s17 }
  0x42   :  { %s228_s28 = sshll.u32 %s7229_s7, 4  ;;  %s7230_s29 = smov [#allocation26]   ;;  %s229_s28 = int_to_ptr.vmem [resolvable:$true] %s228_s28 }
  0x43   :  { %234 = dma.hbm_to_vmem [thread:$0]  %s227_s25, 48, %s229_s28, [#allocation24], %s7214_s26, %s7214_s26, %s7215_s2  }
  0x44   :  { %s241_s18 = sshll.u32 %s7230_s29, 4  ;;  %s242_s18 = int_to_ptr.vmem [resolvable:$true] %s241_s18 }
  0x45   :  { %247 = dma.hbm_to_vmem [thread:$0]  %s240_s17, 48, %s242_s18, [#allocation27], %s7214_s26, %s7214_s26, %s7215_s2  }
  0x46   :  { %7189 = dma.done.wait [#allocation3], 512  }
  0x47   :  { %7190 = vsyncadd [#allocation3], 4294966784 }
  0x48   :  { %7191 = dma.done.wait [#allocation6], 80  }
  0x49   :  { %7192 = vsyncadd [#allocation6], 4294967216 }
  0x4a   :  { %7193 = dma.done.wait [#allocation9], 32  }
  0x4b   :  { %7194 = vsyncadd [#allocation9], 4294967264 }
  0x4c   :  { %7195 = dma.done.wait [#allocation12], 1584  }
  0x4d   :  { %7196 = vsyncadd [#allocation12], 4294965712 }
  0x4e   :  { %7197 = dma.done.wait [#allocation15], 1584  }
  0x4f   :  { %7198 = vsyncadd [#allocation15], 4294965712 }
  0x50   :  { %7199 = dma.done.wait [#allocation18], 1584  }
  0x51   :  { %7200 = vsyncadd [#allocation18], 4294965712 }
  0x52   :  { %7201 = dma.done.wait [#allocation21], 96  }
  0x53   :  { %7202 = vsyncadd [#allocation21], 4294967200 }
  0x54   :  { %7203 = dma.done.wait [#allocation24], 96  }
  0x55   :  { %7204 = vsyncadd [#allocation24], 4294967200 }
  0x56   :  { %7205 = dma.done.wait [#allocation27], 48  }
  0x57   :  { %7206 = vsyncadd [#allocation27], 4294967248  ;;  %v7231_v0 = vmov 0   ;;  %s10075_s3 = sld [smem:[#allocation44_spill]]  ;;  %vm330_vm0 = vcmask 392192   ;;  %v316_v9 = vld [vmem:[#allocation2] sm:$0xff]  ;;  %v10058_v14 = vlaneseq }
  0x58   :  { %6180 = vset.pattern.permute.xlu0 %v7231_v0  ;;  %6362 = vset.pattern.permute.xlu2 %v7231_v0  ;;  %s10076_s4 = sld [smem:[#allocation45_spill]]  ;;  %v317_v10 = vld [vmem:[#allocation2 + $0x8] sm:$0xff]  ;;  %v388_v11 = vld [vmem:[#allocation7] sm:$0x7]  ;;  %vm396_vm1 = vcmask 1042432   ;;  %v318_v12 = vld [vmem:[#allocation2 + $0x10] sm:$0xff] }
  0x59   :  { %5846 = vmatpush.msk.msra.mxu1 %vm396_vm1, %v388_v11  ;;  %v319_v13 = vld [vmem:[#allocation2 + $0x18] sm:$0xff]  ;;  %v7475_v15 = vand.u32 127, %v10058_v14  ;;  %vm389_vm2 = vcmask 23552   ;;  %v7232_v17 = vmov 0.0   ;;  %v6363_v21 = vld [vmem:[#allocation5] ss:$0 sm:$0xff] }
  0x5a   :  { %vm428_vm5 = vcmask 261120   ;;  %v7233_v28 = vmov 32.0   ;;  %s10078_s7 = sld [smem:[#allocation47_spill]]  ;;  %v589_v62 = vld [vmem:[%s10040_s8 + $0x18] sm:$0xff]  ;;  %s7235_s10 = smov 96  }
  0x5b   :  { %10077 = vst [vmem:[#allocation42_spill] sm:$0xff] %v7475_v15  ;;  %6391 = vrcp.f32 %v7233_v28  ;;  %624 = vmatpush.msra.mxu2 %v589_v62  ;;  %6145 = vmatpush.msra.mxu3 %v589_v62  ;;  %s7236_s12 = smov 112   ;;  %s7237_s30 = smov 104  }
  0x5c   :  { %s7238_s24 = smov 64   ;;  %s7239_s15 = smov 24  }
  0x5d   :  { %v372_v1 = vld [vmem:[%s10075_s3] sm:$0xff]  ;;  %v373_v6 = vld [vmem:[%s10075_s3 + $0x8] sm:$0xff]  ;;  %s10080_s5 = sld [smem:[#allocation51_spill]] }
  0x5e   :  { %v325_v2 = vld [vmem:[%s10076_s4 + $0x28] sm:$0xff]  ;;  %v324_v3 = vld [vmem:[%s10076_s4 + $0x20] sm:$0xff]  ;;  %377 = vperm.xlu0 %6180, %v372_v1   ;;  %v323_v4 = vld [vmem:[%s10076_s4 + $0x18] sm:$0xff] }
  0x5f   :  { %353 = vmatpush.msra.mxu0 %v325_v2  ;;  %v322_v5 = vld [vmem:[%s10076_s4 + $0x10] sm:$0xff]  ;;  %v321_v7 = vld [vmem:[%s10076_s4 + $0x8] sm:$0xff]  ;;  %v320_v8 = vld [vmem:[%s10076_s4] sm:$0xff]  ;;  %s7234_s4 = smov 120  }
  0x60   :  { %v423_v31 = vld [vmem:[%s10078_s7] sm:$0xff]  ;;  %v588_v2 = vld [vmem:[%s10040_s8 + $0x10] sm:$0xff] }
  0x61   :  { %354 = vmatpush.msra.mxu0 %v324_v3  ;;  %v6392_v29 = vpop.eup %6391  ;;  %625 = vmatpush.msra.mxu2 %v588_v2 }
  0x62   :  { %v448_v30 = vmul.f32 32.0, %v6392_v29  ;;  %vm452_vm6 = vweird.f32 %v6392_v29  ;;  %6146 = vmatpush.msra.mxu3 %v588_v2 }
  0x63   :  { %355 = vmatpush.msra.mxu0 %v323_v4  ;;  %s5804_s14 = sshll.u32 %s10080_s5, 4  ;;  %s5805_s14 = int_to_ptr.hbm [resolvable:$true] %s5804_s14 }
  0x64   :  { %v449_v32 = vsub.f32 1.0, %v448_v30 }
  0x65   :  { %356 = vmatpush.msra.mxu0 %v322_v5  ;;  %v587_v5 = vld [vmem:[%s10040_s8 + $0x8] sm:$0xff] }
  0x66   :  { %380 = vperm.xlu0 %6180, %v373_v6   ;;  %v450_v37 = vmul.f32 %v6392_v29, %v449_v32  ;;  %626 = vmatpush.msra.mxu2 %v587_v5 }
  0x67   :  { %357 = vmatpush.msra.mxu0 %v321_v7  ;;  %6147 = vmatpush.msra.mxu3 %v587_v5 }
  0x68   :  { %v451_v39 = vadd.f32 %v6392_v29, %v450_v37 }
  0x69   :  { %358 = vmatpush.msra.mxu0 %v320_v8  ;;  %v586_v8 = vld [vmem:[%s10040_s8] sm:$0xff] }
  0x6a   :  { %5840 = vmatmul.msk.f32.vlgmr.msra.gmra.mxu0 %vm330_vm0, %v316_v9  ;;  %v7487_v45 = vsel %vm452_vm6, %v6392_v29, %v451_v39  ;;  %627 = vmatpush.msra.mxu2 %v586_v8 }
  0x6b   :  { %6148 = vmatpush.msra.mxu3 %v586_v8 }
  0x72   :  { %5841 = vmatmul.msk.f32.gmra.mxu0 %vm330_vm0, %v317_v10 }
  0x7a   :  { %5842 = vmatmul.msk.f32.gmra.mxu0 %vm330_vm0, %v318_v12 }
  0x82   :  { %5843 = vmatmul.msk.f32.gmra.mxu0 %vm330_vm0, %v319_v13 }
  0xd0   :  { %v378_v16 = vpop.permute.xlu0 %377 }
  0xd1   :  { %vm382_vm3 = vcmp.eq.s32.totalorder %v378_v16, %v7475_v15 }
  0xd2   :  { %v5844_v18 = vsel %vm382_vm3, 1.0, %v7232_v17 }
  0xd3   :  { %5847 = vmatmul.msk.f32.vlgmr.msra.gmra.mxu1 %vm389_vm2, %v5844_v18 }
  0xd8   :  { %v381_v19 = vpop.permute.xlu0 %380 }
  0xd9   :  { %vm383_vm4 = vcmp.eq.s32.totalorder %v381_v19, %v7475_v15 }
  0xda   :  { %v5845_v20 = vsel %vm383_vm4, 1.0, %v7232_v17 }
  0xdb   :  { %5848 = vmatmul.msk.f32.gmra.mxu1 %vm389_vm2, %v5845_v20 }
  0xe7   :  { %v360_v22 = vpop.f32.mrf.mxu0 }
  0xe8   :  { %v361_v23 = vadd.f32 %v6363_v21, %v360_v22 }
  0xea   :  { %v429_v24 = vsel %vm428_vm5, %v361_v23, 0.0 }
  0xeb   :  { %430 = vadd.xlane.f32.xlu1 %v429_v24 }
  0xef   :  { %v363_v25 = vpop.f32.mrf.mxu0 }
  0xf0   :  { %v364_v26 = vadd.f32 %v6363_v21, %v363_v25 }
  0xf2   :  { %v432_v27 = vsel %vm428_vm5, %v364_v26, 0.0 }
  0xf3   :  { %433 = vadd.xlane.f32.xlu1 %v432_v27 }
  0xf7   :  { %v366_v34 = vpop.f32.mrf.mxu0 }
  0xf8   :  { %v367_v38 = vadd.f32 %v6363_v21, %v366_v34  ;;  %v7540_v34 = vld [vmem:[#allocation8] ss:$0 sm:$0xff] }
  0xfa   :  { %v438_v42 = vsel %vm428_vm5, %v367_v38, 0.0 }
  0xff   :  { %v369_v43 = vpop.f32.mrf.mxu0 }
 0x100   :  { %v370_v47 = vadd.f32 %v6363_v21, %v369_v43 }
 0x102   :  { %v441_v50 = vsel %vm428_vm5, %v370_v47, 0.0 }
 0x150   :  { %v417_v33 = vpop.f32.mrf.mxu1 }
 0x151   :  { %v424_v35 = vadd.f32 %v423_v31, %v417_v33 }
 0x153   :  { %v435_v36 = vsel %vm428_vm5, %v424_v35, 0.0 }
 0x154   :  { %436 = vadd.xlane.f32.xlu2 %v435_v36 }
 0x158   :  { %v420_v40 = vpop.f32.mrf.mxu1 }
 0x159   :  { %v425_v41 = vadd.f32 %v423_v31, %v420_v40 }
 0x15b   :  { %v444_v44 = vsel %vm428_vm5, %v425_v41, 0.0 }
 0x15c   :  { %439 = vadd.xlane.f32.xlu2 %v438_v42  ;;  %445 = vadd.xlane.f32.xlu1 %v444_v44 }
 0x15e   :  { %v431_v46 = vpop.xlane.xlu1 %430 }
 0x15f   :  { %v454_v48 = vmul.f32 %v7487_v45, %v431_v46 }
 0x161   :  { %v7490_v49 = vsub.f32 %v361_v23, %v454_v48 }
 0x163   :  { %v466_v51 = vmul.f32 %v7490_v49, %v7490_v49 }
 0x164   :  { %442 = vadd.xlane.f32.xlu2 %v441_v50 }
 0x165   :  { %v472_v52 = vsel %vm428_vm5, %v466_v51, 0.0 }
 0x166   :  { %473 = vadd.xlane.f32.xlu0 %v472_v52  ;;  %v434_v53 = vpop.xlane.xlu1 %433 }
 0x167   :  { %v455_v54 = vmul.f32 %v7487_v45, %v434_v53 }
 0x169   :  { %v7497_v55 = vsub.f32 %v364_v26, %v455_v54 }
 0x16b   :  { %v467_v56 = vmul.f32 %v7497_v55, %v7497_v55 }
 0x16d   :  { %v475_v57 = vsel %vm428_vm5, %v467_v56, 0.0 }
 0x16e   :  { %476 = vadd.xlane.f32.xlu1 %v475_v57 }
 0x1c7   :  { %v437_v58 = vpop.xlane.xlu2 %436 }
 0x1c8   :  { %v456_v59 = vmul.f32 %v7487_v45, %v437_v58 }
 0x1ca   :  { %v7503_v60 = vsub.f32 %v424_v35, %v456_v59 }
 0x1cc   :  { %v468_v61 = vmul.f32 %v7503_v60, %v7503_v60 }
 0x1ce   :  { %v478_v63 = vsel %vm428_vm5, %v468_v61, 0.0 }
 0x1cf   :  { %479 = vadd.xlane.f32.xlu2 %v478_v63  ;;  %v440_v0 = vpop.xlane.xlu2 %439  ;;  %v446_v1 = vpop.xlane.xlu1 %445 }
 0x1d0   :  { %v457_v3 = vmul.f32 %v7487_v45, %v440_v0  ;;  %v459_v4 = vmul.f32 %v7487_v45, %v446_v1 }
 0x1d2   :  { %v7519_v6 = vsub.f32 %v367_v38, %v457_v3  ;;  %v7521_v7 = vsub.f32 %v425_v41, %v459_v4  ;;  %v7543_v38 = vld [vmem:[#allocation10] ss:$0 sm:$0xff] }
 0x1d4   :  { %v469_v9 = vmul.f32 %v7519_v6, %v7519_v6  ;;  %v471_v10 = vmul.f32 %v7521_v7, %v7521_v7 }
 0x1d6   :  { %v481_v11 = vsel %vm428_vm5, %v469_v9, 0.0  ;;  %v487_v12 = vsel %vm428_vm5, %v471_v10, 0.0 }
 0x1d7   :  { %v443_v13 = vpop.xlane.xlu2 %442  ;;  %482 = vadd.xlane.f32.xlu1 %v481_v11  ;;  %488 = vadd.xlane.f32.xlu2 %v487_v12 }
 0x1d8   :  { %v458_v16 = vmul.f32 %v7487_v45, %v443_v13 }
 0x1d9   :  { %v474_v17 = vpop.xlane.xlu0 %473 }
 0x1da   :  { %v490_v18 = vmul.f32 %v474_v17, %v7487_v45  ;;  %v7534_v19 = vsub.f32 %v370_v47, %v458_v16 }
 0x1dc   :  { %v496_v20 = vadd.f32 1e-05, %v490_v18  ;;  %v470_v21 = vmul.f32 %v7534_v19, %v7534_v19 }
 0x1de   :  { %6393 = vrsqrt.f32 %v496_v20  ;;  %v484_v22 = vsel %vm428_vm5, %v470_v21, 0.0  ;;  %vm508_vm8 = vweird.f32 %v496_v20 }
 0x1df   :  { %485 = vadd.xlane.f32.xlu1 %v484_v22 }
 0x1e1   :  { %v477_v23 = vpop.xlane.xlu1 %476 }
 0x1e2   :  { %v491_v24 = vmul.f32 %v477_v23, %v7487_v45 }
 0x1e4   :  { %v6394_v25 = vpop.eup %6393  ;;  %v497_v26 = vadd.f32 1e-05, %v491_v24 }
 0x1e5   :  { %v503_v27 = vmul.f32 %v6394_v25, %v496_v20  ;;  %vm509_vm7 = vweird.f32 %v6394_v25 }
 0x1e6   :  { %6395 = vrsqrt.f32 %v497_v26  ;;  %vm510_vm9 = vmor %vm508_vm8, %vm509_vm7  ;;  %vm518_vm11 = vweird.f32 %v497_v26 }
 0x1e7   :  { %v504_v28 = vmul.f32 %v6394_v25, %v503_v27 }
 0x1e9   :  { %v505_v29 = vmul.f32 0.5, %v504_v28 }
 0x1eb   :  { %v506_v30 = vsub.f32 1.5, %v505_v29 }
 0x1ec   :  { %v6396_v31 = vpop.eup %6395 }
 0x1ed   :  { %v507_v32 = vmul.f32 %v6394_v25, %v506_v30  ;;  %v513_v33 = vmul.f32 %v6396_v31, %v497_v26  ;;  %vm519_vm10 = vweird.f32 %v6396_v31 }
 0x1ee   :  { %vm520_vm12 = vmor %vm518_vm11, %vm519_vm10  ;;  %vm743_vm10 = vcmask 64512   ;;  %vm1090_vm11 = vcmask 195584  }
 0x1ef   :  { %v514_v35 = vmul.f32 %v6396_v31, %v513_v33  ;;  %v511_v36 = vsel %vm510_vm9, %v6394_v25, %v507_v32 }
 0x1f0   :  { %v562_v37 = vmul.f32 %v511_v36, %v7490_v49 }
 0x1f1   :  { %v515_v39 = vmul.f32 0.5, %v514_v35 }
 0x1f2   :  { %v571_v40 = vmul.f32 %v7540_v34, %v562_v37 }
 0x1f3   :  { %v516_v41 = vsub.f32 1.5, %v515_v39 }
 0x1f4   :  { %v7547_v42 = vadd.f32 %v7543_v38, %v571_v40 }
 0x1f5   :  { %v517_v43 = vmul.f32 %v6396_v31, %v516_v41 }
 0x1f6   :  { %5849 = vmatmul.msk.f32.vlgmr.msra.gmra.mxu2 %vm428_vm5, %v7547_v42 }
 0x1f7   :  { %v521_v44 = vsel %vm520_vm12, %v6396_v31, %v517_v43  ;;  %v6366_v43 = vld [vmem:[#allocation11] ss:$0 sm:$0xff]  ;;  %vm1782_vm12 = vcmask 130048  }
 0x1f8   :  { %v563_v46 = vmul.f32 %v521_v44, %v7497_v55 }
 0x1fa   :  { %v572_v47 = vmul.f32 %v7540_v34, %v563_v46 }
 0x1fc   :  { %v7554_v48 = vadd.f32 %v7543_v38, %v572_v47 }
 0x1fe   :  { %5850 = vmatmul.msk.f32.gmra.mxu2 %vm428_vm5, %v7554_v48 }
 0x242   :  { %v480_v49 = vpop.xlane.xlu2 %479 }
 0x243   :  { %v492_v50 = vmul.f32 %v480_v49, %v7487_v45 }
 0x245   :  { %v498_v51 = vadd.f32 1e-05, %v492_v50 }
 0x247   :  { %6397 = vrsqrt.f32 %v498_v51  ;;  %vm528_vm14 = vweird.f32 %v498_v51 }
 0x24a   :  { %v489_v52 = vpop.xlane.xlu2 %488  ;;  %v483_v53 = vpop.xlane.xlu1 %482 }
 0x24b   :  { %v495_v54 = vmul.f32 %v489_v52, %v7487_v45  ;;  %v493_v56 = vmul.f32 %v483_v53, %v7487_v45 }
 0x24d   :  { %v6398_v55 = vpop.eup %6397  ;;  %v501_v57 = vadd.f32 1e-05, %v495_v54  ;;  %v499_v58 = vadd.f32 1e-05, %v493_v56 }
 0x24e   :  { %v523_v59 = vmul.f32 %v6398_v55, %v498_v51  ;;  %vm529_vm13 = vweird.f32 %v6398_v55 }
 0x24f   :  { %6399 = vrsqrt.f32 %v501_v57  ;;  %vm530_vm15 = vmor %vm528_vm14, %vm529_vm13  ;;  %vm558_vm2 = vweird.f32 %v501_v57  ;;  %vm538_vm4 = vweird.f32 %v499_v58 }
 0x250   :  { %v524_v61 = vmul.f32 %v6398_v55, %v523_v59  ;;  %6401 = vrsqrt.f32 %v499_v58 }
 0x252   :  { %v525_v62 = vmul.f32 0.5, %v524_v61  ;;  %v486_v63 = vpop.xlane.xlu1 %485 }
 0x253   :  { %v494_v0 = vmul.f32 %v486_v63, %v7487_v45 }
 0x254   :  { %v526_v1 = vsub.f32 1.5, %v525_v62 }
 0x255   :  { %v6400_v2 = vpop.eup %6399  ;;  %v500_v3 = vadd.f32 1e-05, %v494_v0 }
 0x256   :  { %v6402_v4 = vpop.eup %6401  ;;  %v527_v5 = vmul.f32 %v6398_v55, %v526_v1  ;;  %v553_v8 = vmul.f32 %v6400_v2, %v501_v57  ;;  %vm559_vm0 = vweird.f32 %v6400_v2 }
 0x257   :  { %v533_v9 = vmul.f32 %v6402_v4, %v499_v58  ;;  %6403 = vrsqrt.f32 %v500_v3  ;;  %vm539_vm1 = vweird.f32 %v6402_v4  ;;  %vm560_vm3 = vmor %vm558_vm2, %vm559_vm0  ;;  %vm548_vm8 = vweird.f32 %v500_v3 }
 0x258   :  { %v554_v10 = vmul.f32 %v6400_v2, %v553_v8  ;;  %v531_v11 = vsel %vm530_vm15, %v6398_v55, %v527_v5  ;;  %vm540_vm6 = vmor %vm538_vm4, %vm539_vm1 }
 0x259   :  { %v534_v12 = vmul.f32 %v6402_v4, %v533_v9  ;;  %v564_v13 = vmul.f32 %v531_v11, %v7503_v60 }
 0x25a   :  { %v555_v16 = vmul.f32 0.5, %v554_v10 }
 0x25b   :  { %v535_v17 = vmul.f32 0.5, %v534_v12  ;;  %v573_v18 = vmul.f32 %v7540_v34, %v564_v13 }
 0x25c   :  { %v556_v20 = vsub.f32 1.5, %v555_v16 }
 0x25d   :  { %v6404_v21 = vpop.eup %6403  ;;  %v536_v22 = vsub.f32 1.5, %v535_v17  ;;  %v7565_v23 = vadd.f32 %v7543_v38, %v573_v18 }
 0x25e   :  { %v557_v24 = vmul.f32 %v6400_v2, %v556_v20  ;;  %v543_v25 = vmul.f32 %v6404_v21, %v500_v3  ;;  %vm549_vm7 = vweird.f32 %v6404_v21 }
 0x25f   :  { %v537_v26 = vmul.f32 %v6402_v4, %v536_v22  ;;  %5851 = vmatmul.msk.f32.gmra.mxu2 %vm428_vm5, %v7565_v23  ;;  %vm550_vm9 = vmor %vm548_vm8, %vm549_vm7 }
 0x260   :  { %v544_v60 = vmul.f32 %v6404_v21, %v543_v25  ;;  %v561_v27 = vsel %vm560_vm3, %v6400_v2, %v557_v24 }
 0x261   :  { %v541_v28 = vsel %vm540_vm6, %v6402_v4, %v537_v26  ;;  %v567_v29 = vmul.f32 %v561_v27, %v7521_v7 }
 0x262   :  { %v545_v30 = vmul.f32 0.5, %v544_v60  ;;  %v565_v31 = vmul.f32 %v541_v28, %v7519_v6 }
 0x263   :  { %v576_v32 = vmul.f32 %v7540_v34, %v567_v29 }
 0x264   :  { %v546_v33 = vsub.f32 1.5, %v545_v30  ;;  %v574_v35 = vmul.f32 %v7540_v34, %v565_v31 }
 0x265   :  { %v7574_v36 = vadd.f32 %v7543_v38, %v576_v32 }
 0x266   :  { %v547_v37 = vmul.f32 %v6404_v21, %v546_v33  ;;  %v7577_v39 = vadd.f32 %v7543_v38, %v574_v35 }
 0x267   :  { %5854 = vmatmul.msk.f32.vlgmr.msra.gmra.mxu3 %vm428_vm5, %v7574_v36 }
 0x268   :  { %5852 = vmatmul.msk.f32.gmra.mxu2 %vm428_vm5, %v7577_v39  ;;  %v551_v6 = vsel %vm550_vm9, %v6404_v21, %v547_v37 }
 0x269   :  { %v566_v7 = vmul.f32 %v551_v6, %v7534_v19 }
 0x26b   :  { %v575_v40 = vmul.f32 %v7540_v34, %v566_v7 }
 0x26d   :  { %v7586_v41 = vadd.f32 %v7543_v38, %v575_v40 }
 0x270   :  { %5853 = vmatmul.msk.f32.gmra.mxu2 %vm428_vm5, %v7586_v41 }
 0x279   :  { %v629_v44 = vpop.f32.mrf.mxu2 }
 0x27a   :  { %v7590_v46 = vadd.f32 %v6366_v43, %v629_v44 }
 0x27c   :  { %698 = vrot.lane.b32.xlu0 %v7590_v46, %s7234_s4  ;;  %737 = vrot.lane.b32.xlu1 %v7590_v46, %s7235_s10  ;;  %v7597_v19 = vmul.f32 0.35355338, %v7590_v46 }
 0x27e   :  { %656 = vrot.lane.b32.xlu2 %v7597_v19, %s7234_s4 }
 0x281   :  { %v632_v34 = vpop.f32.mrf.mxu2 }
 0x282   :  { %v7601_v38 = vadd.f32 %v6366_v43, %v632_v34 }
 0x284   :  { %704 = vrot.lane.b32.xlu0 %v7590_v46, %s7236_s12  ;;  %710 = vrot.lane.b32.xlu1 %v7590_v46, %s7237_s30  ;;  %v7610_v47 = vmul.f32 0.35355338, %v7601_v38 }
 0x286   :  { %706 = vrot.lane.b32.xlu2 %v7601_v38, %s7236_s12 }
 0x28c   :  { %662 = vrot.lane.b32.xlu1 %v7597_v19, %s7236_s12  ;;  %658 = vrot.lane.b32.xlu0 %v7610_v47, %s7234_s4 }
 0x28e   :  { %739 = vrot.lane.b32.xlu2 %v7601_v38, %s7235_s10 }
 0x294   :  { %700 = vrot.lane.b32.xlu1 %v7601_v38, %s7234_s4 }
 0x296   :  { %712 = vrot.lane.b32.xlu2 %v7601_v38, %s7237_s30 }
 0x2d8   :  { %v7640_v55 = vpop.permute.xlu2 %656 }
 0x2e0   :  { %v7652_v59 = vpop.permute.xlu2 %706 }
 0x2e2   :  { %v635_v49 = vpop.f32.mrf.mxu2 }
 0x2e3   :  { %v7622_v50 = vadd.f32 %v6366_v43, %v635_v49 }
 0x2e5   :  { %702 = vrot.lane.b32.xlu2 %v7622_v50, %s7234_s4  ;;  %741 = vrot.lane.b32.xlu1 %v7622_v50, %s7235_s10  ;;  %v649_v4 = vmul.f32 0.35355338, %v7622_v50 }
 0x2e6   :  { %714 = vrot.lane.b32.xlu0 %v7622_v50, %s7237_s30 }
 0x2e8   :  { %v740_v0 = vpop.permute.xlu2 %739 }
 0x2ea   :  { %v644_v51 = vpop.f32.mrf.mxu3 }
 0x2eb   :  { %v638_v52 = vpop.f32.mrf.mxu2  ;;  %v7630_v53 = vadd.f32 %v6366_v43, %v644_v51 }
 0x2ec   :  { %v7632_v54 = vadd.f32 %v6366_v43, %v638_v52 }
 0x2ed   :  { %708 = vrot.lane.b32.xlu2 %v7622_v50, %s7236_s12  ;;  %v7742_v27 = vmul.f32 0.35355338, %v7630_v53 }
 0x2ee   :  { %v738_v56 = vpop.permute.xlu1 %737  ;;  %723 = vrot.lane.b32.xlu0 %v7630_v53, %s7234_s4  ;;  %719 = vrot.lane.b32.xlu1 %v7632_v54, %s7234_s4  ;;  %v7642_v57 = vpop.permute.xlu0 %698  ;;  %v7687_v5 = vmul.f32 0.35355338, %v7632_v54 }
 0x2f0   :  { %v7674_v3 = vpop.permute.xlu2 %712 }
 0x2f3   :  { %v641_v63 = vpop.f32.mrf.mxu2 }
 0x2f4   :  { %v7664_v1 = vadd.f32 %v6366_v43, %v641_v63 }
 0x2f5   :  { %729 = vrot.lane.b32.xlu2 %v7630_v53, %s7236_s12 }
 0x2f6   :  { %v7646_v58 = vpop.permute.xlu1 %710  ;;  %725 = vrot.lane.b32.xlu0 %v7632_v54, %s7236_s12  ;;  %731 = vrot.lane.b32.xlu1 %v7632_v54, %s7237_s30  ;;  %v7654_v61 = vpop.permute.xlu0 %704  ;;  %v7735_v24 = vmul.f32 0.35355338, %v7664_v1 }
 0x2f7   :  { %v6191_v35 = vpack.i.bf16 %v7654_v61, %v7642_v57 }
 0x2fd   :  { %826 = vrot.lane.b32.xlu2 %v7654_v61, %s7235_s10 }
 0x2fe   :  { %v7658_v62 = vpop.permute.xlu1 %662  ;;  %735 = vrot.lane.b32.xlu0 %v7630_v53, %s7237_s30  ;;  %782 = vrot.lane.b32.xlu1 %v7642_v57, %s7235_s10  ;;  %v7706_v10 = vpop.permute.xlu0 %658 }
 0x306   :  { %v7666_v2 = vpop.permute.xlu1 %700  ;;  %727 = vrot.lane.b32.xlu0 %v7664_v1, %s7236_s12  ;;  %721 = vrot.lane.b32.xlu1 %v7664_v1, %s7234_s4 }
 0x307   :  { %784 = vrot.lane.b32.xlu2 %v7666_v2, %s7235_s10  ;;  %v6186_v31 = vpack.i.bf16 %v7652_v59, %v7666_v2 }
 0x30e   :  { %733 = vrot.lane.b32.xlu0 %v7664_v1, %s7237_s30  ;;  %872 = vrot.lane.b32.xlu1 %v7674_v3, %s7235_s10 }
 0x30f   :  { %828 = vrot.lane.b32.xlu2 %v7652_v59, %s7235_s10 }
 0x316   :  { %664 = vrot.lane.b32.xlu0 %v7610_v47, %s7236_s12  ;;  %666 = vrot.lane.b32.xlu1 %v649_v4, %s7236_s12 }
 0x31e   :  { %668 = vrot.lane.b32.xlu0 %v7597_v19, %s7237_s30  ;;  %677 = vrot.lane.b32.xlu1 %v7687_v5, %s7234_s4 }
 0x326   :  { %670 = vrot.lane.b32.xlu0 %v7610_v47, %s7237_s30 }
 0x32e   :  { %683 = vrot.lane.b32.xlu0 %v7687_v5, %s7236_s12 }
 0x33f   :  { %v7697_v8 = vpop.permute.xlu2 %702 }
 0x340   :  { %786 = vrot.lane.b32.xlu2 %v7697_v8, %s7235_s10 }
 0x347   :  { %v7701_v9 = vpop.permute.xlu2 %708 }
 0x348   :  { %830 = vrot.lane.b32.xlu1 %v7701_v9, %s7235_s10  ;;  %660 = vrot.lane.b32.xlu2 %v649_v4, %s7234_s4  ;;  %v6181_v7 = vpack.i.bf16 %v7701_v9, %v7697_v8 }
 0x34f   :  { %v7710_v11 = vpop.permute.xlu2 %729 }
 0x350   :  { %870 = vrot.lane.b32.xlu2 %v7646_v58, %s7235_s10 }
 0x357   :  { %v742_v12 = vpop.permute.xlu1 %741  ;;  %v827_v60 = vpop.permute.xlu2 %826 }
 0x358   :  { %v715_v13 = vpop.permute.xlu0 %714  ;;  %1006 = vrot.lane.b32.xlu2 %v7710_v11, %s7235_s10  ;;  %5855 = vmatpush.xpose.msk.msrb.mxu1 %vm743_vm10, %v742_v12 }
 0x359   :  { %874 = vrot.lane.b32.xlu0 %v715_v13, %s7235_s10  ;;  %v6196_v37 = vpack.i.bf16 %v7674_v3, %v715_v13 }
 0x35c   :  { %5856 = vmatpush.xpose.msk.msrb.mxu1 %vm743_vm10, %v740_v0 }
 0x360   :  { %v724_v16 = vpop.permute.xlu0 %723  ;;  %v720_v17 = vpop.permute.xlu1 %719  ;;  %5857 = vmatpush.xpose.msk.msrb.mxu1 %vm743_vm10, %v738_v56 }
 0x361   :  { %962 = vrot.lane.b32.xlu1 %v724_v16, %s7235_s10  ;;  %v785_v28 = vpop.permute.xlu2 %784  ;;  %v6201_v40 = vpack.i.bf16 %v724_v16, %v7646_v58 }
 0x363   :  { %5858 = vmatmul.msk.f32.vlgmr.msrb.gmra.mxu1 %vm743_vm10, %v7597_v19 }
 0x368   :  { %v7721_v18 = vpop.permute.xlu0 %725  ;;  %v7723_v20 = vpop.permute.xlu1 %731 }
 0x369   :  { %1002 = vrot.lane.b32.xlu2 %v7721_v18, %s7235_s10  ;;  %958 = vrot.lane.b32.xlu1 %v720_v17, %s7235_s10  ;;  %v829_v30 = vpop.permute.xlu2 %828 }
 0x36b   :  { %5859 = vmatmul.msk.f32.gmra.mxu1 %vm743_vm10, %v7610_v47 }
 0x370   :  { %v7730_v21 = vpop.permute.xlu0 %735  ;;  %v783_v22 = vpop.permute.xlu1 %782 }
 0x371   :  { %672 = vrot.lane.b32.xlu1 %v649_v4, %s7237_s30 }
 0x373   :  { %5860 = vmatmul.msk.f32.gmra.mxu1 %vm743_vm10, %v649_v4 }
 0x378   :  { %v728_v25 = vpop.permute.xlu0 %727  ;;  %v722_v26 = vpop.permute.xlu1 %721 }
 0x379   :  { %1004 = vrot.lane.b32.xlu2 %v728_v25, %s7235_s10  ;;  %685 = vrot.lane.b32.xlu1 %v7735_v24, %s7236_s12  ;;  %v6206_v43 = vpack.i.bf16 %v722_v26, %v7710_v11  ;;  %v6211_v19 = vpack.i.bf16 %v720_v17, %v728_v25 }
 0x37a   :  { %960 = vrot.lane.b32.xlu0 %v722_v26, %s7235_s10 }
 0x380   :  { %v7756_v29 = vpop.permute.xlu0 %733  ;;  %v873_v33 = vpop.permute.xlu1 %872 }
 0x381   :  { %1050 = vrot.lane.b32.xlu2 %v7730_v21, %s7235_s10  ;;  %681 = vrot.lane.b32.xlu1 %v7742_v27, %s7234_s4 }
 0x382   :  { %1046 = vrot.lane.b32.xlu0 %v7723_v20, %s7235_s10 }
 0x388   :  { %v665_v6 = vpop.permute.xlu0 %664  ;;  %v667_v44 = vpop.permute.xlu1 %666 }
 0x389   :  { %679 = vrot.lane.b32.xlu2 %v7735_v24, %s7234_s4  ;;  %693 = vrot.lane.b32.xlu1 %v7742_v27, %s7237_s30 }
 0x38a   :  { %687 = vrot.lane.b32.xlu0 %v7742_v27, %s7236_s12 }
 0x390   :  { %v669_v34 = vpop.permute.xlu0 %668  ;;  %v678_v49 = vpop.permute.xlu1 %677 }
 0x391   :  { %689 = vrot.lane.b32.xlu2 %v7687_v5, %s7237_s30  ;;  %914 = vrot.lane.b32.xlu1 %v7632_v54, %s7235_s10 }
 0x392   :  { %1048 = vrot.lane.b32.xlu0 %v7756_v29, %s7235_s10 }
 0x398   :  { %v671_v51 = vpop.permute.xlu0 %670 }
 0x399   :  { %691 = vrot.lane.b32.xlu2 %v7735_v24, %s7237_s30  ;;  %6187 = vrot.lane.b32.xlu1 %v6186_v31, %s7238_s24 }
 0x39a   :  { %918 = vrot.lane.b32.xlu0 %v7630_v53, %s7235_s10  ;;  %v787_v32 = vpop.permute.xlu2 %786 }
 0x39b   :  { %5861 = vmatpush.xpose.msk.msra.mxu1 %vm743_vm10, %v787_v32 }
 0x39f   :  { %5862 = vmatpush.xpose.msk.msra.mxu1 %vm743_vm10, %v785_v28 }
 0x3a1   :  { %916 = vrot.lane.b32.xlu2 %v7664_v1, %s7235_s10  ;;  %6192 = vrot.lane.b32.xlu1 %v6191_v35, %s7238_s24 }
 0x3a2   :  { %6197 = vrot.lane.b32.xlu0 %v6196_v37, %s7238_s24  ;;  %v661_v47 = vpop.permute.xlu2 %660 }
 0x3a3   :  { %5863 = vmatpush.xpose.msk.msra.mxu1 %vm743_vm10, %v783_v22 }
 0x3a6   :  { %5864 = vmatmul.msk.f32.vlgmr.msra.gmra.mxu1 %vm743_vm10, %v7640_v55  ;;  %v684_v55 = vpop.permute.xlu0 %683 }
 0x3a9   :  { %6182 = vrot.lane.b32.xlu2 %v6181_v7, %s7238_s24  ;;  %6202 = vrot.lane.b32.xlu1 %v6201_v40, %s7238_s24 }
 0x3aa   :  { %6207 = vrot.lane.b32.xlu0 %v6206_v43, %s7238_s24  ;;  %v871_v52 = vpop.permute.xlu2 %870 }
 0x3ae   :  { %5865 = vmatmul.msk.f32.gmra.mxu1 %vm743_vm10, %v7706_v10 }
 0x3b1   :  { %6212 = vrot.lane.b32.xlu2 %v6211_v19, %s7238_s24 }
 0x3b2   :  { %v1007_v57 = vpop.permute.xlu2 %1006 }
 0x3b6   :  { %5866 = vmatmul.msk.f32.gmra.mxu1 %vm743_vm10, %v661_v47 }
 0x3ba   :  { %v831_v56 = vpop.permute.xlu1 %830 }
 0x3bb   :  { %5867 = vmatpush.xpose.msk.msrb.mxu3 %vm743_vm10, %v831_v56 }
 0x3bf   :  { %5868 = vmatpush.xpose.msk.msrb.mxu3 %vm743_vm10, %v829_v30 }
 0x3c3   :  { %5869 = vmatpush.xpose.msk.msrb.mxu3 %vm743_vm10, %v827_v60  ;;  %v1003_v58 = vpop.permute.xlu2 %1002 }
 0x3c6   :  { %5870 = vmatmul.msk.f32.vlgmr.msrb.gmra.mxu3 %vm743_vm10, %v7658_v62 }
 0x3c7   :  { %5891 = vmatpush.xpose.msk.msra.mxu3 %vm743_vm10, %v1007_v57 }
 0x3cb   :  { %v875_v59 = vpop.permute.xlu0 %874 }
 0x3cc   :  { %5873 = vmatpush.xpose.msk.msrb.mxu1 %vm743_vm10, %v875_v59 }
 0x3ce   :  { %5871 = vmatmul.msk.f32.gmra.mxu3 %vm743_vm10, %v665_v6 }
 0x3d0   :  { %5874 = vmatpush.xpose.msk.msrb.mxu1 %vm743_vm10, %v873_v33 }
 0x3d3   :  { %v1005_v61 = vpop.permute.xlu2 %1004  ;;  %v963_v63 = vpop.permute.xlu1 %962 }
 0x3d4   :  { %5875 = vmatpush.xpose.msk.msrb.mxu1 %vm743_vm10, %v871_v52  ;;  %5885 = vmatpush.xpose.msk.msrb.mxu2 %vm743_vm10, %v963_v63 }
 0x3d5   :  { %5892 = vmatpush.xpose.msk.msra.mxu3 %vm743_vm10, %v1005_v61 }
 0x3d6   :  { %5872 = vmatmul.msk.f32.gmra.mxu3 %vm743_vm10, %v667_v44 }
 0x3d7   :  { %5876 = vmatmul.msk.f32.vlgmr.msrb.gmra.mxu1 %vm743_vm10, %v669_v34 }
 0x3d9   :  { %5893 = vmatpush.xpose.msk.msra.mxu3 %vm743_vm10, %v1003_v58 }
 0x3db   :  { %v1051_v62 = vpop.permute.xlu2 %1050  ;;  %v959_v0 = vpop.permute.xlu1 %958 }
 0x3dc   :  { %5897 = vmatpush.xpose.msk.msra.mxu1 %vm743_vm10, %v1051_v62 }
 0x3de   :  { %5894 = vmatmul.msk.f32.vlgmr.msra.gmra.mxu3 %vm743_vm10, %v684_v55 }
 0x3df   :  { %5877 = vmatmul.msk.f32.gmra.mxu1 %vm743_vm10, %v671_v51 }
 0x3e0   :  { %v7812_v2 = vpop.f32.mrf.mxu1 }
 0x3e1   :  { %v1091_v3 = vsel %vm1090_vm11, %v7812_v2, -inf }
 0x3e2   :  { %1092 = vmax.xlane.f32.xlu1 %v1091_v3 }
 0x3e3   :  { %v680_v4 = vpop.permute.xlu2 %679  ;;  %v673_v8 = vpop.permute.xlu1 %672 }
 0x3e7   :  { %5878 = vmatmul.msk.f32.gmra.mxu1 %vm743_vm10, %v673_v8 }
 0x3e8   :  { %v7817_v9 = vpop.f32.mrf.mxu1 }
 0x3e9   :  { %v1094_v10 = vsel %vm1090_vm11, %v7817_v9, -inf }
 0x3ea   :  { %1095 = vmax.xlane.f32.xlu1 %v1094_v10 }
 0x3eb   :  { %v690_v11 = vpop.permute.xlu2 %689  ;;  %v686_v12 = vpop.permute.xlu1 %685 }
 0x3ec   :  { %v961_v13 = vpop.permute.xlu0 %960  ;;  %5895 = vmatmul.msk.f32.gmra.mxu3 %vm743_vm10, %v686_v12 }
 0x3ed   :  { %5886 = vmatpush.xpose.msk.msrb.mxu2 %vm743_vm10, %v961_v13 }
 0x3f0   :  { %v7823_v16 = vpop.f32.mrf.mxu1 }
 0x3f1   :  { %5887 = vmatpush.xpose.msk.msrb.mxu2 %vm743_vm10, %v959_v0  ;;  %v1097_v17 = vsel %vm1090_vm11, %v7823_v16, -inf }
 0x3f2   :  { %1098 = vmax.xlane.f32.xlu0 %v1097_v17 }
 0x3f3   :  { %v692_v22 = vpop.permute.xlu2 %691  ;;  %v682_v25 = vpop.permute.xlu1 %681 }
 0x3f4   :  { %v1047_v26 = vpop.permute.xlu0 %1046  ;;  %5888 = vmatmul.msk.f32.vlgmr.msrb.gmra.mxu2 %vm743_vm10, %v678_v49 }
 0x3fb   :  { %v917_v60 = vpop.permute.xlu2 %916  ;;  %v694_v28 = vpop.permute.xlu1 %693 }
 0x3fc   :  { %v688_v30 = vpop.permute.xlu0 %687  ;;  %5889 = vmatmul.msk.f32.gmra.mxu2 %vm743_vm10, %v680_v4 }
 0x3fd   :  { %5896 = vmatmul.msk.f32.gmra.mxu3 %vm743_vm10, %v688_v30 }
 0x403   :  { %v6183_v31 = vpop.permute.xlu2 %6182  ;;  %v915_v32 = vpop.permute.xlu1 %914 }
 0x404   :  { %v6185_v33 = vunpack.i.h.bf16 %v6183_v31  ;;  %v6184_v35 = vunpack.i.l.bf16 %v6183_v31  ;;  %v1049_v37 = vpop.permute.xlu0 %1048  ;;  %5890 = vmatmul.msk.f32.gmra.mxu2 %vm743_vm10, %v682_v25 }
 0x405   :  { %5898 = vmatpush.xpose.msk.msra.mxu1 %vm743_vm10, %v1049_v37 }
 0x406   :  { %1466 = vmatpush.msra.mxu2 %v6184_v35  ;;  %1510 = vmatpush.msrb.mxu3 %v6185_v33 }
 0x409   :  { %5899 = vmatpush.xpose.msk.msra.mxu1 %vm743_vm10, %v1047_v26 }
 0x40b   :  { %v6188_v6 = vpop.permute.xlu1 %6187  ;;  %v6213_v56 = vpop.permute.xlu2 %6212 }
 0x40c   :  { %v919_v7 = vpop.permute.xlu0 %918  ;;  %5900 = vmatmul.msk.f32.vlgmr.msra.gmra.mxu1 %vm743_vm10, %v690_v11  ;;  %v6190_v40 = vunpack.i.h.bf16 %v6188_v6  ;;  %v6189_v43 = vunpack.i.l.bf16 %v6188_v6  ;;  %v6214_v63 = vunpack.i.l.bf16 %v6213_v56  ;;  %v6215_v62 = vunpack.i.h.bf16 %v6213_v56 }
 0x40d   :  { %5879 = vmatpush.xpose.msk.msrb.mxu0 %vm743_vm10, %v919_v7 }
 0x40e   :  { %1467 = vmatpush.msra.mxu2 %v6189_v43  ;;  %1511 = vmatpush.msrb.mxu3 %v6190_v40  ;;  %v6216_v40 = vpack.i.bf16 %v7730_v21, %v7721_v18 }
 0x411   :  { %5880 = vmatpush.xpose.msk.msrb.mxu0 %vm743_vm10, %v917_v60 }
 0x413   :  { %v6193_v44 = vpop.permute.xlu1 %6192 }
 0x414   :  { %v6198_v19 = vpop.permute.xlu0 %6197  ;;  %5901 = vmatmul.msk.f32.gmra.mxu1 %vm743_vm10, %v692_v22  ;;  %v6195_v34 = vunpack.i.h.bf16 %v6193_v44  ;;  %v6194_v47 = vunpack.i.l.bf16 %v6193_v44 }
 0x415   :  { %v6199_v49 = vunpack.i.l.bf16 %v6198_v19  ;;  %5881 = vmatpush.xpose.msk.msrb.mxu0 %vm743_vm10, %v915_v32  ;;  %v6200_v51 = vunpack.i.h.bf16 %v6198_v19 }
 0x416   :  { %1468 = vmatpush.msra.mxu2 %v6194_v47  ;;  %1512 = vmatpush.msrb.mxu3 %v6195_v34 }
 0x417   :  { %1554 = vmatpush.msrb.mxu1 %v6199_v49 }
 0x418   :  { %5882 = vmatmul.msk.f32.vlgmr.msrb.gmra.mxu0 %vm743_vm10, %v7687_v5 }
 0x419   :  { %1555 = vmatpush.msrb.mxu1 %v6200_v51 }
 0x41b   :  { %v6203_v52 = vpop.permute.xlu1 %6202 }
 0x41c   :  { %v6208_v55 = vpop.permute.xlu0 %6207  ;;  %5902 = vmatmul.msk.f32.gmra.mxu1 %vm743_vm10, %v694_v28  ;;  %v6205_v57 = vunpack.i.h.bf16 %v6203_v52  ;;  %v6204_v58 = vunpack.i.l.bf16 %v6203_v52 }
 0x41d   :  { %v6209_v59 = vunpack.i.l.bf16 %v6208_v55  ;;  %v6210_v61 = vunpack.i.h.bf16 %v6208_v55 }
 0x41e   :  { %1556 = vmatpush.msrb.mxu1 %v6204_v58  ;;  %1642 = vmatpush.msrb.mxu2 %v6205_v57 }
 0x41f   :  { %1686 = vmatpush.msra.mxu3 %v6209_v59 }
 0x420   :  { %5883 = vmatmul.msk.f32.gmra.mxu0 %vm743_vm10, %v7735_v24  ;;  %1643 = vmatpush.msrb.mxu2 %v6210_v61 }
 0x421   :  { %1687 = vmatpush.msra.mxu3 %v6214_v63 }
 0x422   :  { %1644 = vmatpush.msrb.mxu2 %v6215_v62 }
 0x423   :  { %v7844_v5 = vpop.f32.mrf.mxu1 }
 0x424   :  { %v1100_v34 = vsel %vm1090_vm11, %v7844_v5, -inf }
 0x428   :  { %5884 = vmatmul.msk.f32.gmra.mxu0 %vm743_vm10, %v7742_v27 }
 0x42b   :  { %v7848_v0 = vpop.f32.mrf.mxu1 }
 0x42c   :  { %v1103_v3 = vsel %vm1090_vm11, %v7848_v0, -inf }
 0x42d   :  { %1104 = vmax.xlane.f32.xlu1 %v1103_v3 }
 0x433   :  { %v823_v4 = vpop.f32.mrf.mxu1 }
 0x434   :  { %v1106_v8 = vsel %vm1090_vm11, %v823_v4, -inf }
 0x435   :  { %1107 = vmax.xlane.f32.xlu1 %v1106_v8 }
 0x449   :  { %v7871_v26 = vpop.f32.mrf.mxu3 }
 0x44a   :  { %v1109_v31 = vsel %vm1090_vm11, %v7871_v26, -inf }
 0x451   :  { %v7883_v33 = vpop.f32.mrf.mxu3 }
 0x452   :  { %v1112_v6 = vsel %vm1090_vm11, %v7883_v33, -inf }
 0x454   :  { %v7855_v24 = vpop.f32.mrf.mxu1 }
 0x455   :  { %v1093_v35 = vpop.xlane.xlu1 %1092 }
 0x456   :  { %v1163_v49 = vsub.f32 %v7812_v2, %v1093_v35  ;;  %v1118_v2 = vsel %vm1090_vm11, %v7855_v24, -inf }
 0x458   :  { %v1187_v52 = vmul.f32 1.442695, %v1163_v49 }
 0x459   :  { %v7893_v43 = vpop.f32.mrf.mxu3 }
 0x45a   :  { %v1115_v19 = vsel %vm1090_vm11, %v7893_v43, -inf  ;;  %6405 = vpow2.f32 %v1187_v52 }
 0x45c   :  { %v7861_v27 = vpop.f32.mrf.mxu1 }
 0x45d   :  { %v1096_v44 = vpop.xlane.xlu1 %1095  ;;  %v1121_v63 = vsel %vm1090_vm11, %v7861_v27, -inf }
 0x460   :  { %v7915_v59 = vpop.eup %6405 }
 0x461   :  { %v7900_v47 = vpop.f32.mrf.mxu3  ;;  %v1235_v62 = vsel %vm1090_vm11, %v7915_v59, 0.0 }
 0x462   :  { %v1145_v18 = vsel %vm1090_vm11, %v7900_v47, -inf }
 0x464   :  { %v7867_v22 = vpop.f32.mrf.mxu1 }
 0x465   :  { %v1124_v25 = vsel %vm1090_vm11, %v7867_v22, -inf }
 0x46f   :  { %v7909_v56 = vpop.f32.mrf.mxu3 }
 0x470   :  { %v1148_v55 = vsel %vm1090_vm11, %v7909_v56, -inf }
 0x477   :  { %v7853_v10 = vpop.f32.mrf.mxu2 }
 0x478   :  { %v1136_v21 = vsel %vm1090_vm11, %v7853_v10, -inf }
 0x47f   :  { %v7857_v11 = vpop.f32.mrf.mxu2 }
 0x480   :  { %v1139_v12 = vsel %vm1090_vm11, %v7857_v11, -inf  ;;  %v7921_v3 = vpop.f32.mrf.mxu3 }
 0x481   :  { %1140 = vmax.xlane.f32.xlu1 %v1139_v12  ;;  %v1151_v8 = vsel %vm1090_vm11, %v7921_v3, -inf }
 0x487   :  { %v7863_v13 = vpop.f32.mrf.mxu2 }
 0x488   :  { %v1142_v17 = vsel %vm1090_vm11, %v7863_v13, -inf }
 0x489   :  { %1143 = vmax.xlane.f32.xlu1 %v1142_v17  ;;  %v6221_v17 = vpack.i.bf16 %v7723_v20, %v7756_v29  ;;  %v7933_v35 = vpop.f32.mrf.mxu1 }
 0x491   :  { %1125 = vmax.xlane.f32.xlu1 %v1124_v25  ;;  %v7945_v49 = vpop.f32.mrf.mxu1 }
 0x495   :  { %v7873_v60 = vpop.f32.mrf.mxu0 }
 0x496   :  { %v1127_v28 = vsel %vm1090_vm11, %v7873_v60, -inf }
 0x497   :  { %1128 = vmax.xlane.f32.xlu2 %v1127_v28 }
 0x49d   :  { %v7877_v30 = vpop.f32.mrf.mxu0 }
 0x49e   :  { %v1130_v32 = vsel %vm1090_vm11, %v7877_v30, -inf }
 0x49f   :  { %1110 = vmax.xlane.f32.xlu2 %v1109_v31  ;;  %1131 = vmax.xlane.f32.xlu0 %v1130_v32 }
 0x4a0   :  { %v7903_v51 = vpop.xlane.xlu1 %1104 }
 0x4a5   :  { %v7885_v37 = vpop.f32.mrf.mxu0 }
 0x4a6   :  { %v1133_v7 = vsel %vm1090_vm11, %v7885_v37, -inf }
 0x4a7   :  { %1113 = vmax.xlane.f32.xlu2 %v1112_v6  ;;  %1134 = vmax.xlane.f32.xlu0 %v1133_v7 }
 0x4a8   :  { %v1108_v57 = vpop.xlane.xlu1 %1107 }
 0x4a9   :  { %v1168_v58 = vsub.f32 %v823_v4, %v1108_v57 }
 0x4aa   :  { %6217 = vrot.lane.b32.xlu1 %v6216_v40, %s7238_s24  ;;  %v1164_v40 = vsub.f32 %v7817_v9, %v1096_v44  ;;  %v7949_v9 = vpop.xlane.xlu0 %1098 }
 0x4ab   :  { %v1197_v61 = vmul.f32 1.442695, %v1168_v58 }
 0x4ac   :  { %v1189_v29 = vmul.f32 1.442695, %v1164_v40 }
 0x4ad   :  { %6407 = vpow2.f32 %v1197_v61 }
 0x4af   :  { %1116 = vmax.xlane.f32.xlu2 %v1115_v19  ;;  %1101 = vmax.xlane.f32.xlu0 %v1100_v34 }
 0x4b3   :  { %v7925_v12 = vpop.eup %6407 }
 0x4b4   :  { %v1250_v4 = vsel %vm1090_vm11, %v7925_v12, 0.0 }
 0x4b7   :  { %1146 = vmax.xlane.f32.xlu2 %v1145_v18  ;;  %1137 = vmax.xlane.f32.xlu0 %v1136_v21  ;;  %v1157_v18 = vsel %vm1090_vm11, %v7945_v49, -inf }
 0x4bf   :  { %1149 = vmax.xlane.f32.xlu2 %v1148_v55  ;;  %1119 = vmax.xlane.f32.xlu0 %v1118_v2  ;;  %v7959_v55 = vpop.f32.mrf.mxu1 }
 0x4c7   :  { %1122 = vmax.xlane.f32.xlu0 %v1121_v63  ;;  %1236 = vadd.xlane.f32.xlu2 %v1235_v62  ;;  %v1160_v63 = vsel %vm1090_vm11, %v7959_v55, -inf  ;;  %v1167_v62 = vsub.f32 %v7848_v0, %v7903_v51 }
 0x4cf   :  { %1152 = vmax.xlane.f32.xlu2 %v1151_v8 }
 0x4d4   :  { %1251 = vadd.xlane.f32.xlu1 %v1250_v4  ;;  %v1195_v4 = vmul.f32 1.442695, %v1167_v62 }
 0x4db   :  { %6222 = vrot.lane.b32.xlu0 %v6221_v17, %s7238_s24 }
 0x4f4   :  { %v1141_v25 = vpop.xlane.xlu1 %1140 }
 0x4f5   :  { %v1179_v28 = vsub.f32 %v7857_v11, %v1141_v25  ;;  %v1154_v11 = vsel %vm1090_vm11, %v7933_v35, -inf }
 0x4f7   :  { %v1219_v31 = vmul.f32 1.442695, %v1179_v28 }
 0x4f9   :  { %6409 = vpow2.f32 %v1219_v31 }
 0x4fc   :  { %v1144_v32 = vpop.xlane.xlu1 %1143 }
 0x4fd   :  { %v1180_v6 = vsub.f32 %v7863_v13, %v1144_v32 }
 0x4ff   :  { %v7936_v7 = vpop.eup %6409  ;;  %v1221_v19 = vmul.f32 1.442695, %v1180_v6 }
 0x500   :  { %v1283_v20 = vsel %vm1090_vm11, %v7936_v7, 0.0 }
 0x501   :  { %6411 = vpow2.f32 %v1221_v19  ;;  %1284 = vadd.xlane.f32.xlu1 %v1283_v20 }
 0x502   :  { %6413 = vpow2.f32 %v1189_v29 }
 0x504   :  { %v7964_v61 = vpop.xlane.xlu1 %1125 }
 0x505   :  { %1155 = vmax.xlane.f32.xlu0 %v1154_v11 }
 0x507   :  { %v7943_v34 = vpop.eup %6411 }
 0x508   :  { %v1286_v13 = vsel %vm1090_vm11, %v7943_v34, 0.0  ;;  %v7955_v21 = vpop.eup %6413 }
 0x509   :  { %1287 = vadd.xlane.f32.xlu1 %v1286_v13  ;;  %v1238_v52 = vsel %vm1090_vm11, %v7955_v21, 0.0  ;;  %v6231_v13 = vpack.i.bf16 %v7630_v53, %v7590_v46 }
 0x50a   :  { %v7951_v44 = vpop.xlane.xlu2 %1128 }
 0x50d   :  { %1158 = vmax.xlane.f32.xlu0 %v1157_v18 }
 0x511   :  { %1239 = vadd.xlane.f32.xlu1 %v1238_v52 }
 0x512   :  { %v1111_v2 = vpop.xlane.xlu2 %1110  ;;  %v7961_v57 = vpop.xlane.xlu0 %1131 }
 0x513   :  { %v1169_v58 = vsub.f32 %v7871_v26, %v1111_v2 }
 0x515   :  { %v1199_v8 = vmul.f32 1.442695, %v1169_v58  ;;  %1161 = vmax.xlane.f32.xlu0 %v1160_v63 }
 0x517   :  { %6415 = vpow2.f32 %v1199_v8 }
 0x518   :  { %6417 = vpow2.f32 %v1195_v4 }
 0x51a   :  { %v1114_v17 = vpop.xlane.xlu2 %1113  ;;  %v7970_v25 = vpop.xlane.xlu0 %1134 }
 0x51b   :  { %v1170_v29 = vsub.f32 %v7883_v33, %v1114_v17 }
 0x51c   :  { %v6218_v28 = vpop.permute.xlu1 %6217 }
 0x51d   :  { %v7972_v31 = vpop.eup %6415  ;;  %v6220_v26 = vunpack.i.h.bf16 %v6218_v28  ;;  %v6219_v32 = vunpack.i.l.bf16 %v6218_v28  ;;  %v1201_v18 = vmul.f32 1.442695, %v1170_v29 }
 0x51e   :  { %v1253_v6 = vsel %vm1090_vm11, %v7972_v31, 0.0  ;;  %v7976_v40 = vpop.eup %6417 }
 0x51f   :  { %1254 = vadd.xlane.f32.xlu0 %v1253_v6  ;;  %1688 = vmatpush.msra.mxu3 %v6219_v32  ;;  %v1247_v11 = vsel %vm1090_vm11, %v7976_v40, 0.0 }
 0x520   :  { %1730 = vmatpush.msra.mxu1 %v6220_v26 }
 0x522   :  { %v1117_v0 = vpop.xlane.xlu2 %1116  ;;  %v1102_v51 = vpop.xlane.xlu0 %1101 }
 0x523   :  { %v1166_v19 = vsub.f32 %v7844_v5, %v1102_v51  ;;  %v1171_v17 = vsub.f32 %v7893_v43, %v1117_v0 }
 0x525   :  { %v1193_v20 = vmul.f32 1.442695, %v1166_v19 }
 0x527   :  { %1248 = vadd.xlane.f32.xlu0 %v1247_v11  ;;  %6419 = vpow2.f32 %v1193_v20 }
 0x528   :  { %6421 = vpow2.f32 %v1201_v18 }
 0x52a   :  { %v1147_v52 = vpop.xlane.xlu2 %1146  ;;  %v1138_v2 = vpop.xlane.xlu0 %1137  ;;  %6232 = vrot.lane.b32.xlu1 %v6231_v13, %s7238_s24 }
 0x52b   :  { %v1178_v5 = vsub.f32 %v7853_v10, %v1138_v2  ;;  %v1203_v10 = vmul.f32 1.442695, %v1171_v17  ;;  %v1181_v43 = vsub.f32 %v7900_v47, %v1147_v52  ;;  %v1165_v47 = vsub.f32 %v7823_v16, %v7949_v9 }
 0x52d   :  { %v7985_v58 = vpop.eup %6419  ;;  %v1217_v63 = vmul.f32 1.442695, %v1178_v5  ;;  %v1223_v29 = vmul.f32 1.442695, %v1181_v43 }
 0x52e   :  { %v1244_v33 = vsel %vm1090_vm11, %v7985_v58, 0.0  ;;  %v7991_v46 = vpop.eup %6421 }
 0x52f   :  { %1245 = vadd.xlane.f32.xlu2 %v1244_v33  ;;  %6423 = vpow2.f32 %v1217_v63  ;;  %v1256_v28 = vsel %vm1090_vm11, %v7991_v46, 0.0 }
 0x532   :  { %v1150_v62 = vpop.xlane.xlu2 %1149  ;;  %v1120_v8 = vpop.xlane.xlu0 %1119 }
 0x533   :  { %v1172_v4 = vsub.f32 %v7855_v24, %v1120_v8  ;;  %v1182_v33 = vsub.f32 %v7909_v56, %v1150_v62  ;;  %v1174_v56 = vsub.f32 %v7867_v22, %v7964_v61 }
 0x535   :  { %v1205_v53 = vmul.f32 1.442695, %v1172_v4  ;;  %v7999_v51 = vpop.eup %6423 }
 0x536   :  { %v1280_v0 = vsel %vm1090_vm11, %v7999_v51, 0.0 }
 0x537   :  { %6425 = vpow2.f32 %v1205_v53  ;;  %1257 = vadd.xlane.f32.xlu2 %v1256_v28 }
 0x538   :  { %6427 = vpow2.f32 %v1203_v10  ;;  %v1209_v10 = vmul.f32 1.442695, %v1174_v56 }
 0x53a   :  { %v1123_v26 = vpop.xlane.xlu0 %1122  ;;  %v7996_v32 = vpop.xlane.xlu2 %1236 }
 0x53b   :  { %v1173_v6 = vsub.f32 %v7861_v27, %v1123_v26  ;;  %v1176_v27 = vsub.f32 %v7877_v30, %v7961_v57  ;;  %v1225_v57 = vmul.f32 1.442695, %v1182_v33  ;;  %v1177_v33 = vsub.f32 %v7885_v37, %v7970_v25 }
 0x53d   :  { %v1207_v24 = vmul.f32 1.442695, %v1173_v6  ;;  %v8001_v19 = vpop.eup %6425  ;;  %v1213_v5 = vmul.f32 1.442695, %v1176_v27 }
 0x53e   :  { %v1262_v20 = vsel %vm1090_vm11, %v8001_v19, 0.0  ;;  %v8011_v18 = vpop.eup %6427 }
 0x53f   :  { %6429 = vpow2.f32 %v1207_v24  ;;  %1281 = vadd.xlane.f32.xlu2 %v1280_v0  ;;  %1263 = vadd.xlane.f32.xlu0 %v1262_v20  ;;  %v1259_v30 = vsel %vm1090_vm11, %v8011_v18, 0.0  ;;  %v6236_v20 = vpack.i.bf16 %v7632_v54, %v7664_v1  ;;  %v1215_v54 = vmul.f32 1.442695, %v1177_v33 }
 0x540   :  { %6431 = vpow2.f32 %v1223_v29 }
 0x542   :  { %v1153_v11 = vpop.xlane.xlu2 %1152 }
 0x543   :  { %v1183_v13 = vsub.f32 %v7921_v3, %v1153_v11  ;;  %v1191_v3 = vmul.f32 1.442695, %v1165_v47 }
 0x545   :  { %v8013_v2 = vpop.eup %6429  ;;  %v1227_v52 = vmul.f32 1.442695, %v1183_v13 }
 0x546   :  { %v1265_v63 = vsel %vm1090_vm11, %v8013_v2, 0.0  ;;  %v8022_v8 = vpop.eup %6431 }
 0x547   :  { %6433 = vpow2.f32 %v1227_v52  ;;  %1260 = vadd.xlane.f32.xlu2 %v1259_v30  ;;  %1266 = vadd.xlane.f32.xlu0 %v1265_v63  ;;  %v1289_v53 = vsel %vm1090_vm11, %v8022_v8, 0.0  ;;  %v1252_v56 = vpop.xlane.xlu1 %1251 }
 0x548   :  { %6435 = vpow2.f32 %v1213_v5 }
 0x549   :  { %6437 = vpow2.f32 %v1191_v3 }
 0x54a   :  { %6439 = vpow2.f32 %v1225_v57 }
 0x54b   :  { %6441 = vpow2.f32 %v1209_v10 }
 0x54d   :  { %v8024_v16 = vpop.eup %6433  ;;  %v6223_v9 = vpop.permute.xlu0 %6222 }
 0x54e   :  { %v6224_v62 = vunpack.i.l.bf16 %v6223_v9  ;;  %v1295_v4 = vsel %vm1090_vm11, %v8024_v16, 0.0  ;;  %v8032_v17 = vpop.eup %6435  ;;  %v6225_v28 = vunpack.i.h.bf16 %v6223_v9 }
 0x54f   :  { %1290 = vadd.xlane.f32.xlu2 %v1289_v53  ;;  %1296 = vadd.xlane.f32.xlu0 %v1295_v4  ;;  %v8034_v26 = vpop.eup %6437  ;;  %v1274_v22 = vsel %vm1090_vm11, %v8032_v17, 0.0 }
 0x550   :  { %1731 = vmatpush.msra.mxu1 %v6224_v62  ;;  %v8038_v61 = vpop.eup %6439  ;;  %v1241_v24 = vsel %vm1090_vm11, %v8034_v26, 0.0 }
 0x551   :  { %v1292_v6 = vsel %vm1090_vm11, %v8038_v61, 0.0  ;;  %v8044_v43 = vpop.eup %6441 }
 0x552   :  { %1732 = vmatpush.msra.mxu1 %v6225_v28  ;;  %v1268_v0 = vsel %vm1090_vm11, %v8044_v43, 0.0 }
 0x554   :  { %1275 = vadd.xlane.f32.xlu1 %v1274_v22 }
 0x557   :  { %1293 = vadd.xlane.f32.xlu2 %v1292_v6  ;;  %1242 = vadd.xlane.f32.xlu0 %v1241_v24 }
 0x55f   :  { %1269 = vadd.xlane.f32.xlu2 %v1268_v0 }
 0x56b   :  { %6237 = vrot.lane.b32.xlu0 %v6236_v20, %s7238_s24  ;;  %v6226_v20 = vpack.i.bf16 %v7601_v38, %v7622_v50 }
 0x574   :  { %v1285_v53 = vpop.xlane.xlu1 %1284 }
 0x578   :  { %v1156_v27 = vpop.xlane.xlu0 %1155 }
 0x579   :  { %v1184_v29 = vsub.f32 %v7933_v35, %v1156_v27 }
 0x57b   :  { %v1229_v11 = vmul.f32 1.442695, %v1184_v29 }
 0x57c   :  { %v1288_v6 = vpop.xlane.xlu1 %1287 }
 0x57d   :  { %6443 = vpow2.f32 %v1229_v11 }
 0x580   :  { %v1159_v13 = vpop.xlane.xlu0 %1158 }
 0x581   :  { %v1185_v47 = vsub.f32 %v7945_v49, %v1159_v13 }
 0x583   :  { %v8053_v52 = vpop.eup %6443  ;;  %v1231_v5 = vmul.f32 1.442695, %v1185_v47 }
 0x584   :  { %v1298_v63 = vsel %vm1090_vm11, %v8053_v52, 0.0 }
 0x585   :  { %6445 = vpow2.f32 %v1231_v5  ;;  %1299 = vadd.xlane.f32.xlu2 %v1298_v63  ;;  %v1240_v5 = vpop.xlane.xlu1 %1239 }
 0x586   :  { %6447 = vpow2.f32 %v1215_v54 }
 0x588   :  { %v1162_v1 = vpop.xlane.xlu0 %1161 }
 0x589   :  { %v1186_v35 = vsub.f32 %v7959_v55, %v1162_v1 }
 0x58b   :  { %v8060_v30 = vpop.eup %6445  ;;  %v1233_v3 = vmul.f32 1.442695, %v1186_v35 }
 0x58c   :  { %v1301_v49 = vsel %vm1090_vm11, %v8060_v30, 0.0  ;;  %v8064_v57 = vpop.eup %6447 }
 0x58d   :  { %6449 = vpow2.f32 %v1233_v3  ;;  %1302 = vadd.xlane.f32.xlu2 %v1301_v49  ;;  %v1277_v55 = vsel %vm1090_vm11, %v8064_v57, 0.0 }
 0x592   :  { %v1255_v37 = vpop.xlane.xlu0 %1254 }
 0x593   :  { %v8066_v25 = vpop.eup %6449  ;;  %6451 = vrcp.f32 %v1255_v37 }
 0x594   :  { %v1304_v9 = vsel %vm1090_vm11, %v8066_v25, 0.0 }
 0x595   :  { %1305 = vadd.xlane.f32.xlu2 %v1304_v9  ;;  %1278 = vadd.xlane.f32.xlu0 %v1277_v55  ;;  %v1175_v55 = vsub.f32 %v7873_v60, %v7951_v44 }
 0x597   :  { %v1211_v60 = vmul.f32 1.442695, %v1175_v55 }
 0x599   :  { %v6452_v62 = vpop.eup %6451 }
 0x59a   :  { %v1337_v4 = vmul.f32 %v6452_v62, %v7972_v31  ;;  %v1249_v10 = vpop.xlane.xlu0 %1248 }
 0x59c   :  { %5909 = vmatmul.msk.f32.vlgmr.msrb.gmra.mxu3 %vm1090_vm11, %v1337_v4 }
 0x5a2   :  { %v1246_v28 = vpop.xlane.xlu2 %1245 }
 0x5a3   :  { %6453 = vrcp.f32 %v1246_v28 }
 0x5a4   :  { %6455 = vrcp.f32 %v1249_v10 }
 0x5a9   :  { %v6454_v22 = vpop.eup %6453 }
 0x5aa   :  { %v1334_v24 = vmul.f32 %v6454_v22, %v7985_v58  ;;  %v1258_v0 = vpop.xlane.xlu2 %1257  ;;  %v6456_v31 = vpop.eup %6455 }
 0x5ab   :  { %6457 = vrcp.f32 %v1258_v0  ;;  %v1335_v47 = vmul.f32 %v6456_v31, %v7976_v40 }
 0x5ac   :  { %6459 = vrcp.f32 %v7996_v32  ;;  %5906 = vmatmul.msk.f32.vlgmr.msra.gmra.mxu2 %vm1090_vm11, %v1334_v24 }
 0x5ad   :  { %6227 = vrot.lane.b32.xlu2 %v6226_v20, %s7238_s24  ;;  %6461 = vrcp.f32 %v1252_v56 }
 0x5b1   :  { %v6458_v27 = vpop.eup %6457 }
 0x5b2   :  { %v6460_v29 = vpop.eup %6459  ;;  %v1282_v11 = vpop.xlane.xlu2 %1281  ;;  %v1338_v58 = vmul.f32 %v6458_v27, %v7991_v46 }
 0x5b3   :  { %v1264_v13 = vpop.xlane.xlu0 %1263  ;;  %v8085_v38 = vmul.f32 %v6460_v29, %v7915_v59  ;;  %v6462_v50 = vpop.eup %6461 }
 0x5b4   :  { %6463 = vrcp.f32 %v1264_v13  ;;  %5907 = vmatmul.msk.f32.gmra.mxu2 %vm1090_vm11, %v1335_v47  ;;  %5910 = vmatmul.msk.f32.gmra.mxu3 %vm1090_vm11, %v1338_v58  ;;  %v1336_v40 = vmul.f32 %v6462_v50, %v7925_v12 }
 0x5b5   :  { %6465 = vrcp.f32 %v1240_v5  ;;  %v1358_v32 = vadd.f32 %v1334_v24, %v8085_v38 }
 0x5b6   :  { %6467 = vrcp.f32 %v1282_v11 }
 0x5b7   :  { %v1361_v46 = vadd.f32 %v1358_v32, %v1337_v4 }
 0x5ba   :  { %v6464_v33 = vpop.eup %6463  ;;  %v1261_v63 = vpop.xlane.xlu2 %1260 }
 0x5bb   :  { %v1267_v54 = vpop.xlane.xlu0 %1266  ;;  %v1340_v1 = vmul.f32 %v6464_v33, %v8001_v19  ;;  %6469 = vrcp.f32 %v1261_v63  ;;  %v6466_v35 = vpop.eup %6465 }
 0x5bc   :  { %6471 = vrcp.f32 %v1267_v54  ;;  %5908 = vmatmul.msk.f32.gmra.mxu2 %vm1090_vm11, %v1336_v40  ;;  %v6468_v3 = vpop.eup %6467  ;;  %v8093_v37 = vmul.f32 %v6466_v35, %v7955_v21  ;;  %v6233_v33 = vpop.permute.xlu1 %6232 }
 0x5bd   :  { %v1364_v59 = vadd.f32 %v1361_v46, %v1340_v1  ;;  %5912 = vmatmul.msk.f32.vlgmr.msrb.gmra.mxu1 %vm1090_vm11, %v1340_v1  ;;  %6473 = vrcp.f32 %v1285_v53  ;;  %v8100_v56 = vmul.f32 %v6468_v3, %v7999_v51 }
 0x5be   :  { %v1359_v12 = vadd.f32 %v1335_v47, %v8093_v37 }
 0x5bf   :  { %v1367_v49 = vmul.f32 0.25, %v1364_v59 }
 0x5c0   :  { %v1362_v10 = vadd.f32 %v1359_v12, %v1338_v58 }
 0x5c1   :  { %v6470_v9 = vpop.eup %6469  ;;  %1385 = vst.msk [vmem:[#allocation29] sm:$0xff] %vm1090_vm11, %v1367_v49 }
 0x5c2   :  { %v6472_v19 = vpop.eup %6471  ;;  %v1291_v62 = vpop.xlane.xlu2 %1290  ;;  %v1339_v28 = vmul.f32 %v6470_v9, %v8011_v18 }
 0x5c3   :  { %v1297_v4 = vpop.xlane.xlu0 %1296  ;;  %6475 = vrcp.f32 %v1291_v62  ;;  %v1341_v21 = vmul.f32 %v6472_v19, %v8013_v2  ;;  %v6474_v44 = vpop.eup %6473 }
 0x5c4   :  { %5911 = vmatmul.msk.f32.gmra.mxu3 %vm1090_vm11, %v1339_v28  ;;  %5918 = vmatmul.msk.f32.vlgmr.msrb.gmra.mxu2 %vm1090_vm11, %v8100_v56  ;;  %6477 = vrcp.f32 %v1288_v6  ;;  %v1347_v0 = vmul.f32 %v6474_v44, %v7936_v7 }
 0x5c5   :  { %5913 = vmatmul.msk.f32.gmra.mxu1 %vm1090_vm11, %v1341_v21  ;;  %v1365_v53 = vadd.f32 %v1362_v10, %v1341_v21  ;;  %6479 = vpow2.f32 %v1211_v60  ;;  %v6234_v60 = vunpack.i.l.bf16 %v6233_v33 }
 0x5c7   :  { %v1368_v51 = vmul.f32 0.25, %v1365_v53  ;;  %v1276_v63 = vpop.xlane.xlu1 %1275 }
 0x5c9   :  { %v6476_v22 = vpop.eup %6475  ;;  %1386 = vst.msk [vmem:[#allocation29 + $0x8] sm:$0xff] %vm1090_vm11, %v1368_v51  ;;  %v6235_v51 = vunpack.i.h.bf16 %v6233_v33  ;;  %v1836_v33 = vld [vmem:[#allocation13 + $0x10] sm:$0xff] }
 0x5ca   :  { %v8110_v18 = vmul.f32 %v6476_v22, %v8022_v8  ;;  %v1294_v2 = vpop.xlane.xlu2 %1293  ;;  %v6478_v20 = vpop.eup %6477 }
 0x5cb   :  { %v1243_v24 = vpop.xlane.xlu0 %1242  ;;  %6481 = vrcp.f32 %v1294_v2  ;;  %v8116_v31 = vpop.eup %6479  ;;  %v1348_v8 = vmul.f32 %v6478_v20, %v7943_v34 }
 0x5cc   :  { %6483 = vrcp.f32 %v1243_v24  ;;  %5919 = vmatmul.msk.f32.gmra.mxu2 %vm1090_vm11, %v1347_v0  ;;  %5921 = vmatmul.msk.f32.vlgmr.msra.gmra.mxu3 %vm1090_vm11, %v8110_v18  ;;  %v1271_v13 = vsel %vm1090_vm11, %v8116_v31, 0.0 }
 0x5cd   :  { %6485 = vrcp.f32 %v1297_v4 }
 0x5d1   :  { %v6482_v6 = vpop.eup %6481 }
 0x5d2   :  { %v6484_v27 = vpop.eup %6483  ;;  %v1270_v29 = vpop.xlane.xlu2 %1269  ;;  %v1350_v11 = vmul.f32 %v6482_v6, %v8038_v61 }
 0x5d3   :  { %6487 = vrcp.f32 %v1270_v29  ;;  %v8121_v7 = vmul.f32 %v6484_v27, %v8034_v26  ;;  %v6486_v58 = vpop.eup %6485 }
 0x5d4   :  { %5920 = vmatmul.msk.f32.gmra.mxu2 %vm1090_vm11, %v1348_v8  ;;  %5922 = vmatmul.msk.f32.gmra.mxu3 %vm1090_vm11, %v1350_v11  ;;  %v1351_v61 = vmul.f32 %v6486_v58, %v8024_v16  ;;  %6489 = vrcp.f32 %v1276_v63  ;;  %v1835_v63 = vld [vmem:[#allocation13 + $0x8] sm:$0xff] }
 0x5d5   :  { %v1360_v47 = vadd.f32 %v1336_v40, %v8121_v7 }
 0x5d6   :  { %1272 = vadd.xlane.f32.xlu2 %v1271_v13 }
 0x5d7   :  { %v1363_v50 = vadd.f32 %v1360_v47, %v1339_v28 }
 0x5d9   :  { %v6488_v5 = vpop.eup %6487 }
 0x5da   :  { %v1342_v34 = vmul.f32 %v6488_v5, %v8044_v43  ;;  %v6490_v40 = vpop.eup %6489 }
 0x5db   :  { %v8137_v1 = vmul.f32 %v6490_v40, %v8032_v17 }
 0x5dc   :  { %5914 = vmatmul.msk.f32.gmra.mxu1 %vm1090_vm11, %v1342_v34  ;;  %5923 = vmatmul.msk.f32.gmra.mxu3 %vm1090_vm11, %v1351_v61  ;;  %v1366_v26 = vadd.f32 %v1363_v50, %v1342_v34 }
 0x5dd   :  { %v6238_v35 = vpop.permute.xlu0 %6237  ;;  %v1374_v59 = vadd.f32 %v1347_v0, %v8137_v1 }
 0x5de   :  { %v1369_v32 = vmul.f32 0.25, %v1366_v26 }
 0x5df   :  { %v1377_v12 = vadd.f32 %v1374_v59, %v1350_v11 }
 0x5e0   :  { %1387 = vst.msk [vmem:[#allocation29 + $0x10] sm:$0xff] %vm1090_vm11, %v1369_v32 }
 0x5f8   :  { %v1300_v54 = vpop.xlane.xlu2 %1299 }
 0x5f9   :  { %6491 = vrcp.f32 %v1300_v54  ;;  %v1834_v54 = vld [vmem:[#allocation13] sm:$0xff] }
 0x5ff   :  { %v6492_v46 = vpop.eup %6491 }
 0x600   :  { %v8134_v43 = vmul.f32 %v6492_v46, %v8053_v52  ;;  %v1303_v16 = vpop.xlane.xlu2 %1302 }
 0x601   :  { %6493 = vrcp.f32 %v1303_v16 }
 0x602   :  { %5924 = vmatmul.msk.f32.vlgmr.msra.gmra.mxu1 %vm1090_vm11, %v8134_v43 }
 0x607   :  { %v6494_v3 = vpop.eup %6493 }
 0x608   :  { %v1306_v49 = vpop.xlane.xlu2 %1305  ;;  %v1353_v9 = vmul.f32 %v6494_v3, %v8060_v30  ;;  %v1279_v19 = vpop.xlane.xlu0 %1278 }
 0x609   :  { %6495 = vrcp.f32 %v1306_v49 }
 0x60a   :  { %6497 = vrcp.f32 %v1279_v19  ;;  %5925 = vmatmul.msk.f32.gmra.mxu1 %vm1090_vm11, %v1353_v9  ;;  %v1380_v52 = vadd.f32 %v1377_v12, %v1353_v9 }
 0x60c   :  { %v1383_v17 = vmul.f32 0.25, %v1380_v52 }
 0x60e   :  { %1389 = vst.msk [vmem:[#allocation29 + $0x20] sm:$0xff] %vm1090_vm11, %v1383_v17 }
 0x60f   :  { %v6496_v55 = vpop.eup %6495 }
 0x610   :  { %v6498_v62 = vpop.eup %6497  ;;  %v6228_v4 = vpop.permute.xlu2 %6227  ;;  %v1354_v28 = vmul.f32 %v6496_v55, %v8066_v25  ;;  %v6239_v25 = vunpack.i.l.bf16 %v6238_v35 }
 0x611   :  { %v6229_v21 = vunpack.i.l.bf16 %v6228_v4  ;;  %v8147_v10 = vmul.f32 %v6498_v62, %v8064_v57  ;;  %v6230_v30 = vunpack.i.h.bf16 %v6228_v4  ;;  %v6240_v57 = vunpack.i.h.bf16 %v6238_v35 }
 0x612   :  { %5926 = vmatmul.msk.f32.gmra.mxu1 %vm1090_vm11, %v1354_v28 }
 0x613   :  { %1422 = vmatpush.msra.mxu0 %v6229_v21  ;;  %v1375_v53 = vadd.f32 %v1348_v8, %v8147_v10 }
 0x615   :  { %1423 = vmatpush.msra.mxu0 %v6230_v30  ;;  %v1378_v44 = vadd.f32 %v1375_v53, %v1351_v61 }
 0x617   :  { %1424 = vmatpush.msra.mxu0 %v6234_v60  ;;  %v1381_v22 = vadd.f32 %v1378_v44, %v1354_v28 }
 0x618   :  { %5903 = vmatmul.msk.f32.vlgmr.msra.gmra.mxu0 %vm1090_vm11, %v8085_v38 }
 0x619   :  { %1598 = vmatpush.msrb.mxu0 %v6235_v51  ;;  %v1384_v2 = vmul.f32 0.25, %v1381_v22 }
 0x61b   :  { %1599 = vmatpush.msrb.mxu0 %v6239_v25  ;;  %1390 = vst.msk [vmem:[#allocation29 + $0x28] sm:$0xff] %vm1090_vm11, %v1384_v2 }
 0x61d   :  { %1600 = vmatpush.msrb.mxu0 %v6240_v57 }
 0x61f   :  { %v1514_v24 = vpop.f32.mrf.mxu3 }
 0x620   :  { %5904 = vmatmul.msk.f32.gmra.mxu0 %vm1090_vm11, %v8093_v37  ;;  %1758 = vrot.lane.b32.xlu1 %v1514_v24, %s7214_s26 }
 0x628   :  { %5905 = vmatmul.msk.f32.gmra.mxu0 %vm1090_vm11, %v8121_v7 }
 0x62f   :  { %v1470_v0 = vpop.f32.mrf.mxu2 }
 0x630   :  { %1746 = vrot.lane.b32.xlu2 %v1470_v0, %s7222_s11 }
 0x637   :  { %v1473_v38 = vpop.f32.mrf.mxu2  ;;  %v1517_v20 = vpop.f32.mrf.mxu3 }
 0x638   :  { %1760 = vrot.lane.b32.xlu2 %v1517_v20, %s7214_s26  ;;  %1748 = vrot.lane.b32.xlu0 %v1473_v38, %s7222_s11 }
 0x63a   :  { %v1558_v6 = vpop.f32.mrf.mxu1 }
 0x63f   :  { %v1476_v27 = vpop.f32.mrf.mxu2 }
 0x640   :  { %1770 = vrot.lane.b32.xlu2 %v1558_v6, %s7239_s15  ;;  %1750 = vrot.lane.b32.xlu1 %v1476_v27, %s7222_s11 }
 0x642   :  { %v1561_v37 = vpop.f32.mrf.mxu1 }
 0x647   :  { %v1520_v29 = vpop.f32.mrf.mxu3  ;;  %v1646_v8 = vpop.f32.mrf.mxu2 }
 0x648   :  { %1772 = vrot.lane.b32.xlu2 %v1561_v37, %s7239_s15  ;;  %1762 = vrot.lane.b32.xlu0 %v1520_v29, %s7214_s26 }
 0x649   :  { %v1273_v11 = vpop.xlane.xlu2 %1272  ;;  %1792 = vrot.lane.b32.xlu1 %v1646_v8, %s7222_s11 }
 0x64a   :  { %6499 = vrcp.f32 %v1273_v11 }
 0x64f   :  { %v1649_v13 = vpop.f32.mrf.mxu2  ;;  %v1690_v47 = vpop.f32.mrf.mxu3 }
 0x650   :  { %v6500_v7 = vpop.eup %6499  ;;  %1804 = vrot.lane.b32.xlu0 %v1690_v47, %s7214_s26 }
 0x651   :  { %v1343_v58 = vmul.f32 %v6500_v7, %v8116_v31  ;;  %1794 = vrot.lane.b32.xlu1 %v1649_v13, %s7222_s11 }
 0x653   :  { %v1373_v5 = vadd.f32 %v8100_v56, %v1343_v58  ;;  %5915 = vmatmul.msk.f32.vlgmr.msrb.gmra.mxu0 %vm1090_vm11, %v1343_v58 }
 0x655   :  { %v1376_v34 = vadd.f32 %v1373_v5, %v8110_v18  ;;  %v1837_v18 = vld [vmem:[#allocation13 + $0x18] sm:$0xff] }
 0x656   :  { %1872 = vmatpush.msra.mxu0 %v1837_v18 }
 0x657   :  { %v1379_v61 = vadd.f32 %v1376_v34, %v8134_v43  ;;  %v1652_v50 = vpop.f32.mrf.mxu2  ;;  %v1693_v26 = vpop.f32.mrf.mxu3 }
 0x658   :  { %1806 = vrot.lane.b32.xlu0 %v1693_v26, %s7214_s26  ;;  %1873 = vmatpush.msra.mxu0 %v1836_v33 }
 0x659   :  { %v1382_v32 = vmul.f32 0.25, %v1379_v61  ;;  %1796 = vrot.lane.b32.xlu1 %v1652_v50, %s7222_s11  ;;  %v1564_v31 = vpop.f32.mrf.mxu1  ;;  %v6367_v61 = vld [vmem:[#allocation14] ss:$0 sm:$0xff] }
 0x65a   :  { %1774 = vrot.lane.b32.xlu2 %v1564_v31, %s7239_s15  ;;  %1874 = vmatpush.msra.mxu0 %v1835_v63 }
 0x65b   :  { %1388 = vst.msk [vmem:[#allocation29 + $0x18] sm:$0xff] %vm1090_vm11, %v1382_v32  ;;  %5916 = vmatmul.msk.f32.gmra.mxu0 %vm1090_vm11, %v8137_v1 }
 0x65c   :  { %1875 = vmatpush.msra.mxu0 %v1834_v54 }
 0x65f   :  { %v1696_v56 = vpop.f32.mrf.mxu3 }
 0x660   :  { %1808 = vrot.lane.b32.xlu0 %v1696_v56, %s7214_s26 }
 0x663   :  { %5917 = vmatmul.msk.f32.gmra.mxu0 %vm1090_vm11, %v8147_v10 }
 0x67f   :  { %v1734_v40 = vpop.f32.mrf.mxu1 }
 0x680   :  { %1816 = vrot.lane.b32.xlu2 %v1734_v40, %s7239_s15 }
 0x687   :  { %v1737_v46 = vpop.f32.mrf.mxu1 }
 0x688   :  { %1818 = vrot.lane.b32.xlu2 %v1737_v46, %s7239_s15 }
 0x68a   :  { %v1747_v43 = vpop.permute.xlu2 %1746 }
 0x68f   :  { %v1740_v16 = vpop.f32.mrf.mxu1 }
 0x690   :  { %1820 = vrot.lane.b32.xlu2 %v1740_v16, %s7239_s15 }
 0x692   :  { %v1761_v1 = vpop.permute.xlu2 %1760  ;;  %v1759_v3 = vpop.permute.xlu1 %1758 }
 0x695   :  { %v1426_v35 = vpop.f32.mrf.mxu0 }
 0x696   :  { %v1779_v59 = vsel %vm743_vm10, %v1426_v35, %v1747_v43 }
 0x697   :  { %v1783_v49 = vsel %vm1782_vm12, %v1779_v59, %v1759_v3 }
 0x69a   :  { %v1771_v9 = vpop.permute.xlu2 %1770 }
 0x69b   :  { %v1786_v12 = vsel %vm1090_vm11, %v1783_v49, %v1771_v9 }
 0x69c   :  { %5927 = vmatmul.msk.f32.vlgmr.msra.gmra.mxu0 %vm428_vm5, %v1786_v12 }
 0x69d   :  { %v1429_v19 = vpop.f32.mrf.mxu0 }
 0x6a2   :  { %v1773_v55 = vpop.permute.xlu2 %1772 }
 0x6a5   :  { %v1432_v21 = vpop.f32.mrf.mxu0 }
 0x6aa   :  { %v1749_v52 = vpop.permute.xlu0 %1748 }
 0x6ab   :  { %v1780_v17 = vsel %vm743_vm10, %v1429_v19, %v1749_v52 }
 0x6ac   :  { %v1784_v62 = vsel %vm1782_vm12, %v1780_v17, %v1761_v1 }
 0x6ad   :  { %v1787_v4 = vsel %vm1090_vm11, %v1784_v62, %v1773_v55 }
 0x6ae   :  { %5928 = vmatmul.msk.f32.gmra.mxu0 %vm428_vm5, %v1787_v4 }
 0x6b2   :  { %v1751_v28 = vpop.permute.xlu1 %1750 }
 0x6b3   :  { %v1781_v10 = vsel %vm743_vm10, %v1432_v21, %v1751_v28 }
 0x6b4   :  { %v1775_v53 = vpop.permute.xlu2 %1774 }
 0x6ba   :  { %v1763_v30 = vpop.permute.xlu0 %1762 }
 0x6bb   :  { %v1785_v60 = vsel %vm1782_vm12, %v1781_v10, %v1763_v30  ;;  %v1793_v22 = vpop.permute.xlu1 %1792 }
 0x6bc   :  { %v1788_v44 = vsel %vm1090_vm11, %v1785_v60, %v1775_v53 }
 0x6bd   :  { %5929 = vmatmul.msk.f32.gmra.mxu0 %vm428_vm5, %v1788_v44 }
 0x6c2   :  { %v1805_v25 = vpop.permute.xlu0 %1804 }
 0x6c3   :  { %v1795_v20 = vpop.permute.xlu1 %1794 }
 0x6ca   :  { %v1807_v6 = vpop.permute.xlu0 %1806 }
 0x6cb   :  { %v1797_v7 = vpop.permute.xlu1 %1796 }
 0x6d0   :  { %v1602_v51 = vpop.f32.mrf.mxu0 }
 0x6d1   :  { %v1825_v2 = vsel %vm743_vm10, %v1602_v51, %v1793_v22 }
 0x6d2   :  { %v1828_v0 = vsel %vm1782_vm12, %v1825_v2, %v1805_v25  ;;  %v1809_v47 = vpop.permute.xlu0 %1808 }
 0x6d8   :  { %v1605_v57 = vpop.f32.mrf.mxu0 }
 0x6d9   :  { %v1826_v27 = vsel %vm743_vm10, %v1605_v57, %v1795_v20 }
 0x6da   :  { %v1817_v24 = vpop.permute.xlu2 %1816  ;;  %v1829_v29 = vsel %vm1782_vm12, %v1826_v27, %v1807_v6 }
 0x6db   :  { %v1831_v38 = vsel %vm1090_vm11, %v1828_v0, %v1817_v24 }
 0x6dc   :  { %5930 = vmatmul.msk.f32.gmra.mxu0 %vm428_vm5, %v1831_v38 }
 0x6e0   :  { %v1608_v11 = vpop.f32.mrf.mxu0 }
 0x6e1   :  { %v1827_v13 = vsel %vm743_vm10, %v1608_v11, %v1797_v7  ;;  %v2056_v7 = vld [vmem:[#allocation16 + $0x18] sm:$0xff] }
 0x6e2   :  { %v1819_v37 = vpop.permute.xlu2 %1818  ;;  %v1830_v5 = vsel %vm1782_vm12, %v1827_v13, %v1809_v47  ;;  %2091 = vmatpush.msra.mxu2 %v2056_v7  ;;  %v2055_v13 = vld [vmem:[#allocation16 + $0x10] sm:$0xff]  ;;  %v2054_v47 = vld [vmem:[#allocation16 + $0x8] sm:$0xff] }
 0x6e3   :  { %v1832_v8 = vsel %vm1090_vm11, %v1829_v29, %v1819_v37 }
 0x6e4   :  { %5931 = vmatmul.msk.f32.gmra.mxu0 %vm428_vm5, %v1832_v8  ;;  %2092 = vmatpush.msra.mxu2 %v2055_v13 }
 0x6e6   :  { %2093 = vmatpush.msra.mxu2 %v2054_v47 }
 0x6ea   :  { %v1821_v58 = vpop.permute.xlu2 %1820 }
 0x6eb   :  { %v1833_v34 = vsel %vm1090_vm11, %v1830_v5, %v1821_v58  ;;  %v2053_v58 = vld [vmem:[#allocation16] sm:$0xff] }
 0x6ec   :  { %5932 = vmatmul.msk.f32.gmra.mxu0 %vm428_vm5, %v1833_v34  ;;  %2094 = vmatpush.msra.mxu2 %v2053_v58 }
 0x719   :  { %v1877_v50 = vpop.f32.mrf.mxu0 }
 0x71a   :  { %v1878_v26 = vadd.f32 %v6367_v61, %v1877_v50 }
 0x71c   :  { %v1895_v32 = vadd.f32 %v1878_v26, %v7547_v42 }
 0x71e   :  { %v1903_v31 = vsel %vm428_vm5, %v1895_v32, 0.0 }
 0x71f   :  { %1904 = vadd.xlane.f32.xlu1 %v1903_v31 }
 0x72b   :  { %v1880_v56 = vpop.f32.mrf.mxu0 }
 0x72c   :  { %v1881_v18 = vadd.f32 %v6367_v61, %v1880_v56 }
 0x72e   :  { %v1896_v33 = vadd.f32 %v1881_v18, %v7554_v48 }
 0x730   :  { %v1906_v63 = vsel %vm428_vm5, %v1896_v33, 0.0 }
 0x731   :  { %1907 = vadd.xlane.f32.xlu0 %v1906_v63 }
 0x73a   :  { %v1883_v54 = vpop.f32.mrf.mxu0 }
 0x73b   :  { %v1884_v40 = vadd.f32 %v6367_v61, %v1883_v54  ;;  %v8256_v54 = vld [vmem:[#allocation22] ss:$0 sm:$0xff] }
 0x73d   :  { %v1897_v46 = vadd.f32 %v1884_v40, %v7565_v23 }
 0x73f   :  { %v1909_v43 = vsel %vm428_vm5, %v1897_v46, 0.0 }
 0x740   :  { %1910 = vadd.xlane.f32.xlu2 %v1909_v43 }
 0x759   :  { %v1886_v16 = vpop.f32.mrf.mxu0 }
 0x75a   :  { %v1887_v1 = vadd.f32 %v6367_v61, %v1886_v16  ;;  %v8258_v16 = vld [vmem:[#allocation23] ss:$0 sm:$0xff] }
 0x75c   :  { %v1898_v42 = vadd.f32 %v1887_v1, %v7577_v39 }
 0x75e   :  { %v1912_v35 = vsel %vm428_vm5, %v1898_v42, 0.0 }
 0x75f   :  { %1913 = vadd.xlane.f32.xlu1 %v1912_v35 }
 0x761   :  { %v1889_v59 = vpop.f32.mrf.mxu0 }
 0x762   :  { %v1890_v3 = vadd.f32 %v6367_v61, %v1889_v59 }
 0x764   :  { %v1899_v48 = vadd.f32 %v1890_v3, %v7586_v41 }
 0x766   :  { %v1915_v49 = vsel %vm428_vm5, %v1899_v48, 0.0 }
 0x767   :  { %1916 = vadd.xlane.f32.xlu2 %v1915_v49 }
 0x769   :  { %v1892_v9 = vpop.f32.mrf.mxu0 }
 0x76a   :  { %v1893_v12 = vadd.f32 %v6367_v61, %v1892_v9 }
 0x76c   :  { %v1900_v23 = vadd.f32 %v1893_v12, %v7574_v36 }
 0x76e   :  { %v1918_v19 = vsel %vm428_vm5, %v1900_v23, 0.0 }
 0x76f   :  { %1919 = vadd.xlane.f32.xlu0 %v1918_v19 }
 0x792   :  { %v1905_v52 = vpop.xlane.xlu1 %1904 }
 0x793   :  { %v1921_v39 = vmul.f32 %v1905_v52, %v7487_v45 }
 0x795   :  { %v1927_v17 = vsub.f32 %v1895_v32, %v1921_v39 }
 0x797   :  { %v1933_v55 = vmul.f32 %v1927_v17, %v1927_v17 }
 0x799   :  { %v1939_v62 = vsel %vm428_vm5, %v1933_v55, 0.0 }
 0x79a   :  { %1940 = vadd.xlane.f32.xlu1 %v1939_v62 }
 0x7a4   :  { %v1908_v4 = vpop.xlane.xlu0 %1907 }
 0x7a5   :  { %v1922_v41 = vmul.f32 %v1908_v4, %v7487_v45 }
 0x7a7   :  { %v8225_v28 = vsub.f32 %v1896_v33, %v1922_v41 }
 0x7a9   :  { %v1934_v21 = vmul.f32 %v8225_v28, %v8225_v28 }
 0x7ab   :  { %v1942_v36 = vsel %vm428_vm5, %v1934_v21, 0.0 }
 0x7ac   :  { %1943 = vadd.xlane.f32.xlu2 %v1942_v36 }
 0x7b3   :  { %v1911_v10 = vpop.xlane.xlu2 %1910 }
 0x7b4   :  { %v1923_v30 = vmul.f32 %v1911_v10, %v7487_v45 }
 0x7b6   :  { %v8231_v53 = vsub.f32 %v1897_v46, %v1923_v30 }
 0x7b8   :  { %v1935_v60 = vmul.f32 %v8231_v53, %v8231_v53 }
 0x7ba   :  { %v1945_v44 = vsel %vm428_vm5, %v1935_v60, 0.0 }
 0x7bb   :  { %1946 = vadd.xlane.f32.xlu0 %v1945_v44 }
 0x7d2   :  { %v1914_v51 = vpop.xlane.xlu1 %1913 }
 0x7d3   :  { %v1924_v22 = vmul.f32 %v1914_v51, %v7487_v45 }
 0x7d5   :  { %v8237_v25 = vsub.f32 %v1898_v42, %v1924_v22 }
 0x7d7   :  { %v1936_v2 = vmul.f32 %v8237_v25, %v8237_v25 }
 0x7d9   :  { %v1948_v57 = vsel %vm428_vm5, %v1936_v2, 0.0 }
 0x7da   :  { %v1917_v24 = vpop.xlane.xlu2 %1916  ;;  %1949 = vadd.xlane.f32.xlu1 %v1948_v57 }
 0x7db   :  { %v1925_v0 = vmul.f32 %v1917_v24, %v7487_v45 }
 0x7dd   :  { %v8243_v38 = vsub.f32 %v1899_v48, %v1925_v0 }
 0x7df   :  { %v1937_v20 = vmul.f32 %v8243_v38, %v8243_v38 }
 0x7e1   :  { %v1951_v6 = vsel %vm428_vm5, %v1937_v20, 0.0 }
 0x7e2   :  { %1952 = vadd.xlane.f32.xlu2 %v1951_v6  ;;  %v1920_v27 = vpop.xlane.xlu0 %1919 }
 0x7e3   :  { %v1926_v37 = vmul.f32 %v1920_v27, %v7487_v45 }
 0x7e5   :  { %v8249_v29 = vsub.f32 %v1900_v23, %v1926_v37 }
 0x7e7   :  { %v1938_v8 = vmul.f32 %v8249_v29, %v8249_v29 }
 0x7e9   :  { %v1954_v11 = vsel %vm428_vm5, %v1938_v8, 0.0 }
 0x7ea   :  { %1955 = vadd.xlane.f32.xlu0 %v1954_v11 }
 0x80d   :  { %v1941_v5 = vpop.xlane.xlu1 %1940 }
 0x80e   :  { %v1957_v34 = vmul.f32 %v1941_v5, %v7487_v45 }
 0x810   :  { %v1963_v61 = vadd.f32 1e-05, %v1957_v34 }
 0x812   :  { %6501 = vrsqrt.f32 %v1963_v61  ;;  %vm1975_vm14 = vweird.f32 %v1963_v61 }
 0x818   :  { %v6502_v50 = vpop.eup %6501 }
 0x819   :  { %v1970_v26 = vmul.f32 %v6502_v50, %v1963_v61  ;;  %vm1976_vm13 = vweird.f32 %v6502_v50 }
 0x81a   :  { %vm1977_vm15 = vmor %vm1975_vm14, %vm1976_vm13 }
 0x81b   :  { %v1971_v32 = vmul.f32 %v6502_v50, %v1970_v26 }
 0x81d   :  { %v1972_v31 = vmul.f32 0.5, %v1971_v32 }
 0x81f   :  { %v1973_v56 = vsub.f32 1.5, %v1972_v31  ;;  %v1944_v18 = vpop.xlane.xlu2 %1943 }
 0x820   :  { %v1958_v33 = vmul.f32 %v1944_v18, %v7487_v45 }
 0x821   :  { %v1974_v63 = vmul.f32 %v6502_v50, %v1973_v56 }
 0x822   :  { %v1964_v40 = vadd.f32 1e-05, %v1958_v33 }
 0x823   :  { %v1978_v46 = vsel %vm1977_vm15, %v6502_v50, %v1974_v63 }
 0x824   :  { %v2029_v43 = vmul.f32 %v1978_v46, %v1927_v17  ;;  %6503 = vrsqrt.f32 %v1964_v40  ;;  %vm1985_vm1 = vweird.f32 %v1964_v40 }
 0x826   :  { %v2038_v1 = vmul.f32 %v8256_v54, %v2029_v43 }
 0x828   :  { %v8262_v42 = vadd.f32 %v8258_v16, %v2038_v1 }
 0x82a   :  { %v6504_v35 = vpop.eup %6503  ;;  %5933 = vmatmul.msk.f32.vlgmr.msra.gmra.mxu2 %vm428_vm5, %v8262_v42 }
 0x82b   :  { %v1980_v59 = vmul.f32 %v6504_v35, %v1964_v40  ;;  %vm1986_vm0 = vweird.f32 %v6504_v35 }
 0x82c   :  { %vm1987_vm2 = vmor %vm1985_vm1, %vm1986_vm0 }
 0x82d   :  { %v1981_v3 = vmul.f32 %v6504_v35, %v1980_v59 }
 0x82e   :  { %v1947_v48 = vpop.xlane.xlu0 %1946 }
 0x82f   :  { %v1982_v49 = vmul.f32 0.5, %v1981_v3  ;;  %v1959_v9 = vmul.f32 %v1947_v48, %v7487_v45 }
 0x831   :  { %v1983_v12 = vsub.f32 1.5, %v1982_v49  ;;  %v1965_v23 = vadd.f32 1e-05, %v1959_v9 }
 0x833   :  { %v1984_v19 = vmul.f32 %v6504_v35, %v1983_v12  ;;  %6505 = vrsqrt.f32 %v1965_v23  ;;  %vm1995_vm4 = vweird.f32 %v1965_v23  ;;  %v2122_v12 = vld [vmem:[#allocation19 + $0x10] sm:$0xff] }
 0x835   :  { %v1988_v52 = vsel %vm1987_vm2, %v6504_v35, %v1984_v19  ;;  %v2120_v19 = vld [vmem:[#allocation19] sm:$0xff] }
 0x836   :  { %v2030_v39 = vmul.f32 %v1988_v52, %v8225_v28  ;;  %v6370_v52 = vld [vmem:[#allocation17] ss:$0 sm:$0xff] }
 0x838   :  { %v2039_v17 = vmul.f32 %v8256_v54, %v2030_v39 }
 0x839   :  { %v6506_v55 = vpop.eup %6505 }
 0x83a   :  { %v1990_v62 = vmul.f32 %v6506_v55, %v1965_v23  ;;  %v8270_v4 = vadd.f32 %v8258_v16, %v2039_v17  ;;  %vm1996_vm3 = vweird.f32 %v6506_v55  ;;  %v2121_v23 = vld [vmem:[#allocation19 + $0x8] sm:$0xff] }
 0x83b   :  { %vm1997_vm6 = vmor %vm1995_vm4, %vm1996_vm3 }
 0x83c   :  { %v1991_v41 = vmul.f32 %v6506_v55, %v1990_v62  ;;  %5934 = vmatmul.msk.f32.gmra.mxu2 %vm428_vm5, %v8270_v4 }
 0x83e   :  { %v1992_v21 = vmul.f32 0.5, %v1991_v41 }
 0x840   :  { %v1993_v36 = vsub.f32 1.5, %v1992_v21 }
 0x842   :  { %v1994_v10 = vmul.f32 %v6506_v55, %v1993_v36 }
 0x844   :  { %v1998_v30 = vsel %vm1997_vm6, %v6506_v55, %v1994_v10 }
 0x845   :  { %v2031_v28 = vmul.f32 %v1998_v30, %v8231_v53  ;;  %v2123_v53 = vld [vmem:[#allocation19 + $0x18] sm:$0xff] }
 0x846   :  { %2158 = vmatpush.msrb.mxu3 %v2123_v53 }
 0x847   :  { %v2040_v60 = vmul.f32 %v8256_v54, %v2031_v28 }
 0x848   :  { %2159 = vmatpush.msrb.mxu3 %v2122_v12 }
 0x849   :  { %v8277_v44 = vadd.f32 %v8258_v16, %v2040_v60 }
 0x84a   :  { %2160 = vmatpush.msrb.mxu3 %v2121_v23 }
 0x84b   :  { %5935 = vmatmul.msk.f32.gmra.mxu2 %vm428_vm5, %v8277_v44 }
 0x84c   :  { %2161 = vmatpush.msrb.mxu3 %v2120_v19 }
 0x84d   :  { %v1950_v51 = vpop.xlane.xlu1 %1949 }
 0x84e   :  { %v1960_v22 = vmul.f32 %v1950_v51, %v7487_v45 }
 0x850   :  { %v1966_v2 = vadd.f32 1e-05, %v1960_v22 }
 0x852   :  { %6507 = vrsqrt.f32 %v1966_v2  ;;  %vm2005_vm8 = vweird.f32 %v1966_v2 }
 0x855   :  { %v1953_v57 = vpop.xlane.xlu2 %1952 }
 0x856   :  { %v1961_v24 = vmul.f32 %v1953_v57, %v7487_v45 }
 0x858   :  { %v6508_v0 = vpop.eup %6507  ;;  %v1967_v20 = vadd.f32 1e-05, %v1961_v24  ;;  %v6371_v24 = vld [vmem:[#allocation20] ss:$0 sm:$0xff] }
 0x859   :  { %v2000_v6 = vmul.f32 %v6508_v0, %v1966_v2  ;;  %vm2006_vm7 = vweird.f32 %v6508_v0 }
 0x85a   :  { %6509 = vrsqrt.f32 %v1967_v20  ;;  %vm2007_vm9 = vmor %vm2005_vm8, %vm2006_vm7  ;;  %vm2015_vm14 = vweird.f32 %v1967_v20 }
 0x85b   :  { %v2001_v27 = vmul.f32 %v6508_v0, %v2000_v6 }
 0x85d   :  { %v2002_v37 = vmul.f32 0.5, %v2001_v27  ;;  %v1956_v8 = vpop.xlane.xlu0 %1955 }
 0x85e   :  { %v1962_v11 = vmul.f32 %v1956_v8, %v7487_v45 }
 0x85f   :  { %v2003_v7 = vsub.f32 1.5, %v2002_v37 }
 0x860   :  { %v6510_v13 = vpop.eup %6509  ;;  %v1968_v47 = vadd.f32 1e-05, %v1962_v11 }
 0x861   :  { %v2004_v58 = vmul.f32 %v6508_v0, %v2003_v7  ;;  %v2010_v5 = vmul.f32 %v6510_v13, %v1967_v20  ;;  %vm2016_vm13 = vweird.f32 %v6510_v13 }
 0x862   :  { %6511 = vrsqrt.f32 %v1968_v47  ;;  %vm2017_vm15 = vmor %vm2015_vm14, %vm2016_vm13  ;;  %vm2025_vm1 = vweird.f32 %v1968_v47 }
 0x863   :  { %v2011_v34 = vmul.f32 %v6510_v13, %v2010_v5  ;;  %v2008_v61 = vsel %vm2007_vm9, %v6508_v0, %v2004_v58 }
 0x864   :  { %v2032_v50 = vmul.f32 %v2008_v61, %v8237_v25 }
 0x865   :  { %v2012_v26 = vmul.f32 0.5, %v2011_v34 }
 0x866   :  { %v2041_v32 = vmul.f32 %v8256_v54, %v2032_v50 }
 0x867   :  { %v2013_v31 = vsub.f32 1.5, %v2012_v26 }
 0x868   :  { %v6512_v56 = vpop.eup %6511  ;;  %v8287_v18 = vadd.f32 %v8258_v16, %v2041_v32 }
 0x869   :  { %v2014_v33 = vmul.f32 %v6510_v13, %v2013_v31  ;;  %v2020_v63 = vmul.f32 %v6512_v56, %v1968_v47  ;;  %vm2026_vm0 = vweird.f32 %v6512_v56 }
 0x86a   :  { %5936 = vmatmul.msk.f32.gmra.mxu2 %vm428_vm5, %v8287_v18  ;;  %vm2027_vm2 = vmor %vm2025_vm1, %vm2026_vm0 }
 0x86b   :  { %v2021_v40 = vmul.f32 %v6512_v56, %v2020_v63  ;;  %v2018_v46 = vsel %vm2017_vm15, %v6510_v13, %v2014_v33 }
 0x86c   :  { %v2033_v25 = vmul.f32 %v2018_v46, %v8243_v38 }
 0x86d   :  { %v2022_v43 = vmul.f32 0.5, %v2021_v40 }
 0x86e   :  { %v2042_v1 = vmul.f32 %v8256_v54, %v2033_v25 }
 0x86f   :  { %v2023_v35 = vsub.f32 1.5, %v2022_v43 }
 0x870   :  { %v8294_v59 = vadd.f32 %v8258_v16, %v2042_v1 }
 0x871   :  { %v2024_v3 = vmul.f32 %v6512_v56, %v2023_v35 }
 0x872   :  { %5937 = vmatmul.msk.f32.gmra.mxu2 %vm428_vm5, %v8294_v59 }
 0x873   :  { %v2028_v48 = vsel %vm2027_vm2, %v6512_v56, %v2024_v3 }
 0x874   :  { %v2034_v49 = vmul.f32 %v2028_v48, %v8249_v29 }
 0x876   :  { %v2043_v9 = vmul.f32 %v8256_v54, %v2034_v49 }
 0x878   :  { %v2052_v38 = vadd.f32 %v8258_v16, %v2043_v9 }
 0x87a   :  { %5938 = vmatmul.msk.f32.gmra.mxu2 %vm428_vm5, %v2052_v38 }
 0x8ad   :  { %v2096_v39 = vpop.f32.mrf.mxu2 }
 0x8ae   :  { %v2097_v17 = vadd.f32 %v6370_v52, %v2096_v39 }
 0x8b0   :  { %v2114_v55 = vmax.f32 %v2097_v17, 0.0 }
 0x8b2   :  { %5939 = vmatmul.msk.f32.vlgmr.msrb.gmra.mxu3 %vm428_vm5, %v2114_v55 }
 0x8bf   :  { %v2099_v62 = vpop.f32.mrf.mxu2 }
 0x8c0   :  { %v2100_v29 = vadd.f32 %v6370_v52, %v2099_v62 }
 0x8c2   :  { %v2115_v41 = vmax.f32 %v2100_v29, 0.0 }
 0x8c4   :  { %5940 = vmatmul.msk.f32.gmra.mxu3 %vm428_vm5, %v2115_v41 }
 0x8ce   :  { %v2102_v54 = vpop.f32.mrf.mxu2 }
 0x8cf   :  { %v2103_v16 = vadd.f32 %v6370_v52, %v2102_v54 }
 0x8d1   :  { %v2116_v21 = vmax.f32 %v2103_v16, 0.0 }
 0x8d3   :  { %5941 = vmatmul.msk.f32.gmra.mxu3 %vm428_vm5, %v2116_v21 }
 0x8ed   :  { %v2105_v36 = vpop.f32.mrf.mxu2 }
 0x8ee   :  { %v2106_v10 = vadd.f32 %v6370_v52, %v2105_v36 }
 0x8f0   :  { %v2117_v30 = vmax.f32 %v2106_v10, 0.0 }
 0x8f2   :  { %5942 = vmatmul.msk.f32.gmra.mxu3 %vm428_vm5, %v2117_v30 }
 0x8f5   :  { %v2108_v28 = vpop.f32.mrf.mxu2 }
 0x8f6   :  { %v2109_v60 = vadd.f32 %v6370_v52, %v2108_v28  ;;  %v5948_v28 = vld [vmem:[%s10040_s8 + $0x38] sm:$0xff] }
 0x8f7   :  { %2379 = vmatpush.msrb.mxu1 %v5948_v28 }
 0x8f8   :  { %v2118_v51 = vmax.f32 %v2109_v60, 0.0  ;;  %v5947_v60 = vld [vmem:[%s10040_s8 + $0x30] sm:$0xff] }
 0x8f9   :  { %2380 = vmatpush.msrb.mxu1 %v5947_v60 }
 0x8fa   :  { %5943 = vmatmul.msk.f32.gmra.mxu3 %vm428_vm5, %v2118_v51  ;;  %v5946_v51 = vld [vmem:[%s10040_s8 + $0x28] sm:$0xff] }
 0x8fb   :  { %2381 = vmatpush.msrb.mxu1 %v5946_v51 }
 0x8fd   :  { %v2111_v22 = vpop.f32.mrf.mxu2 }
 0x8fe   :  { %v2112_v2 = vadd.f32 %v6370_v52, %v2111_v22  ;;  %v5945_v22 = vld [vmem:[%s10040_s8 + $0x20] sm:$0xff] }
 0x8ff   :  { %2382 = vmatpush.msrb.mxu1 %v5945_v22 }
 0x900   :  { %v2119_v57 = vmax.f32 %v2112_v2, 0.0 }
 0x902   :  { %5944 = vmatmul.msk.f32.gmra.mxu3 %vm428_vm5, %v2119_v57 }
 0x935   :  { %v2163_v0 = vpop.f32.mrf.mxu3 }
 0x936   :  { %v2164_v20 = vadd.f32 %v6371_v24, %v2163_v0 }
 0x938   :  { %v2181_v6 = vadd.f32 %v2164_v20, %v8262_v42 }
 0x93a   :  { %v2189_v53 = vsel %vm428_vm5, %v2181_v6, 0.0 }
 0x93b   :  { %2190 = vadd.xlane.f32.xlu1 %v2189_v53 }
 0x947   :  { %v2166_v27 = vpop.f32.mrf.mxu3 }
 0x948   :  { %v2167_v37 = vadd.f32 %v6371_v24, %v2166_v27 }
 0x94a   :  { %v2182_v8 = vadd.f32 %v2167_v37, %v8270_v4 }
 0x94c   :  { %v2192_v11 = vsel %vm428_vm5, %v2182_v8, 0.0 }
 0x94d   :  { %2193 = vadd.xlane.f32.xlu2 %v2192_v11 }
 0x956   :  { %v2169_v7 = vpop.f32.mrf.mxu3 }
 0x957   :  { %v2170_v13 = vadd.f32 %v6371_v24, %v2169_v7  ;;  %v8365_v7 = vld [vmem:[#allocation25] ss:$0 sm:$0xff] }
 0x959   :  { %v2183_v47 = vadd.f32 %v2170_v13, %v8277_v44 }
 0x95b   :  { %v2195_v58 = vsel %vm428_vm5, %v2183_v47, 0.0 }
 0x95c   :  { %2196 = vadd.xlane.f32.xlu0 %v2195_v58 }
 0x975   :  { %v2172_v5 = vpop.f32.mrf.mxu3 }
 0x976   :  { %v2173_v34 = vadd.f32 %v6371_v24, %v2172_v5  ;;  %v8367_v5 = vld [vmem:[#allocation26] ss:$0 sm:$0xff] }
 0x978   :  { %v2184_v42 = vadd.f32 %v2173_v34, %v8287_v18 }
 0x97a   :  { %v2198_v61 = vsel %vm428_vm5, %v2184_v42, 0.0 }
 0x97b   :  { %2199 = vadd.xlane.f32.xlu1 %v2198_v61 }
 0x97d   :  { %v2175_v50 = vpop.f32.mrf.mxu3 }
 0x97e   :  { %v2176_v26 = vadd.f32 %v6371_v24, %v2175_v50 }
 0x980   :  { %v2185_v4 = vadd.f32 %v2176_v26, %v8294_v59 }
 0x982   :  { %v2201_v32 = vsel %vm428_vm5, %v2185_v4, 0.0 }
 0x983   :  { %2202 = vadd.xlane.f32.xlu2 %v2201_v32 }
 0x985   :  { %v2178_v31 = vpop.f32.mrf.mxu3 }
 0x986   :  { %v2179_v56 = vadd.f32 %v6371_v24, %v2178_v31 }
 0x988   :  { %v2186_v44 = vadd.f32 %v2179_v56, %v2052_v38 }
 0x98a   :  { %v2204_v33 = vsel %vm428_vm5, %v2186_v44, 0.0 }
 0x98b   :  { %2205 = vadd.xlane.f32.xlu0 %v2204_v33 }
 0x9ae   :  { %v2191_v63 = vpop.xlane.xlu1 %2190 }
 0x9af   :  { %v2207_v40 = vmul.f32 %v2191_v63, %v7487_v45 }
 0x9b1   :  { %v2213_v18 = vsub.f32 %v2181_v6, %v2207_v40 }
 0x9b3   :  { %v2219_v46 = vmul.f32 %v2213_v18, %v2213_v18 }
 0x9b5   :  { %v2225_v25 = vsel %vm428_vm5, %v2219_v46, 0.0 }
 0x9b6   :  { %2226 = vadd.xlane.f32.xlu1 %v2225_v25 }
 0x9c0   :  { %v2194_v43 = vpop.xlane.xlu2 %2193 }
 0x9c1   :  { %v2208_v1 = vmul.f32 %v2194_v43, %v7487_v45 }
 0x9c3   :  { %v8322_v35 = vsub.f32 %v2182_v8, %v2208_v1 }
 0x9c5   :  { %v2220_v59 = vmul.f32 %v8322_v35, %v8322_v35 }
 0x9c7   :  { %v2228_v3 = vsel %vm428_vm5, %v2220_v59, 0.0 }
 0x9c8   :  { %2229 = vadd.xlane.f32.xlu2 %v2228_v3 }
 0x9cf   :  { %v2197_v48 = vpop.xlane.xlu0 %2196 }
 0x9d0   :  { %v2209_v49 = vmul.f32 %v2197_v48, %v7487_v45 }
 0x9d2   :  { %v8328_v9 = vsub.f32 %v2183_v47, %v2209_v49 }
 0x9d4   :  { %v2221_v38 = vmul.f32 %v8328_v9, %v8328_v9 }
 0x9d6   :  { %v2231_v12 = vsel %vm428_vm5, %v2221_v38, 0.0 }
 0x9d7   :  { %2232 = vadd.xlane.f32.xlu0 %v2231_v12 }
 0x9ee   :  { %v2200_v23 = vpop.xlane.xlu1 %2199 }
 0x9ef   :  { %v2210_v19 = vmul.f32 %v2200_v23, %v7487_v45 }
 0x9f1   :  { %v8334_v52 = vsub.f32 %v2184_v42, %v2210_v19 }
 0x9f3   :  { %v2222_v39 = vmul.f32 %v8334_v52, %v8334_v52 }
 0x9f5   :  { %v2234_v17 = vsel %vm428_vm5, %v2222_v39, 0.0 }
 0x9f6   :  { %v2203_v55 = vpop.xlane.xlu2 %2202  ;;  %2235 = vadd.xlane.f32.xlu1 %v2234_v17 }
 0x9f7   :  { %v2211_v62 = vmul.f32 %v2203_v55, %v7487_v45 }
 0x9f9   :  { %v8340_v29 = vsub.f32 %v2185_v4, %v2211_v62 }
 0x9fb   :  { %v2223_v41 = vmul.f32 %v8340_v29, %v8340_v29 }
 0x9fd   :  { %v2237_v54 = vsel %vm428_vm5, %v2223_v41, 0.0 }
 0x9fe   :  { %v2206_v16 = vpop.xlane.xlu0 %2205  ;;  %2238 = vadd.xlane.f32.xlu2 %v2237_v54 }
 0x9ff   :  { %v2212_v21 = vmul.f32 %v2206_v16, %v7487_v45 }
 0xa01   :  { %v8346_v36 = vsub.f32 %v2186_v44, %v2212_v21 }
 0xa03   :  { %v2224_v10 = vmul.f32 %v8346_v36, %v8346_v36 }
 0xa05   :  { %v2240_v30 = vsel %vm428_vm5, %v2224_v10, 0.0 }
 0xa06   :  { %2241 = vadd.xlane.f32.xlu0 %v2240_v30 }
 0xa29   :  { %v2227_v2 = vpop.xlane.xlu1 %2226 }
 0xa2a   :  { %v2243_v57 = vmul.f32 %v2227_v2, %v7487_v45 }
 0xa2c   :  { %v2249_v24 = vadd.f32 1e-05, %v2243_v57 }
 0xa2e   :  { %6513 = vrsqrt.f32 %v2249_v24  ;;  %vm2261_vm4 = vweird.f32 %v2249_v24 }
 0xa34   :  { %v6514_v0 = vpop.eup %6513 }
 0xa35   :  { %v2256_v20 = vmul.f32 %v6514_v0, %v2249_v24  ;;  %vm2262_vm3 = vweird.f32 %v6514_v0 }
 0xa36   :  { %vm2263_vm6 = vmor %vm2261_vm4, %vm2262_vm3 }
 0xa37   :  { %v2257_v6 = vmul.f32 %v6514_v0, %v2256_v20 }
 0xa39   :  { %v2258_v53 = vmul.f32 0.5, %v2257_v6 }
 0xa3b   :  { %v2259_v27 = vsub.f32 1.5, %v2258_v53  ;;  %v2230_v37 = vpop.xlane.xlu2 %2229 }
 0xa3c   :  { %v2244_v8 = vmul.f32 %v2230_v37, %v7487_v45 }
 0xa3d   :  { %v2260_v11 = vmul.f32 %v6514_v0, %v2259_v27 }
 0xa3e   :  { %v2250_v13 = vadd.f32 1e-05, %v2244_v8 }
 0xa3f   :  { %v2264_v47 = vsel %vm2263_vm6, %v6514_v0, %v2260_v11 }
 0xa40   :  { %v2315_v58 = vmul.f32 %v2264_v47, %v2213_v18  ;;  %6515 = vrsqrt.f32 %v2250_v13  ;;  %vm2271_vm8 = vweird.f32 %v2250_v13 }
 0xa42   :  { %v2324_v34 = vmul.f32 %v8365_v7, %v2315_v58 }
 0xa44   :  { %v8371_v42 = vadd.f32 %v8367_v5, %v2324_v34 }
 0xa46   :  { %v6516_v61 = vpop.eup %6515  ;;  %5949 = vmatmul.msk.f32.vlgmr.msrb.gmra.mxu1 %vm428_vm5, %v8371_v42 }
 0xa47   :  { %v2266_v50 = vmul.f32 %v6516_v61, %v2250_v13  ;;  %vm2272_vm7 = vweird.f32 %v6516_v61 }
 0xa48   :  { %vm2273_vm9 = vmor %vm2271_vm8, %vm2272_vm7 }
 0xa49   :  { %v2267_v26 = vmul.f32 %v6516_v61, %v2266_v50 }
 0xa4a   :  { %v2233_v4 = vpop.xlane.xlu0 %2232 }
 0xa4b   :  { %v2268_v32 = vmul.f32 0.5, %v2267_v26  ;;  %v2245_v31 = vmul.f32 %v2233_v4, %v7487_v45 }
 0xa4d   :  { %v2269_v56 = vsub.f32 1.5, %v2268_v32  ;;  %v2251_v44 = vadd.f32 1e-05, %v2245_v31  ;;  %v6374_v31 = vld [vmem:[#allocation11 + $0x1] ss:$0 sm:$0xff] }
 0xa4f   :  { %v2270_v33 = vmul.f32 %v6516_v61, %v2269_v56  ;;  %6517 = vrsqrt.f32 %v2251_v44  ;;  %vm2281_vm14 = vweird.f32 %v2251_v44 }
 0xa51   :  { %v2274_v63 = vsel %vm2273_vm9, %v6516_v61, %v2270_v33 }
 0xa52   :  { %v2316_v40 = vmul.f32 %v2274_v63, %v8322_v35 }
 0xa54   :  { %v2325_v18 = vmul.f32 %v8365_v7, %v2316_v40 }
 0xa55   :  { %v6518_v46 = vpop.eup %6517 }
 0xa56   :  { %v2276_v25 = vmul.f32 %v6518_v46, %v2251_v44  ;;  %v8379_v43 = vadd.f32 %v8367_v5, %v2325_v18  ;;  %vm2282_vm13 = vweird.f32 %v6518_v46 }
 0xa57   :  { %vm2283_vm15 = vmor %vm2281_vm14, %vm2282_vm13 }
 0xa58   :  { %v2277_v1 = vmul.f32 %v6518_v46, %v2276_v25  ;;  %5950 = vmatmul.msk.f32.gmra.mxu1 %vm428_vm5, %v8379_v43 }
 0xa5a   :  { %v2278_v59 = vmul.f32 0.5, %v2277_v1 }
 0xa5c   :  { %v2279_v3 = vsub.f32 1.5, %v2278_v59 }
 0xa5e   :  { %v2280_v48 = vmul.f32 %v6518_v46, %v2279_v3 }
 0xa60   :  { %v2284_v49 = vsel %vm2283_vm15, %v6518_v46, %v2280_v48 }
 0xa61   :  { %v2317_v35 = vmul.f32 %v2284_v49, %v8328_v9 }
 0xa63   :  { %v2326_v38 = vmul.f32 %v8365_v7, %v2317_v35 }
 0xa65   :  { %v8386_v12 = vadd.f32 %v8367_v5, %v2326_v38 }
 0xa67   :  { %5951 = vmatmul.msk.f32.gmra.mxu1 %vm428_vm5, %v8386_v12 }
 0xa69   :  { %v2236_v23 = vpop.xlane.xlu1 %2235 }
 0xa6a   :  { %v2246_v19 = vmul.f32 %v2236_v23, %v7487_v45 }
 0xa6c   :  { %v2252_v39 = vadd.f32 1e-05, %v2246_v19 }
 0xa6e   :  { %6519 = vrsqrt.f32 %v2252_v39  ;;  %vm2291_vm1 = vweird.f32 %v2252_v39 }
 0xa71   :  { %v2239_v17 = vpop.xlane.xlu2 %2238 }
 0xa72   :  { %v2247_v55 = vmul.f32 %v2239_v17, %v7487_v45 }
 0xa74   :  { %v6520_v62 = vpop.eup %6519  ;;  %v2253_v41 = vadd.f32 1e-05, %v2247_v55 }
 0xa75   :  { %v2286_v54 = vmul.f32 %v6520_v62, %v2252_v39  ;;  %vm2292_vm0 = vweird.f32 %v6520_v62 }
 0xa76   :  { %6521 = vrsqrt.f32 %v2253_v41  ;;  %vm2293_vm2 = vmor %vm2291_vm1, %vm2292_vm0  ;;  %vm2301_vm4 = vweird.f32 %v2253_v41 }
 0xa77   :  { %v2287_v9 = vmul.f32 %v6520_v62, %v2286_v54 }
 0xa79   :  { %v2288_v16 = vmul.f32 0.5, %v2287_v9  ;;  %v2242_v21 = vpop.xlane.xlu0 %2241 }
 0xa7a   :  { %v2248_v10 = vmul.f32 %v2242_v21, %v7487_v45 }
 0xa7b   :  { %v2289_v30 = vsub.f32 1.5, %v2288_v16 }
 0xa7c   :  { %v6522_v28 = vpop.eup %6521  ;;  %v2254_v60 = vadd.f32 1e-05, %v2248_v10 }
 0xa7d   :  { %v2290_v51 = vmul.f32 %v6520_v62, %v2289_v30  ;;  %v2296_v22 = vmul.f32 %v6522_v28, %v2253_v41  ;;  %vm2302_vm3 = vweird.f32 %v6522_v28 }
 0xa7e   :  { %6523 = vrsqrt.f32 %v2254_v60  ;;  %vm2303_vm6 = vmor %vm2301_vm4, %vm2302_vm3  ;;  %vm2311_vm8 = vweird.f32 %v2254_v60 }
 0xa7f   :  { %v2297_v2 = vmul.f32 %v6522_v28, %v2296_v22  ;;  %v2294_v57 = vsel %vm2293_vm2, %v6520_v62, %v2290_v51 }
 0xa80   :  { %v2318_v24 = vmul.f32 %v2294_v57, %v8334_v52 }
 0xa81   :  { %v2298_v0 = vmul.f32 0.5, %v2297_v2 }
 0xa82   :  { %v2327_v20 = vmul.f32 %v8365_v7, %v2318_v24 }
 0xa83   :  { %v2299_v6 = vsub.f32 1.5, %v2298_v0 }
 0xa84   :  { %v6524_v53 = vpop.eup %6523  ;;  %v8396_v27 = vadd.f32 %v8367_v5, %v2327_v20 }
 0xa85   :  { %v2300_v37 = vmul.f32 %v6522_v28, %v2299_v6  ;;  %v2306_v8 = vmul.f32 %v6524_v53, %v2254_v60  ;;  %vm2312_vm7 = vweird.f32 %v6524_v53 }
 0xa86   :  { %5952 = vmatmul.msk.f32.gmra.mxu1 %vm428_vm5, %v8396_v27  ;;  %vm2313_vm9 = vmor %vm2311_vm8, %vm2312_vm7 }
 0xa87   :  { %v2304_v11 = vsel %vm2303_vm6, %v6522_v28, %v2300_v37  ;;  %v2307_v13 = vmul.f32 %v6524_v53, %v2306_v8 }
 0xa88   :  { %v2319_v52 = vmul.f32 %v2304_v11, %v8340_v29 }
 0xa89   :  { %v2308_v47 = vmul.f32 0.5, %v2307_v13 }
 0xa8a   :  { %v2328_v58 = vmul.f32 %v8365_v7, %v2319_v52 }
 0xa8b   :  { %v2309_v34 = vsub.f32 1.5, %v2308_v47 }
 0xa8c   :  { %v8403_v61 = vadd.f32 %v8367_v5, %v2328_v58 }
 0xa8d   :  { %v2310_v50 = vmul.f32 %v6524_v53, %v2309_v34 }
 0xa8e   :  { %5953 = vmatmul.msk.f32.gmra.mxu1 %vm428_vm5, %v8403_v61 }
 0xa8f   :  { %v2314_v26 = vsel %vm2313_vm9, %v6524_v53, %v2310_v50 }
 0xa90   :  { %v2320_v4 = vmul.f32 %v2314_v26, %v8346_v36 }
 0xa92   :  { %v2329_v32 = vmul.f32 %v8365_v7, %v2320_v4 }
 0xa94   :  { %v8410_v29 = vadd.f32 %v8367_v5, %v2329_v32 }
 0xa96   :  { %5954 = vmatmul.msk.f32.gmra.mxu1 %vm428_vm5, %v8410_v29 }
 0xac3   :  { %v2384_v56 = vpop.f32.mrf.mxu1 }
 0xac4   :  { %v8414_v44 = vadd.f32 %v6374_v31, %v2384_v56 }
 0xac6   :  { %2459 = vrot.lane.b32.xlu2 %v8414_v44, %s7236_s12  ;;  %2453 = vrot.lane.b32.xlu1 %v8414_v44, %s7234_s4  ;;  %v8421_v36 = vmul.f32 0.35355338, %v8414_v44 }
 0xac8   :  { %2411 = vrot.lane.b32.xlu0 %v8421_v36, %s7234_s4 }
 0xace   :  { %2465 = vrot.lane.b32.xlu2 %v8414_v44, %s7237_s30  ;;  %2417 = vrot.lane.b32.xlu1 %v8421_v36, %s7236_s12 }
 0xad5   :  { %v2387_v7 = vpop.f32.mrf.mxu1 }
 0xad6   :  { %v8429_v5 = vadd.f32 %v6374_v31, %v2387_v7  ;;  %2423 = vrot.lane.b32.xlu2 %v8421_v36, %s7237_s30 }
 0xad8   :  { %2467 = vrot.lane.b32.xlu1 %v8429_v5, %s7237_s30  ;;  %2455 = vrot.lane.b32.xlu0 %v8429_v5, %s7234_s4  ;;  %v8438_v33 = vmul.f32 0.35355338, %v8429_v5 }
 0xade   :  { %2419 = vrot.lane.b32.xlu2 %v8438_v33, %s7236_s12 }
 0xae0   :  { %2413 = vrot.lane.b32.xlu1 %v8438_v33, %s7234_s4  ;;  %2461 = vrot.lane.b32.xlu0 %v8429_v5, %s7236_s12 }
 0xae4   :  { %v2390_v63 = vpop.f32.mrf.mxu1 }
 0xae5   :  { %v8446_v40 = vadd.f32 %v6374_v31, %v2390_v63 }
 0xae7   :  { %2463 = vrot.lane.b32.xlu2 %v8446_v40, %s7236_s12  ;;  %v8455_v18 = vmul.f32 0.35355338, %v8446_v40 }
 0xae8   :  { %2457 = vrot.lane.b32.xlu1 %v8446_v40, %s7234_s4  ;;  %2425 = vrot.lane.b32.xlu0 %v8438_v33, %s7237_s30 }
 0xaef   :  { %2421 = vrot.lane.b32.xlu2 %v8455_v18, %s7236_s12 }
 0xaf0   :  { %2415 = vrot.lane.b32.xlu1 %v8455_v18, %s7234_s4  ;;  %2469 = vrot.lane.b32.xlu0 %v8446_v40, %s7237_s30 }
 0xaf7   :  { %2427 = vrot.lane.b32.xlu2 %v8455_v18, %s7237_s30 }
 0xb03   :  { %v2393_v46 = vpop.f32.mrf.mxu1 }
 0xb04   :  { %v8465_v25 = vadd.f32 %v6374_v31, %v2393_v46 }
 0xb06   :  { %2486 = vrot.lane.b32.xlu0 %v8465_v25, %s7237_s30  ;;  %2480 = vrot.lane.b32.xlu2 %v8465_v25, %s7236_s12  ;;  %v8474_v59 = vmul.f32 0.35355338, %v8465_v25 }
 0xb07   :  { %2474 = vrot.lane.b32.xlu1 %v8465_v25, %s7234_s4 }
 0xb0b   :  { %v2396_v1 = vpop.f32.mrf.mxu1 }
 0xb0c   :  { %v8480_v48 = vadd.f32 %v6374_v31, %v2396_v1 }
 0xb0e   :  { %2438 = vrot.lane.b32.xlu0 %v8474_v59, %s7236_s12  ;;  %2432 = vrot.lane.b32.xlu2 %v8474_v59, %s7234_s4  ;;  %v8551_v6 = vmul.f32 0.35355338, %v8480_v48 }
 0xb13   :  { %v2399_v3 = vpop.f32.mrf.mxu1 }
 0xb14   :  { %v8482_v49 = vadd.f32 %v6374_v31, %v2399_v3 }
 0xb16   :  { %2484 = vrot.lane.b32.xlu1 %v8482_v49, %s7236_s12  ;;  %2482 = vrot.lane.b32.xlu0 %v8480_v48, %s7236_s12  ;;  %v8556_v8 = vmul.f32 0.35355338, %v8482_v49 }
 0xb17   :  { %2476 = vrot.lane.b32.xlu2 %v8480_v48, %s7234_s4 }
 0xb1e   :  { %2488 = vrot.lane.b32.xlu0 %v8480_v48, %s7237_s30 }
 0xb20   :  { %v8492_v35 = vpop.permute.xlu2 %2459 }
 0xb21   :  { %2580 = vrot.lane.b32.xlu2 %v8492_v35, %s7235_s10 }
 0xb26   :  { %2478 = vrot.lane.b32.xlu0 %v8482_v49, %s7234_s4 }
 0xb28   :  { %v8498_v38 = vpop.permute.xlu2 %2465 }
 0xb2e   :  { %2490 = vrot.lane.b32.xlu0 %v8482_v49, %s7237_s30 }
 0xb30   :  { %v8502_v23 = vpop.permute.xlu2 %2423 }
 0xb36   :  { %2624 = vrot.lane.b32.xlu0 %v8498_v38, %s7235_s10 }
 0xb38   :  { %v2454_v19 = vpop.permute.xlu1 %2453  ;;  %v8506_v39 = vpop.permute.xlu2 %2419 }
 0xb39   :  { %2536 = vrot.lane.b32.xlu1 %v2454_v19, %s7235_s10  ;;  %v6251_v50 = vpack.i.bf16 %v8492_v35, %v2454_v19 }
 0xb3a   :  { %v8509_v17 = vpop.permute.xlu0 %2411 }
 0xb40   :  { %v8511_v55 = vpop.permute.xlu1 %2417 }
 0xb41   :  { %v8513_v62 = vpop.permute.xlu2 %2463 }
 0xb49   :  { %v8517_v9 = vpop.permute.xlu2 %2421 }
 0xb4a   :  { %v2456_v41 = vpop.permute.xlu0 %2455  ;;  %v2468_v54 = vpop.permute.xlu1 %2467 }
 0xb4b   :  { %2538 = vrot.lane.b32.xlu1 %v2456_v41, %s7235_s10  ;;  %2626 = vrot.lane.b32.xlu0 %v2468_v54, %s7235_s10 }
 0xb51   :  { %v8522_v10 = vpop.permute.xlu2 %2427 }
 0xb52   :  { %v2462_v16 = vpop.permute.xlu0 %2461  ;;  %v8519_v21 = vpop.permute.xlu1 %2413 }
 0xb53   :  { %2582 = vrot.lane.b32.xlu2 %v2462_v16, %s7235_s10  ;;  %v6246_v47 = vpack.i.bf16 %v2462_v16, %v2456_v41 }
 0xb5a   :  { %v8524_v30 = vpop.permute.xlu0 %2425  ;;  %v8526_v28 = vpop.permute.xlu1 %2457 }
 0xb5b   :  { %2584 = vrot.lane.b32.xlu2 %v8513_v62, %s7235_s10  ;;  %2540 = vrot.lane.b32.xlu1 %v8526_v28, %s7235_s10  ;;  %v6241_v1 = vpack.i.bf16 %v8513_v62, %v8526_v28 }
 0xb60   :  { %v8532_v60 = vpop.permute.xlu2 %2480 }
 0xb62   :  { %v2470_v51 = vpop.permute.xlu0 %2469  ;;  %v8539_v2 = vpop.permute.xlu1 %2415 }
 0xb63   :  { %2628 = vrot.lane.b32.xlu2 %v2470_v51, %s7235_s10  ;;  %2756 = vrot.lane.b32.xlu1 %v8532_v60, %s7235_s10  ;;  %v6256_v4 = vpack.i.bf16 %v2468_v54, %v2470_v51 }
 0xb68   :  { %v8537_v22 = vpop.permute.xlu2 %2432 }
 0xb71   :  { %v8541_v57 = vpop.permute.xlu2 %2476 }
 0xb72   :  { %2714 = vrot.lane.b32.xlu0 %v8541_v57, %s7235_s10 }
 0xb78   :  { %v8545_v24 = vpop.permute.xlu0 %2486 }
 0xb79   :  { %v2475_v0 = vpop.permute.xlu1 %2474 }
 0xb7a   :  { %2712 = vrot.lane.b32.xlu2 %v2475_v0, %s7235_s10 }
 0xb7b   :  { %v2581_v52 = vpop.permute.xlu2 %2580 }
 0xb80   :  { %v8548_v20 = vpop.permute.xlu0 %2438 }
 0xb82   :  { %2440 = vrot.lane.b32.xlu2 %v8551_v6, %s7236_s12 }
 0xb88   :  { %v2483_v53 = vpop.permute.xlu0 %2482  ;;  %v2485_v37 = vpop.permute.xlu1 %2484 }
 0xb89   :  { %2758 = vrot.lane.b32.xlu1 %v2483_v53, %s7235_s10  ;;  %2760 = vrot.lane.b32.xlu0 %v2485_v37, %s7235_s10  ;;  %v6261_v3 = vpack.i.bf16 %v2475_v0, %v2483_v53 }
 0xb8a   :  { %2436 = vrot.lane.b32.xlu2 %v8556_v8, %s7234_s4 }
 0xb90   :  { %v8562_v11 = vpop.permute.xlu0 %2488 }
 0xb91   :  { %2802 = vrot.lane.b32.xlu0 %v8562_v11, %s7235_s10 }
 0xb92   :  { %2494 = vrot.lane.b32.xlu2 %v8429_v5, %s7235_s10 }
 0xb98   :  { %v2479_v13 = vpop.permute.xlu0 %2478 }
 0xb99   :  { %2716 = vrot.lane.b32.xlu1 %v2479_v13, %s7235_s10  ;;  %2800 = vrot.lane.b32.xlu0 %v8545_v24, %s7235_s10  ;;  %v6266_v35 = vpack.i.bf16 %v2479_v13, %v8498_v38 }
 0xb9a   :  { %2448 = vrot.lane.b32.xlu2 %v8556_v8, %s7237_s30 }
 0xba0   :  { %v8579_v58 = vpop.permute.xlu0 %2490 }
 0xba1   :  { %2434 = vrot.lane.b32.xlu1 %v8551_v6, %s7234_s4  ;;  %2496 = vrot.lane.b32.xlu0 %v8446_v40, %s7235_s10 }
 0xba2   :  { %2668 = vrot.lane.b32.xlu2 %v8465_v25, %s7235_s10 }
 0xba8   :  { %v2625_v32 = vpop.permute.xlu0 %2624 }
 0xba9   :  { %2804 = vrot.lane.b32.xlu1 %v8579_v58, %s7235_s10  ;;  %2446 = vrot.lane.b32.xlu0 %v8551_v6, %s7237_s30 }
 0xbaa   :  { %6247 = vrot.lane.b32.xlu2 %v6246_v47, %s7238_s24 }
 0xbab   :  { %v2537_v31 = vpop.permute.xlu1 %2536 }
 0xbad   :  { %v2583_v34 = vpop.permute.xlu2 %2582 }
 0xbb1   :  { %2444 = vrot.lane.b32.xlu1 %v8474_v59, %s7237_s30  ;;  %2672 = vrot.lane.b32.xlu0 %v8482_v49, %s7235_s10 }
 0xbb2   :  { %6252 = vrot.lane.b32.xlu2 %v6251_v50, %s7238_s24 }
 0xbb5   :  { %v2585_v26 = vpop.permute.xlu2 %2584 }
 0xbb6   :  { %5967 = vmatpush.xpose.msk.msra.mxu3 %vm743_vm10, %v2585_v26 }
 0xbb9   :  { %2442 = vrot.lane.b32.xlu1 %v8556_v8, %s7236_s12  ;;  %6257 = vrot.lane.b32.xlu0 %v6256_v4, %s7238_s24 }
 0xbba   :  { %5968 = vmatpush.xpose.msk.msra.mxu3 %vm743_vm10, %v2583_v34 }
 0xbbd   :  { %v2629_v56 = vpop.permute.xlu2 %2628  ;;  %v2627_v7 = vpop.permute.xlu0 %2626 }
 0xbbe   :  { %5969 = vmatpush.xpose.msk.msra.mxu3 %vm743_vm10, %v2581_v52  ;;  %5973 = vmatpush.xpose.msk.msra.mxu1 %vm743_vm10, %v2629_v56  ;;  %v2539_v63 = vpop.permute.xlu1 %2538 }
 0xbc1   :  { %2492 = vrot.lane.b32.xlu1 %v8414_v44, %s7235_s10  ;;  %5970 = vmatmul.msk.f32.vlgmr.msra.gmra.mxu3 %vm743_vm10, %v8511_v55 }
 0xbc2   :  { %5974 = vmatpush.xpose.msk.msra.mxu1 %vm743_vm10, %v2627_v7 }
 0xbc6   :  { %5975 = vmatpush.xpose.msk.msra.mxu1 %vm743_vm10, %v2625_v32 }
 0xbc9   :  { %2670 = vrot.lane.b32.xlu1 %v8480_v48, %s7235_s10  ;;  %5971 = vmatmul.msk.f32.gmra.mxu3 %vm743_vm10, %v8506_v39 }
 0xbca   :  { %5976 = vmatmul.msk.f32.vlgmr.msra.gmra.mxu1 %vm743_vm10, %v8502_v23  ;;  %v6271_v23 = vpack.i.bf16 %v8541_v57, %v2485_v37 }
 0xbcd   :  { %v2541_v46 = vpop.permute.xlu1 %2540 }
 0xbce   :  { %5961 = vmatpush.xpose.msk.msrb.mxu2 %vm743_vm10, %v2541_v46 }
 0xbd1   :  { %6242 = vrot.lane.b32.xlu1 %v6241_v1, %s7238_s24  ;;  %5972 = vmatmul.msk.f32.gmra.mxu3 %vm743_vm10, %v8517_v9 }
 0xbd2   :  { %5977 = vmatmul.msk.f32.gmra.mxu1 %vm743_vm10, %v8524_v30  ;;  %5962 = vmatpush.xpose.msk.msrb.mxu2 %vm743_vm10, %v2539_v63 }
 0xbd4   :  { %v2713_v55 = vpop.permute.xlu2 %2712 }
 0xbd5   :  { %v2757_v39 = vpop.permute.xlu1 %2756 }
 0xbd6   :  { %5963 = vmatpush.xpose.msk.msrb.mxu2 %vm743_vm10, %v2537_v31 }
 0xbd9   :  { %6262 = vrot.lane.b32.xlu1 %v6261_v3, %s7238_s24  ;;  %5964 = vmatmul.msk.f32.vlgmr.msrb.gmra.mxu2 %vm743_vm10, %v8509_v17 }
 0xbda   :  { %5978 = vmatmul.msk.f32.gmra.mxu1 %vm743_vm10, %v8522_v10 }
 0xbdc   :  { %v2441_v38 = vpop.permute.xlu2 %2440 }
 0xbe1   :  { %6267 = vrot.lane.b32.xlu1 %v6266_v35, %s7238_s24  ;;  %5965 = vmatmul.msk.f32.gmra.mxu2 %vm743_vm10, %v8519_v21 }
 0xbe4   :  { %v2715_v19 = vpop.permute.xlu0 %2714  ;;  %v2437_v16 = vpop.permute.xlu2 %2436 }
 0xbe9   :  { %6272 = vrot.lane.b32.xlu1 %v6271_v23, %s7238_s24  ;;  %5966 = vmatmul.msk.f32.gmra.mxu2 %vm743_vm10, %v8539_v2 }
 0xbec   :  { %v2495_v30 = vpop.permute.xlu2 %2494 }
 0xbf4   :  { %v2449_v0 = vpop.permute.xlu2 %2448 }
 0xbfb   :  { %v2761_v62 = vpop.permute.xlu0 %2760  ;;  %v2759_v17 = vpop.permute.xlu1 %2758 }
 0xbfc   :  { %5991 = vmatpush.xpose.msk.msrb.mxu3 %vm743_vm10, %v2761_v62  ;;  %v2669_v13 = vpop.permute.xlu2 %2668 }
 0xc00   :  { %5992 = vmatpush.xpose.msk.msrb.mxu3 %vm743_vm10, %v2759_v17 }
 0xc03   :  { %v2803_v41 = vpop.permute.xlu0 %2802 }
 0xc04   :  { %5993 = vmatpush.xpose.msk.msrb.mxu3 %vm743_vm10, %v2757_v39  ;;  %v6248_v47 = vpop.permute.xlu2 %6247 }
 0xc05   :  { %v6250_v31 = vunpack.i.h.bf16 %v6248_v47  ;;  %v6249_v56 = vunpack.i.l.bf16 %v6248_v47 }
 0xc07   :  { %5994 = vmatmul.msk.f32.vlgmr.msrb.gmra.mxu3 %vm743_vm10, %v8548_v20 }
 0xc0b   :  { %v2801_v54 = vpop.permute.xlu0 %2800  ;;  %v2717_v9 = vpop.permute.xlu1 %2716 }
 0xc0c   :  { %5985 = vmatpush.xpose.msk.msra.mxu2 %vm743_vm10, %v2717_v9  ;;  %v6253_v32 = vpop.permute.xlu2 %6252 }
 0xc0d   :  { %v6254_v7 = vunpack.i.l.bf16 %v6253_v32 }
 0xc0f   :  { %5995 = vmatmul.msk.f32.gmra.mxu3 %vm743_vm10, %v2441_v38 }
 0xc10   :  { %5986 = vmatpush.xpose.msk.msra.mxu2 %vm743_vm10, %v2715_v19 }
 0xc13   :  { %v2497_v21 = vpop.permute.xlu0 %2496  ;;  %v2435_v10 = vpop.permute.xlu1 %2434 }
 0xc14   :  { %5955 = vmatpush.xpose.msk.msrb.mxu0 %vm743_vm10, %v2497_v21  ;;  %5987 = vmatpush.xpose.msk.msra.mxu2 %vm743_vm10, %v2713_v55 }
 0xc17   :  { %5988 = vmatmul.msk.f32.vlgmr.msra.gmra.mxu2 %vm743_vm10, %v8537_v22 }
 0xc18   :  { %5956 = vmatpush.xpose.msk.msrb.mxu0 %vm743_vm10, %v2495_v30 }
 0xc1b   :  { %v2447_v28 = vpop.permute.xlu0 %2446  ;;  %v2805_v51 = vpop.permute.xlu1 %2804 }
 0xc1c   :  { %5997 = vmatpush.xpose.msk.msrb.mxu1 %vm743_vm10, %v2805_v51 }
 0xc1f   :  { %5989 = vmatmul.msk.f32.gmra.mxu2 %vm743_vm10, %v2435_v10 }
 0xc20   :  { %5998 = vmatpush.xpose.msk.msrb.mxu1 %vm743_vm10, %v2803_v41 }
 0xc23   :  { %v2673_v2 = vpop.permute.xlu0 %2672  ;;  %v2445_v57 = vpop.permute.xlu1 %2444 }
 0xc24   :  { %5999 = vmatpush.xpose.msk.msrb.mxu1 %vm743_vm10, %v2801_v54 }
 0xc27   :  { %5990 = vmatmul.msk.f32.gmra.mxu2 %vm743_vm10, %v2437_v16  ;;  %6000 = vmatmul.msk.f32.vlgmr.msrb.gmra.mxu1 %vm743_vm10, %v2445_v57 }
 0xc2b   :  { %v6258_v22 = vpop.permute.xlu0 %6257  ;;  %v2443_v20 = vpop.permute.xlu1 %2442 }
 0xc2c   :  { %v6259_v53 = vunpack.i.l.bf16 %v6258_v22  ;;  %5996 = vmatmul.msk.f32.gmra.mxu3 %vm743_vm10, %v2443_v20  ;;  %v6260_v37 = vunpack.i.h.bf16 %v6258_v22 }
 0xc2e   :  { %3308 = vmatpush.msra.mxu1 %v6259_v53 }
 0xc2f   :  { %6001 = vmatmul.msk.f32.gmra.mxu1 %vm743_vm10, %v2447_v28 }
 0xc30   :  { %3309 = vmatpush.msra.mxu1 %v6260_v37 }
 0xc33   :  { %v2493_v52 = vpop.permute.xlu1 %2492 }
 0xc34   :  { %5957 = vmatpush.xpose.msk.msrb.mxu0 %vm743_vm10, %v2493_v52 }
 0xc37   :  { %5958 = vmatmul.msk.f32.vlgmr.msrb.gmra.mxu0 %vm743_vm10, %v8421_v36  ;;  %6002 = vmatmul.msk.f32.gmra.mxu1 %vm743_vm10, %v2449_v0  ;;  %v6255_v36 = vunpack.i.h.bf16 %v6253_v32 }
 0xc38   :  { %5979 = vmatpush.xpose.msk.msra.mxu0 %vm743_vm10, %v2673_v2 }
 0xc3b   :  { %v2671_v34 = vpop.permute.xlu1 %2670 }
 0xc3c   :  { %5980 = vmatpush.xpose.msk.msra.mxu0 %vm743_vm10, %v2671_v34 }
 0xc3f   :  { %5959 = vmatmul.msk.f32.gmra.mxu0 %vm743_vm10, %v8438_v33 }
 0xc40   :  { %5981 = vmatpush.xpose.msk.msra.mxu0 %vm743_vm10, %v2669_v13 }
 0xc43   :  { %v6243_v50 = vpop.permute.xlu1 %6242 }
 0xc44   :  { %v6245_v26 = vunpack.i.h.bf16 %v6243_v50  ;;  %v6244_v4 = vunpack.i.l.bf16 %v6243_v50  ;;  %v8698_v10 = vpop.f32.mrf.mxu3 }
 0xc45   :  { %v2862_v22 = vsel %vm1090_vm11, %v8698_v10, -inf }
 0xc46   :  { %3220 = vmatpush.msrb.mxu2 %v6244_v4  ;;  %3264 = vmatpush.msra.mxu3 %v6245_v26 }
 0xc47   :  { %5960 = vmatmul.msk.f32.gmra.mxu0 %vm743_vm10, %v8455_v18 }
 0xc48   :  { %3221 = vmatpush.msrb.mxu2 %v6249_v56  ;;  %3265 = vmatpush.msra.mxu3 %v6250_v31 }
 0xc4a   :  { %3222 = vmatpush.msrb.mxu2 %v6254_v7  ;;  %3266 = vmatpush.msra.mxu3 %v6255_v36 }
 0xc4b   :  { %v6263_v33 = vpop.permute.xlu1 %6262 }
 0xc4c   :  { %v6265_v23 = vunpack.i.h.bf16 %v6263_v33  ;;  %v6264_v19 = vunpack.i.l.bf16 %v6263_v33  ;;  %v8716_v53 = vpop.f32.mrf.mxu3 }
 0xc4d   :  { %v2865_v47 = vsel %vm1090_vm11, %v8716_v53, -inf }
 0xc4f   :  { %5982 = vmatmul.msk.f32.vlgmr.msra.gmra.mxu0 %vm743_vm10, %v8474_v59 }
 0xc53   :  { %v6268_v63 = vpop.permute.xlu1 %6267 }
 0xc54   :  { %v6270_v46 = vunpack.i.h.bf16 %v6268_v63  ;;  %v6269_v1 = vunpack.i.l.bf16 %v6268_v63  ;;  %v2621_v50 = vpop.f32.mrf.mxu3 }
 0xc55   :  { %v2868_v32 = vsel %vm1090_vm11, %v2621_v50, -inf }
 0xc56   :  { %3310 = vmatpush.msra.mxu1 %v6269_v1  ;;  %3396 = vmatpush.msra.mxu2 %v6270_v46 }
 0xc57   :  { %5983 = vmatmul.msk.f32.gmra.mxu0 %vm743_vm10, %v8551_v6  ;;  %v8678_v6 = vpop.f32.mrf.mxu1 }
 0xc58   :  { %v2871_v31 = vsel %vm1090_vm11, %v8678_v6, -inf }
 0xc5b   :  { %v6273_v3 = vpop.permute.xlu1 %6272 }
 0xc5c   :  { %v6275_v18 = vunpack.i.h.bf16 %v6273_v3  ;;  %v6274_v35 = vunpack.i.l.bf16 %v6273_v3  ;;  %v8672_v59 = vpop.f32.mrf.mxu2 }
 0xc5d   :  { %v2853_v7 = vsel %vm1090_vm11, %v8672_v59, -inf }
 0xc5e   :  { %3397 = vmatpush.msra.mxu2 %v6275_v18  ;;  %3440 = vmatpush.msrb.mxu3 %v6274_v35 }
 0xc5f   :  { %5984 = vmatmul.msk.f32.gmra.mxu0 %vm743_vm10, %v8556_v8  ;;  %v8686_v8 = vpop.f32.mrf.mxu1 }
 0xc60   :  { %3398 = vmatpush.msra.mxu2 %v6265_v23  ;;  %3441 = vmatpush.msrb.mxu3 %v6264_v19  ;;  %v2874_v46 = vsel %vm1090_vm11, %v8686_v8, -inf }
 0xc64   :  { %v8680_v62 = vpop.f32.mrf.mxu2 }
 0xc65   :  { %v2856_v54 = vsel %vm1090_vm11, %v8680_v62, -inf }
 0xc67   :  { %v8696_v21 = vpop.f32.mrf.mxu1 }
 0xc68   :  { %v2877_v28 = vsel %vm1090_vm11, %v8696_v21, -inf }
 0xc6c   :  { %v8694_v16 = vpop.f32.mrf.mxu2 }
 0xc6d   :  { %v2859_v0 = vsel %vm1090_vm11, %v8694_v16, -inf }
 0xc8a   :  { %v8735_v56 = vpop.f32.mrf.mxu3 }
 0xc8b   :  { %v2898_v36 = vsel %vm1090_vm11, %v8735_v56, -inf }
 0xc92   :  { %v8741_v33 = vpop.f32.mrf.mxu3 }
 0xc93   :  { %v2901_v63 = vsel %vm1090_vm11, %v8741_v33, -inf }
 0xc9a   :  { %v8706_v2 = vpop.f32.mrf.mxu2 }
 0xc9b   :  { %v2889_v23 = vsel %vm1090_vm11, %v8706_v2, -inf }
 0xca2   :  { %v8718_v37 = vpop.f32.mrf.mxu2 }
 0xca3   :  { %v2892_v52 = vsel %vm1090_vm11, %v8718_v37, -inf }
 0xca4   :  { %v8749_v3 = vpop.f32.mrf.mxu1 }
 0xca5   :  { %v2907_v35 = vsel %vm1090_vm11, %v8749_v3, -inf }
 0xcaa   :  { %v8728_v26 = vpop.f32.mrf.mxu2 }
 0xcab   :  { %v2895_v4 = vsel %vm1090_vm11, %v8728_v26, -inf }
 0xcac   :  { %v8757_v19 = vpop.f32.mrf.mxu1 }
 0xcaf   :  { %v8747_v1 = vpop.f32.mrf.mxu3 }
 0xcb0   :  { %v2904_v18 = vsel %vm1090_vm11, %v8747_v1, -inf }
 0xcb4   :  { %v8674_v39 = vpop.f32.mrf.mxu0 }
 0xcb5   :  { %v2844_v55 = vsel %vm1090_vm11, %v8674_v39, -inf }
 0xcb6   :  { %2845 = vmax.xlane.f32.xlu2 %v2844_v55  ;;  %v2910_v55 = vsel %vm1090_vm11, %v8757_v19, -inf }
 0xcbc   :  { %v8682_v17 = vpop.f32.mrf.mxu0 }
 0xcbd   :  { %v2847_v38 = vsel %vm1090_vm11, %v8682_v17, -inf }
 0xcbe   :  { %2848 = vmax.xlane.f32.xlu2 %v2847_v38  ;;  %v8761_v38 = vpop.f32.mrf.mxu1 }
 0xcc4   :  { %v8688_v41 = vpop.f32.mrf.mxu0 }
 0xcc5   :  { %v2850_v9 = vsel %vm1090_vm11, %v8688_v41, -inf }
 0xcc6   :  { %2857 = vmax.xlane.f32.xlu2 %v2856_v54  ;;  %2851 = vmax.xlane.f32.xlu0 %v2850_v9  ;;  %v2913_v54 = vsel %vm1090_vm11, %v8761_v38, -inf }
 0xccc   :  { %v8700_v30 = vpop.f32.mrf.mxu0 }
 0xccd   :  { %v2880_v51 = vsel %vm1090_vm11, %v8700_v30, -inf }
 0xcce   :  { %2878 = vmax.xlane.f32.xlu2 %v2877_v28  ;;  %2881 = vmax.xlane.f32.xlu1 %v2880_v51 }
 0xcd4   :  { %v8708_v57 = vpop.f32.mrf.mxu0 }
 0xcd5   :  { %v2883_v20 = vsel %vm1090_vm11, %v8708_v57, -inf }
 0xcd6   :  { %2860 = vmax.xlane.f32.xlu2 %v2859_v0  ;;  %2863 = vmax.xlane.f32.xlu1 %v2862_v22 }
 0xcd7   :  { %2884 = vmax.xlane.f32.xlu0 %v2883_v20 }
 0xcdc   :  { %v8720_v13 = vpop.f32.mrf.mxu0 }
 0xcdd   :  { %v2886_v34 = vsel %vm1090_vm11, %v8720_v13, -inf }
 0xcde   :  { %2893 = vmax.xlane.f32.xlu2 %v2892_v52  ;;  %2866 = vmax.xlane.f32.xlu1 %v2865_v47 }
 0xcdf   :  { %2887 = vmax.xlane.f32.xlu0 %v2886_v34 }
 0xce6   :  { %2896 = vmax.xlane.f32.xlu2 %v2895_v4  ;;  %2869 = vmax.xlane.f32.xlu1 %v2868_v32 }
 0xce7   :  { %2872 = vmax.xlane.f32.xlu0 %v2871_v31 }
 0xcee   :  { %2899 = vmax.xlane.f32.xlu1 %v2898_v36 }
 0xcef   :  { %2854 = vmax.xlane.f32.xlu0 %v2853_v7 }
 0xcf6   :  { %2902 = vmax.xlane.f32.xlu1 %v2901_v63 }
 0xcf7   :  { %2875 = vmax.xlane.f32.xlu0 %v2874_v46 }
 0xcfe   :  { %2905 = vmax.xlane.f32.xlu1 %v2904_v18 }
 0xcff   :  { %2908 = vmax.xlane.f32.xlu0 %v2907_v35 }
 0xd07   :  { %2890 = vmax.xlane.f32.xlu0 %v2889_v23 }
 0xd0f   :  { %2911 = vmax.xlane.f32.xlu0 %v2910_v55 }
 0xd17   :  { %2914 = vmax.xlane.f32.xlu0 %v2913_v54 }
 0xd29   :  { %v8765_v9 = vpop.xlane.xlu2 %2845 }
 0xd31   :  { %v8767_v28 = vpop.xlane.xlu2 %2848 }
 0xd39   :  { %v2858_v51 = vpop.xlane.xlu2 %2857  ;;  %v8771_v20 = vpop.xlane.xlu0 %2851 }
 0xd41   :  { %v2879_v0 = vpop.xlane.xlu2 %2878  ;;  %v8769_v22 = vpop.xlane.xlu1 %2881 }
 0xd42   :  { %v2927_v52 = vsub.f32 %v8696_v21, %v2879_v0 }
 0xd44   :  { %v2962_v47 = vmul.f32 1.442695, %v2927_v52 }
 0xd46   :  { %6525 = vpow2.f32 %v2962_v47 }
 0xd49   :  { %v2861_v34 = vpop.xlane.xlu2 %2860  ;;  %v2864_v4 = vpop.xlane.xlu1 %2863 }
 0xd4a   :  { %v2921_v32 = vsub.f32 %v8694_v16, %v2861_v34  ;;  %v8775_v31 = vpop.xlane.xlu0 %2884  ;;  %v2922_v52 = vsub.f32 %v8698_v10, %v2864_v4 }
 0xd4c   :  { %v8777_v36 = vpop.eup %6525  ;;  %v2950_v7 = vmul.f32 1.442695, %v2921_v32  ;;  %v2952_v34 = vmul.f32 1.442695, %v2922_v52 }
 0xd4d   :  { %v3021_v63 = vsel %vm1090_vm11, %v8777_v36, 0.0 }
 0xd4e   :  { %6527 = vpow2.f32 %v2950_v7  ;;  %3022 = vadd.xlane.f32.xlu2 %v3021_v63 }
 0xd51   :  { %v2867_v46 = vpop.xlane.xlu1 %2866 }
 0xd52   :  { %v8781_v18 = vpop.xlane.xlu0 %2887 }
 0xd54   :  { %v8783_v21 = vpop.eup %6527 }
 0xd55   :  { %v3003_v35 = vsel %vm1090_vm11, %v8783_v21, 0.0 }
 0xd56   :  { %3004 = vadd.xlane.f32.xlu2 %v3003_v35  ;;  %v2923_v35 = vsub.f32 %v8716_v53, %v2867_v46  ;;  %v2920_v53 = vsub.f32 %v8680_v62, %v2858_v51 }
 0xd59   :  { %v2870_v16 = vpop.xlane.xlu1 %2869 }
 0xd5a   :  { %v2873_v23 = vpop.xlane.xlu0 %2872  ;;  %v2924_v55 = vsub.f32 %v2621_v50, %v2870_v16  ;;  %v2954_v50 = vmul.f32 1.442695, %v2923_v35 }
 0xd5b   :  { %v2925_v54 = vsub.f32 %v8678_v6, %v2873_v23 }
 0xd5c   :  { %v2956_v0 = vmul.f32 1.442695, %v2924_v55 }
 0xd5d   :  { %v2958_v47 = vmul.f32 1.442695, %v2925_v54  ;;  %v2948_v54 = vmul.f32 1.442695, %v2920_v53 }
 0xd5f   :  { %6529 = vpow2.f32 %v2958_v47 }
 0xd60   :  { %6531 = vpow2.f32 %v2956_v0 }
 0xd61   :  { %6533 = vpow2.f32 %v2952_v34 }
 0xd62   :  { %v2855_v32 = vpop.xlane.xlu0 %2854 }
 0xd63   :  { %v2919_v7 = vsub.f32 %v8672_v59, %v2855_v32  ;;  %v2900_v32 = vpop.xlane.xlu1 %2899 }
 0xd65   :  { %v8790_v63 = vpop.eup %6529  ;;  %v2946_v14 = vmul.f32 1.442695, %v2919_v7 }
 0xd66   :  { %v8793_v15 = vpop.eup %6531  ;;  %v3015_v6 = vsel %vm1090_vm11, %v8790_v63, 0.0 }
 0xd67   :  { %6535 = vpow2.f32 %v2946_v14  ;;  %3016 = vadd.xlane.f32.xlu0 %v3015_v6  ;;  %v3012_v10 = vsel %vm1090_vm11, %v8793_v15, 0.0  ;;  %v8799_v59 = vpop.eup %6533 }
 0xd68   :  { %3013 = vadd.xlane.f32.xlu2 %v3012_v10  ;;  %6537 = vpow2.f32 %v2954_v50  ;;  %v3006_v55 = vsel %vm1090_vm11, %v8799_v59, 0.0  ;;  %v2934_v10 = vsub.f32 %v8735_v56, %v2900_v32  ;;  %v6276_v56 = vpack.i.bf16 %v8579_v58, %v8532_v60 }
 0xd69   :  { %v2917_v32 = vsub.f32 %v8682_v17, %v8767_v28 }
 0xd6a   :  { %v2876_v4 = vpop.xlane.xlu0 %2875  ;;  %v2976_v53 = vmul.f32 1.442695, %v2934_v10 }
 0xd6b   :  { %v2926_v16 = vsub.f32 %v8686_v8, %v2876_v4  ;;  %v2903_v17 = vpop.xlane.xlu1 %2902 }
 0xd6d   :  { %v8802_v23 = vpop.eup %6535  ;;  %v2960_v46 = vmul.f32 1.442695, %v2926_v16 }
 0xd6e   :  { %v2997_v14 = vsel %vm1090_vm11, %v8802_v23, 0.0  ;;  %v8809_v52 = vpop.eup %6537 }
 0xd6f   :  { %6539 = vpow2.f32 %v2960_v46  ;;  %2998 = vadd.xlane.f32.xlu1 %v2997_v14  ;;  %3007 = vadd.xlane.f32.xlu0 %v3006_v55  ;;  %v3009_v34 = vsel %vm1090_vm11, %v8809_v52, 0.0 }
 0xd70   :  { %6541 = vpow2.f32 %v2948_v54  ;;  %v6281_v54 = vpack.i.bf16 %v8545_v24, %v8562_v11  ;;  %v2916_v24 = vsub.f32 %v8674_v39, %v8765_v9  ;;  %v2942_v11 = vmul.f32 1.442695, %v2917_v32 }
 0xd72   :  { %v2909_v0 = vpop.xlane.xlu0 %2908 }
 0xd73   :  { %v2937_v8 = vsub.f32 %v8749_v3, %v2909_v0 }
 0xd75   :  { %v8812_v47 = vpop.eup %6539  ;;  %v2982_v62 = vmul.f32 1.442695, %v2937_v8  ;;  %v6286_v8 = vpack.i.bf16 %v8429_v5, %v8446_v40  ;;  %v2940_v5 = vmul.f32 1.442695, %v2916_v24  ;;  %v2918_v40 = vsub.f32 %v8688_v41, %v8771_v20 }
 0xd76   :  { %v3018_v51 = vsel %vm1090_vm11, %v8812_v47, 0.0  ;;  %v8818_v35 = vpop.eup %6541  ;;  %v2929_v41 = vsub.f32 %v8708_v57, %v8775_v31  ;;  %v2930_v57 = vsub.f32 %v8720_v13, %v8781_v18  ;;  %v6296_v24 = vpack.i.bf16 %v8465_v25, %v8480_v48 }
 0xd77   :  { %6543 = vpow2.f32 %v2982_v62  ;;  %3019 = vadd.xlane.f32.xlu0 %v3018_v51  ;;  %3010 = vadd.xlane.f32.xlu1 %v3009_v34  ;;  %v3000_v4 = vsel %vm1090_vm11, %v8818_v35, 0.0  ;;  %v2894_v62 = vpop.xlane.xlu2 %2893  ;;  %v2944_v28 = vmul.f32 1.442695, %v2918_v40 }
 0xd78   :  { %v2932_v58 = vsub.f32 %v8718_v37, %v2894_v62 }
 0xd7a   :  { %v2891_v7 = vpop.xlane.xlu0 %2890  ;;  %v2972_v34 = vmul.f32 1.442695, %v2932_v58 }
 0xd7b   :  { %v2931_v6 = vsub.f32 %v8706_v2, %v2891_v7 }
 0xd7d   :  { %v8821_v3 = vpop.eup %6543  ;;  %v2970_v50 = vmul.f32 1.442695, %v2931_v6  ;;  %v2935_v6 = vsub.f32 %v8741_v33, %v2903_v17 }
 0xd7e   :  { %v3051_v16 = vsel %vm1090_vm11, %v8821_v3, 0.0 }
 0xd7f   :  { %6545 = vpow2.f32 %v2970_v50  ;;  %3001 = vadd.xlane.f32.xlu0 %v3000_v4  ;;  %3052 = vadd.xlane.f32.xlu2 %v3051_v16  ;;  %v2978_v50 = vmul.f32 1.442695, %v2935_v6  ;;  %v2966_v16 = vmul.f32 1.442695, %v2929_v41 }
 0xd80   :  { %6547 = vpow2.f32 %v2976_v53 }
 0xd82   :  { %v2912_v0 = vpop.xlane.xlu0 %2911 }
 0xd83   :  { %v2938_v60 = vsub.f32 %v8757_v19, %v2912_v0  ;;  %v2968_v0 = vmul.f32 1.442695, %v2930_v57 }
 0xd85   :  { %v8828_v46 = vpop.eup %6545  ;;  %v2984_v51 = vmul.f32 1.442695, %v2938_v60  ;;  %v2906_v60 = vpop.xlane.xlu1 %2905 }
 0xd86   :  { %v3033_v2 = vsel %vm1090_vm11, %v8828_v46, 0.0  ;;  %v8832_v14 = vpop.eup %6547 }
 0xd87   :  { %3034 = vadd.xlane.f32.xlu2 %v3033_v2  ;;  %v3042_v55 = vsel %vm1090_vm11, %v8832_v14, 0.0  ;;  %6549 = vpow2.f32 %v2984_v51 }
 0xd88   :  { %6551 = vpow2.f32 %v2972_v34  ;;  %v2936_v34 = vsub.f32 %v8747_v1, %v2906_v60  ;;  %v6291_v60 = vpack.i.bf16 %v8482_v49, %v8414_v44 }
 0xd89   :  { %6553 = vpow2.f32 %v2942_v11 }
 0xd8a   :  { %6555 = vpow2.f32 %v2940_v5  ;;  %v2915_v4 = vpop.xlane.xlu0 %2914  ;;  %v2980_v5 = vmul.f32 1.442695, %v2936_v34 }
 0xd8b   :  { %6557 = vpow2.f32 %v2944_v28  ;;  %v2939_v33 = vsub.f32 %v8761_v38, %v2915_v4 }
 0xd8c   :  { %6559 = vpow2.f32 %v2978_v50 }
 0xd8d   :  { %v8851_v7 = vpop.eup %6549  ;;  %6561 = vpow2.f32 %v2966_v16 }
 0xd8e   :  { %v8855_v19 = vpop.eup %6551  ;;  %v3054_v37 = vsel %vm1090_vm11, %v8851_v7, 0.0 }
 0xd8f   :  { %3043 = vadd.xlane.f32.xlu2 %v3042_v55  ;;  %v3036_v39 = vsel %vm1090_vm11, %v8855_v19, 0.0  ;;  %v8861_v9 = vpop.eup %6553  ;;  %v2897_v55 = vpop.xlane.xlu2 %2896 }
 0xd90   :  { %6277 = vrot.lane.b32.xlu1 %v6276_v56, %s7238_s24  ;;  %v8866_v20 = vpop.eup %6555  ;;  %v2991_v10 = vsel %vm1090_vm11, %v8861_v9, 0.0  ;;  %v2986_v56 = vmul.f32 1.442695, %v2939_v33  ;;  %v2933_v62 = vsub.f32 %v8728_v26, %v2897_v55 }
 0xd91   :  { %v2988_v53 = vsel %vm1090_vm11, %v8866_v20, 0.0  ;;  %v8872_v2 = vpop.eup %6557 }
 0xd92   :  { %v2994_v31 = vsel %vm1090_vm11, %v8872_v2, 0.0  ;;  %6563 = vpow2.f32 %v2986_v56  ;;  %v2974_v18 = vmul.f32 1.442695, %v2933_v62 }
 0xd93   :  { %6282 = vrot.lane.b32.xlu0 %v6281_v54, %s7238_s24  ;;  %v8879_v54 = vpop.eup %6559  ;;  %6565 = vpow2.f32 %v2968_v0 }
 0xd94   :  { %v3045_v38 = vsel %vm1090_vm11, %v8879_v54, 0.0  ;;  %6567 = vpow2.f32 %v2974_v18 }
 0xda7   :  { %6287 = vrot.lane.b32.xlu2 %v6286_v8, %s7238_s24  ;;  %v8881_v8 = vpop.eup %6561 }
 0xda8   :  { %v3027_v13 = vsel %vm1090_vm11, %v8881_v8, 0.0  ;;  %v8888_v58 = vpop.eup %6563 }
 0xda9   :  { %v8890_v51 = vpop.eup %6565  ;;  %v3057_v32 = vsel %vm1090_vm11, %v8888_v58, 0.0 }
 0xdaa   :  { %v3030_v11 = vsel %vm1090_vm11, %v8890_v51, 0.0 }
 0xdba   :  { %3055 = vadd.xlane.f32.xlu1 %v3054_v37  ;;  %v8900_v37 = vpop.eup %6567 }
 0xdbb   :  { %v3039_v1 = vsel %vm1090_vm11, %v8900_v37, 0.0 }
 0xdbd   :  { %3037 = vadd.xlane.f32.xlu0 %v3036_v39 }
 0xdc1   :  { %v3023_v26 = vpop.xlane.xlu2 %3022 }
 0xdc2   :  { %2992 = vadd.xlane.f32.xlu1 %v2991_v10 }
 0xdc5   :  { %2989 = vadd.xlane.f32.xlu0 %v2988_v53 }
 0xdc9   :  { %v3005_v28 = vpop.xlane.xlu2 %3004 }
 0xdca   :  { %2995 = vadd.xlane.f32.xlu1 %v2994_v31 }
 0xdd0   :  { %3046 = vadd.xlane.f32.xlu2 %v3045_v38 }
 0xdd2   :  { %3028 = vadd.xlane.f32.xlu1 %v3027_v13 }
 0xdd8   :  { %3058 = vadd.xlane.f32.xlu2 %v3057_v32 }
 0xdd9   :  { %6297 = vrot.lane.b32.xlu0 %v6296_v24, %s7238_s24 }
 0xdda   :  { %v3017_v40 = vpop.xlane.xlu0 %3016  ;;  %3031 = vadd.xlane.f32.xlu1 %v3030_v11 }
 0xddb   :  { %6569 = vrcp.f32 %v3017_v40  ;;  %v3014_v50 = vpop.xlane.xlu2 %3013 }
 0xddc   :  { %6571 = vpow2.f32 %v2980_v5 }
 0xde0   :  { %3040 = vadd.xlane.f32.xlu2 %v3039_v1 }
 0xde1   :  { %v6570_v17 = vpop.eup %6569 }
 0xde2   :  { %v8905_v25 = vmul.f32 %v6570_v17, %v8790_v63  ;;  %v3008_v48 = vpop.xlane.xlu0 %3007  ;;  %v2999_v39 = vpop.xlane.xlu1 %2998 }
 0xde3   :  { %6573 = vrcp.f32 %v3008_v48  ;;  %v8907_v6 = vpop.eup %6571 }
 0xde4   :  { %6575 = vrcp.f32 %v2999_v39  ;;  %6012 = vmatmul.msk.f32.vlgmr.msra.gmra.mxu1 %vm1090_vm11, %v8905_v25  ;;  %v3048_v41 = vsel %vm1090_vm11, %v8907_v6, 0.0 }
 0xde8   :  { %3049 = vadd.xlane.f32.xlu2 %v3048_v41 }
 0xde9   :  { %v6574_v10 = vpop.eup %6573 }
 0xdea   :  { %v6576_v4 = vpop.eup %6575  ;;  %v8914_v16 = vmul.f32 %v6574_v10, %v8799_v59  ;;  %v3020_v63 = vpop.xlane.xlu0 %3019 }
 0xdeb   :  { %v3011_v53 = vpop.xlane.xlu1 %3010  ;;  %v8917_v33 = vmul.f32 %v6576_v4, %v8802_v23  ;;  %6577 = vrcp.f32 %v3020_v63 }
 0xdec   :  { %6579 = vrcp.f32 %v3011_v53  ;;  %6009 = vmatmul.msk.f32.vlgmr.msra.gmra.mxu3 %vm1090_vm11, %v8914_v16 }
 0xded   :  { %6006 = vmatmul.msk.f32.vlgmr.msrb.gmra.mxu2 %vm1090_vm11, %v8917_v33  ;;  %6581 = vrcp.f32 %v3023_v26 }
 0xdee   :  { %6583 = vrcp.f32 %v3014_v50 }
 0xdf1   :  { %v6578_v57 = vpop.eup %6577 }
 0xdf2   :  { %v6580_v31 = vpop.eup %6579  ;;  %v3002_v56 = vpop.xlane.xlu0 %3001  ;;  %v8924_v55 = vmul.f32 %v6578_v57, %v8812_v47 }
 0xdf3   :  { %v3053_v59 = vpop.xlane.xlu2 %3052  ;;  %6585 = vrcp.f32 %v3002_v56  ;;  %v8927_v23 = vmul.f32 %v6580_v31, %v8809_v52  ;;  %v6582_v0 = vpop.eup %6581 }
 0xdf4   :  { %6013 = vmatmul.msk.f32.gmra.mxu1 %vm1090_vm11, %v8924_v55  ;;  %v6584_v62 = vpop.eup %6583  ;;  %6587 = vrcp.f32 %v3005_v28  ;;  %v8937_v47 = vmul.f32 %v6582_v0, %v8777_v36 }
 0xdf5   :  { %6010 = vmatmul.msk.f32.gmra.mxu3 %vm1090_vm11, %v8927_v23  ;;  %v8940_v52 = vmul.f32 %v6584_v62, %v8793_v15  ;;  %6589 = vrcp.f32 %v3053_v59 }
 0xdf9   :  { %v6586_v38 = vpop.eup %6585 }
 0xdfa   :  { %v8934_v18 = vmul.f32 %v6586_v38, %v8818_v35  ;;  %v6588_v35 = vpop.eup %6587 }
 0xdfb   :  { %v3035_v13 = vpop.xlane.xlu2 %3034  ;;  %v8952_v34 = vmul.f32 %v6588_v35, %v8783_v21  ;;  %v6590_v44 = vpop.eup %6589 }
 0xdfc   :  { %6007 = vmatmul.msk.f32.gmra.mxu2 %vm1090_vm11, %v8934_v18  ;;  %6014 = vmatmul.msk.f32.gmra.mxu1 %vm1090_vm11, %v8937_v47  ;;  %6591 = vrcp.f32 %v3035_v13  ;;  %v8957_v1 = vmul.f32 %v6590_v44, %v8821_v3 }
 0xdfd   :  { %6011 = vmatmul.msk.f32.gmra.mxu3 %vm1090_vm11, %v8940_v52 }
 0xe00   :  { %6292 = vrot.lane.b32.xlu2 %v6291_v60, %s7238_s24 }
 0xe02   :  { %v6278_v15 = vpop.permute.xlu1 %6277  ;;  %v6592_v11 = vpop.eup %6591 }
 0xe03   :  { %v3044_v36 = vpop.xlane.xlu2 %3043  ;;  %v6280_v26 = vunpack.i.h.bf16 %v6278_v15  ;;  %v6279_v32 = vunpack.i.l.bf16 %v6278_v15  ;;  %v8960_v21 = vmul.f32 %v6592_v11, %v8828_v46  ;;  %v2928_v46 = vsub.f32 %v8700_v30, %v8769_v22 }
 0xe04   :  { %6593 = vrcp.f32 %v3044_v36  ;;  %6008 = vmatmul.msk.f32.gmra.mxu2 %vm1090_vm11, %v8952_v34 }
 0xe05   :  { %v6283_v24 = vpop.permute.xlu0 %6282  ;;  %3442 = vmatpush.msrb.mxu3 %v6279_v32  ;;  %3484 = vmatpush.msrb.mxu1 %v6280_v26 }
 0xe06   :  { %v6284_v49 = vunpack.i.l.bf16 %v6283_v24  ;;  %v6285_v5 = vunpack.i.h.bf16 %v6283_v24 }
 0xe08   :  { %3485 = vmatpush.msrb.mxu1 %v6284_v49 }
 0xe0a   :  { %v6594_v40 = vpop.eup %6593  ;;  %3486 = vmatpush.msrb.mxu1 %v6285_v5 }
 0xe0b   :  { %v8963_v17 = vmul.f32 %v6594_v40, %v8832_v14  ;;  %v6288_v28 = vpop.permute.xlu2 %6287  ;;  %6024 = vmatmul.msk.f32.vlgmr.msrb.gmra.mxu1 %vm1090_vm11, %v8957_v1  ;;  %v2964_v14 = vmul.f32 1.442695, %v2928_v46 }
 0xe0c   :  { %v6289_v48 = vunpack.i.l.bf16 %v6288_v28  ;;  %6018 = vmatmul.msk.f32.vlgmr.msra.gmra.mxu2 %vm1090_vm11, %v8960_v21  ;;  %v6290_v3 = vunpack.i.h.bf16 %v6288_v28 }
 0xe0d   :  { %6021 = vmatmul.msk.f32.vlgmr.msrb.gmra.mxu3 %vm1090_vm11, %v8963_v17  ;;  %6595 = vpow2.f32 %v2964_v14 }
 0xe0e   :  { %3176 = vmatpush.msrb.mxu0 %v6289_v48 }
 0xe10   :  { %3177 = vmatpush.msrb.mxu0 %v6290_v3 }
 0xe13   :  { %v8973_v39 = vpop.eup %6595 }
 0xe14   :  { %v3024_v41 = vsel %vm1090_vm11, %v8973_v39, 0.0 }
 0xe29   :  { %3025 = vadd.xlane.f32.xlu2 %v3024_v41 }
 0xe2d   :  { %v3056_v10 = vpop.xlane.xlu1 %3055 }
 0xe2e   :  { %6597 = vrcp.f32 %v3056_v10 }
 0xe30   :  { %v3038_v50 = vpop.xlane.xlu0 %3037 }
 0xe31   :  { %6599 = vrcp.f32 %v3038_v50 }
 0xe34   :  { %v6598_v4 = vpop.eup %6597 }
 0xe35   :  { %v2993_v63 = vpop.xlane.xlu1 %2992  ;;  %v3106_v53 = vmul.f32 %v6598_v4, %v8851_v7 }
 0xe36   :  { %6601 = vrcp.f32 %v2993_v63 }
 0xe37   :  { %v6600_v57 = vpop.eup %6599  ;;  %6025 = vmatmul.msk.f32.gmra.mxu1 %vm1090_vm11, %v3106_v53 }
 0xe38   :  { %v2990_v30 = vpop.xlane.xlu0 %2989  ;;  %v3100_v22 = vmul.f32 %v6600_v57, %v8855_v19 }
 0xe39   :  { %6603 = vrcp.f32 %v2990_v30 }
 0xe3a   :  { %6019 = vmatmul.msk.f32.gmra.mxu2 %vm1090_vm11, %v3100_v22 }
 0xe3c   :  { %v6602_v31 = vpop.eup %6601 }
 0xe3d   :  { %v2996_v56 = vpop.xlane.xlu1 %2995  ;;  %v8982_v59 = vmul.f32 %v6602_v31, %v8861_v9 }
 0xe3e   :  { %6605 = vrcp.f32 %v2996_v56 }
 0xe3f   :  { %v6604_v0 = vpop.eup %6603  ;;  %v3112_v7 = vadd.f32 %v8934_v18, %v8982_v59 }
 0xe40   :  { %v3084_v62 = vmul.f32 %v6604_v0, %v8866_v20 }
 0xe41   :  { %v3115_v38 = vadd.f32 %v3112_v7, %v8927_v23 }
 0xe42   :  { %v3111_v13 = vadd.f32 %v8917_v33, %v3084_v62 }
 0xe43   :  { %v3047_v19 = vpop.xlane.xlu2 %3046  ;;  %v3118_v60 = vadd.f32 %v3115_v38, %v8924_v55 }
 0xe44   :  { %v6606_v35 = vpop.eup %6605  ;;  %v3114_v36 = vadd.f32 %v3111_v13, %v8914_v16  ;;  %6607 = vrcp.f32 %v3047_v19 }
 0xe45   :  { %v3029_v9 = vpop.xlane.xlu1 %3028  ;;  %v3121_v15 = vmul.f32 0.25, %v3118_v60  ;;  %v8992_v26 = vmul.f32 %v6606_v35, %v8872_v2 }
 0xe46   :  { %v3117_v18 = vadd.f32 %v3114_v36, %v8905_v25  ;;  %6609 = vrcp.f32 %v3029_v9 }
 0xe47   :  { %3140 = vst.msk [vmem:[#allocation29 + $0x38] sm:$0xff] %vm1090_vm11, %v3121_v15  ;;  %v3113_v20 = vadd.f32 %v8952_v34, %v8992_v26 }
 0xe48   :  { %v3120_v33 = vmul.f32 0.25, %v3117_v18 }
 0xe49   :  { %v3116_v55 = vadd.f32 %v3113_v20, %v8940_v52 }
 0xe4a   :  { %v6608_v23 = vpop.eup %6607  ;;  %3139 = vst.msk [vmem:[#allocation29 + $0x30] sm:$0xff] %vm1090_vm11, %v3120_v33 }
 0xe4b   :  { %v3059_v16 = vpop.xlane.xlu2 %3058  ;;  %v3103_v32 = vmul.f32 %v6608_v23, %v8879_v54  ;;  %v3119_v2 = vadd.f32 %v3116_v55, %v8937_v47  ;;  %v3590_v55 = vld [vmem:[#allocation13 + $0x30] sm:$0xff] }
 0xe4c   :  { %v6610_v24 = vpop.eup %6609  ;;  %6611 = vrcp.f32 %v3059_v16 }
 0xe4d   :  { %6022 = vmatmul.msk.f32.gmra.mxu3 %vm1090_vm11, %v3103_v32  ;;  %v3122_v25 = vmul.f32 0.25, %v3119_v2  ;;  %v9004_v44 = vmul.f32 %v6610_v24, %v8881_v8  ;;  %v3032_v47 = vpop.xlane.xlu1 %3031 }
 0xe4f   :  { %3141 = vst.msk [vmem:[#allocation29 + $0x40] sm:$0xff] %vm1090_vm11, %v3122_v25  ;;  %v3127_v52 = vadd.f32 %v3100_v22, %v9004_v44 }
 0xe51   :  { %v3130_v34 = vadd.f32 %v3127_v52, %v3103_v32 }
 0xe52   :  { %v6612_v49 = vpop.eup %6611 }
 0xe53   :  { %v3041_v11 = vpop.xlane.xlu2 %3040  ;;  %v3107_v5 = vmul.f32 %v6612_v49, %v8888_v58  ;;  %v3133_v54 = vadd.f32 %v3130_v34, %v3106_v53  ;;  %v6298_v53 = vpop.permute.xlu0 %6297 }
 0xe54   :  { %6613 = vrcp.f32 %v3041_v11  ;;  %v6299_v30 = vunpack.i.l.bf16 %v6298_v53  ;;  %v6300_v22 = vunpack.i.h.bf16 %v6298_v53 }
 0xe55   :  { %6026 = vmatmul.msk.f32.gmra.mxu1 %vm1090_vm11, %v3107_v5  ;;  %v3136_v40 = vmul.f32 0.25, %v3133_v54  ;;  %6615 = vrcp.f32 %v3032_v47 }
 0xe57   :  { %3143 = vst.msk [vmem:[#allocation29 + $0x50] sm:$0xff] %vm1090_vm11, %v3136_v40 }
 0xe5a   :  { %v6614_v8 = vpop.eup %6613 }
 0xe5b   :  { %v3050_v28 = vpop.xlane.xlu2 %3049  ;;  %v3101_v48 = vmul.f32 %v6614_v8, %v8900_v37  ;;  %v6616_v3 = vpop.eup %6615 }
 0xe5c   :  { %6617 = vrcp.f32 %v3050_v28  ;;  %v3098_v58 = vmul.f32 %v6616_v3, %v8890_v51 }
 0xe5d   :  { %6020 = vmatmul.msk.f32.gmra.mxu2 %vm1090_vm11, %v3101_v48 }
 0xe5e   :  { %v3128_v50 = vadd.f32 %v3101_v48, %v3098_v58 }
 0xe61   :  { %v3312_v46 = vpop.f32.mrf.mxu1 }
 0xe62   :  { %v6618_v14 = vpop.eup %6617  ;;  %3524 = vrot.lane.b32.xlu0 %v3312_v46, %s7239_s15 }
 0xe63   :  { %v6293_v41 = vpop.permute.xlu2 %6292  ;;  %v3104_v10 = vmul.f32 %v6618_v14, %v8907_v6 }
 0xe64   :  { %v6295_v4 = vunpack.i.h.bf16 %v6293_v41  ;;  %v6294_v63 = vunpack.i.l.bf16 %v6293_v41 }
 0xe65   :  { %6023 = vmatmul.msk.f32.gmra.mxu3 %vm1090_vm11, %v3104_v10  ;;  %v3131_v37 = vadd.f32 %v3128_v50, %v3104_v10 }
 0xe66   :  { %3178 = vmatpush.msrb.mxu0 %v6294_v63 }
 0xe67   :  { %6003 = vmatmul.msk.f32.vlgmr.msrb.gmra.mxu0 %vm1090_vm11, %v3084_v62  ;;  %v3134_v57 = vadd.f32 %v3131_v37, %v3107_v5 }
 0xe68   :  { %3352 = vmatpush.msra.mxu0 %v6295_v4 }
 0xe69   :  { %v3137_v51 = vmul.f32 0.25, %v3134_v57 }
 0xe6a   :  { %3353 = vmatpush.msra.mxu0 %v6299_v30 }
 0xe6b   :  { %3144 = vst.msk [vmem:[#allocation29 + $0x58] sm:$0xff] %vm1090_vm11, %v3137_v51 }
 0xe6c   :  { %3354 = vmatpush.msra.mxu0 %v6300_v22 }
 0xe6f   :  { %6004 = vmatmul.msk.f32.gmra.mxu0 %vm1090_vm11, %v8982_v59  ;;  %v3268_v6 = vpop.f32.mrf.mxu3 }
 0xe70   :  { %v3224_v31 = vpop.f32.mrf.mxu2  ;;  %3512 = vrot.lane.b32.xlu0 %v3268_v6, %s7214_s26 }
 0xe71   :  { %3500 = vrot.lane.b32.xlu1 %v3224_v31, %s7222_s11  ;;  %v3315_v56 = vpop.f32.mrf.mxu1 }
 0xe77   :  { %6005 = vmatmul.msk.f32.gmra.mxu0 %vm1090_vm11, %v8992_v26 }
 0xe78   :  { %v3271_v0 = vpop.f32.mrf.mxu3 }
 0xe79   :  { %3514 = vrot.lane.b32.xlu2 %v3271_v0, %s7214_s26  ;;  %v3318_v62 = vpop.f32.mrf.mxu1 }
 0xe7f   :  { %v3227_v7 = vpop.f32.mrf.mxu2 }
 0xe80   :  { %3502 = vrot.lane.b32.xlu0 %v3227_v7, %s7222_s11  ;;  %v3274_v59 = vpop.f32.mrf.mxu3 }
 0xe87   :  { %v3230_v38 = vpop.f32.mrf.mxu2 }
 0xe88   :  { %v3488_v13 = vpop.f32.mrf.mxu1  ;;  %3526 = vrot.lane.b32.xlu0 %v3315_v56, %s7239_s15  ;;  %3504 = vrot.lane.b32.xlu1 %v3230_v38, %s7222_s11 }
 0xe89   :  { %3569 = vrot.lane.b32.xlu2 %v3488_v13, %s7239_s15 }
 0xe8f   :  { %v3400_v19 = vpop.f32.mrf.mxu2 }
 0xe90   :  { %3516 = vrot.lane.b32.xlu0 %v3274_v59, %s7214_s26  ;;  %3528 = vrot.lane.b32.xlu1 %v3318_v62, %s7239_s15  ;;  %v3444_v60 = vpop.f32.mrf.mxu3 }
 0xe98   :  { %3557 = vrot.lane.b32.xlu1 %v3444_v60, %s7214_s26  ;;  %3545 = vrot.lane.b32.xlu0 %v3400_v19, %s7222_s11 }
 0xe9c   :  { %v3026_v35 = vpop.xlane.xlu2 %3025 }
 0xe9d   :  { %6619 = vrcp.f32 %v3026_v35 }
 0xea3   :  { %v6620_v36 = vpop.eup %6619 }
 0xea4   :  { %v3096_v9 = vmul.f32 %v6620_v36, %v8973_v39 }
 0xea6   :  { %v3126_v15 = vadd.f32 %v8960_v21, %v3096_v9  ;;  %6015 = vmatmul.msk.f32.vlgmr.msra.gmra.mxu0 %vm1090_vm11, %v3096_v9  ;;  %v3591_v21 = vld [vmem:[#allocation13 + $0x38] sm:$0xff]  ;;  %v6375_v9 = vld [vmem:[#allocation14 + $0x1] ss:$0 sm:$0xff] }
 0xea7   :  { %3627 = vmatpush.msrb.mxu0 %v3591_v21 }
 0xea8   :  { %v3129_v26 = vadd.f32 %v3126_v15, %v8963_v17  ;;  %v3589_v17 = vld [vmem:[#allocation13 + $0x28] sm:$0xff] }
 0xea9   :  { %3628 = vmatpush.msrb.mxu0 %v3590_v55 }
 0xeaa   :  { %v3132_v18 = vadd.f32 %v3129_v26, %v8957_v1  ;;  %v3588_v1 = vld [vmem:[#allocation13 + $0x20] sm:$0xff] }
 0xeab   :  { %3629 = vmatpush.msrb.mxu0 %v3589_v17 }
 0xeac   :  { %v3135_v20 = vmul.f32 0.25, %v3132_v18 }
 0xead   :  { %3630 = vmatpush.msrb.mxu0 %v3588_v1 }
 0xeae   :  { %3142 = vst.msk [vmem:[#allocation29 + $0x48] sm:$0xff] %vm1090_vm11, %v3135_v20  ;;  %6016 = vmatmul.msk.f32.gmra.mxu0 %vm1090_vm11, %v9004_v44 }
 0xeb4   :  { %v3491_v33 = vpop.f32.mrf.mxu1 }
 0xeb5   :  { %3571 = vrot.lane.b32.xlu2 %v3491_v33, %s7239_s15 }
 0xeb6   :  { %6017 = vmatmul.msk.f32.gmra.mxu0 %vm1090_vm11, %v3098_v58 }
 0xebd   :  { %v3403_v39 = vpop.f32.mrf.mxu2 }
 0xebe   :  { %3547 = vrot.lane.b32.xlu0 %v3403_v39, %s7222_s11 }
 0xed0   :  { %v3447_v23 = vpop.f32.mrf.mxu3 }
 0xed1   :  { %3559 = vrot.lane.b32.xlu1 %v3447_v23, %s7214_s26 }
 0xed2   :  { %v3494_v16 = vpop.f32.mrf.mxu1 }
 0xed3   :  { %3573 = vrot.lane.b32.xlu2 %v3494_v16, %s7239_s15  ;;  %v3515_v40 = vpop.permute.xlu2 %3514 }
 0xed4   :  { %v3525_v32 = vpop.permute.xlu0 %3524 }
 0xee0   :  { %v3406_v2 = vpop.f32.mrf.mxu2 }
 0xee1   :  { %3549 = vrot.lane.b32.xlu0 %v3406_v2, %s7222_s11 }
 0xee2   :  { %v3513_v44 = vpop.permute.xlu0 %3512 }
 0xee3   :  { %v3501_v24 = vpop.permute.xlu1 %3500  ;;  %v3570_v57 = vpop.permute.xlu2 %3569 }
 0xee4   :  { %v3180_v25 = vpop.f32.mrf.mxu0 }
 0xee5   :  { %v3533_v52 = vsel %vm743_vm10, %v3180_v25, %v3501_v24 }
 0xee6   :  { %v3536_v34 = vsel %vm1782_vm12, %v3533_v52, %v3513_v44 }
 0xee7   :  { %v3539_v49 = vsel %vm1090_vm11, %v3536_v34, %v3525_v32 }
 0xee8   :  { %v3450_v11 = vpop.f32.mrf.mxu3  ;;  %6027 = vmatmul.msk.f32.vlgmr.msrb.gmra.mxu0 %vm428_vm5, %v3539_v49 }
 0xee9   :  { %3561 = vrot.lane.b32.xlu1 %v3450_v11, %s7214_s26 }
 0xeec   :  { %v3183_v54 = vpop.f32.mrf.mxu0 }
 0xef2   :  { %v3503_v5 = vpop.permute.xlu0 %3502 }
 0xef3   :  { %v3534_v47 = vsel %vm743_vm10, %v3183_v54, %v3503_v5 }
 0xef4   :  { %v3537_v8 = vsel %vm1782_vm12, %v3534_v47, %v3515_v40  ;;  %v3186_v46 = vpop.f32.mrf.mxu0 }
 0xefa   :  { %v3527_v28 = vpop.permute.xlu0 %3526  ;;  %v3505_v48 = vpop.permute.xlu1 %3504 }
 0xefb   :  { %v3540_v3 = vsel %vm1090_vm11, %v3537_v8, %v3527_v28  ;;  %v3535_v58 = vsel %vm743_vm10, %v3186_v46, %v3505_v48 }
 0xefc   :  { %6028 = vmatmul.msk.f32.gmra.mxu0 %vm428_vm5, %v3540_v3 }
 0xf02   :  { %v3517_v14 = vpop.permute.xlu0 %3516  ;;  %v3529_v41 = vpop.permute.xlu1 %3528 }
 0xf03   :  { %v3538_v10 = vsel %vm1782_vm12, %v3535_v58, %v3517_v14 }
 0xf04   :  { %v3541_v50 = vsel %vm1090_vm11, %v3538_v10, %v3529_v41 }
 0xf05   :  { %6029 = vmatmul.msk.f32.gmra.mxu0 %vm428_vm5, %v3541_v50 }
 0xf0a   :  { %v3546_v4 = vpop.permute.xlu0 %3545  ;;  %v3558_v53 = vpop.permute.xlu1 %3557 }
 0xf0f   :  { %v3572_v0 = vpop.permute.xlu2 %3571 }
 0xf23   :  { %v3356_v63 = vpop.f32.mrf.mxu0 }
 0xf24   :  { %v3578_v37 = vsel %vm743_vm10, %v3356_v63, %v3546_v4 }
 0xf25   :  { %v3581_v30 = vsel %vm1782_vm12, %v3578_v37, %v3558_v53 }
 0xf26   :  { %v3584_v51 = vsel %vm1090_vm11, %v3581_v30, %v3570_v57 }
 0xf27   :  { %6030 = vmatmul.msk.f32.gmra.mxu0 %vm428_vm5, %v3584_v51 }
 0xf2b   :  { %v3359_v6 = vpop.f32.mrf.mxu0 }
 0xf2d   :  { %v3574_v60 = vpop.permute.xlu2 %3573 }
 0xf30   :  { %v3548_v22 = vpop.permute.xlu0 %3547 }
 0xf31   :  { %v3579_v31 = vsel %vm743_vm10, %v3359_v6, %v3548_v22  ;;  %v3814_v6 = vld [vmem:[#allocation16 + $0x38] sm:$0xff] }
 0xf32   :  { %3850 = vmatpush.msrb.mxu2 %v3814_v6 }
 0xf33   :  { %v3362_v13 = vpop.f32.mrf.mxu0 }
 0xf43   :  { %v3560_v56 = vpop.permute.xlu1 %3559 }
 0xf44   :  { %v3582_v7 = vsel %vm1782_vm12, %v3579_v31, %v3560_v56  ;;  %v3813_v31 = vld [vmem:[#allocation16 + $0x30] sm:$0xff]  ;;  %v3812_v56 = vld [vmem:[#allocation16 + $0x28] sm:$0xff] }
 0xf45   :  { %v3585_v62 = vsel %vm1090_vm11, %v3582_v7, %v3572_v0  ;;  %3851 = vmatpush.msrb.mxu2 %v3813_v31 }
 0xf46   :  { %6031 = vmatmul.msk.f32.gmra.mxu0 %vm428_vm5, %v3585_v62  ;;  %v3811_v62 = vld [vmem:[#allocation16 + $0x20] sm:$0xff] }
 0xf47   :  { %3852 = vmatpush.msrb.mxu2 %v3812_v56 }
 0xf49   :  { %3853 = vmatpush.msrb.mxu2 %v3811_v62 }
 0xf53   :  { %v3550_v38 = vpop.permute.xlu0 %3549 }
 0xf54   :  { %v3580_v59 = vsel %vm743_vm10, %v3362_v13, %v3550_v38 }
 0xf5b   :  { %v3562_v19 = vpop.permute.xlu1 %3561 }
 0xf5c   :  { %v3583_v35 = vsel %vm1782_vm12, %v3580_v59, %v3562_v19 }
 0xf5d   :  { %v3586_v36 = vsel %vm1090_vm11, %v3583_v35, %v3574_v60 }
 0xf5e   :  { %6032 = vmatmul.msk.f32.gmra.mxu0 %vm428_vm5, %v3586_v36 }
 0xf65   :  { %v3632_v15 = vpop.f32.mrf.mxu0 }
 0xf66   :  { %v3633_v26 = vadd.f32 %v6375_v9, %v3632_v15 }
 0xf68   :  { %v3650_v18 = vadd.f32 %v3633_v26, %v8371_v42 }
 0xf6a   :  { %v3660_v20 = vsel %vm428_vm5, %v3650_v18, 0.0 }
 0xf6b   :  { %3661 = vadd.xlane.f32.xlu0 %v3660_v20 }
 0xf79   :  { %v3635_v33 = vpop.f32.mrf.mxu0 }
 0xf7a   :  { %v3636_v39 = vadd.f32 %v6375_v9, %v3635_v33 }
 0xf7c   :  { %v3651_v21 = vadd.f32 %v3636_v39, %v8379_v43  ;;  %v9118_v39 = vld [vmem:[#allocation22 + $0x1] ss:$0 sm:$0xff] }
 0xf7e   :  { %v3663_v55 = vsel %vm428_vm5, %v3651_v21, 0.0 }
 0xf7f   :  { %3664 = vadd.xlane.f32.xlu1 %v3663_v55 }
 0xf82   :  { %v3638_v17 = vpop.f32.mrf.mxu0 }
 0xf83   :  { %v3639_v1 = vadd.f32 %v6375_v9, %v3638_v17  ;;  %v9121_v17 = vld [vmem:[#allocation23 + $0x1] ss:$0 sm:$0xff] }
 0xf85   :  { %v3652_v23 = vadd.f32 %v3639_v1, %v8386_v12 }
 0xf87   :  { %v3666_v16 = vsel %vm428_vm5, %v3652_v23, 0.0 }
 0xf88   :  { %3667 = vadd.xlane.f32.xlu2 %v3666_v16 }
 0xfa4   :  { %v3641_v32 = vpop.f32.mrf.mxu0 }
 0xfa5   :  { %v3642_v2 = vadd.f32 %v6375_v9, %v3641_v32 }
 0xfa7   :  { %v3653_v42 = vadd.f32 %v3642_v2, %v8396_v27 }
 0xfa9   :  { %v3669_v24 = vsel %vm428_vm5, %v3653_v42, 0.0 }
 0xfaa   :  { %3670 = vadd.xlane.f32.xlu0 %v3669_v24 }
 0xfc3   :  { %v3644_v25 = vpop.f32.mrf.mxu0 }
 0xfc4   :  { %v3645_v44 = vadd.f32 %v6375_v9, %v3644_v25 }
 0xfc6   :  { %v3654_v43 = vadd.f32 %v3645_v44, %v8403_v61 }
 0xfc8   :  { %v3672_v52 = vsel %vm428_vm5, %v3654_v43, 0.0 }
 0xfc9   :  { %3673 = vadd.xlane.f32.xlu1 %v3672_v52 }
 0xfdb   :  { %v3647_v34 = vpop.f32.mrf.mxu0 }
 0xfdc   :  { %v3648_v49 = vadd.f32 %v6375_v9, %v3647_v34 }
 0xfde   :  { %v3655_v12 = vadd.f32 %v3648_v49, %v8410_v29  ;;  %v3662_v11 = vpop.xlane.xlu0 %3661 }
 0xfdf   :  { %v3678_v5 = vmul.f32 %v3662_v11, %v7487_v45 }
 0xfe0   :  { %v3675_v54 = vsel %vm428_vm5, %v3655_v12, 0.0 }
 0xfe1   :  { %v3684_v27 = vsub.f32 %v3650_v18, %v3678_v5  ;;  %3676 = vadd.xlane.f32.xlu2 %v3675_v54 }
 0xfe3   :  { %v3690_v47 = vmul.f32 %v3684_v27, %v3684_v27 }
 0xfe5   :  { %v3696_v40 = vsel %vm428_vm5, %v3690_v47, 0.0 }
 0xfe6   :  { %3697 = vadd.xlane.f32.xlu0 %v3696_v40 }
 0xff2   :  { %v3665_v8 = vpop.xlane.xlu1 %3664 }
 0xff3   :  { %v3679_v61 = vmul.f32 %v3665_v8, %v7487_v45 }
 0xff5   :  { %v9088_v28 = vsub.f32 %v3651_v21, %v3679_v61 }
 0xff7   :  { %v3691_v48 = vmul.f32 %v9088_v28, %v9088_v28 }
 0xff9   :  { %v3699_v29 = vsel %vm428_vm5, %v3691_v48, 0.0 }
 0xffa   :  { %3700 = vadd.xlane.f32.xlu1 %v3699_v29 }
 0xffb   :  { %v3668_v3 = vpop.xlane.xlu2 %3667 }
 0xffc   :  { %v3680_v46 = vmul.f32 %v3668_v3, %v7487_v45 }
 0xffe   :  { %v9094_v58 = vsub.f32 %v3652_v23, %v3680_v46 }
0x1000   :  { %v3692_v14 = vmul.f32 %v9094_v58, %v9094_v58 }
0x1002   :  { %v3702_v41 = vsel %vm428_vm5, %v3692_v14, 0.0 }
0x1003   :  { %3703 = vadd.xlane.f32.xlu2 %v3702_v41 }
0x101d   :  { %v3671_v10 = vpop.xlane.xlu0 %3670 }
0x101e   :  { %v3681_v50 = vmul.f32 %v3671_v10, %v7487_v45 }
0x1020   :  { %v9100_v4 = vsub.f32 %v3653_v42, %v3681_v50 }
0x1022   :  { %v3693_v63 = vmul.f32 %v9100_v4, %v9100_v4 }
0x1024   :  { %v3705_v53 = vsel %vm428_vm5, %v3693_v63, 0.0 }
0x1025   :  { %3706 = vadd.xlane.f32.xlu0 %v3705_v53 }
0x103c   :  { %v3674_v37 = vpop.xlane.xlu1 %3673 }
0x103d   :  { %v3682_v57 = vmul.f32 %v3674_v37, %v7487_v45 }
0x103f   :  { %v9106_v30 = vsub.f32 %v3654_v43, %v3682_v57 }
0x1041   :  { %v3694_v51 = vmul.f32 %v9106_v30, %v9106_v30 }
0x1043   :  { %v3708_v22 = vsel %vm428_vm5, %v3694_v51, 0.0 }
0x1044   :  { %3709 = vadd.xlane.f32.xlu1 %v3708_v22 }
0x1054   :  { %v3677_v0 = vpop.xlane.xlu2 %3676 }
0x1055   :  { %v3683_v7 = vmul.f32 %v3677_v0, %v7487_v45 }
0x1057   :  { %v9112_v38 = vsub.f32 %v3655_v12, %v3683_v7 }
0x1059   :  { %v3698_v13 = vpop.xlane.xlu0 %3697  ;;  %v3695_v59 = vmul.f32 %v9112_v38, %v9112_v38 }
0x105a   :  { %v3714_v19 = vmul.f32 %v3698_v13, %v7487_v45 }
0x105b   :  { %v3711_v60 = vsel %vm428_vm5, %v3695_v59, 0.0 }
0x105c   :  { %v3720_v35 = vadd.f32 1e-05, %v3714_v19  ;;  %3712 = vadd.xlane.f32.xlu2 %v3711_v60 }
0x105e   :  { %6621 = vrsqrt.f32 %v3720_v35  ;;  %vm3732_vm14 = vweird.f32 %v3720_v35 }
0x1064   :  { %v6622_v36 = vpop.eup %6621 }
0x1065   :  { %v3727_v9 = vmul.f32 %v6622_v36, %v3720_v35  ;;  %vm3733_vm13 = vweird.f32 %v6622_v36  ;;  %v3883_v35 = vld [vmem:[#allocation19 + $0x38] sm:$0xff] }
0x1066   :  { %vm3734_vm15 = vmor %vm3732_vm14, %vm3733_vm13  ;;  %3919 = vmatpush.msra.mxu3 %v3883_v35 }
0x1067   :  { %v3728_v15 = vmul.f32 %v6622_v36, %v3727_v9 }
0x1069   :  { %v3729_v26 = vmul.f32 0.5, %v3728_v15 }
0x106b   :  { %v3730_v18 = vsub.f32 1.5, %v3729_v26 }
0x106d   :  { %v3731_v20 = vmul.f32 %v6622_v36, %v3730_v18  ;;  %v3701_v33 = vpop.xlane.xlu1 %3700 }
0x106e   :  { %v3715_v21 = vmul.f32 %v3701_v33, %v7487_v45 }
0x106f   :  { %v3735_v55 = vsel %vm3734_vm15, %v6622_v36, %v3731_v20 }
0x1070   :  { %v3786_v1 = vmul.f32 %v3735_v55, %v3684_v27  ;;  %v3721_v23 = vadd.f32 1e-05, %v3715_v21  ;;  %v3882_v21 = vld [vmem:[#allocation19 + $0x30] sm:$0xff] }
0x1071   :  { %3920 = vmatpush.msra.mxu3 %v3882_v21 }
0x1072   :  { %v3795_v16 = vmul.f32 %v9118_v39, %v3786_v1  ;;  %6623 = vrsqrt.f32 %v3721_v23  ;;  %vm3742_vm1 = vweird.f32 %v3721_v23 }
0x1074   :  { %v9125_v32 = vadd.f32 %v9121_v17, %v3795_v16 }
0x1076   :  { %v3704_v2 = vpop.xlane.xlu2 %3703  ;;  %6033 = vmatmul.msk.f32.vlgmr.msrb.gmra.mxu2 %vm428_vm5, %v9125_v32 }
0x1077   :  { %v3716_v42 = vmul.f32 %v3704_v2, %v7487_v45 }
0x1078   :  { %v6624_v24 = vpop.eup %6623 }
0x1079   :  { %v3737_v25 = vmul.f32 %v6624_v24, %v3721_v23  ;;  %v3722_v44 = vadd.f32 1e-05, %v3716_v42  ;;  %vm3743_vm0 = vweird.f32 %v6624_v24  ;;  %v3881_v23 = vld [vmem:[#allocation19 + $0x28] sm:$0xff] }
0x107a   :  { %vm3744_vm2 = vmor %vm3742_vm1, %vm3743_vm0  ;;  %3921 = vmatpush.msra.mxu3 %v3881_v23 }
0x107b   :  { %v3738_v43 = vmul.f32 %v6624_v24, %v3737_v25  ;;  %6625 = vrsqrt.f32 %v3722_v44  ;;  %vm3752_vm4 = vweird.f32 %v3722_v44 }
0x107d   :  { %v3739_v52 = vmul.f32 0.5, %v3738_v43 }
0x107f   :  { %v3740_v34 = vsub.f32 1.5, %v3739_v52 }
0x1081   :  { %v6626_v49 = vpop.eup %6625  ;;  %v3741_v12 = vmul.f32 %v6624_v24, %v3740_v34  ;;  %v6378_v34 = vld [vmem:[#allocation17 + $0x1] ss:$0 sm:$0xff] }
0x1082   :  { %v3747_v11 = vmul.f32 %v6626_v49, %v3722_v44  ;;  %vm3753_vm3 = vweird.f32 %v6626_v49 }
0x1083   :  { %v3745_v5 = vsel %vm3744_vm2, %v6624_v24, %v3741_v12  ;;  %vm3754_vm6 = vmor %vm3752_vm4, %vm3753_vm3 }
0x1084   :  { %v3787_v54 = vmul.f32 %v3745_v5, %v9088_v28  ;;  %v3748_v27 = vmul.f32 %v6626_v49, %v3747_v11 }
0x1086   :  { %v3749_v47 = vmul.f32 0.5, %v3748_v27  ;;  %v3796_v40 = vmul.f32 %v9118_v39, %v3787_v54 }
0x1088   :  { %v3750_v8 = vsub.f32 1.5, %v3749_v47  ;;  %v9133_v61 = vadd.f32 %v9121_v17, %v3796_v40 }
0x108a   :  { %v3751_v48 = vmul.f32 %v6626_v49, %v3750_v8  ;;  %6034 = vmatmul.msk.f32.gmra.mxu2 %vm428_vm5, %v9133_v61 }
0x108c   :  { %v3755_v29 = vsel %vm3754_vm6, %v6626_v49, %v3751_v48 }
0x108d   :  { %v3788_v3 = vmul.f32 %v3755_v29, %v9094_v58 }
0x108f   :  { %v3797_v28 = vmul.f32 %v9118_v39, %v3788_v3 }
0x1091   :  { %v9140_v46 = vadd.f32 %v9121_v17, %v3797_v28 }
0x1093   :  { %6035 = vmatmul.msk.f32.gmra.mxu2 %vm428_vm5, %v9140_v46 }
0x1098   :  { %v3707_v14 = vpop.xlane.xlu0 %3706 }
0x1099   :  { %v3717_v41 = vmul.f32 %v3707_v14, %v7487_v45 }
0x109b   :  { %v3723_v10 = vadd.f32 1e-05, %v3717_v41 }
0x109d   :  { %6627 = vrsqrt.f32 %v3723_v10  ;;  %vm3762_vm8 = vweird.f32 %v3723_v10 }
0x10a3   :  { %v6628_v50 = vpop.eup %6627 }
0x10a4   :  { %v3757_v63 = vmul.f32 %v6628_v50, %v3723_v10  ;;  %vm3763_vm7 = vweird.f32 %v6628_v50  ;;  %v6379_v10 = vld [vmem:[#allocation20 + $0x1] ss:$0 sm:$0xff] }
0x10a5   :  { %vm3764_vm9 = vmor %vm3762_vm8, %vm3763_vm7 }
0x10a6   :  { %v3758_v53 = vmul.f32 %v6628_v50, %v3757_v63 }
0x10a8   :  { %v3759_v37 = vmul.f32 0.5, %v3758_v53 }
0x10aa   :  { %v3760_v57 = vsub.f32 1.5, %v3759_v37 }
0x10ac   :  { %v3761_v58 = vmul.f32 %v6628_v50, %v3760_v57 }
0x10ae   :  { %v3765_v51 = vsel %vm3764_vm9, %v6628_v50, %v3761_v58 }
0x10af   :  { %v3789_v22 = vmul.f32 %v3765_v51, %v9100_v4 }
0x10b1   :  { %v3798_v6 = vmul.f32 %v9118_v39, %v3789_v22 }
0x10b3   :  { %v9148_v31 = vadd.f32 %v9121_v17, %v3798_v6 }
0x10b5   :  { %6036 = vmatmul.msk.f32.gmra.mxu2 %vm428_vm5, %v9148_v31 }
0x10b7   :  { %v3710_v56 = vpop.xlane.xlu1 %3709 }
0x10b8   :  { %v3718_v0 = vmul.f32 %v3710_v56, %v7487_v45 }
0x10ba   :  { %v3724_v7 = vadd.f32 1e-05, %v3718_v0 }
0x10bc   :  { %6629 = vrsqrt.f32 %v3724_v7  ;;  %vm3772_vm14 = vweird.f32 %v3724_v7 }
0x10c2   :  { %v6630_v62 = vpop.eup %6629 }
0x10c3   :  { %v3767_v13 = vmul.f32 %v6630_v62, %v3724_v7  ;;  %vm3773_vm13 = vweird.f32 %v6630_v62 }
0x10c4   :  { %vm3774_vm15 = vmor %vm3772_vm14, %vm3773_vm13 }
0x10c5   :  { %v3768_v59 = vmul.f32 %v6630_v62, %v3767_v13 }
0x10c7   :  { %v3769_v19 = vmul.f32 0.5, %v3768_v59 }
0x10c9   :  { %v3770_v60 = vsub.f32 1.5, %v3769_v19 }
0x10cb   :  { %v3771_v4 = vmul.f32 %v6630_v62, %v3770_v60 }
0x10cd   :  { %v3775_v36 = vsel %vm3774_vm15, %v6630_v62, %v3771_v4 }
0x10ce   :  { %v3790_v9 = vmul.f32 %v3775_v36, %v9106_v30  ;;  %v3880_v30 = vld [vmem:[#allocation19 + $0x20] sm:$0xff] }
0x10cf   :  { %v3713_v15 = vpop.xlane.xlu2 %3712  ;;  %3922 = vmatpush.msra.mxu3 %v3880_v30 }
0x10d0   :  { %v3719_v26 = vmul.f32 %v3713_v15, %v7487_v45  ;;  %v3799_v18 = vmul.f32 %v9118_v39, %v3790_v9 }
0x10d2   :  { %v3725_v20 = vadd.f32 1e-05, %v3719_v26  ;;  %v9157_v33 = vadd.f32 %v9121_v17, %v3799_v18 }
0x10d4   :  { %6631 = vrsqrt.f32 %v3725_v20  ;;  %6037 = vmatmul.msk.f32.gmra.mxu2 %vm428_vm5, %v9157_v33  ;;  %vm3782_vm1 = vweird.f32 %v3725_v20 }
0x10da   :  { %v6632_v55 = vpop.eup %6631 }
0x10db   :  { %v3777_v1 = vmul.f32 %v6632_v55, %v3725_v20  ;;  %vm3783_vm0 = vweird.f32 %v6632_v55 }
0x10dc   :  { %vm3784_vm2 = vmor %vm3782_vm1, %vm3783_vm0 }
0x10dd   :  { %v3778_v16 = vmul.f32 %v6632_v55, %v3777_v1 }
0x10df   :  { %v3779_v2 = vmul.f32 0.5, %v3778_v16 }
0x10e1   :  { %v3780_v42 = vsub.f32 1.5, %v3779_v2 }
0x10e3   :  { %v3781_v24 = vmul.f32 %v6632_v55, %v3780_v42 }
0x10e5   :  { %v3785_v25 = vsel %vm3784_vm2, %v6632_v55, %v3781_v24 }
0x10e6   :  { %v3791_v44 = vmul.f32 %v3785_v25, %v9112_v38 }
0x10e8   :  { %v3800_v43 = vmul.f32 %v9118_v39, %v3791_v44 }
0x10ea   :  { %v3809_v52 = vadd.f32 %v9121_v17, %v3800_v43 }
0x10ec   :  { %6038 = vmatmul.msk.f32.gmra.mxu2 %vm428_vm5, %v3809_v52 }
0x10f9   :  { %v3855_v49 = vpop.f32.mrf.mxu2 }
0x10fa   :  { %v3856_v12 = vadd.f32 %v6378_v34, %v3855_v49 }
0x10fc   :  { %v3873_v11 = vmax.f32 %v3856_v12, 0.0 }
0x10fe   :  { %6039 = vmatmul.msk.f32.vlgmr.msra.gmra.mxu3 %vm428_vm5, %v3873_v11 }
0x110d   :  { %v3858_v5 = vpop.f32.mrf.mxu2 }
0x110e   :  { %v3859_v54 = vadd.f32 %v6378_v34, %v3858_v5 }
0x1110   :  { %v3874_v27 = vmax.f32 %v3859_v54, 0.0 }
0x1112   :  { %6040 = vmatmul.msk.f32.gmra.mxu3 %vm428_vm5, %v3874_v27  ;;  %v6048_v27 = vld [vmem:[%s10040_s8 + $0x58] sm:$0xff] }
0x1113   :  { %4142 = vmatpush.msra.mxu1 %v6048_v27 }
0x1116   :  { %v3861_v47 = vpop.f32.mrf.mxu2 }
0x1117   :  { %v3862_v40 = vadd.f32 %v6378_v34, %v3861_v47  ;;  %v6047_v47 = vld [vmem:[%s10040_s8 + $0x50] sm:$0xff] }
0x1118   :  { %4143 = vmatpush.msra.mxu1 %v6047_v47 }
0x1119   :  { %v3875_v38 = vmax.f32 %v3862_v40, 0.0  ;;  %v6046_v40 = vld [vmem:[%s10040_s8 + $0x48] sm:$0xff] }
0x111a   :  { %4144 = vmatpush.msra.mxu1 %v6046_v40 }
0x111b   :  { %6041 = vmatmul.msk.f32.gmra.mxu3 %vm428_vm5, %v3875_v38 }
0x1138   :  { %v3864_v39 = vpop.f32.mrf.mxu2 }
0x1139   :  { %v3865_v17 = vadd.f32 %v6378_v34, %v3864_v39 }
0x113b   :  { %v3876_v8 = vmax.f32 %v3865_v17, 0.0  ;;  %v6045_v17 = vld [vmem:[%s10040_s8 + $0x40] sm:$0xff] }
0x113c   :  { %4145 = vmatpush.msra.mxu1 %v6045_v17 }
0x113d   :  { %6042 = vmatmul.msk.f32.gmra.mxu3 %vm428_vm5, %v3876_v8 }
0x1157   :  { %v3867_v48 = vpop.f32.mrf.mxu2 }
0x1158   :  { %v3868_v29 = vadd.f32 %v6378_v34, %v3867_v48 }
0x115a   :  { %v3877_v3 = vmax.f32 %v3868_v29, 0.0 }
0x115c   :  { %6043 = vmatmul.msk.f32.gmra.mxu3 %vm428_vm5, %v3877_v3 }
0x116f   :  { %v3870_v28 = vpop.f32.mrf.mxu2 }
0x1170   :  { %v3871_v14 = vadd.f32 %v6378_v34, %v3870_v28 }
0x1172   :  { %v3878_v41 = vmax.f32 %v3871_v14, 0.0 }
0x1174   :  { %6044 = vmatmul.msk.f32.gmra.mxu3 %vm428_vm5, %v3878_v41 }
0x1181   :  { %v3924_v50 = vpop.f32.mrf.mxu3 }
0x1182   :  { %v3925_v63 = vadd.f32 %v6379_v10, %v3924_v50 }
0x1184   :  { %v3942_v53 = vadd.f32 %v3925_v63, %v9125_v32 }
0x1186   :  { %v3952_v37 = vsel %vm428_vm5, %v3942_v53, 0.0 }
0x1187   :  { %3953 = vadd.xlane.f32.xlu0 %v3952_v37 }
0x1195   :  { %v3927_v57 = vpop.f32.mrf.mxu3 }
0x1196   :  { %v3928_v58 = vadd.f32 %v6379_v10, %v3927_v57 }
0x1198   :  { %v3943_v51 = vadd.f32 %v3928_v58, %v9133_v61  ;;  %v9227_v58 = vld [vmem:[#allocation25 + $0x1] ss:$0 sm:$0xff] }
0x119a   :  { %v3955_v22 = vsel %vm428_vm5, %v3943_v51, 0.0 }
0x119b   :  { %3956 = vadd.xlane.f32.xlu1 %v3955_v22 }
0x119e   :  { %v3930_v6 = vpop.f32.mrf.mxu3 }
0x119f   :  { %v3931_v56 = vadd.f32 %v6379_v10, %v3930_v6  ;;  %v9230_v6 = vld [vmem:[#allocation26 + $0x1] ss:$0 sm:$0xff] }
0x11a1   :  { %v3944_v0 = vadd.f32 %v3931_v56, %v9140_v46 }
0x11a3   :  { %v3958_v7 = vsel %vm428_vm5, %v3944_v0, 0.0 }
0x11a4   :  { %3959 = vadd.xlane.f32.xlu2 %v3958_v7 }
0x11c0   :  { %v3933_v62 = vpop.f32.mrf.mxu3 }
0x11c1   :  { %v3934_v13 = vadd.f32 %v6379_v10, %v3933_v62 }
0x11c3   :  { %v3945_v32 = vadd.f32 %v3934_v13, %v9148_v31 }
0x11c5   :  { %v3961_v59 = vsel %vm428_vm5, %v3945_v32, 0.0 }
0x11c6   :  { %3962 = vadd.xlane.f32.xlu0 %v3961_v59 }
0x11df   :  { %v3936_v19 = vpop.f32.mrf.mxu3 }
0x11e0   :  { %v3937_v60 = vadd.f32 %v6379_v10, %v3936_v19 }
0x11e2   :  { %v3946_v61 = vadd.f32 %v3937_v60, %v9157_v33 }
0x11e4   :  { %v3964_v4 = vsel %vm428_vm5, %v3946_v61, 0.0 }
0x11e5   :  { %3965 = vadd.xlane.f32.xlu1 %v3964_v4 }
0x11f7   :  { %v3939_v35 = vpop.f32.mrf.mxu3 }
0x11f8   :  { %v3940_v36 = vadd.f32 %v6379_v10, %v3939_v35 }
0x11fa   :  { %v3947_v46 = vadd.f32 %v3940_v36, %v3809_v52  ;;  %v3954_v9 = vpop.xlane.xlu0 %3953 }
0x11fb   :  { %v3970_v15 = vmul.f32 %v3954_v9, %v7487_v45 }
0x11fc   :  { %v3967_v26 = vsel %vm428_vm5, %v3947_v46, 0.0 }
0x11fd   :  { %v3976_v18 = vsub.f32 %v3942_v53, %v3970_v15  ;;  %3968 = vadd.xlane.f32.xlu2 %v3967_v26 }
0x11ff   :  { %v3982_v31 = vmul.f32 %v3976_v18, %v3976_v18 }
0x1201   :  { %v3988_v20 = vsel %vm428_vm5, %v3982_v31, 0.0 }
0x1202   :  { %3989 = vadd.xlane.f32.xlu0 %v3988_v20 }
0x120e   :  { %v3957_v21 = vpop.xlane.xlu1 %3956 }
0x120f   :  { %v3971_v33 = vmul.f32 %v3957_v21, %v7487_v45 }
0x1211   :  { %v9185_v55 = vsub.f32 %v3943_v51, %v3971_v33 }
0x1213   :  { %v3983_v1 = vmul.f32 %v9185_v55, %v9185_v55 }
0x1215   :  { %v3991_v23 = vsel %vm428_vm5, %v3983_v1, 0.0 }
0x1216   :  { %3992 = vadd.xlane.f32.xlu1 %v3991_v23 }
0x1217   :  { %v3960_v30 = vpop.xlane.xlu2 %3959 }
0x1218   :  { %v3972_v16 = vmul.f32 %v3960_v30, %v7487_v45 }
0x121a   :  { %v9191_v2 = vsub.f32 %v3944_v0, %v3972_v16 }
0x121c   :  { %v3984_v42 = vmul.f32 %v9191_v2, %v9191_v2 }
0x121e   :  { %v3994_v24 = vsel %vm428_vm5, %v3984_v42, 0.0 }
0x121f   :  { %3995 = vadd.xlane.f32.xlu2 %v3994_v24 }
0x1239   :  { %v3963_v25 = vpop.xlane.xlu0 %3962 }
0x123a   :  { %v3973_v44 = vmul.f32 %v3963_v25, %v7487_v45 }
0x123c   :  { %v9197_v43 = vsub.f32 %v3945_v32, %v3973_v44 }
0x123e   :  { %v3985_v52 = vmul.f32 %v9197_v43, %v9197_v43 }
0x1240   :  { %v3997_v34 = vsel %vm428_vm5, %v3985_v52, 0.0 }
0x1241   :  { %3998 = vadd.xlane.f32.xlu0 %v3997_v34 }
0x1258   :  { %v3966_v49 = vpop.xlane.xlu1 %3965 }
0x1259   :  { %v3974_v12 = vmul.f32 %v3966_v49, %v7487_v45 }
0x125b   :  { %v9203_v11 = vsub.f32 %v3946_v61, %v3974_v12 }
0x125d   :  { %v3986_v5 = vmul.f32 %v9203_v11, %v9203_v11 }
0x125f   :  { %v4000_v54 = vsel %vm428_vm5, %v3986_v5, 0.0 }
0x1260   :  { %4001 = vadd.xlane.f32.xlu1 %v4000_v54 }
0x1270   :  { %v3969_v38 = vpop.xlane.xlu2 %3968 }
0x1271   :  { %v3975_v39 = vmul.f32 %v3969_v38, %v7487_v45 }
0x1273   :  { %v9221_v8 = vsub.f32 %v3947_v46, %v3975_v39 }
0x1275   :  { %v3990_v48 = vpop.xlane.xlu0 %3989  ;;  %v3987_v29 = vmul.f32 %v9221_v8, %v9221_v8 }
0x1276   :  { %v4006_v3 = vmul.f32 %v3990_v48, %v7487_v45 }
0x1277   :  { %v4003_v28 = vsel %vm428_vm5, %v3987_v29, 0.0 }
0x1278   :  { %v4012_v14 = vadd.f32 1e-05, %v4006_v3  ;;  %4004 = vadd.xlane.f32.xlu2 %v4003_v28 }
0x127a   :  { %6633 = vrsqrt.f32 %v4012_v14  ;;  %vm4024_vm4 = vweird.f32 %v4012_v14 }
0x1280   :  { %v6634_v41 = vpop.eup %6633 }
0x1281   :  { %v4019_v10 = vmul.f32 %v6634_v41, %v4012_v14  ;;  %vm4025_vm3 = vweird.f32 %v6634_v41 }
0x1282   :  { %vm4026_vm6 = vmor %vm4024_vm4, %vm4025_vm3 }
0x1283   :  { %v4020_v50 = vmul.f32 %v6634_v41, %v4019_v10 }
0x1285   :  { %v4021_v63 = vmul.f32 0.5, %v4020_v50 }
0x1287   :  { %v4022_v53 = vsub.f32 1.5, %v4021_v63 }
0x1289   :  { %v4023_v37 = vmul.f32 %v6634_v41, %v4022_v53  ;;  %v3993_v57 = vpop.xlane.xlu1 %3992 }
0x128a   :  { %v4007_v51 = vmul.f32 %v3993_v57, %v7487_v45 }
0x128b   :  { %v4027_v22 = vsel %vm4026_vm6, %v6634_v41, %v4023_v37 }
0x128c   :  { %v4078_v56 = vmul.f32 %v4027_v22, %v3976_v18  ;;  %v4013_v0 = vadd.f32 1e-05, %v4007_v51 }
0x128e   :  { %v4087_v7 = vmul.f32 %v9227_v58, %v4078_v56  ;;  %6635 = vrsqrt.f32 %v4013_v0  ;;  %vm4034_vm8 = vweird.f32 %v4013_v0 }
0x1290   :  { %v9234_v62 = vadd.f32 %v9230_v6, %v4087_v7 }
0x1292   :  { %v3996_v13 = vpop.xlane.xlu2 %3995  ;;  %6049 = vmatmul.msk.f32.vlgmr.msra.gmra.mxu1 %vm428_vm5, %v9234_v62 }
0x1293   :  { %v4008_v32 = vmul.f32 %v3996_v13, %v7487_v45 }
0x1294   :  { %v6636_v59 = vpop.eup %6635 }
0x1295   :  { %v4029_v19 = vmul.f32 %v6636_v59, %v4013_v0  ;;  %v4014_v60 = vadd.f32 1e-05, %v4008_v32  ;;  %vm4035_vm7 = vweird.f32 %v6636_v59 }
0x1296   :  { %vm4036_vm9 = vmor %vm4034_vm8, %vm4035_vm7 }
0x1297   :  { %v4030_v61 = vmul.f32 %v6636_v59, %v4029_v19  ;;  %6637 = vrsqrt.f32 %v4014_v60  ;;  %vm4044_vm14 = vweird.f32 %v4014_v60  ;;  %v6382_v19 = vld [vmem:[#allocation11 + $0x2] ss:$0 sm:$0xff] }
0x1299   :  { %v4031_v4 = vmul.f32 0.5, %v4030_v61 }
0x129b   :  { %v4032_v35 = vsub.f32 1.5, %v4031_v4 }
0x129d   :  { %v6638_v36 = vpop.eup %6637  ;;  %v4033_v46 = vmul.f32 %v6636_v59, %v4032_v35 }
0x129e   :  { %v4039_v9 = vmul.f32 %v6638_v36, %v4014_v60  ;;  %vm4045_vm13 = vweird.f32 %v6638_v36 }
0x129f   :  { %v4037_v15 = vsel %vm4036_vm9, %v6636_v59, %v4033_v46  ;;  %vm4046_vm15 = vmor %vm4044_vm14, %vm4045_vm13 }
0x12a0   :  { %v4079_v26 = vmul.f32 %v4037_v15, %v9185_v55  ;;  %v4040_v18 = vmul.f32 %v6638_v36, %v4039_v9 }
0x12a2   :  { %v4041_v31 = vmul.f32 0.5, %v4040_v18  ;;  %v4088_v20 = vmul.f32 %v9227_v58, %v4079_v26 }
0x12a4   :  { %v4042_v21 = vsub.f32 1.5, %v4041_v31  ;;  %v9242_v33 = vadd.f32 %v9230_v6, %v4088_v20 }
0x12a6   :  { %v4043_v1 = vmul.f32 %v6638_v36, %v4042_v21  ;;  %6050 = vmatmul.msk.f32.gmra.mxu1 %vm428_vm5, %v9242_v33 }
0x12a8   :  { %v4047_v23 = vsel %vm4046_vm15, %v6638_v36, %v4043_v1 }
0x12a9   :  { %v4080_v30 = vmul.f32 %v4047_v23, %v9191_v2 }
0x12ab   :  { %v4089_v55 = vmul.f32 %v9227_v58, %v4080_v30 }
0x12ad   :  { %v9249_v16 = vadd.f32 %v9230_v6, %v4089_v55 }
0x12af   :  { %6051 = vmatmul.msk.f32.gmra.mxu1 %vm428_vm5, %v9249_v16 }
0x12b4   :  { %v3999_v42 = vpop.xlane.xlu0 %3998 }
0x12b5   :  { %v4009_v24 = vmul.f32 %v3999_v42, %v7487_v45 }
0x12b7   :  { %v4015_v25 = vadd.f32 1e-05, %v4009_v24 }
0x12b9   :  { %6639 = vrsqrt.f32 %v4015_v25  ;;  %vm4054_vm1 = vweird.f32 %v4015_v25 }
0x12bf   :  { %v6640_v44 = vpop.eup %6639 }
0x12c0   :  { %v4049_v52 = vmul.f32 %v6640_v44, %v4015_v25  ;;  %vm4055_vm0 = vweird.f32 %v6640_v44 }
0x12c1   :  { %vm4056_vm2 = vmor %vm4054_vm1, %vm4055_vm0 }
0x12c2   :  { %v4050_v34 = vmul.f32 %v6640_v44, %v4049_v52 }
0x12c4   :  { %v4051_v49 = vmul.f32 0.5, %v4050_v34 }
0x12c6   :  { %v4052_v12 = vsub.f32 1.5, %v4051_v49 }
0x12c8   :  { %v4053_v2 = vmul.f32 %v6640_v44, %v4052_v12 }
0x12ca   :  { %v4057_v5 = vsel %vm4056_vm2, %v6640_v44, %v4053_v2 }
0x12cb   :  { %v4081_v54 = vmul.f32 %v4057_v5, %v9197_v43 }
0x12cd   :  { %v4090_v27 = vmul.f32 %v9227_v58, %v4081_v54 }
0x12cf   :  { %v9257_v47 = vadd.f32 %v9230_v6, %v4090_v27 }
0x12d1   :  { %6052 = vmatmul.msk.f32.gmra.mxu1 %vm428_vm5, %v9257_v47 }
0x12d3   :  { %v4002_v40 = vpop.xlane.xlu1 %4001 }
0x12d4   :  { %v4010_v38 = vmul.f32 %v4002_v40, %v7487_v45 }
0x12d6   :  { %v4016_v39 = vadd.f32 1e-05, %v4010_v38 }
0x12d8   :  { %6641 = vrsqrt.f32 %v4016_v39  ;;  %vm4064_vm4 = vweird.f32 %v4016_v39 }
0x12de   :  { %v6642_v17 = vpop.eup %6641 }
0x12df   :  { %v4059_v48 = vmul.f32 %v6642_v17, %v4016_v39  ;;  %vm4065_vm3 = vweird.f32 %v6642_v17 }
0x12e0   :  { %vm4066_vm6 = vmor %vm4064_vm4, %vm4065_vm3 }
0x12e1   :  { %v4060_v29 = vmul.f32 %v6642_v17, %v4059_v48 }
0x12e3   :  { %v4061_v3 = vmul.f32 0.5, %v4060_v29 }
0x12e5   :  { %v4062_v28 = vsub.f32 1.5, %v4061_v3 }
0x12e7   :  { %v4063_v43 = vmul.f32 %v6642_v17, %v4062_v28 }
0x12e9   :  { %v4067_v14 = vsel %vm4066_vm6, %v6642_v17, %v4063_v43 }
0x12ea   :  { %v4082_v41 = vmul.f32 %v4067_v14, %v9203_v11 }
0x12eb   :  { %v4005_v10 = vpop.xlane.xlu2 %4004 }
0x12ec   :  { %v4011_v50 = vmul.f32 %v4005_v10, %v7487_v45  ;;  %v4091_v63 = vmul.f32 %v9227_v58, %v4082_v41 }
0x12ee   :  { %v4017_v53 = vadd.f32 1e-05, %v4011_v50  ;;  %v9266_v37 = vadd.f32 %v9230_v6, %v4091_v63 }
0x12f0   :  { %6643 = vrsqrt.f32 %v4017_v53  ;;  %6053 = vmatmul.msk.f32.gmra.mxu1 %vm428_vm5, %v9266_v37  ;;  %vm4074_vm8 = vweird.f32 %v4017_v53 }
0x12f6   :  { %v6644_v57 = vpop.eup %6643 }
0x12f7   :  { %v4069_v51 = vmul.f32 %v6644_v57, %v4017_v53  ;;  %vm4075_vm7 = vweird.f32 %v6644_v57 }
0x12f8   :  { %vm4076_vm9 = vmor %vm4074_vm8, %vm4075_vm7 }
0x12f9   :  { %v4070_v22 = vmul.f32 %v6644_v57, %v4069_v51 }
0x12fb   :  { %v4071_v56 = vmul.f32 0.5, %v4070_v22 }
0x12fd   :  { %v4072_v0 = vsub.f32 1.5, %v4071_v56 }
0x12ff   :  { %v4073_v11 = vmul.f32 %v6644_v57, %v4072_v0 }
0x1301   :  { %v4077_v7 = vsel %vm4076_vm9, %v6644_v57, %v4073_v11 }
0x1302   :  { %v4083_v13 = vmul.f32 %v4077_v7, %v9221_v8 }
0x1304   :  { %v4092_v32 = vmul.f32 %v9227_v58, %v4083_v13 }
0x1306   :  { %v9273_v59 = vadd.f32 %v9230_v6, %v4092_v32 }
0x1308   :  { %6054 = vmatmul.msk.f32.gmra.mxu1 %vm428_vm5, %v9273_v59 }
0x130f   :  { %v4147_v60 = vpop.f32.mrf.mxu1 }
0x1310   :  { %v9277_v61 = vadd.f32 %v6382_v19, %v4147_v60 }
0x1312   :  { %4222 = vrot.lane.b32.xlu2 %v9277_v61, %s7236_s12  ;;  %4216 = vrot.lane.b32.xlu1 %v9277_v61, %s7234_s4  ;;  %v9284_v8 = vmul.f32 0.35355338, %v9277_v61 }
0x1314   :  { %4174 = vrot.lane.b32.xlu0 %v9284_v8, %s7234_s4 }
0x131a   :  { %4228 = vrot.lane.b32.xlu2 %v9277_v61, %s7237_s30  ;;  %4180 = vrot.lane.b32.xlu1 %v9284_v8, %s7236_s12 }
0x1322   :  { %4186 = vrot.lane.b32.xlu2 %v9284_v8, %s7237_s30 }
0x1323   :  { %v4150_v58 = vpop.f32.mrf.mxu1 }
0x1324   :  { %v9294_v6 = vadd.f32 %v6382_v19, %v4150_v58 }
0x1326   :  { %4230 = vrot.lane.b32.xlu1 %v9294_v6, %s7237_s30  ;;  %4224 = vrot.lane.b32.xlu0 %v9294_v6, %s7236_s12  ;;  %v9303_v4 = vmul.f32 0.35355338, %v9294_v6 }
0x132a   :  { %4218 = vrot.lane.b32.xlu2 %v9294_v6, %s7234_s4 }
0x132c   :  { %v4153_v35 = vpop.f32.mrf.mxu1 }
0x132d   :  { %v9311_v36 = vadd.f32 %v6382_v19, %v4153_v35 }
0x132e   :  { %4176 = vrot.lane.b32.xlu1 %v9303_v4, %s7234_s4  ;;  %4188 = vrot.lane.b32.xlu0 %v9303_v4, %s7237_s30 }
0x132f   :  { %v9318_v46 = vmul.f32 0.35355338, %v9311_v36 }
0x1332   :  { %4182 = vrot.lane.b32.xlu2 %v9303_v4, %s7236_s12 }
0x1336   :  { %4226 = vrot.lane.b32.xlu1 %v9311_v36, %s7236_s12  ;;  %4220 = vrot.lane.b32.xlu0 %v9311_v36, %s7234_s4 }
0x133a   :  { %4184 = vrot.lane.b32.xlu2 %v9318_v46, %s7236_s12 }
0x133e   :  { %4178 = vrot.lane.b32.xlu1 %v9318_v46, %s7234_s4  ;;  %4232 = vrot.lane.b32.xlu0 %v9311_v36, %s7237_s30 }
0x134e   :  { %v4156_v9 = vpop.f32.mrf.mxu1 }
0x134f   :  { %v9326_v15 = vadd.f32 %v6382_v19, %v4156_v9 }
0x1351   :  { %4249 = vrot.lane.b32.xlu0 %v9326_v15, %s7237_s30  ;;  %4243 = vrot.lane.b32.xlu2 %v9326_v15, %s7236_s12  ;;  %v9378_v12 = vmul.f32 0.35355338, %v9326_v15 }
0x1352   :  { %4237 = vrot.lane.b32.xlu1 %v9326_v15, %s7234_s4 }
0x136c   :  { %v9340_v31 = vpop.permute.xlu2 %4222 }
0x136d   :  { %v4159_v26 = vpop.f32.mrf.mxu1 }
0x136e   :  { %v9334_v18 = vadd.f32 %v6382_v19, %v4159_v26 }
0x1370   :  { %4245 = vrot.lane.b32.xlu0 %v9334_v18, %s7236_s12  ;;  %4239 = vrot.lane.b32.xlu2 %v9334_v18, %s7234_s4  ;;  %v9412_v48 = vmul.f32 0.35355338, %v9334_v18 }
0x1374   :  { %v9346_v20 = vpop.permute.xlu2 %4228 }
0x1378   :  { %4251 = vrot.lane.b32.xlu0 %v9334_v18, %s7237_s30  ;;  %4343 = vrot.lane.b32.xlu2 %v9340_v31, %s7235_s10 }
0x137c   :  { %v9354_v30 = vpop.permute.xlu2 %4186 }
0x1384   :  { %v4217_v1 = vpop.permute.xlu1 %4216  ;;  %v4219_v24 = vpop.permute.xlu2 %4218 }
0x1385   :  { %v4162_v21 = vpop.f32.mrf.mxu1  ;;  %v6311_v53 = vpack.i.bf16 %v9340_v31, %v4217_v1 }
0x1386   :  { %v9348_v23 = vadd.f32 %v6382_v19, %v4162_v21  ;;  %v9356_v55 = vpop.permute.xlu0 %4174 }
0x1388   :  { %4241 = vrot.lane.b32.xlu0 %v9348_v23, %s7234_s4  ;;  %4247 = vrot.lane.b32.xlu1 %v9348_v23, %s7236_s12  ;;  %v9417_v29 = vmul.f32 0.35355338, %v9348_v23 }
0x138c   :  { %v9358_v42 = vpop.permute.xlu1 %4180  ;;  %v9369_v52 = vpop.permute.xlu2 %4182 }
0x1390   :  { %4253 = vrot.lane.b32.xlu0 %v9348_v23, %s7237_s30  ;;  %4299 = vrot.lane.b32.xlu1 %v4217_v1, %s7235_s10 }
0x1394   :  { %v9380_v2 = vpop.permute.xlu2 %4184 }
0x1398   :  { %v9363_v25 = vpop.permute.xlu1 %4230  ;;  %4387 = vrot.lane.b32.xlu0 %v9346_v20, %s7235_s10  ;;  %4301 = vrot.lane.b32.xlu1 %v4219_v24, %s7235_s10  ;;  %v4225_v44 = vpop.permute.xlu0 %4224 }
0x1399   :  { %4345 = vrot.lane.b32.xlu2 %v4225_v44, %s7235_s10  ;;  %v6306_v41 = vpack.i.bf16 %v4225_v44, %v4219_v24 }
0x13a0   :  { %v9371_v34 = vpop.permute.xlu1 %4176  ;;  %4389 = vrot.lane.b32.xlu0 %v9363_v25, %s7235_s10  ;;  %v9375_v49 = vpop.permute.xlu0 %4188 }
0x13a8   :  { %v9382_v5 = vpop.permute.xlu1 %4226  ;;  %4201 = vrot.lane.b32.xlu0 %v9378_v12, %s7236_s12  ;;  %v9386_v54 = vpop.permute.xlu0 %4220 }
0x13a9   :  { %4347 = vrot.lane.b32.xlu2 %v9382_v5, %s7235_s10  ;;  %4303 = vrot.lane.b32.xlu1 %v9386_v54, %s7235_s10  ;;  %v6301_v26 = vpack.i.bf16 %v9382_v5, %v9386_v54 }
0x13ab   :  { %v9392_v27 = vpop.permute.xlu2 %4243 }
0x13b0   :  { %v9394_v40 = vpop.permute.xlu0 %4232  ;;  %v9402_v38 = vpop.permute.xlu1 %4178 }
0x13b1   :  { %4519 = vrot.lane.b32.xlu1 %v9392_v27, %s7235_s10  ;;  %4391 = vrot.lane.b32.xlu2 %v9394_v40, %s7235_s10  ;;  %v6316_v58 = vpack.i.bf16 %v9363_v25, %v9394_v40 }
0x13b9   :  { %4195 = vrot.lane.b32.xlu2 %v9378_v12, %s7234_s4 }
0x13c1   :  { %4190 = vrot.lane.b32.xlu2 %v9318_v46, %s7237_s30 }
0x13c3   :  { %v4250_v3 = vpop.permute.xlu0 %4249 }
0x13c4   :  { %v9406_v39 = vpop.permute.xlu1 %4237 }
0x13c9   :  { %4475 = vrot.lane.b32.xlu2 %v9406_v39, %s7235_s10 }
0x13ca   :  { %v4240_v17 = vpop.permute.xlu2 %4239 }
0x13cb   :  { %4477 = vrot.lane.b32.xlu0 %v4240_v17, %s7235_s10 }
0x13d1   :  { %4203 = vrot.lane.b32.xlu2 %v9412_v48, %s7236_s12 }
0x13d2   :  { %v4344_v14 = vpop.permute.xlu2 %4343 }
0x13d9   :  { %4199 = vrot.lane.b32.xlu2 %v9417_v29, %s7234_s4 }
0x13e1   :  { %4257 = vrot.lane.b32.xlu2 %v9294_v6, %s7235_s10 }
0x13e2   :  { %v4246_v28 = vpop.permute.xlu0 %4245 }
0x13e3   :  { %4521 = vrot.lane.b32.xlu1 %v4246_v28, %s7235_s10  ;;  %v6321_v35 = vpack.i.bf16 %v9406_v39, %v4246_v28 }
0x13e9   :  { %4211 = vrot.lane.b32.xlu2 %v9417_v29, %s7237_s30 }
0x13ea   :  { %v4252_v43 = vpop.permute.xlu0 %4251 }
0x13eb   :  { %4565 = vrot.lane.b32.xlu0 %v4252_v43, %s7235_s10  ;;  %v6326_v22 = vpack.i.bf16 %v4250_v3, %v4252_v43 }
0x13f1   :  { %4431 = vrot.lane.b32.xlu2 %v9326_v15, %s7235_s10 }
0x13f3   :  { %v4346_v63 = vpop.permute.xlu2 %4345 }
0x13f9   :  { %6307 = vrot.lane.b32.xlu2 %v6306_v41, %s7238_s24 }
0x13fa   :  { %v4248_v10 = vpop.permute.xlu1 %4247  ;;  %v4242_v50 = vpop.permute.xlu0 %4241 }
0x13fb   :  { %4523 = vrot.lane.b32.xlu0 %v4248_v10, %s7235_s10  ;;  %4479 = vrot.lane.b32.xlu1 %v4242_v50, %s7235_s10  ;;  %v6336_v7 = vpack.i.bf16 %v4240_v17, %v4248_v10  ;;  %v6331_v31 = vpack.i.bf16 %v4242_v50, %v9346_v20 }
0x1401   :  { %6312 = vrot.lane.b32.xlu2 %v6311_v53, %s7238_s24 }
0x1402   :  { %v4254_v57 = vpop.permute.xlu0 %4253  ;;  %v4300_v56 = vpop.permute.xlu1 %4299 }
0x1403   :  { %v4348_v51 = vpop.permute.xlu2 %4347  ;;  %4563 = vrot.lane.b32.xlu0 %v4250_v3, %s7235_s10  ;;  %4197 = vrot.lane.b32.xlu1 %v9412_v48, %s7234_s4  ;;  %v6341_v21 = vpack.i.bf16 %v4254_v57, %v9392_v27 }
0x1404   :  { %6067 = vmatpush.xpose.msk.msrb.mxu3 %vm743_vm10, %v4348_v51 }
0x1408   :  { %6068 = vmatpush.xpose.msk.msrb.mxu3 %vm743_vm10, %v4346_v63 }
0x1409   :  { %6327 = vrot.lane.b32.xlu2 %v6326_v22, %s7238_s24 }
0x140a   :  { %v4388_v0 = vpop.permute.xlu0 %4387  ;;  %v4302_v32 = vpop.permute.xlu1 %4301 }
0x140b   :  { %v4392_v11 = vpop.permute.xlu2 %4391  ;;  %4259 = vrot.lane.b32.xlu0 %v9311_v36, %s7235_s10  ;;  %4567 = vrot.lane.b32.xlu1 %v4254_v57, %s7235_s10 }
0x140c   :  { %6069 = vmatpush.xpose.msk.msrb.mxu3 %vm743_vm10, %v4344_v14  ;;  %6073 = vmatpush.xpose.msk.msrb.mxu1 %vm743_vm10, %v4392_v11 }
0x140f   :  { %6070 = vmatmul.msk.f32.vlgmr.msrb.gmra.mxu3 %vm743_vm10, %v9358_v42 }
0x1411   :  { %6337 = vrot.lane.b32.xlu2 %v6336_v7, %s7238_s24 }
0x1412   :  { %v4390_v13 = vpop.permute.xlu0 %4389 }
0x1413   :  { %4209 = vrot.lane.b32.xlu0 %v9412_v48, %s7237_s30  ;;  %4207 = vrot.lane.b32.xlu1 %v9378_v12, %s7237_s30  ;;  %v4196_v60 = vpop.permute.xlu2 %4195  ;;  %s7241_s30 = smov [#allocation28]  }
0x1414   :  { %6074 = vmatpush.xpose.msk.msrb.mxu1 %vm743_vm10, %v4390_v13 }
0x1417   :  { %6071 = vmatmul.msk.f32.gmra.mxu3 %vm743_vm10, %v9369_v52 }
0x1418   :  { %6075 = vmatpush.xpose.msk.msrb.mxu1 %vm743_vm10, %v4388_v0 }
0x141b   :  { %6076 = vmatmul.msk.f32.vlgmr.msrb.gmra.mxu1 %vm743_vm10, %v9354_v30  ;;  %v4304_v19 = vpop.permute.xlu1 %4303  ;;  %4435 = vrot.lane.b32.xlu0 %v9348_v23, %s7235_s10  ;;  %v4191_v9 = vpop.permute.xlu2 %4190 }
0x141c   :  { %4205 = vrot.lane.b32.xlu1 %v9417_v29, %s7236_s12  ;;  %6061 = vmatpush.xpose.msk.msra.mxu2 %vm743_vm10, %v4304_v19  ;;  %v4202_v30 = vpop.permute.xlu0 %4201  ;;  %s5814_s12 = sshll.u32 %s10055_s23, 4  ;;  %s5815_s12 = int_to_ptr.hbm [resolvable:$true] %s5814_s12 }
0x141f   :  { %6072 = vmatmul.msk.f32.gmra.mxu3 %vm743_vm10, %v9380_v2 }
0x1420   :  { %6062 = vmatpush.xpose.msk.msra.mxu2 %vm743_vm10, %v4302_v32 }
0x1423   :  { %6077 = vmatmul.msk.f32.gmra.mxu1 %vm743_vm10, %v9375_v49  ;;  %6317 = vrot.lane.b32.xlu0 %v6316_v58, %s7238_s24  ;;  %v4476_v1 = vpop.permute.xlu2 %4475  ;;  %v4520_v42 = vpop.permute.xlu1 %4519 }
0x1424   :  { %4255 = vrot.lane.b32.xlu1 %v9277_v61, %s7235_s10  ;;  %6063 = vmatpush.xpose.msk.msra.mxu2 %vm743_vm10, %v4300_v56 }
0x1427   :  { %6064 = vmatmul.msk.f32.vlgmr.msra.gmra.mxu2 %vm743_vm10, %v9356_v55 }
0x142b   :  { %6078 = vmatmul.msk.f32.gmra.mxu1 %vm743_vm10, %v4191_v9  ;;  %6322 = vrot.lane.b32.xlu0 %v6321_v35, %s7238_s24  ;;  %v4204_v55 = vpop.permute.xlu2 %4203 }
0x142c   :  { %4433 = vrot.lane.b32.xlu1 %v9334_v18, %s7235_s10 }
0x142f   :  { %6065 = vmatmul.msk.f32.gmra.mxu2 %vm743_vm10, %v9371_v34 }
0x1433   :  { %v4200_v25 = vpop.permute.xlu2 %4199 }
0x1434   :  { %6302 = vrot.lane.b32.xlu1 %v6301_v26, %s7238_s24 }
0x1437   :  { %6066 = vmatmul.msk.f32.gmra.mxu2 %vm743_vm10, %v9402_v38 }
0x143b   :  { %v4258_v34 = vpop.permute.xlu2 %4257 }
0x143c   :  { %6332 = vrot.lane.b32.xlu1 %v6331_v31, %s7238_s24 }
0x143d   :  { %v4478_v24 = vpop.permute.xlu0 %4477 }
0x1443   :  { %v4212_v54 = vpop.permute.xlu2 %4211 }
0x1444   :  { %6342 = vrot.lane.b32.xlu1 %v6341_v21, %s7238_s24 }
0x144b   :  { %v4432_v38 = vpop.permute.xlu2 %4431 }
0x1453   :  { %v6308_v3 = vpop.permute.xlu2 %6307 }
0x1454   :  { %v6310_v0 = vunpack.i.h.bf16 %v6308_v3  ;;  %v6309_v11 = vunpack.i.l.bf16 %v6308_v3 }
0x1455   :  { %v4522_v44 = vpop.permute.xlu1 %4521 }
0x145b   :  { %v6313_v14 = vpop.permute.xlu2 %6312 }
0x145c   :  { %v6314_v13 = vunpack.i.l.bf16 %v6313_v14 }
0x145d   :  { %v4566_v52 = vpop.permute.xlu0 %4565 }
0x1463   :  { %v6328_v57 = vpop.permute.xlu2 %6327 }
0x146b   :  { %v6338_v7 = vpop.permute.xlu2 %6337 }
0x146c   :  { %v6339_v19 = vunpack.i.l.bf16 %v6338_v7  ;;  %v6340_v9 = vunpack.i.h.bf16 %v6338_v7 }
0x146d   :  { %v4480_v49 = vpop.permute.xlu1 %4479  ;;  %v4524_v2 = vpop.permute.xlu0 %4523 }
0x146e   :  { %6085 = vmatpush.xpose.msk.msrb.mxu2 %vm743_vm10, %v4480_v49  ;;  %6091 = vmatpush.xpose.msk.msra.mxu3 %vm743_vm10, %v4524_v2 }
0x1472   :  { %6086 = vmatpush.xpose.msk.msrb.mxu2 %vm743_vm10, %v4478_v24  ;;  %6092 = vmatpush.xpose.msk.msra.mxu3 %vm743_vm10, %v4522_v44 }
0x1475   :  { %v4198_v20 = vpop.permute.xlu1 %4197  ;;  %v4564_v5 = vpop.permute.xlu0 %4563 }
0x1476   :  { %6087 = vmatpush.xpose.msk.msrb.mxu2 %vm743_vm10, %v4476_v1  ;;  %6093 = vmatpush.xpose.msk.msra.mxu3 %vm743_vm10, %v4520_v42  ;;  %v6329_v1 = vunpack.i.l.bf16 %v6328_v57 }
0x1479   :  { %6088 = vmatmul.msk.f32.vlgmr.msrb.gmra.mxu2 %vm743_vm10, %v4196_v60  ;;  %6094 = vmatmul.msk.f32.vlgmr.msra.gmra.mxu3 %vm743_vm10, %v4202_v30  ;;  %v6330_v30 = vunpack.i.h.bf16 %v6328_v57 }
0x147d   :  { %v4568_v27 = vpop.permute.xlu1 %4567  ;;  %v4260_v40 = vpop.permute.xlu0 %4259 }
0x147e   :  { %6055 = vmatpush.xpose.msk.msra.mxu0 %vm743_vm10, %v4260_v40  ;;  %6097 = vmatpush.xpose.msk.msra.mxu1 %vm743_vm10, %v4568_v27 }
0x1481   :  { %6089 = vmatmul.msk.f32.gmra.mxu2 %vm743_vm10, %v4198_v20  ;;  %6095 = vmatmul.msk.f32.gmra.mxu3 %vm743_vm10, %v4204_v55 }
0x1482   :  { %6056 = vmatpush.xpose.msk.msra.mxu0 %vm743_vm10, %v4258_v34  ;;  %6098 = vmatpush.xpose.msk.msra.mxu1 %vm743_vm10, %v4566_v52 }
0x1485   :  { %v4208_v39 = vpop.permute.xlu1 %4207  ;;  %v4210_v17 = vpop.permute.xlu0 %4209 }
0x1486   :  { %6099 = vmatpush.xpose.msk.msra.mxu1 %vm743_vm10, %v4564_v5 }
0x1489   :  { %6090 = vmatmul.msk.f32.gmra.mxu2 %vm743_vm10, %v4200_v25  ;;  %6100 = vmatmul.msk.f32.vlgmr.msra.gmra.mxu1 %vm743_vm10, %v4208_v39 }
0x148d   :  { %v4436_v28 = vpop.permute.xlu0 %4435 }
0x148e   :  { %v4206_v43 = vpop.permute.xlu1 %4205 }
0x148f   :  { %6096 = vmatmul.msk.f32.gmra.mxu3 %vm743_vm10, %v4206_v43 }
0x1491   :  { %6101 = vmatmul.msk.f32.gmra.mxu1 %vm743_vm10, %v4210_v17 }
0x1495   :  { %v6318_v41 = vpop.permute.xlu0 %6317 }
0x1496   :  { %v4256_v10 = vpop.permute.xlu1 %4255  ;;  %v6319_v50 = vunpack.i.l.bf16 %v6318_v41  ;;  %v6320_v63 = vunpack.i.h.bf16 %v6318_v41 }
0x1497   :  { %6057 = vmatpush.xpose.msk.msra.mxu0 %vm743_vm10, %v4256_v10 }
0x1498   :  { %5071 = vmatpush.msrb.mxu1 %v6319_v50  ;;  %v9540_v44 = vpop.f32.mrf.mxu1 }
0x1499   :  { %6102 = vmatmul.msk.f32.gmra.mxu1 %vm743_vm10, %v4212_v54  ;;  %v4634_v34 = vsel %vm1090_vm11, %v9540_v44, -inf }
0x149a   :  { %6058 = vmatmul.msk.f32.vlgmr.msra.gmra.mxu0 %vm743_vm10, %v9284_v8  ;;  %5072 = vmatpush.msrb.mxu1 %v6320_v63  ;;  %v6315_v8 = vunpack.i.h.bf16 %v6313_v14 }
0x149b   :  { %6079 = vmatpush.xpose.msk.msrb.mxu0 %vm743_vm10, %v4436_v28 }
0x149d   :  { %v6323_v32 = vpop.permute.xlu0 %6322 }
0x149e   :  { %v4434_v53 = vpop.permute.xlu1 %4433 }
0x149f   :  { %6080 = vmatpush.xpose.msk.msrb.mxu0 %vm743_vm10, %v4434_v53 }
0x14a0   :  { %v9552_v20 = vpop.f32.mrf.mxu1 }
0x14a1   :  { %v4637_v28 = vsel %vm1090_vm11, %v9552_v20, -inf }
0x14a2   :  { %6059 = vmatmul.msk.f32.gmra.mxu0 %vm743_vm10, %v9303_v4  ;;  %v6324_v4 = vunpack.i.l.bf16 %v6323_v32 }
0x14a3   :  { %6081 = vmatpush.xpose.msk.msrb.mxu0 %vm743_vm10, %v4432_v38 }
0x14a6   :  { %v6303_v51 = vpop.permute.xlu1 %6302 }
0x14a7   :  { %v6305_v22 = vunpack.i.h.bf16 %v6303_v51  ;;  %v6304_v56 = vunpack.i.l.bf16 %v6303_v51 }
0x14a8   :  { %v9566_v17 = vpop.f32.mrf.mxu1 }
0x14a9   :  { %4983 = vmatpush.msra.mxu2 %v6304_v56  ;;  %5027 = vmatpush.msrb.mxu3 %v6305_v22 }
0x14aa   :  { %6060 = vmatmul.msk.f32.gmra.mxu0 %vm743_vm10, %v9318_v46  ;;  %v6325_v46 = vunpack.i.h.bf16 %v6323_v32  ;;  %v9550_v2 = vpop.f32.mrf.mxu2 }
0x14ab   :  { %4984 = vmatpush.msra.mxu2 %v6309_v11  ;;  %5028 = vmatpush.msrb.mxu3 %v6310_v0  ;;  %v4616_v54 = vsel %vm1090_vm11, %v9550_v2, -inf  ;;  %v4640_v11 = vsel %vm1090_vm11, %v9566_v17, -inf }
0x14ad   :  { %4985 = vmatpush.msra.mxu2 %v6314_v13  ;;  %5029 = vmatpush.msrb.mxu3 %v6315_v8 }
0x14ae   :  { %v6333_v60 = vpop.permute.xlu1 %6332 }
0x14af   :  { %5203 = vmatpush.msra.mxu3 %v6339_v19  ;;  %v6335_v58 = vunpack.i.h.bf16 %v6333_v60  ;;  %v6334_v35 = vunpack.i.l.bf16 %v6333_v60 }
0x14b1   :  { %5204 = vmatpush.msra.mxu3 %v6324_v4  ;;  %5073 = vmatpush.msrb.mxu1 %v6334_v35 }
0x14b2   :  { %5159 = vmatpush.msrb.mxu2 %v6335_v58  ;;  %6082 = vmatmul.msk.f32.vlgmr.msrb.gmra.mxu0 %vm743_vm10, %v9378_v12  ;;  %v9564_v39 = vpop.f32.mrf.mxu2 }
0x14b3   :  { %v4619_v57 = vsel %vm1090_vm11, %v9564_v39, -inf }
0x14b4   :  { %5160 = vmatpush.msrb.mxu2 %v6340_v9 }
0x14b6   :  { %5161 = vmatpush.msrb.mxu2 %v6325_v46  ;;  %v6343_v26 = vpop.permute.xlu1 %6342 }
0x14b7   :  { %v6345_v31 = vunpack.i.h.bf16 %v6343_v26  ;;  %v6344_v21 = vunpack.i.l.bf16 %v6343_v26 }
0x14b9   :  { %5205 = vmatpush.msra.mxu3 %v6344_v21  ;;  %5247 = vmatpush.msra.mxu1 %v6345_v31 }
0x14ba   :  { %6083 = vmatmul.msk.f32.gmra.mxu0 %vm743_vm10, %v9412_v48  ;;  %v9578_v10 = vpop.f32.mrf.mxu2 }
0x14bb   :  { %5248 = vmatpush.msra.mxu1 %v6329_v1  ;;  %v4622_v19 = vsel %vm1090_vm11, %v9578_v10, -inf }
0x14bd   :  { %5249 = vmatpush.msra.mxu1 %v6330_v30 }
0x14c2   :  { %6084 = vmatmul.msk.f32.gmra.mxu0 %vm743_vm10, %v9417_v29  ;;  %v9542_v29 = vpop.f32.mrf.mxu3 }
0x14c3   :  { %v4625_v27 = vsel %vm1090_vm11, %v9542_v29, -inf }
0x14ca   :  { %v9562_v38 = vpop.f32.mrf.mxu3 }
0x14cb   :  { %v4628_v43 = vsel %vm1090_vm11, %v9562_v38, -inf }
0x14d2   :  { %v9576_v41 = vpop.f32.mrf.mxu3 }
0x14d3   :  { %v4631_v53 = vsel %vm1090_vm11, %v9576_v41, -inf }
0x14fc   :  { %v9588_v51 = vpop.f32.mrf.mxu3  ;;  %v9590_v22 = vpop.f32.mrf.mxu2 }
0x14fd   :  { %v4652_v56 = vsel %vm1090_vm11, %v9590_v22, -inf  ;;  %v4661_v0 = vsel %vm1090_vm11, %v9588_v51, -inf }
0x1504   :  { %v9600_v8 = vpop.f32.mrf.mxu3  ;;  %v9621_v1 = vpop.f32.mrf.mxu2 }
0x1505   :  { %v4664_v32 = vsel %vm1090_vm11, %v9600_v8, -inf }
0x1506   :  { %v9580_v50 = vpop.f32.mrf.mxu1 }
0x1507   :  { %v4670_v63 = vsel %vm1090_vm11, %v9580_v50, -inf }
0x150e   :  { %v9598_v7 = vpop.f32.mrf.mxu1 }
0x150f   :  { %v4673_v13 = vsel %vm1090_vm11, %v9598_v7, -inf }
0x1512   :  { %v9608_v4 = vpop.f32.mrf.mxu3 }
0x1513   :  { %v4667_v35 = vsel %vm1090_vm11, %v9608_v4, -inf }
0x1516   :  { %v9610_v60 = vpop.f32.mrf.mxu1 }
0x1517   :  { %v9528_v55 = vpop.f32.mrf.mxu0  ;;  %v4676_v58 = vsel %vm1090_vm11, %v9610_v60, -inf }
0x1518   :  { %v4607_v12 = vsel %vm1090_vm11, %v9528_v55, -inf }
0x1519   :  { %4608 = vmax.xlane.f32.xlu2 %v4607_v12  ;;  %v4655_v12 = vsel %vm1090_vm11, %v9621_v1, -inf }
0x151f   :  { %v9532_v42 = vpop.f32.mrf.mxu0 }
0x1520   :  { %v4610_v24 = vsel %vm1090_vm11, %v9532_v42, -inf }
0x1521   :  { %4611 = vmax.xlane.f32.xlu2 %v4610_v24 }
0x1527   :  { %v9536_v25 = vpop.f32.mrf.mxu0 }
0x1528   :  { %v4613_v48 = vsel %vm1090_vm11, %v9536_v25, -inf }
0x1529   :  { %4614 = vmax.xlane.f32.xlu0 %v4613_v48 }
0x152f   :  { %v9544_v52 = vpop.f32.mrf.mxu0 }
0x1530   :  { %v4643_v49 = vsel %vm1090_vm11, %v9544_v52, -inf }
0x1531   :  { %4635 = vmax.xlane.f32.xlu0 %v4634_v34  ;;  %4644 = vmax.xlane.f32.xlu1 %v4643_v49 }
0x1537   :  { %v9554_v5 = vpop.f32.mrf.mxu0 }
0x1538   :  { %v4646_v40 = vsel %vm1090_vm11, %v9554_v5, -inf }
0x1539   :  { %4617 = vmax.xlane.f32.xlu0 %v4616_v54  ;;  %4626 = vmax.xlane.f32.xlu1 %v4625_v27 }
0x153a   :  { %4647 = vmax.xlane.f32.xlu2 %v4646_v40 }
0x153f   :  { %v9568_v3 = vpop.f32.mrf.mxu0 }
0x1540   :  { %v4649_v14 = vsel %vm1090_vm11, %v9568_v3, -inf }
0x1541   :  { %4638 = vmax.xlane.f32.xlu0 %v4637_v28  ;;  %4629 = vmax.xlane.f32.xlu1 %v4628_v43 }
0x1542   :  { %4650 = vmax.xlane.f32.xlu2 %v4649_v14 }
0x1549   :  { %4671 = vmax.xlane.f32.xlu0 %v4670_v63  ;;  %4632 = vmax.xlane.f32.xlu1 %v4631_v53 }
0x154a   :  { %4620 = vmax.xlane.f32.xlu2 %v4619_v57 }
0x1551   :  { %4653 = vmax.xlane.f32.xlu0 %v4652_v56  ;;  %4662 = vmax.xlane.f32.xlu1 %v4661_v0 }
0x1552   :  { %4641 = vmax.xlane.f32.xlu2 %v4640_v11 }
0x1559   :  { %4674 = vmax.xlane.f32.xlu0 %v4673_v13  ;;  %4665 = vmax.xlane.f32.xlu1 %v4664_v32 }
0x155a   :  { %4623 = vmax.xlane.f32.xlu2 %v4622_v19 }
0x1561   :  { %4677 = vmax.xlane.f32.xlu0 %v4676_v58  ;;  %4668 = vmax.xlane.f32.xlu1 %v4667_v35 }
0x158c   :  { %v4609_v9 = vpop.xlane.xlu2 %4608 }
0x158d   :  { %v4679_v46 = vsub.f32 %v9528_v55, %v4609_v9  ;;  %v9629_v55 = vpop.f32.mrf.mxu2 }
0x158e   :  { %v4658_v27 = vsel %vm1090_vm11, %v9629_v55, -inf }
0x158f   :  { %v4703_v26 = vmul.f32 1.442695, %v4679_v46 }
0x1591   :  { %6645 = vpow2.f32 %v4703_v26 }
0x1594   :  { %v9631_v34 = vpop.xlane.xlu2 %4611 }
0x1597   :  { %v9617_v31 = vpop.eup %6645 }
0x1598   :  { %v4751_v21 = vsel %vm1090_vm11, %v9617_v31, 0.0 }
0x1599   :  { %4752 = vadd.xlane.f32.xlu2 %v4751_v21 }
0x159c   :  { %v9623_v30 = vpop.xlane.xlu0 %4614 }
0x15a1   :  { %4656 = vmax.xlane.f32.xlu2 %v4655_v12 }
0x15a4   :  { %v9627_v24 = vpop.xlane.xlu1 %4644  ;;  %v4636_v48 = vpop.xlane.xlu0 %4635 }
0x15a5   :  { %v4688_v49 = vsub.f32 %v9540_v44, %v4636_v48 }
0x15a7   :  { %v4721_v54 = vmul.f32 1.442695, %v4688_v49 }
0x15a9   :  { %4659 = vmax.xlane.f32.xlu2 %v4658_v27  ;;  %6647 = vpow2.f32 %v4721_v54 }
0x15ac   :  { %v4627_v40 = vpop.xlane.xlu1 %4626  ;;  %v4618_v28 = vpop.xlane.xlu0 %4617 }
0x15ad   :  { %v4685_v43 = vsub.f32 %v9542_v29, %v4627_v40  ;;  %v9637_v14 = vpop.xlane.xlu2 %4647  ;;  %v4682_v63 = vsub.f32 %v9550_v2, %v4618_v28 }
0x15af   :  { %v4715_v53 = vmul.f32 1.442695, %v4685_v43  ;;  %v4709_v57 = vmul.f32 1.442695, %v4682_v63  ;;  %v9640_v56 = vpop.eup %6647 }
0x15b0   :  { %v4778_v44 = vsel %vm1090_vm11, %v9640_v56, 0.0 }
0x15b1   :  { %6649 = vpow2.f32 %v4715_v53  ;;  %4779 = vadd.xlane.f32.xlu0 %v4778_v44 }
0x15b2   :  { %6651 = vpow2.f32 %v4709_v57 }
0x15b4   :  { %v4630_v0 = vpop.xlane.xlu1 %4629  ;;  %v4639_v11 = vpop.xlane.xlu0 %4638 }
0x15b5   :  { %v4686_v13 = vsub.f32 %v9562_v38, %v4630_v0  ;;  %v9645_v32 = vpop.xlane.xlu2 %4650  ;;  %v4689_v29 = vsub.f32 %v9552_v20, %v4639_v11 }
0x15b7   :  { %v9648_v19 = vpop.eup %6649  ;;  %v4717_v2 = vmul.f32 1.442695, %v4686_v13  ;;  %v4723_v58 = vmul.f32 1.442695, %v4689_v29 }
0x15b8   :  { %v4769_v35 = vsel %vm1090_vm11, %v9648_v19, 0.0  ;;  %v9652_v9 = vpop.eup %6651 }
0x15b9   :  { %6653 = vpow2.f32 %v4717_v2  ;;  %4770 = vadd.xlane.f32.xlu0 %v4769_v35  ;;  %v4760_v46 = vsel %vm1090_vm11, %v9652_v9, 0.0 }
0x15ba   :  { %6655 = vpow2.f32 %v4723_v58  ;;  %4761 = vadd.xlane.f32.xlu1 %v4760_v46 }
0x15bc   :  { %v4672_v38 = vpop.xlane.xlu0 %4671  ;;  %v4633_v40 = vpop.xlane.xlu1 %4632 }
0x15bd   :  { %v4621_v26 = vpop.xlane.xlu2 %4620  ;;  %v4700_v54 = vsub.f32 %v9580_v50, %v4672_v38  ;;  %v4687_v58 = vsub.f32 %v9576_v41, %v4633_v40  ;;  %v4691_v41 = vsub.f32 %v9544_v52, %v9627_v24 }
0x15be   :  { %v4683_v20 = vsub.f32 %v9564_v39, %v4621_v26 }
0x15bf   :  { %v9657_v21 = vpop.eup %6653  ;;  %v4745_v28 = vmul.f32 1.442695, %v4700_v54  ;;  %v4727_v40 = vmul.f32 1.442695, %v4691_v41 }
0x15c0   :  { %v4711_v12 = vmul.f32 1.442695, %v4683_v20  ;;  %v4772_v48 = vsel %vm1090_vm11, %v9657_v21, 0.0  ;;  %v9661_v49 = vpop.eup %6655 }
0x15c1   :  { %v4781_v27 = vsel %vm1090_vm11, %v9661_v49, 0.0 }
0x15c2   :  { %6657 = vpow2.f32 %v4711_v12  ;;  %4773 = vadd.xlane.f32.xlu1 %v4772_v48  ;;  %4782 = vadd.xlane.f32.xlu0 %v4781_v27 }
0x15c3   :  { %6659 = vpow2.f32 %v4745_v28 }
0x15c4   :  { %v4654_v63 = vpop.xlane.xlu0 %4653  ;;  %v4663_v13 = vpop.xlane.xlu1 %4662 }
0x15c5   :  { %v4642_v43 = vpop.xlane.xlu2 %4641  ;;  %v4694_v44 = vsub.f32 %v9590_v22, %v4654_v63  ;;  %v4697_v46 = vsub.f32 %v9588_v51, %v4663_v13 }
0x15c6   :  { %v4690_v39 = vsub.f32 %v9566_v17, %v4642_v43 }
0x15c7   :  { %v4733_v0 = vmul.f32 1.442695, %v4694_v44  ;;  %v4739_v26 = vmul.f32 1.442695, %v4697_v46 }
0x15c8   :  { %v9667_v53 = vpop.eup %6657  ;;  %v4725_v57 = vmul.f32 1.442695, %v4690_v39 }
0x15c9   :  { %v4763_v50 = vsel %vm1090_vm11, %v9667_v53, 0.0  ;;  %v9673_v2 = vpop.eup %6659 }
0x15ca   :  { %6661 = vpow2.f32 %v4725_v57  ;;  %4764 = vadd.xlane.f32.xlu0 %v4763_v50  ;;  %v4814_v38 = vsel %vm1090_vm11, %v9673_v2, 0.0 }
0x15cb   :  { %6663 = vpow2.f32 %v4733_v0 }
0x15cc   :  { %v4675_v20 = vpop.xlane.xlu0 %4674  ;;  %v4666_v39 = vpop.xlane.xlu1 %4665 }
0x15cd   :  { %v4624_v11 = vpop.xlane.xlu2 %4623  ;;  %v4701_v51 = vsub.f32 %v9598_v7, %v4675_v20  ;;  %v4698_v52 = vsub.f32 %v9600_v8, %v4666_v39  ;;  %v6356_v20 = vpack.i.bf16 %v9326_v15, %v9334_v18 }
0x15ce   :  { %v4684_v29 = vsub.f32 %v9578_v10, %v4624_v11  ;;  %v4719_v10 = vmul.f32 1.442695, %v4687_v58 }
0x15cf   :  { %v4747_v28 = vmul.f32 1.442695, %v4701_v51  ;;  %v4741_v57 = vmul.f32 1.442695, %v4698_v52 }
0x15d0   :  { %v9675_v17 = vpop.eup %6661  ;;  %v4713_v35 = vmul.f32 1.442695, %v4684_v29 }
0x15d1   :  { %v4784_v22 = vsel %vm1090_vm11, %v9675_v17, 0.0  ;;  %v9683_v12 = vpop.eup %6663 }
0x15d2   :  { %6665 = vpow2.f32 %v4713_v35  ;;  %4785 = vadd.xlane.f32.xlu2 %v4784_v22  ;;  %4815 = vadd.xlane.f32.xlu0 %v4814_v38  ;;  %v4796_v27 = vsel %vm1090_vm11, %v9683_v12, 0.0 }
0x15d3   :  { %6667 = vpow2.f32 %v4719_v10 }
0x15d4   :  { %6669 = vpow2.f32 %v4739_v26  ;;  %v4678_v50 = vpop.xlane.xlu0 %4677  ;;  %v4669_v58 = vpop.xlane.xlu1 %4668 }
0x15d5   :  { %6671 = vpow2.f32 %v4727_v40  ;;  %v4702_v11 = vsub.f32 %v9610_v60, %v4678_v50  ;;  %v4699_v46 = vsub.f32 %v9608_v4, %v4669_v58 }
0x15d6   :  { %6673 = vpow2.f32 %v4747_v28  ;;  %v4693_v28 = vsub.f32 %v9568_v3, %v9645_v32 }
0x15d7   :  { %6675 = vpow2.f32 %v4741_v57  ;;  %v4749_v29 = vmul.f32 1.442695, %v4702_v11  ;;  %v4743_v60 = vmul.f32 1.442695, %v4699_v46 }
0x15d8   :  { %v9685_v48 = vpop.eup %6665  ;;  %v4731_v15 = vmul.f32 1.442695, %v4693_v28 }
0x15d9   :  { %v4766_v54 = vsel %vm1090_vm11, %v9685_v48, 0.0  ;;  %v9694_v43 = vpop.eup %6667  ;;  %6677 = vpow2.f32 %v4749_v29 }
0x15da   :  { %4767 = vadd.xlane.f32.xlu2 %v4766_v54  ;;  %4797 = vadd.xlane.f32.xlu0 %v4796_v27  ;;  %v9696_v63 = vpop.eup %6669  ;;  %v4775_v7 = vsel %vm1090_vm11, %v9694_v43, 0.0  ;;  %6679 = vpow2.f32 %v4743_v60  ;;  %v6346_v27 = vpack.i.bf16 %v9294_v6, %v9311_v36 }
0x15db   :  { %v4805_v24 = vsel %vm1090_vm11, %v9696_v63, 0.0  ;;  %v9703_v44 = vpop.eup %6671 }
0x15dc   :  { %v9705_v0 = vpop.eup %6673  ;;  %v4787_v8 = vsel %vm1090_vm11, %v9703_v44, 0.0 }
0x15dd   :  { %v4817_v13 = vsel %vm1090_vm11, %v9705_v0, 0.0  ;;  %v9712_v35 = vpop.eup %6675 }
0x15de   :  { %v4808_v22 = vsel %vm1090_vm11, %v9712_v35, 0.0 }
0x15df   :  { %v9717_v38 = vpop.eup %6677 }
0x15e0   :  { %v4820_v10 = vsel %vm1090_vm11, %v9717_v38, 0.0  ;;  %v9721_v26 = vpop.eup %6679 }
0x15e1   :  { %v4811_v4 = vsel %vm1090_vm11, %v9721_v26, 0.0 }
0x15e2   :  { %4776 = vadd.xlane.f32.xlu2 %v4775_v7  ;;  %4806 = vadd.xlane.f32.xlu0 %v4805_v24  ;;  %v4680_v7 = vsub.f32 %v9532_v42, %v9631_v34 }
0x15e4   :  { %v4705_v36 = vmul.f32 1.442695, %v4680_v7 }
0x15ea   :  { %4788 = vadd.xlane.f32.xlu2 %v4787_v8  ;;  %4818 = vadd.xlane.f32.xlu0 %v4817_v13  ;;  %v4681_v8 = vsub.f32 %v9536_v25, %v9623_v30 }
0x15ec   :  { %v4707_v58 = vmul.f32 1.442695, %v4681_v8 }
0x15f2   :  { %4809 = vadd.xlane.f32.xlu0 %v4808_v22 }
0x15fa   :  { %4821 = vadd.xlane.f32.xlu0 %v4820_v10 }
0x1602   :  { %6357 = vrot.lane.b32.xlu2 %v6356_v20, %s7238_s24  ;;  %4812 = vadd.xlane.f32.xlu0 %v4811_v4 }
0x160c   :  { %v4753_v41 = vpop.xlane.xlu2 %4752 }
0x1614   :  { %v4657_v51 = vpop.xlane.xlu2 %4656 }
0x1615   :  { %v4695_v54 = vsub.f32 %v9621_v1, %v4657_v51 }
0x1616   :  { %6347 = vrot.lane.b32.xlu0 %v6346_v27, %s7238_s24 }
0x1617   :  { %v4735_v40 = vmul.f32 1.442695, %v4695_v54 }
0x1619   :  { %6681 = vpow2.f32 %v4735_v40 }
0x161a   :  { %6683 = vpow2.f32 %v4731_v15 }
0x161c   :  { %v4660_v18 = vpop.xlane.xlu2 %4659 }
0x161d   :  { %v4696_v39 = vsub.f32 %v9629_v55, %v4660_v18 }
0x161f   :  { %v9735_v52 = vpop.eup %6681  ;;  %v4737_v1 = vmul.f32 1.442695, %v4696_v39 }
0x1620   :  { %v4799_v6 = vsel %vm1090_vm11, %v9735_v52, 0.0  ;;  %v9741_v3 = vpop.eup %6683 }
0x1621   :  { %6685 = vpow2.f32 %v4737_v1  ;;  %4800 = vadd.xlane.f32.xlu1 %v4799_v6  ;;  %v4793_v42 = vsel %vm1090_vm11, %v9741_v3, 0.0 }
0x1624   :  { %v4780_v24 = vpop.xlane.xlu0 %4779 }
0x1625   :  { %6687 = vrcp.f32 %v4780_v24 }
0x1626   :  { %6689 = vpow2.f32 %v4705_v36 }
0x1627   :  { %v9743_v32 = vpop.eup %6685  ;;  %6691 = vrcp.f32 %v4753_v41 }
0x1628   :  { %v4802_v55 = vsel %vm1090_vm11, %v9743_v32, 0.0 }
0x1629   :  { %4803 = vadd.xlane.f32.xlu1 %v4802_v55 }
0x162b   :  { %4794 = vadd.xlane.f32.xlu2 %v4793_v42  ;;  %v6688_v34 = vpop.eup %6687 }
0x162c   :  { %v9749_v57 = vpop.eup %6689  ;;  %v4856_v50 = vmul.f32 %v6688_v34, %v9640_v56  ;;  %v4771_v11 = vpop.xlane.xlu0 %4770 }
0x162d   :  { %v4762_v13 = vpop.xlane.xlu1 %4761  ;;  %6693 = vrcp.f32 %v4771_v11  ;;  %v4754_v29 = vsel %vm1090_vm11, %v9749_v57, 0.0  ;;  %v6692_v46 = vpop.eup %6691 }
0x162e   :  { %6695 = vrcp.f32 %v4762_v13  ;;  %6112 = vmatmul.msk.f32.vlgmr.msrb.gmra.mxu1 %vm1090_vm11, %v4856_v50  ;;  %v9759_v56 = vmul.f32 %v6692_v46, %v9617_v31 }
0x162f   :  { %6697 = vpow2.f32 %v4707_v58 }
0x1631   :  { %4755 = vadd.xlane.f32.xlu1 %v4754_v29  ;;  %v4692_v29 = vsub.f32 %v9554_v5, %v9637_v14 }
0x1633   :  { %v6694_v22 = vpop.eup %6693 }
0x1634   :  { %v6696_v60 = vpop.eup %6695  ;;  %v4853_v10 = vmul.f32 %v6694_v22, %v9648_v19 }
0x1635   :  { %v4850_v25 = vmul.f32 %v6696_v60, %v9652_v9  ;;  %v4774_v30 = vpop.xlane.xlu1 %4773  ;;  %v4783_v20 = vpop.xlane.xlu0 %4782 }
0x1636   :  { %6699 = vrcp.f32 %v4774_v30  ;;  %6109 = vmatmul.msk.f32.vlgmr.msrb.gmra.mxu3 %vm1090_vm11, %v4853_v10  ;;  %v9765_v51 = vpop.eup %6697 }
0x1637   :  { %v4874_v4 = vadd.f32 %v4850_v25, %v9759_v56  ;;  %6701 = vrcp.f32 %v4783_v20  ;;  %6106 = vmatmul.msk.f32.vlgmr.msra.gmra.mxu2 %vm1090_vm11, %v4850_v25  ;;  %v4757_v15 = vsel %vm1090_vm11, %v9765_v51, 0.0 }
0x1639   :  { %v4877_v41 = vadd.f32 %v4874_v4, %v4853_v10 }
0x163b   :  { %v4880_v19 = vadd.f32 %v4877_v41, %v4856_v50 }
0x163c   :  { %v6700_v54 = vpop.eup %6699 }
0x163d   :  { %v6702_v27 = vpop.eup %6701  ;;  %v4883_v31 = vmul.f32 0.25, %v4880_v19  ;;  %v4765_v40 = vpop.xlane.xlu0 %4764  ;;  %v9768_v9 = vmul.f32 %v6700_v54, %v9657_v21 }
0x163e   :  { %6703 = vrcp.f32 %v4765_v40  ;;  %v9771_v28 = vmul.f32 %v6702_v27, %v9661_v49  ;;  %v6351_v49 = vpack.i.bf16 %v9348_v23, %v9277_v61 }
0x163f   :  { %4902 = vst.msk [vmem:[#allocation29 + $0x60] sm:$0xff] %vm1090_vm11, %v4883_v31  ;;  %6110 = vmatmul.msk.f32.gmra.mxu3 %vm1090_vm11, %v9768_v9 }
0x1640   :  { %6113 = vmatmul.msk.f32.gmra.mxu1 %vm1090_vm11, %v9771_v28  ;;  %4758 = vadd.xlane.f32.xlu0 %v4757_v15 }
0x1644   :  { %v6704_v18 = vpop.eup %6703 }
0x1645   :  { %v4786_v39 = vpop.xlane.xlu2 %4785  ;;  %v4816_v21 = vpop.xlane.xlu0 %4815  ;;  %v9781_v7 = vmul.f32 %v6704_v18, %v9667_v53 }
0x1646   :  { %6705 = vrcp.f32 %v4786_v39 }
0x1647   :  { %6107 = vmatmul.msk.f32.gmra.mxu2 %vm1090_vm11, %v9781_v7  ;;  %6707 = vrcp.f32 %v4816_v21 }
0x164a   :  { %6352 = vrot.lane.b32.xlu1 %v6351_v49, %s7238_s24  ;;  %s5802_s24 = sshll.u32 %s7241_s30, 4  ;;  %s5803_s24 = int_to_ptr.vmem [resolvable:$true] %s5802_s24 }
0x164c   :  { %v6706_v1 = vpop.eup %6705 }
0x164d   :  { %v4768_v6 = vpop.xlane.xlu2 %4767  ;;  %v9789_v36 = vmul.f32 %v6706_v1, %v9675_v17  ;;  %v4798_v24 = vpop.xlane.xlu0 %4797 }
0x164e   :  { %6709 = vrcp.f32 %v4768_v6  ;;  %v6708_v53 = vpop.eup %6707 }
0x164f   :  { %6114 = vmatmul.msk.f32.gmra.mxu1 %vm1090_vm11, %v9789_v36  ;;  %6711 = vrcp.f32 %v4798_v24  ;;  %v4868_v42 = vmul.f32 %v6708_v53, %v9673_v2 }
0x1654   :  { %v6710_v55 = vpop.eup %6709 }
0x1655   :  { %v4777_v34 = vpop.xlane.xlu2 %4776  ;;  %v9795_v61 = vmul.f32 %v6710_v55, %v9685_v48  ;;  %v4807_v23 = vpop.xlane.xlu0 %4806 }
0x1656   :  { %6713 = vrcp.f32 %v4777_v34  ;;  %v6712_v17 = vpop.eup %6711 }
0x1657   :  { %6108 = vmatmul.msk.f32.gmra.mxu2 %vm1090_vm11, %v9795_v61  ;;  %6124 = vmatmul.msk.f32.vlgmr.msra.gmra.mxu1 %vm1090_vm11, %v4868_v42  ;;  %6715 = vrcp.f32 %v4807_v23  ;;  %v4862_v11 = vmul.f32 %v6712_v17, %v9683_v12 }
0x165c   :  { %v6714_v50 = vpop.eup %6713 }
0x165d   :  { %v4789_v8 = vpop.xlane.xlu2 %4788  ;;  %v9802_v13 = vmul.f32 %v6714_v50, %v9694_v43  ;;  %v4819_v2 = vpop.xlane.xlu0 %4818  ;;  %v4729_v43 = vmul.f32 1.442695, %v4692_v29 }
0x165e   :  { %6717 = vrcp.f32 %v4789_v8  ;;  %v6716_v48 = vpop.eup %6715 }
0x165f   :  { %6719 = vrcp.f32 %v4819_v2  ;;  %6111 = vmatmul.msk.f32.gmra.mxu3 %vm1090_vm11, %v9802_v13  ;;  %6118 = vmatmul.msk.f32.vlgmr.msrb.gmra.mxu2 %vm1090_vm11, %v4862_v11  ;;  %v4865_v12 = vmul.f32 %v6716_v48, %v9696_v63 }
0x1664   :  { %v6718_v58 = vpop.eup %6717 }
0x1665   :  { %v6720_v46 = vpop.eup %6719  ;;  %v9811_v22 = vmul.f32 %v6718_v58, %v9703_v44  ;;  %v4810_v60 = vpop.xlane.xlu0 %4809 }
0x1666   :  { %v9814_v10 = vmul.f32 %v6720_v46, %v9705_v0  ;;  %6721 = vrcp.f32 %v4810_v60  ;;  %v6358_v39 = vpop.permute.xlu2 %6357 }
0x1667   :  { %v4889_v25 = vadd.f32 %v4862_v11, %v9811_v22  ;;  %6121 = vmatmul.msk.f32.vlgmr.msra.gmra.mxu3 %vm1090_vm11, %v4865_v12  ;;  %6723 = vpow2.f32 %v4729_v43  ;;  %v6359_v60 = vunpack.i.l.bf16 %v6358_v39 }
0x1668   :  { %6125 = vmatmul.msk.f32.gmra.mxu1 %vm1090_vm11, %v9814_v10 }
0x1669   :  { %v4892_v5 = vadd.f32 %v4889_v25, %v4865_v12 }
0x166b   :  { %v4895_v14 = vadd.f32 %v4892_v5, %v4868_v42  ;;  %v6360_v5 = vunpack.i.h.bf16 %v6358_v39  ;;  %v5353_v39 = vld [vmem:[#allocation13 + $0x50] sm:$0xff] }
0x166c   :  { %v6722_v63 = vpop.eup %6721 }
0x166d   :  { %v4898_v30 = vmul.f32 0.25, %v4895_v14  ;;  %v4822_v44 = vpop.xlane.xlu0 %4821  ;;  %v9821_v20 = vmul.f32 %v6722_v63, %v9712_v35  ;;  %v9824_v0 = vpop.eup %6723 }
0x166e   :  { %6725 = vrcp.f32 %v4822_v44  ;;  %v4790_v4 = vsel %vm1090_vm11, %v9824_v0, 0.0 }
0x166f   :  { %4905 = vst.msk [vmem:[#allocation29 + $0x78] sm:$0xff] %vm1090_vm11, %v4898_v30  ;;  %6122 = vmatmul.msk.f32.gmra.mxu3 %vm1090_vm11, %v9821_v20 }
0x1674   :  { %4791 = vadd.xlane.f32.xlu1 %v4790_v4  ;;  %v6726_v41 = vpop.eup %6725 }
0x1675   :  { %v4813_v19 = vpop.xlane.xlu0 %4812  ;;  %v4870_v54 = vmul.f32 %v6726_v41, %v9717_v38 }
0x1676   :  { %6727 = vrcp.f32 %v4813_v19 }
0x1677   :  { %6126 = vmatmul.msk.f32.gmra.mxu1 %vm1090_vm11, %v4870_v54 }
0x167c   :  { %v6728_v35 = vpop.eup %6727 }
0x167d   :  { %v4867_v27 = vmul.f32 %v6728_v35, %v9721_v26 }
0x167f   :  { %6123 = vmatmul.msk.f32.gmra.mxu3 %vm1090_vm11, %v4867_v27 }
0x1688   :  { %v6348_v31 = vpop.permute.xlu0 %6347 }
0x1689   :  { %v6349_v40 = vunpack.i.l.bf16 %v6348_v31  ;;  %v6350_v15 = vunpack.i.h.bf16 %v6348_v31 }
0x168b   :  { %4939 = vmatpush.msra.mxu0 %v6349_v40 }
0x168d   :  { %4940 = vmatpush.msra.mxu0 %v6350_v15 }
0x1694   :  { %v4801_v18 = vpop.xlane.xlu1 %4800 }
0x1695   :  { %6729 = vrcp.f32 %v4801_v18 }
0x169b   :  { %v6730_v21 = vpop.eup %6729 }
0x169c   :  { %v4804_v49 = vpop.xlane.xlu1 %4803  ;;  %v9835_v38 = vmul.f32 %v6730_v21, %v9735_v52  ;;  %v5351_v21 = vld [vmem:[#allocation13 + $0x40] sm:$0xff] }
0x169d   :  { %6731 = vrcp.f32 %v4804_v49 }
0x169e   :  { %v4795_v1 = vpop.xlane.xlu2 %4794  ;;  %6119 = vmatmul.msk.f32.gmra.mxu2 %vm1090_vm11, %v9835_v38 }
0x169f   :  { %6733 = vrcp.f32 %v4795_v1 }
0x16a3   :  { %v6732_v26 = vpop.eup %6731 }
0x16a4   :  { %v4756_v6 = vpop.xlane.xlu1 %4755  ;;  %v4864_v24 = vmul.f32 %v6732_v26, %v9743_v32 }
0x16a5   :  { %v6734_v53 = vpop.eup %6733  ;;  %6735 = vrcp.f32 %v4756_v6 }
0x16a6   :  { %6120 = vmatmul.msk.f32.gmra.mxu2 %vm1090_vm11, %v4864_v24  ;;  %v9842_v55 = vmul.f32 %v6734_v53, %v9741_v3 }
0x16a8   :  { %v4891_v52 = vadd.f32 %v4864_v24, %v9842_v55 }
0x16aa   :  { %v4894_v42 = vadd.f32 %v4891_v52, %v4867_v27 }
0x16ab   :  { %v6736_v34 = vpop.eup %6735  ;;  %v5075_v23 = vpop.f32.mrf.mxu1 }
0x16ac   :  { %v4848_v17 = vmul.f32 %v6736_v34, %v9749_v57  ;;  %v4897_v50 = vadd.f32 %v4894_v42, %v4870_v54  ;;  %5287 = vrot.lane.b32.xlu1 %v5075_v23, %s7239_s15 }
0x16ae   :  { %v4875_v11 = vadd.f32 %v9781_v7, %v4848_v17  ;;  %v4900_v32 = vmul.f32 0.25, %v4897_v50 }
0x16b0   :  { %v4878_v8 = vadd.f32 %v4875_v11, %v9768_v9  ;;  %4907 = vst.msk [vmem:[#allocation29 + $0x88] sm:$0xff] %vm1090_vm11, %v4900_v32 }
0x16b2   :  { %v4881_v3 = vadd.f32 %v4878_v8, %v9771_v28 }
0x16b3   :  { %v4759_v2 = vpop.xlane.xlu0 %4758 }
0x16b4   :  { %v4884_v48 = vmul.f32 0.25, %v4881_v3  ;;  %6737 = vrcp.f32 %v4759_v2 }
0x16b6   :  { %4903 = vst.msk [vmem:[#allocation29 + $0x68] sm:$0xff] %vm1090_vm11, %v4884_v48 }
0x16b9   :  { %v5031_v14 = vpop.f32.mrf.mxu3 }
0x16ba   :  { %v6738_v29 = vpop.eup %6737  ;;  %v4987_v58 = vpop.f32.mrf.mxu2 }
0x16bb   :  { %5263 = vrot.lane.b32.xlu0 %v4987_v58, %s7222_s11  ;;  %v4849_v46 = vmul.f32 %v6738_v29, %v9765_v51 }
0x16bc   :  { %v6353_v57 = vpop.permute.xlu1 %6352 }
0x16bd   :  { %v6355_v7 = vunpack.i.h.bf16 %v6353_v57  ;;  %v6354_v12 = vunpack.i.l.bf16 %v6353_v57  ;;  %v5078_v43 = vpop.f32.mrf.mxu1  ;;  %v4876_v9 = vadd.f32 %v9795_v61, %v4849_v46 }
0x16be   :  { %5289 = vrot.lane.b32.xlu2 %v5078_v43, %s7239_s15 }
0x16bf   :  { %4941 = vmatpush.msra.mxu0 %v6354_v12  ;;  %v4879_v28 = vadd.f32 %v4876_v9, %v9802_v13 }
0x16c0   :  { %6103 = vmatmul.msk.f32.vlgmr.msra.gmra.mxu0 %vm1090_vm11, %v9759_v56 }
0x16c1   :  { %5115 = vmatpush.msrb.mxu0 %v6355_v7  ;;  %v4882_v25 = vadd.f32 %v4879_v28, %v9789_v36 }
0x16c2   :  { %v5034_v56 = vpop.f32.mrf.mxu3 }
0x16c3   :  { %5116 = vmatpush.msrb.mxu0 %v6359_v60  ;;  %5275 = vrot.lane.b32.xlu0 %v5031_v14, %s7214_s26  ;;  %v4885_v51 = vmul.f32 0.25, %v4882_v25 }
0x16c5   :  { %5117 = vmatpush.msrb.mxu0 %v6360_v5  ;;  %4904 = vst.msk [vmem:[#allocation29 + $0x70] sm:$0xff] %vm1090_vm11, %v4885_v51 }
0x16c8   :  { %6104 = vmatmul.msk.f32.gmra.mxu0 %vm1090_vm11, %v4848_v17 }
0x16ca   :  { %v4990_v61 = vpop.f32.mrf.mxu2 }
0x16cb   :  { %5265 = vrot.lane.b32.xlu0 %v4990_v61, %s7222_s11 }
0x16cc   :  { %v5081_v63 = vpop.f32.mrf.mxu1 }
0x16d0   :  { %6105 = vmatmul.msk.f32.gmra.mxu0 %vm1090_vm11, %v4849_v46 }
0x16d3   :  { %5277 = vrot.lane.b32.xlu0 %v5034_v56, %s7214_s26 }
0x16d4   :  { %v5251_v54 = vpop.f32.mrf.mxu1 }
0x16d8   :  { %6115 = vmatmul.msk.f32.vlgmr.msrb.gmra.mxu0 %vm1090_vm11, %v9811_v22 }
0x16da   :  { %v4993_v36 = vpop.f32.mrf.mxu2 }
0x16db   :  { %5267 = vrot.lane.b32.xlu0 %v4993_v36, %s7222_s11 }
0x16e2   :  { %v5037_v13 = vpop.f32.mrf.mxu3  ;;  %v5163_v44 = vpop.f32.mrf.mxu2 }
0x16e3   :  { %5279 = vrot.lane.b32.xlu1 %v5037_v13, %s7214_s26  ;;  %5291 = vrot.lane.b32.xlu0 %v5081_v63, %s7239_s15 }
0x16e7   :  { %v4792_v30 = vpop.xlane.xlu1 %4791 }
0x16e8   :  { %6739 = vrcp.f32 %v4792_v30 }
0x16ea   :  { %v5207_v4 = vpop.f32.mrf.mxu3 }
0x16eb   :  { %5308 = vrot.lane.b32.xlu1 %v5163_v44, %s7222_s11  ;;  %5320 = vrot.lane.b32.xlu0 %v5207_v4, %s7214_s26 }
0x16ee   :  { %v6740_v41 = vpop.eup %6739 }
0x16ef   :  { %v4860_v22 = vmul.f32 %v6740_v41, %v9824_v0  ;;  %v5254_v0 = vpop.f32.mrf.mxu1 }
0x16f1   :  { %v4890_v19 = vadd.f32 %v9835_v38, %v4860_v22  ;;  %6116 = vmatmul.msk.f32.gmra.mxu0 %vm1090_vm11, %v4860_v22 }
0x16f2   :  { %v5210_v27 = vpop.f32.mrf.mxu3 }
0x16f3   :  { %v4893_v35 = vadd.f32 %v4890_v19, %v9821_v20  ;;  %5332 = vrot.lane.b32.xlu1 %v5251_v54, %s7239_s15  ;;  %5322 = vrot.lane.b32.xlu0 %v5210_v27, %s7214_s26  ;;  %v5354_v20 = vld [vmem:[#allocation13 + $0x58] sm:$0xff]  ;;  %v6383_v19 = vld [vmem:[#allocation14 + $0x2] ss:$0 sm:$0xff] }
0x16f4   :  { %5390 = vmatpush.msra.mxu0 %v5354_v20 }
0x16f5   :  { %v4896_v31 = vadd.f32 %v4893_v35, %v9814_v10  ;;  %v5352_v10 = vld [vmem:[#allocation13 + $0x48] sm:$0xff] }
0x16f6   :  { %5391 = vmatpush.msra.mxu0 %v5353_v39 }
0x16f7   :  { %v4899_v40 = vmul.f32 0.25, %v4896_v31  ;;  %v5257_v15 = vpop.f32.mrf.mxu1 }
0x16f8   :  { %5392 = vmatpush.msra.mxu0 %v5352_v10 }
0x16f9   :  { %4906 = vst.msk [vmem:[#allocation29 + $0x80] sm:$0xff] %vm1090_vm11, %v4899_v40  ;;  %6117 = vmatmul.msk.f32.gmra.mxu0 %vm1090_vm11, %v9842_v55 }
0x16fa   :  { %5393 = vmatpush.msra.mxu0 %v5351_v21 }
0x16fb   :  { %5334 = vrot.lane.b32.xlu1 %v5254_v0, %s7239_s15 }
0x1702   :  { %v5213_v18 = vpop.f32.mrf.mxu3 }
0x1703   :  { %5336 = vrot.lane.b32.xlu1 %v5257_v15, %s7239_s15  ;;  %5324 = vrot.lane.b32.xlu0 %v5213_v18, %s7214_s26 }
0x1718   :  { %v5290_v50 = vpop.permute.xlu2 %5289 }
0x171e   :  { %v5288_v55 = vpop.permute.xlu1 %5287 }
0x1721   :  { %v5166_v49 = vpop.f32.mrf.mxu2 }
0x1722   :  { %5310 = vrot.lane.b32.xlu2 %v5166_v49, %s7222_s11 }
0x1729   :  { %v5169_v38 = vpop.f32.mrf.mxu2 }
0x172a   :  { %5312 = vrot.lane.b32.xlu2 %v5169_v38, %s7222_s11 }
0x172d   :  { %v5264_v1 = vpop.permute.xlu0 %5263 }
0x1735   :  { %v5276_v26 = vpop.permute.xlu0 %5275 }
0x173d   :  { %v4943_v6 = vpop.f32.mrf.mxu0  ;;  %v5266_v24 = vpop.permute.xlu0 %5265 }
0x173e   :  { %v5296_v53 = vsel %vm743_vm10, %v4943_v6, %v5264_v1 }
0x173f   :  { %v5299_v52 = vsel %vm1782_vm12, %v5296_v53, %v5276_v26 }
0x1740   :  { %v5302_v42 = vsel %vm1090_vm11, %v5299_v52, %v5288_v55 }
0x1741   :  { %6127 = vmatmul.msk.f32.vlgmr.msra.gmra.mxu0 %vm428_vm5, %v5302_v42 }
0x1745   :  { %v4946_v34 = vpop.f32.mrf.mxu0  ;;  %v5278_v23 = vpop.permute.xlu0 %5277 }
0x1746   :  { %v5297_v17 = vsel %vm743_vm10, %v4946_v34, %v5266_v24 }
0x1747   :  { %v5300_v11 = vsel %vm1782_vm12, %v5297_v17, %v5278_v23 }
0x1748   :  { %v5303_v32 = vsel %vm1090_vm11, %v5300_v11, %v5290_v50 }
0x1749   :  { %6128 = vmatmul.msk.f32.gmra.mxu0 %vm428_vm5, %v5303_v32 }
0x174d   :  { %v5268_v8 = vpop.permute.xlu0 %5267  ;;  %v4949_v3 = vpop.f32.mrf.mxu0 }
0x174e   :  { %v5298_v2 = vsel %vm743_vm10, %v4949_v3, %v5268_v8 }
0x1755   :  { %v5280_v48 = vpop.permute.xlu1 %5279  ;;  %v5292_v58 = vpop.permute.xlu0 %5291 }
0x1756   :  { %v5301_v29 = vsel %vm1782_vm12, %v5298_v2, %v5280_v48  ;;  %v5119_v7 = vpop.f32.mrf.mxu0 }
0x1757   :  { %v5304_v57 = vsel %vm1090_vm11, %v5301_v29, %v5292_v58 }
0x1758   :  { %6129 = vmatmul.msk.f32.gmra.mxu0 %vm428_vm5, %v5304_v57 }
0x175d   :  { %v5309_v46 = vpop.permute.xlu1 %5308  ;;  %v5321_v43 = vpop.permute.xlu0 %5320 }
0x175e   :  { %v5341_v12 = vsel %vm743_vm10, %v5119_v7, %v5309_v46 }
0x175f   :  { %v5344_v9 = vsel %vm1782_vm12, %v5341_v12, %v5321_v43 }
0x1765   :  { %v5333_v28 = vpop.permute.xlu1 %5332  ;;  %v5323_v51 = vpop.permute.xlu0 %5322 }
0x1766   :  { %v5347_v60 = vsel %vm1090_vm11, %v5344_v9, %v5333_v28 }
0x1767   :  { %6130 = vmatmul.msk.f32.gmra.mxu0 %vm428_vm5, %v5347_v60 }
0x176d   :  { %v5335_v5 = vpop.permute.xlu1 %5334 }
0x176e   :  { %v5122_v25 = vpop.f32.mrf.mxu0 }
0x1775   :  { %v5325_v30 = vpop.permute.xlu0 %5324  ;;  %v5337_v4 = vpop.permute.xlu1 %5336 }
0x1776   :  { %v5125_v13 = vpop.f32.mrf.mxu0 }
0x177c   :  { %v5311_v14 = vpop.permute.xlu2 %5310 }
0x177d   :  { %v5342_v61 = vsel %vm743_vm10, %v5122_v25, %v5311_v14 }
0x177e   :  { %v5345_v56 = vsel %vm1782_vm12, %v5342_v61, %v5323_v51 }
0x177f   :  { %v5348_v36 = vsel %vm1090_vm11, %v5345_v56, %v5335_v5 }
0x1780   :  { %6131 = vmatmul.msk.f32.gmra.mxu0 %vm428_vm5, %v5348_v36  ;;  %v5577_v36 = vld [vmem:[#allocation16 + $0x58] sm:$0xff] }
0x1781   :  { %5613 = vmatpush.msra.mxu2 %v5577_v36 }
0x1784   :  { %v5313_v63 = vpop.permute.xlu2 %5312 }
0x1785   :  { %v5343_v44 = vsel %vm743_vm10, %v5125_v13, %v5313_v63  ;;  %v5576_v13 = vld [vmem:[#allocation16 + $0x50] sm:$0xff]  ;;  %v5575_v63 = vld [vmem:[#allocation16 + $0x48] sm:$0xff] }
0x1786   :  { %v5346_v41 = vsel %vm1782_vm12, %v5343_v44, %v5325_v30  ;;  %5614 = vmatpush.msra.mxu2 %v5576_v13  ;;  %v5574_v30 = vld [vmem:[#allocation16 + $0x40] sm:$0xff] }
0x1787   :  { %v5349_v22 = vsel %vm1090_vm11, %v5346_v41, %v5337_v4  ;;  %v5646_v13 = vld [vmem:[#allocation19 + $0x58] sm:$0xff] }
0x1788   :  { %6132 = vmatmul.msk.f32.gmra.mxu0 %vm428_vm5, %v5349_v22  ;;  %5615 = vmatpush.msra.mxu2 %v5575_v63 }
0x1789   :  { %5682 = vmatpush.msrb.mxu3 %v5646_v13 }
0x178a   :  { %5616 = vmatpush.msra.mxu2 %v5574_v30 }
0x17be   :  { %v5395_v54 = vpop.f32.mrf.mxu0 }
0x17bf   :  { %v5396_v35 = vadd.f32 %v6383_v19, %v5395_v54 }
0x17c1   :  { %v5413_v27 = vadd.f32 %v5396_v35, %v9234_v62 }
0x17c3   :  { %v5423_v31 = vsel %vm428_vm5, %v5413_v27, 0.0 }
0x17c4   :  { %5424 = vadd.xlane.f32.xlu2 %v5423_v31 }
0x17c6   :  { %v5398_v40 = vpop.f32.mrf.mxu0 }
0x17c7   :  { %v5399_v0 = vadd.f32 %v6383_v19, %v5398_v40 }
0x17c9   :  { %v5414_v15 = vadd.f32 %v5399_v0, %v9242_v33 }
0x17cb   :  { %v5426_v18 = vsel %vm428_vm5, %v5414_v15, 0.0 }
0x17cc   :  { %5427 = vadd.xlane.f32.xlu0 %v5426_v18 }
0x17d5   :  { %v5401_v20 = vpop.f32.mrf.mxu0 }
0x17d6   :  { %v5402_v39 = vadd.f32 %v6383_v19, %v5401_v20 }
0x17d8   :  { %v5415_v10 = vadd.f32 %v5402_v39, %v9249_v16  ;;  %v9962_v39 = vld [vmem:[#allocation22 + $0x2] ss:$0 sm:$0xff] }
0x17da   :  { %v5429_v21 = vsel %vm428_vm5, %v5415_v10, 0.0 }
0x17db   :  { %5430 = vadd.xlane.f32.xlu1 %v5429_v21 }
0x17e4   :  { %v5404_v49 = vpop.f32.mrf.mxu0 }
0x17e5   :  { %v5405_v38 = vadd.f32 %v6383_v19, %v5404_v49  ;;  %v9964_v49 = vld [vmem:[#allocation23 + $0x2] ss:$0 sm:$0xff] }
0x17e7   :  { %v5416_v62 = vadd.f32 %v5405_v38, %v9257_v47 }
0x17e9   :  { %v5432_v1 = vsel %vm428_vm5, %v5416_v62, 0.0 }
0x17ea   :  { %5433 = vadd.xlane.f32.xlu2 %v5432_v1 }
0x17fd   :  { %v5407_v26 = vpop.f32.mrf.mxu0 }
0x17fe   :  { %v5408_v6 = vadd.f32 %v6383_v19, %v5407_v26 }
0x1800   :  { %v5417_v33 = vadd.f32 %v5408_v6, %v9266_v37 }
0x1802   :  { %v5435_v24 = vsel %vm428_vm5, %v5417_v33, 0.0 }
0x1803   :  { %5436 = vadd.xlane.f32.xlu0 %v5435_v24 }
0x1805   :  { %v5410_v53 = vpop.f32.mrf.mxu0 }
0x1806   :  { %v5411_v55 = vadd.f32 %v6383_v19, %v5410_v53 }
0x1808   :  { %v5418_v16 = vadd.f32 %v5411_v55, %v9273_v59 }
0x180a   :  { %v5438_v52 = vsel %vm428_vm5, %v5418_v16, 0.0 }
0x180b   :  { %5439 = vadd.xlane.f32.xlu2 %v5438_v52 }
0x1837   :  { %v5425_v42 = vpop.xlane.xlu2 %5424 }
0x1838   :  { %v5441_v47 = vmul.f32 %v5425_v42, %v7487_v45 }
0x183a   :  { %v9925_v34 = vsub.f32 %v5413_v27, %v5441_v47 }
0x183c   :  { %v5453_v23 = vmul.f32 %v9925_v34, %v9925_v34 }
0x183e   :  { %v5459_v37 = vsel %vm428_vm5, %v5453_v23, 0.0 }
0x183f   :  { %v5428_v17 = vpop.xlane.xlu0 %5427  ;;  %5460 = vadd.xlane.f32.xlu1 %v5459_v37 }
0x1840   :  { %v5442_v50 = vmul.f32 %v5428_v17, %v7487_v45 }
0x1842   :  { %v9931_v11 = vsub.f32 %v5414_v15, %v5442_v50 }
0x1844   :  { %v5454_v59 = vmul.f32 %v9931_v11, %v9931_v11 }
0x1846   :  { %v5462_v32 = vsel %vm428_vm5, %v5454_v59, 0.0 }
0x1847   :  { %5463 = vadd.xlane.f32.xlu0 %v5462_v32 }
0x184e   :  { %v5431_v8 = vpop.xlane.xlu1 %5430 }
0x184f   :  { %v5443_v3 = vmul.f32 %v5431_v8, %v7487_v45 }
0x1851   :  { %v9937_v2 = vsub.f32 %v5415_v10, %v5443_v3 }
0x1853   :  { %v5455_v48 = vmul.f32 %v9937_v2, %v9937_v2 }
0x1855   :  { %v5465_v29 = vsel %vm428_vm5, %v5455_v48, 0.0 }
0x1856   :  { %5466 = vadd.xlane.f32.xlu2 %v5465_v29 }
0x185d   :  { %v5434_v58 = vpop.xlane.xlu2 %5433 }
0x185e   :  { %v5444_v57 = vmul.f32 %v5434_v58, %v7487_v45 }
0x1860   :  { %v9943_v46 = vsub.f32 %v5416_v62, %v5444_v57 }
0x1862   :  { %v5456_v7 = vmul.f32 %v9943_v46, %v9943_v46 }
0x1864   :  { %v5468_v12 = vsel %vm428_vm5, %v5456_v7, 0.0 }
0x1865   :  { %5469 = vadd.xlane.f32.xlu1 %v5468_v12 }
0x1876   :  { %v5437_v43 = vpop.xlane.xlu0 %5436 }
0x1877   :  { %v5445_v9 = vmul.f32 %v5437_v43, %v7487_v45 }
0x1879   :  { %v9949_v28 = vsub.f32 %v5417_v33, %v5445_v9 }
0x187b   :  { %v5457_v60 = vmul.f32 %v9949_v28, %v9949_v28 }
0x187d   :  { %v5471_v25 = vsel %vm428_vm5, %v5457_v60, 0.0 }
0x187e   :  { %5472 = vadd.xlane.f32.xlu0 %v5471_v25  ;;  %v5440_v5 = vpop.xlane.xlu2 %5439 }
0x187f   :  { %v5446_v14 = vmul.f32 %v5440_v5, %v7487_v45 }
0x1881   :  { %v9955_v51 = vsub.f32 %v5418_v16, %v5446_v14 }
0x1883   :  { %v5458_v61 = vmul.f32 %v9955_v51, %v9955_v51 }
0x1885   :  { %v5474_v56 = vsel %vm428_vm5, %v5458_v61, 0.0 }
0x1886   :  { %5475 = vadd.xlane.f32.xlu2 %v5474_v56 }
0x18b2   :  { %v5461_v44 = vpop.xlane.xlu1 %5460 }
0x18b3   :  { %v5477_v4 = vmul.f32 %v5461_v44, %v7487_v45 }
0x18b5   :  { %v5483_v41 = vadd.f32 1e-05, %v5477_v4 }
0x18b7   :  { %6741 = vrsqrt.f32 %v5483_v41  ;;  %vm5495_vm11 = vweird.f32 %v5483_v41 }
0x18ba   :  { %v5464_v22 = vpop.xlane.xlu0 %5463 }
0x18bb   :  { %v5478_v19 = vmul.f32 %v5464_v22, %v7487_v45 }
0x18bd   :  { %v6742_v54 = vpop.eup %6741  ;;  %v5484_v35 = vadd.f32 1e-05, %v5478_v19 }
0x18be   :  { %v5490_v27 = vmul.f32 %v6742_v54, %v5483_v41  ;;  %vm5496_vm10 = vweird.f32 %v6742_v54 }
0x18bf   :  { %6743 = vrsqrt.f32 %v5484_v35  ;;  %vm5497_vm12 = vmor %vm5495_vm11, %vm5496_vm10  ;;  %vm5505_vm14 = vweird.f32 %v5484_v35 }
0x18c0   :  { %v5491_v31 = vmul.f32 %v6742_v54, %v5490_v27 }
0x18c2   :  { %v5492_v40 = vmul.f32 0.5, %v5491_v31 }
0x18c4   :  { %v5493_v0 = vsub.f32 1.5, %v5492_v40 }
0x18c5   :  { %v6744_v15 = vpop.eup %6743 }
0x18c6   :  { %v5494_v18 = vmul.f32 %v6742_v54, %v5493_v0  ;;  %v5500_v20 = vmul.f32 %v6744_v15, %v5484_v35  ;;  %vm5506_vm13 = vweird.f32 %v6744_v15 }
0x18c7   :  { %vm5507_vm15 = vmor %vm5505_vm14, %vm5506_vm13 }
0x18c8   :  { %v5498_v10 = vsel %vm5497_vm12, %v6742_v54, %v5494_v18  ;;  %v5501_v21 = vmul.f32 %v6744_v15, %v5500_v20 }
0x18c9   :  { %v5549_v38 = vmul.f32 %v5498_v10, %v9925_v34  ;;  %v5467_v62 = vpop.xlane.xlu2 %5466 }
0x18ca   :  { %v5502_v1 = vmul.f32 0.5, %v5501_v21  ;;  %v5479_v26 = vmul.f32 %v5467_v62, %v7487_v45 }
0x18cb   :  { %v5558_v6 = vmul.f32 %v9962_v39, %v5549_v38 }
0x18cc   :  { %v5503_v33 = vsub.f32 1.5, %v5502_v1  ;;  %v5485_v24 = vadd.f32 1e-05, %v5479_v26 }
0x18cd   :  { %v5567_v53 = vadd.f32 %v9964_v49, %v5558_v6  ;;  %v5644_v6 = vld [vmem:[#allocation19 + $0x48] sm:$0xff] }
0x18ce   :  { %v5504_v55 = vmul.f32 %v6744_v15, %v5503_v33  ;;  %6745 = vrsqrt.f32 %v5485_v24  ;;  %vm5515_vm1 = vweird.f32 %v5485_v24  ;;  %v5643_v33 = vld [vmem:[#allocation19 + $0x40] sm:$0xff] }
0x18cf   :  { %6133 = vmatmul.msk.f32.vlgmr.msra.gmra.mxu2 %vm428_vm5, %v5567_v53 }
0x18d0   :  { %v5508_v16 = vsel %vm5507_vm15, %v6744_v15, %v5504_v55 }
0x18d1   :  { %v5550_v52 = vmul.f32 %v5508_v16, %v9931_v11 }
0x18d3   :  { %v5559_v42 = vmul.f32 %v9962_v39, %v5550_v52 }
0x18d4   :  { %v6746_v47 = vpop.eup %6745 }
0x18d5   :  { %v5510_v34 = vmul.f32 %v6746_v47, %v5485_v24  ;;  %v5568_v23 = vadd.f32 %v9964_v49, %v5559_v42  ;;  %vm5516_vm0 = vweird.f32 %v6746_v47  ;;  %v6386_v24 = vld [vmem:[#allocation17 + $0x2] ss:$0 sm:$0xff] }
0x18d6   :  { %vm5517_vm2 = vmor %vm5515_vm1, %vm5516_vm0 }
0x18d7   :  { %v5511_v37 = vmul.f32 %v6746_v47, %v5510_v34  ;;  %6134 = vmatmul.msk.f32.gmra.mxu2 %vm428_vm5, %v5568_v23 }
0x18d8   :  { %v5470_v17 = vpop.xlane.xlu1 %5469 }
0x18d9   :  { %v5512_v50 = vmul.f32 0.5, %v5511_v37  ;;  %v5480_v59 = vmul.f32 %v5470_v17, %v7487_v45 }
0x18db   :  { %v5513_v32 = vsub.f32 1.5, %v5512_v50  ;;  %v5486_v8 = vadd.f32 1e-05, %v5480_v59 }
0x18dd   :  { %v5514_v3 = vmul.f32 %v6746_v47, %v5513_v32  ;;  %6747 = vrsqrt.f32 %v5486_v8  ;;  %vm5525_vm4 = vweird.f32 %v5486_v8 }
0x18df   :  { %v5518_v11 = vsel %vm5517_vm2, %v6746_v47, %v5514_v3 }
0x18e0   :  { %v5551_v48 = vmul.f32 %v5518_v11, %v9937_v2 }
0x18e2   :  { %v5560_v29 = vmul.f32 %v9962_v39, %v5551_v48 }
0x18e3   :  { %v6748_v58 = vpop.eup %6747 }
0x18e4   :  { %v5520_v57 = vmul.f32 %v6748_v58, %v5486_v8  ;;  %v9979_v7 = vadd.f32 %v9964_v49, %v5560_v29  ;;  %vm5526_vm3 = vweird.f32 %v6748_v58  ;;  %v6387_v29 = vld [vmem:[#allocation20 + $0x2] ss:$0 sm:$0xff] }
0x18e5   :  { %vm5527_vm6 = vmor %vm5525_vm4, %vm5526_vm3  ;;  %vm5795_vm3 = vcmask 58368  }
0x18e6   :  { %v5521_v12 = vmul.f32 %v6748_v58, %v5520_v57  ;;  %6135 = vmatmul.msk.f32.gmra.mxu2 %vm428_vm5, %v9979_v7 }
0x18e8   :  { %v5522_v43 = vmul.f32 0.5, %v5521_v12 }
0x18ea   :  { %v5523_v9 = vsub.f32 1.5, %v5522_v43 }
0x18ec   :  { %v5524_v60 = vmul.f32 %v6748_v58, %v5523_v9 }
0x18ee   :  { %v5528_v25 = vsel %vm5527_vm6, %v6748_v58, %v5524_v60 }
0x18ef   :  { %v5552_v2 = vmul.f32 %v5528_v25, %v9943_v46 }
0x18f1   :  { %v5473_v5 = vpop.xlane.xlu0 %5472  ;;  %v5561_v14 = vmul.f32 %v9962_v39, %v5552_v2 }
0x18f2   :  { %v5481_v61 = vmul.f32 %v5473_v5, %v7487_v45 }
0x18f3   :  { %v5570_v56 = vadd.f32 %v9964_v49, %v5561_v14 }
0x18f4   :  { %v5487_v36 = vadd.f32 1e-05, %v5481_v61 }
0x18f5   :  { %6136 = vmatmul.msk.f32.gmra.mxu2 %vm428_vm5, %v5570_v56 }
0x18f6   :  { %6749 = vrsqrt.f32 %v5487_v36  ;;  %vm5535_vm8 = vweird.f32 %v5487_v36 }
0x18f9   :  { %v5476_v63 = vpop.xlane.xlu2 %5475 }
0x18fa   :  { %v5482_v30 = vmul.f32 %v5476_v63, %v7487_v45 }
0x18fc   :  { %v6750_v44 = vpop.eup %6749  ;;  %v5488_v4 = vadd.f32 1e-05, %v5482_v30 }
0x18fd   :  { %v5530_v41 = vmul.f32 %v6750_v44, %v5487_v36  ;;  %vm5536_vm7 = vweird.f32 %v6750_v44 }
0x18fe   :  { %6751 = vrsqrt.f32 %v5488_v4  ;;  %vm5537_vm9 = vmor %vm5535_vm8, %vm5536_vm7  ;;  %vm5545_vm11 = vweird.f32 %v5488_v4 }
0x18ff   :  { %v5531_v46 = vmul.f32 %v6750_v44, %v5530_v41 }
0x1901   :  { %v5532_v22 = vmul.f32 0.5, %v5531_v46  ;;  %v10079_v46 = vlaneseq }
0x1903   :  { %v5533_v19 = vsub.f32 1.5, %v5532_v22  ;;  %v5774_v22 = vshrl.u32 %v10079_v46, 7 }
0x1904   :  { %v6752_v54 = vpop.eup %6751 }
0x1905   :  { %v5534_v35 = vmul.f32 %v6750_v44, %v5533_v19  ;;  %v5540_v27 = vmul.f32 %v6752_v54, %v5488_v4  ;;  %vm5546_vm10 = vweird.f32 %v6752_v54  ;;  %6361 = vset.pattern.permute.xlu1 %v5774_v22 }
0x1906   :  { %vm5547_vm12 = vmor %vm5545_vm11, %vm5546_vm10 }
0x1907   :  { %v5538_v31 = vsel %vm5537_vm9, %v6750_v44, %v5534_v35  ;;  %v5541_v40 = vmul.f32 %v6752_v54, %v5540_v27 }
0x1908   :  { %v5553_v0 = vmul.f32 %v5538_v31, %v9949_v28  ;;  %v5645_v28 = vld [vmem:[#allocation19 + $0x50] sm:$0xff] }
0x1909   :  { %v5542_v15 = vmul.f32 0.5, %v5541_v40  ;;  %5683 = vmatpush.msrb.mxu3 %v5645_v28 }
0x190a   :  { %v5562_v18 = vmul.f32 %v9962_v39, %v5553_v0 }
0x190b   :  { %v5543_v20 = vsub.f32 1.5, %v5542_v15  ;;  %5684 = vmatpush.msrb.mxu3 %v5644_v6 }
0x190c   :  { %v5571_v10 = vadd.f32 %v9964_v49, %v5562_v18 }
0x190d   :  { %v5544_v21 = vmul.f32 %v6752_v54, %v5543_v20  ;;  %5685 = vmatpush.msrb.mxu3 %v5643_v33 }
0x190e   :  { %6137 = vmatmul.msk.f32.gmra.mxu2 %vm428_vm5, %v5571_v10  ;;  %v6388_v10 = vld [vmem:[#allocation25 + $0x2] ss:$0 sm:$0xff] }
0x190f   :  { %v5548_v38 = vsel %vm5547_vm12, %v6752_v54, %v5544_v21  ;;  %v6390_v54 = vld [vmem:[%s10053_s21] ss:$0 sm:$0xff] }
0x1910   :  { %v5554_v62 = vmul.f32 %v5548_v38, %v9955_v51 }
0x1912   :  { %v5563_v1 = vmul.f32 %v9962_v39, %v5554_v62  ;;  %v6389_v62 = vld [vmem:[#allocation26 + $0x2] ss:$0 sm:$0xff] }
0x1914   :  { %v5572_v26 = vadd.f32 %v9964_v49, %v5563_v1 }
0x1916   :  { %6138 = vmatmul.msk.f32.gmra.mxu2 %vm428_vm5, %v5572_v26 }
0x1952   :  { %v5618_v53 = vpop.f32.mrf.mxu2 }
0x1953   :  { %v5619_v55 = vadd.f32 %v6386_v24, %v5618_v53 }
0x1955   :  { %v5636_v16 = vmax.f32 %v5619_v55, 0.0 }
0x1957   :  { %6139 = vmatmul.msk.f32.vlgmr.msrb.gmra.mxu3 %vm428_vm5, %v5636_v16 }
0x195a   :  { %v5621_v52 = vpop.f32.mrf.mxu2 }
0x195b   :  { %v5622_v51 = vadd.f32 %v6386_v24, %v5621_v52 }
0x195d   :  { %v5637_v42 = vmax.f32 %v5622_v51, 0.0 }
0x195f   :  { %6140 = vmatmul.msk.f32.gmra.mxu3 %vm428_vm5, %v5637_v42 }
0x1969   :  { %v5624_v39 = vpop.f32.mrf.mxu2 }
0x196a   :  { %v5625_v49 = vadd.f32 %v6386_v24, %v5624_v39 }
0x196c   :  { %v5638_v47 = vmax.f32 %v5625_v49, 0.0 }
0x196e   :  { %6141 = vmatmul.msk.f32.gmra.mxu3 %vm428_vm5, %v5638_v47 }
0x1978   :  { %v5627_v34 = vpop.f32.mrf.mxu2 }
0x1979   :  { %v5628_v23 = vadd.f32 %v6386_v24, %v5627_v34 }
0x197b   :  { %v5639_v37 = vmax.f32 %v5628_v23, 0.0 }
0x197d   :  { %6142 = vmatmul.msk.f32.gmra.mxu3 %vm428_vm5, %v5639_v37 }
0x1991   :  { %v5630_v17 = vpop.f32.mrf.mxu2 }
0x1992   :  { %v5631_v50 = vadd.f32 %v6386_v24, %v5630_v17 }
0x1994   :  { %v5640_v59 = vmax.f32 %v5631_v50, 0.0 }
0x1996   :  { %6143 = vmatmul.msk.f32.gmra.mxu3 %vm428_vm5, %v5640_v59 }
0x1999   :  { %v5633_v32 = vpop.f32.mrf.mxu2 }
0x199a   :  { %v5634_v8 = vadd.f32 %v6386_v24, %v5633_v32 }
0x199c   :  { %v5641_v3 = vmax.f32 %v5634_v8, 0.0 }
0x199e   :  { %6144 = vmatmul.msk.f32.gmra.mxu3 %vm428_vm5, %v5641_v3 }
0x19da   :  { %v5687_v11 = vpop.f32.mrf.mxu3 }
0x19e2   :  { %v5689_v48 = vpop.f32.mrf.mxu3 }
0x19f1   :  { %v5691_v58 = vpop.f32.mrf.mxu3 }
0x19f2   :  { %v5692_v57 = vadd.f32 %v6387_v29, %v5691_v58 }
0x19f4   :  { %v5701_v12 = vadd.f32 %v5692_v57, %v9979_v7 }
0x19f6   :  { %v5707_v43 = vsel %vm428_vm5, %v5701_v12, 0.0 }
0x19f7   :  { %5708 = vadd.xlane.f32.xlu1 %v5707_v43 }
0x1a00   :  { %v5694_v9 = vpop.f32.mrf.mxu3 }
0x1a19   :  { %v5696_v60 = vpop.f32.mrf.mxu3 }
0x1a21   :  { %v5698_v25 = vpop.f32.mrf.mxu3 }
0x1a22   :  { %v5699_v2 = vadd.f32 %v6387_v29, %v5698_v25  ;;  %v10081_v29 = vld [vmem:[#allocation42_spill] sm:$0xff] }
0x1a24   :  { %v5702_v5 = vadd.f32 %v5699_v2, %v5572_v26  ;;  %v5761_v26 = vld [vmem:[%s10052_s20] sm:$0xff]  ;;  %s7240_s20 = smov [#allocation29]  }
0x1a25   :  { %s5812_s13 = sshll.u32 %s7240_s20, 4  ;;  %s5813_s13 = int_to_ptr.vmem [resolvable:$true] %s5812_s13 }
0x1a26   :  { %v5710_v14 = vsel %vm428_vm5, %v5702_v5, 0.0  ;;  %5820 = dma.vmem_to_hbm [thread:$0]  %s5813_s13, 2304, %s5815_s12, [#allocation30], %s7221_s27, %s7221_s27, %s7222_s11  }
0x1a27   :  { %5711 = vadd.xlane.f32.xlu0 %v5710_v14 }
0x1a6a   :  { %v5709_v61 = vpop.xlane.xlu1 %5708 }
0x1a6b   :  { %v5713_v56 = vmul.f32 %v5709_v61, %v7487_v45 }
0x1a6d   :  { %v5715_v36 = vsub.f32 %v5701_v12, %v5713_v56 }
0x1a6f   :  { %v5717_v13 = vmul.f32 %v5715_v36, %v5715_v36 }
0x1a71   :  { %v5719_v63 = vsel %vm428_vm5, %v5717_v13, 0.0 }
0x1a72   :  { %5720 = vadd.xlane.f32.xlu2 %v5719_v63 }
0x1a9a   :  { %v5712_v7 = vpop.xlane.xlu0 %5711 }
0x1a9b   :  { %v5714_v30 = vmul.f32 %v5712_v7, %v7487_v45 }
0x1a9d   :  { %v5716_v44 = vsub.f32 %v5702_v5, %v5714_v30 }
0x1a9f   :  { %v5718_v4 = vmul.f32 %v5716_v44, %v5716_v44 }
0x1aa1   :  { %v5722_v41 = vsel %vm428_vm5, %v5718_v4, 0.0 }
0x1aa2   :  { %5723 = vadd.xlane.f32.xlu1 %v5722_v41 }
0x1abb   :  { %5777 = vperm.xlu1 %6361, %v6390_v54  }
0x1ae5   :  { %v5721_v19 = vpop.xlane.xlu2 %5720 }
0x1ae6   :  { %v5725_v35 = vmul.f32 %v5721_v19, %v7487_v45 }
0x1ae8   :  { %v5727_v27 = vadd.f32 1e-05, %v5725_v35 }
0x1aea   :  { %6753 = vrsqrt.f32 %v5727_v27  ;;  %vm5735_vm14 = vweird.f32 %v5727_v27 }
0x1af0   :  { %v6754_v31 = vpop.eup %6753 }
0x1af1   :  { %v5730_v40 = vmul.f32 %v6754_v31, %v5727_v27  ;;  %vm5736_vm13 = vweird.f32 %v6754_v31 }
0x1af2   :  { %vm5737_vm15 = vmor %vm5735_vm14, %vm5736_vm13 }
0x1af3   :  { %v5731_v0 = vmul.f32 %v6754_v31, %v5730_v40 }
0x1af5   :  { %v5732_v15 = vmul.f32 0.5, %v5731_v0 }
0x1af7   :  { %v5733_v18 = vsub.f32 1.5, %v5732_v15 }
0x1af9   :  { %v5734_v20 = vmul.f32 %v6754_v31, %v5733_v18 }
0x1afb   :  { %v5738_v21 = vsel %vm5737_vm15, %v6754_v31, %v5734_v20 }
0x1afc   :  { %v5749_v38 = vmul.f32 %v5738_v21, %v5715_v36 }
0x1afe   :  { %v5754_v1 = vmul.f32 %v6388_v10, %v5749_v38 }
0x1b00   :  { %v5759_v28 = vadd.f32 %v6389_v62, %v5754_v1 }
0x1b02   :  { %v5762_v6 = vmul.f32 %v5761_v26, %v5759_v28 }
0x1b04   :  { %v5764_v33 = vsel %vm428_vm5, %v5762_v6, 0.0 }
0x1b05   :  { %5765 = vadd.xlane.f32.xlu0 %v5764_v33 }
0x1b15   :  { %v5724_v24 = vpop.xlane.xlu1 %5723 }
0x1b16   :  { %v5726_v53 = vmul.f32 %v5724_v24, %v7487_v45 }
0x1b18   :  { %v5728_v55 = vadd.f32 1e-05, %v5726_v53 }
0x1b1a   :  { %6755 = vrsqrt.f32 %v5728_v55  ;;  %vm5745_vm1 = vweird.f32 %v5728_v55 }
0x1b20   :  { %v6756_v16 = vpop.eup %6755 }
0x1b21   :  { %v5740_v52 = vmul.f32 %v6756_v16, %v5728_v55  ;;  %vm5746_vm0 = vweird.f32 %v6756_v16 }
0x1b22   :  { %vm5747_vm2 = vmor %vm5745_vm1, %vm5746_vm0 }
0x1b23   :  { %v5741_v51 = vmul.f32 %v6756_v16, %v5740_v52 }
0x1b25   :  { %v5742_v42 = vmul.f32 0.5, %v5741_v51 }
0x1b27   :  { %v5743_v39 = vsub.f32 1.5, %v5742_v42 }
0x1b29   :  { %v5744_v49 = vmul.f32 %v6756_v16, %v5743_v39 }
0x1b2b   :  { %v5748_v47 = vsel %vm5747_vm2, %v6756_v16, %v5744_v49 }
0x1b2c   :  { %v5750_v34 = vmul.f32 %v5748_v47, %v5716_v44 }
0x1b2d   :  { %v5778_v45 = vpop.permute.xlu1 %5777 }
0x1b2e   :  { %v5755_v23 = vmul.f32 %v6388_v10, %v5750_v34 }
0x1b30   :  { %v5760_v37 = vadd.f32 %v6389_v62, %v5755_v23 }
0x1b32   :  { %v5763_v17 = vmul.f32 %v5761_v26, %v5760_v37 }
0x1b34   :  { %v5767_v50 = vsel %vm428_vm5, %v5763_v17, 0.0  ;;  %vm5792_vm5 = vcmask 1041409  }
0x1b35   :  { %5768 = vadd.xlane.f32.xlu2 %v5767_v50 }
0x1b78   :  { %v5766_v59 = vpop.xlane.xlu0 %5765 }
0x1b79   :  { %v5780_v32 = vadd.f32 %v5778_v45, %v5766_v59 }
0x1b7b   :  { %5785 = vperm.xlu0 %6180, %v5780_v32  }
0x1ba8   :  { %v5769_v8 = vpop.xlane.xlu2 %5768 }
0x1ba9   :  { %v5781_v3 = vadd.f32 %v5778_v45, %v5769_v8 }
0x1bab   :  { %5788 = vperm.xlu2 %6362, %v5781_v3  }
0x1bed   :  { %v5786_v11 = vpop.permute.xlu0 %5785 }
0x1bee   :  { %v5790_v58 = vperm.slane %v5786_v11, %v10081_v29 }
0x1c05   :  { %v5789_v48 = vpop.permute.xlu2 %5788 }
0x1c06   :  { %v5791_v57 = vperm.slane %v5789_v48, %v10081_v29 }
0x1c08   :  { %v5793_v12 = vsel %vm5792_vm5, %v5791_v57, %v5790_v58 }
0x1c09   :  { %5796 = vst.msk [vmem:[#allocation28] sm:$0x3] %vm5795_vm3, %v5793_v12 }
0x1c0a   :  { %5807 = dma.vmem_to_hbm [thread:$0]  %s5803_s24, 32, %s5805_s14, [#allocation4]  }
0x1c0b   :  { %7207 = dma.done.wait [#allocation4], 32  }
0x1c0c   :  { %7208 = vsyncadd [#allocation4], 4294967264 }
0x1c0d   :  { %7209 = dma.done.wait [#allocation30], 2304  }
0x1c0e   :  { %7210 = vsyncadd [#allocation30], 4294964992 }
0x1c0f   :  { %5829 = vsyncpa [#allocation3], 1 }
0x1c10   :  { %5830 = vsyncpa [#allocation6], 1 }
0x1c11   :  { %5831 = vsyncpa [#allocation9], 1 }
0x1c12   :  { %5832 = vsyncpa [#allocation12], 1 }
0x1c13   :  { %5833 = vsyncpa [#allocation15], 1 }
0x1c14   :  { %5834 = vsyncpa [#allocation18], 1 }
0x1c15   :  { %5835 = vsyncpa [#allocation21], 1 }
0x1c16   :  { %5836 = vsyncpa [#allocation24], 1 }
0x1c17   :  { %5837 = vsyncpa [#allocation27], 1 }
0x1c18   :  { %5838 = vsyncpa [#allocation4], 1 }
0x1c19   :  { %5839 = vsyncpa [#allocation30], 1 }

</bundles_post_ra>
